<compile_context>
chip_gen: v5e
topology: v5e:2x2
jax: 0.10.0
libtpu: 0.0.40
codegen_flags: <defaults>
</compile_context>

<pallas_src>
import functools

import jax
import jax.numpy as jnp
from jax import lax
from jax.experimental import pallas as pl
from jax.experimental.pallas import tpu as pltpu

EPS = 1e-5          # nn.BatchNorm2d default eps
LANE = 128          # channel dims padded to multiples of this
MB = 1024 * 1024


def _ceil_to(x, m):
    return (x + m - 1) // m * m


def _pad_last(x, target):
    pad = target - x.shape[-1]
    if pad == 0:
        return x
    return jnp.pad(x, [(0, 0)] * (x.ndim - 1) + [(0, pad)])


def _pick_row_tile(r, cap=512):
    """Largest divisor of r that is <= cap and a multiple of 8."""
    for t in range(min(cap, r), 7, -1):
        if r % t == 0 and t % 8 == 0:
            return t
    if r <= 2048:        # small enough to run as a single block
        return r
    # TODO(synk): pad R to a tileable size for awkward N*H*W.
    raise NotImplementedError(f"no multiple-of-8 row tile <= {cap} divides R={r}")


def _bn_affine(s, ss, g, b, count):
    """Fold batch statistics (sum, sum-sq) + gamma/beta into scale & shift."""
    mu = s / count
    var = jnp.maximum(ss / count - mu * mu, 0.0)
    a = g * lax.rsqrt(var + EPS)
    c = b - mu * a
    return a.astype(jnp.float32), c.astype(jnp.float32)


def _cparams(footprint_bytes):
    lim = int(min(64 * MB, max(32 * MB, 2 * footprint_bytes)))
    return pltpu.CompilerParams(dimension_semantics=("parallel",),
                                vmem_limit_bytes=lim)


# --------------------------- kernels -----------------------------------------

def _conv1_kernel(x_ref, w1_ref, t1_ref, s_ref, ss_ref):
    # conv1 (1x1): bf16 matmul with f32 accumulation.  Per-tile partial BN1
    # statistics are written to this step's own output row (no cross-step state).
    y = jnp.dot(x_ref[...], w1_ref[...], preferred_element_type=jnp.float32)
    yb = y.astype(jnp.bfloat16)
    t1_ref[...] = yb
    yf = yb.astype(jnp.float32)
    s_ref[0] = jnp.sum(yf, axis=0, keepdims=True)
    ss_ref[0] = jnp.sum(yf * yf, axis=0, keepdims=True)


def _conv2_kernel(t1_ref, a1_ref, c1_ref, w2_ref, t2_ref, s_ref, ss_ref,
                  pad_scr, acc_scr, *, H, W, Wp):
    # Per image: BN1 scale/shift + ReLU into a flattened zero-padded VMEM slab,
    # then the 3x3 conv as 9 accumulating (H*Wp, Pp) @ (Pp, Pp) bf16 matmuls,
    # each tap a contiguous row slice of the slab (no reshape, no im2col).
    Pp = t1_ref.shape[-1]
    dt = pad_scr.dtype

    a1 = a1_ref[...]                              # (1, Pp) f32
    c1 = c1_ref[...]

    # Zero the top / bottom padded rows every step (no cross-step state =>
    # the grid axis can be sharded across TensorCores).
    pad_scr[pl.ds(0, Wp), :] = jnp.zeros((Wp, Pp), dt)
    pad_scr[pl.ds((H + 1) * Wp, 2 * Wp), :] = jnp.zeros((2 * Wp, Pp), dt)

    # BN1 + ReLU per image row, one aligned (Wp, Pp) store per row:
    #   [ zero pad col | W data cols | zero pad cols ]
    zleft = jnp.zeros((1, Pp), dt)
    zright = jnp.zeros((Wp - W - 1, Pp), dt)
    for h in range(H):
        row = jnp.maximum(t1_ref[0, h].astype(jnp.float32) * a1 + c1, 0.0)
        pad_scr[pl.ds((h + 1) * Wp, Wp), :] = jnp.concatenate(
            [zleft, row.astype(dt), zright], axis=0)

    # 9 taps: contiguous slices at offset dy*Wp + dx, accumulated into an
    # explicit f32 VMEM scratch (low vreg pressure, MXU stays busy).
    HWp = H * Wp
    for k in range(9):
        dy, dx = divmod(k, 3)
        slab = pad_scr[pl.ds(dy * Wp + dx, HWp), :]
        contrib = jnp.dot(slab, w2_ref[k], preferred_element_type=jnp.float32)
        if k == 0:
            acc_scr[...] = contrib
        else:
            acc_scr[...] += contrib

    # Drop the pad columns (aligned per-row reads), store bf16 t2, and compute
    # this image's BN2 partial statistics from the stored (rounded) values.
    s = jnp.zeros((1, Pp), jnp.float32)
    ss = jnp.zeros((1, Pp), jnp.float32)
    for h in range(H):
        rb = acc_scr[pl.ds(h * Wp, W), :].astype(jnp.bfloat16)
        t2_ref[0, h] = rb
        rf = rb.astype(jnp.float32)
        s = s + jnp.sum(rf, axis=0, keepdims=True)
        ss = ss + jnp.sum(rf * rf, axis=0, keepdims=True)
    s_ref[0] = s
    ss_ref[0] = ss


def _conv3_kernel(t2_ref, a2_ref, c2_ref, w3_ref, t3_ref, s_ref, ss_ref):
    # BN2 scale/shift + ReLU, conv3 (1x1) bf16 matmul, per-tile BN3 partials.
    y2 = jnp.maximum(t2_ref[...].astype(jnp.float32) * a2_ref[...] + c2_ref[...], 0.0)
    t3 = jnp.dot(y2.astype(jnp.bfloat16), w3_ref[...],
                 preferred_element_type=jnp.float32)
    tb = t3.astype(jnp.bfloat16)
    t3_ref[...] = tb
    tf = tb.astype(jnp.float32)
    s_ref[0] = jnp.sum(tf, axis=0, keepdims=True)
    ss_ref[0] = jnp.sum(tf * tf, axis=0, keepdims=True)


def _epilogue_kernel(t3_ref, res_ref, a3_ref, c3_ref, o_ref):
    # BN3 scale/shift + residual add + ReLU (f32 VPU; inputs are bf16 slabs).
    z = (t3_ref[...].astype(jnp.float32) * a3_ref[...] + c3_ref[...]
         + res_ref[...].astype(jnp.float32))
    o_ref[...] = jnp.maximum(z, 0.0)


# --------------------------- wrapper ------------------------------------------

def bottleneck_forward(x_nchw, params, *, row_tile=512):
    """Bottleneck forward (stride=1, downsample=None => inplanes == planes*4),
    training-mode BatchNorm with global batch statistics."""
    N, Cin, H, W = x_nchw.shape
    P = params["w1"].shape[1]
    C4 = params["w3"].shape[1]
    assert Cin == C4, "downsample=None requires inplanes == planes * expansion"
    R = N * H * W
    TM = _pick_row_tile(R, row_tile)
    G = R // TM

    Cp = _ceil_to(Cin, LANE)          # padded Cin == padded C4
    Pp = _ceil_to(P, LANE)
    Wp = _ceil_to(W + 2, 16)          # widened row pitch (bf16 sublane pack = 16)

    # Channels-last bf16 slab: conv1 input AND residual (single HBM copy).
    x2d = jnp.transpose(x_nchw, (0, 2, 3, 1)).astype(jnp.float32).reshape(R, Cin)
    x2dp = _pad_last(x2d, Cp).astype(jnp.bfloat16)

    # Weights: bf16, channel-padded with zeros (padded channels fold to
    # scale=shift=0 because their gamma/beta pads are zero).
    w1 = jnp.pad(params["w1"], ((0, Cp - Cin), (0, Pp - P))).astype(jnp.bfloat16)
    w2 = jnp.pad(params["w2"], ((0, 0), (0, 0), (0, Pp - P), (0, Pp - P)))
    w2 = w2.reshape(9, Pp, Pp).astype(jnp.bfloat16)
    w3 = jnp.pad(params["w3"], ((0, Pp - P), (0, Cp - C4))).astype(jnp.bfloat16)
    g1 = _pad_last(params["g1"].astype(jnp.float32), Pp)
    b1 = _pad_last(params["b1"].astype(jnp.float32), Pp)
    g2 = _pad_last(params["g2"].astype(jnp.float32), Pp)
    b2 = _pad_last(params["b2"].astype(jnp.float32), Pp)
    g3 = _pad_last(params["g3"].astype(jnp.float32), Cp)
    b3 = _pad_last(params["b3"].astype(jnp.float32), Cp)

    # ---- A: conv1 (1x1) + BN1 partial statistics ------------------------------
    fa = 2 * (TM * Cp * 2 + TM * Pp * 2 + Cp * Pp * 2) + 4 * Pp * 8
    t1, s1p, ss1p = pl.pallas_call(
        _conv1_kernel,
        grid=(G,),
        in_specs=[pl.BlockSpec((TM, Cp), lambda i: (i, 0)),
                  pl.BlockSpec((Cp, Pp), lambda i: (0, 0))],
        out_specs=(pl.BlockSpec((TM, Pp), lambda i: (i, 0)),
                   pl.BlockSpec((1, 1, Pp), lambda i: (i, 0, 0)),
                   pl.BlockSpec((1, 1, Pp), lambda i: (i, 0, 0))),
        out_shape=(jax.ShapeDtypeStruct((R, Pp), jnp.bfloat16),
                   jax.ShapeDtypeStruct((G, 1, Pp), jnp.float32),
                   jax.ShapeDtypeStruct((G, 1, Pp), jnp.float32)),
        compiler_params=_cparams(fa),
        cost_estimate=pl.CostEstimate(flops=2 * R * Cp * Pp, transcendentals=0,
                                      bytes_accessed=2 * R * Cp + 2 * R * Pp + 2 * Cp * Pp),
    )(x2dp, w1)
    a1, c1 = _bn_affine(jnp.sum(s1p, axis=0), jnp.sum(ss1p, axis=0), g1, b1, R)

    # ---- B: BN1+ReLU, 3x3 conv2 from flattened padded VMEM slab ---------------
    conv2 = functools.partial(_conv2_kernel, H=H, W=W, Wp=Wp)
    fb = (2 * (2 * H * W * Pp * 2) + 2 * 9 * Pp * Pp * 2
          + (H + 3) * Wp * Pp * 2 + H * Wp * Pp * 4 + 8 * Pp * 8)
    t2, s2p, ss2p = pl.pallas_call(
        conv2,
        grid=(N,),
        in_specs=[pl.BlockSpec((1, H, W, Pp), lambda n: (n, 0, 0, 0)),
                  pl.BlockSpec((1, Pp), lambda n: (0, 0)),
                  pl.BlockSpec((1, Pp), lambda n: (0, 0)),
                  pl.BlockSpec((9, Pp, Pp), lambda n: (0, 0, 0))],
        out_specs=(pl.BlockSpec((1, H, W, Pp), lambda n: (n, 0, 0, 0)),
                   pl.BlockSpec((1, 1, Pp), lambda n: (n, 0, 0)),
                   pl.BlockSpec((1, 1, Pp), lambda n: (n, 0, 0))),
        out_shape=(jax.ShapeDtypeStruct((N, H, W, Pp), jnp.bfloat16),
                   jax.ShapeDtypeStruct((N, 1, Pp), jnp.float32),
                   jax.ShapeDtypeStruct((N, 1, Pp), jnp.float32)),
        scratch_shapes=[pltpu.VMEM(((H + 3) * Wp, Pp), jnp.bfloat16),
                        pltpu.VMEM((H * Wp, Pp), jnp.float32)],
        compiler_params=_cparams(fb),
        cost_estimate=pl.CostEstimate(flops=2 * N * H * Wp * 9 * Pp * Pp,
                                      transcendentals=0,
                                      bytes_accessed=4 * R * Pp + 18 * Pp * Pp),
    )(t1.reshape(N, H, W, Pp), a1, c1, w2)
    a2, c2 = _bn_affine(jnp.sum(s2p, axis=0), jnp.sum(ss2p, axis=0), g2, b2, R)

    # ---- C: BN2+ReLU, conv3 (1x1), BN3 partial statistics ----------------------
    fc = 2 * (TM * Pp * 2 + TM * Cp * 2 + Pp * Cp * 2) + 4 * Cp * 8
    t3, s3p, ss3p = pl.pallas_call(
        _conv3_kernel,
        grid=(G,),
        in_specs=[pl.BlockSpec((TM, Pp), lambda i: (i, 0)),
                  pl.BlockSpec((1, Pp), lambda i: (0, 0)),
                  pl.BlockSpec((1, Pp), lambda i: (0, 0)),
                  pl.BlockSpec((Pp, Cp), lambda i: (0, 0))],
        out_specs=(pl.BlockSpec((TM, Cp), lambda i: (i, 0)),
                   pl.BlockSpec((1, 1, Cp), lambda i: (i, 0, 0)),
                   pl.BlockSpec((1, 1, Cp), lambda i: (i, 0, 0))),
        out_shape=(jax.ShapeDtypeStruct((R, Cp), jnp.bfloat16),
                   jax.ShapeDtypeStruct((G, 1, Cp), jnp.float32),
                   jax.ShapeDtypeStruct((G, 1, Cp), jnp.float32)),
        compiler_params=_cparams(fc),
        cost_estimate=pl.CostEstimate(flops=2 * R * Pp * Cp, transcendentals=0,
                                      bytes_accessed=2 * R * Pp + 2 * R * Cp + 2 * Pp * Cp),
    )(t2.reshape(R, Pp), a2, c2, w3)
    a3, c3 = _bn_affine(jnp.sum(s3p, axis=0), jnp.sum(ss3p, axis=0), g3, b3, R)

    # ---- D: BN3 + residual add + ReLU ------------------------------------------
    fd = 2 * (2 * TM * Cp * 2 + TM * Cp * 4)
    out2d = pl.pallas_call(
        _epilogue_kernel,
        grid=(G,),
        in_specs=[pl.BlockSpec((TM, Cp), lambda i: (i, 0)),
                  pl.BlockSpec((TM, Cp), lambda i: (i, 0)),
                  pl.BlockSpec((1, Cp), lambda i: (0, 0)),
                  pl.BlockSpec((1, Cp), lambda i: (0, 0))],
        out_specs=pl.BlockSpec((TM, Cp), lambda i: (i, 0)),
        out_shape=jax.ShapeDtypeStruct((R, Cp), jnp.float32),
        compiler_params=_cparams(fd),
        cost_estimate=pl.CostEstimate(flops=3 * R * Cp, transcendentals=0,
                                      bytes_accessed=8 * R * Cp),
    )(t3, x2dp, a3, c3)

    # TODO(synk): when chaining blocks, keep the padded (R, Cp) slab and hoist
    # this NCHW round-trip out of the per-block wrapper.
    out = out2d[:, :C4].reshape(N, H, W, C4)
    return jnp.transpose(out, (0, 3, 1, 2))  # back to NCHW


# --------------------------- pure-JAX reference --------------------------------

def ref_bottleneck(x_nchw, params):
    """Pure-JAX f32 reference (XLA convs) for correctness checking."""
    Cin, P = params["w1"].shape
    C4 = params["w3"].shape[1]
    x = jnp.transpose(x_nchw, (0, 2, 3, 1)).astype(jnp.float32)

    def bn(y, g, b):
        mu = jnp.mean(y, axis=(0, 1, 2), keepdims=True)
        var = jnp.mean((y - mu) ** 2, axis=(0, 1, 2), keepdims=True)
        return (y - mu) * lax.rsqrt(var + EPS) * g.reshape(1, 1, 1, -1) + b.reshape(1, 1, 1, -1)

    dn = ("NHWC", "HWIO", "NHWC")
    y = lax.conv_general_dilated(x, params["w1"].reshape(1, 1, Cin, P), (1, 1), "VALID",
                                 dimension_numbers=dn)
    y = jnp.maximum(bn(y, params["g1"], params["b1"]), 0.0)
    y = lax.conv_general_dilated(y, params["w2"], (1, 1), "SAME", dimension_numbers=dn)
    y = jnp.maximum(bn(y, params["g2"], params["b2"]), 0.0)
    y = lax.conv_general_dilated(y, params["w3"].reshape(1, 1, P, C4), (1, 1), "VALID",
                                 dimension_numbers=dn)
    y = bn(y, params["g3"], params["b3"])
    y = jnp.maximum(y + x, 0.0)
    return jnp.transpose(y, (0, 3, 1, 2))


if __name__ == "__main__":
    # Small shapes consistent with the module: inplanes = planes * expansion.
    N, H, W = 2, 16, 16
    planes = 32
    Cin = planes * 4     # 128 (so downsample=None is valid)
    C4 = planes * 4      # 128

    key = jax.random.PRNGKey(0)
    ks = jax.random.split(key, 10)
    params = {
        "w1": jax.random.normal(ks[0], (Cin, planes), jnp.float32) / jnp.sqrt(Cin),
        "w2": jax.random.normal(ks[1], (3, 3, planes, planes), jnp.float32) / jnp.sqrt(9 * planes),
        "w3": jax.random.normal(ks[2], (planes, C4), jnp.float32) / jnp.sqrt(planes),
        "g1": 1.0 + 0.1 * jax.random.normal(ks[3], (1, planes), jnp.float32),
        "b1": 0.1 * jax.random.normal(ks[4], (1, planes), jnp.float32),
        "g2": 1.0 + 0.1 * jax.random.normal(ks[5], (1, planes), jnp.float32),
        "b2": 0.1 * jax.random.normal(ks[6], (1, planes), jnp.float32),
        "g3": 1.0 + 0.1 * jax.random.normal(ks[7], (1, C4), jnp.float32),
        "b3": 0.1 * jax.random.normal(ks[8], (1, C4), jnp.float32),
    }
    x = jax.random.normal(ks[9], (N, Cin, H, W), jnp.float32)  # NCHW like PyTorch

    fwd = jax.jit(bottleneck_forward)
    out = jax.block_until_ready(fwd(x, params))
    ref = jax.block_until_ready(ref_bottleneck(x, params))

    assert out.shape == (N, C4, H, W), out.shape
    max_err = float(jnp.max(jnp.abs(out - ref)))
    # bf16 matmul operands / bf16 activation slabs -> ~1e-2-level differences vs f32 ref.
    assert jnp.allclose(out, ref, atol=5e-2, rtol=5e-2), max_err
    print("KERNEL_OK")
</pallas_src>

<mosaic_0001>
module attributes {stable_mosaic.version = 11 : i64} {
  func.func @_conv1_kernel(%arg0: i32, %arg1: memref<512x128xbf16, #tpu.memory_space<vmem>>, %arg2: memref<128x128xbf16, #tpu.memory_space<vmem>>, %arg3: memref<512x128xbf16, #tpu.memory_space<vmem>>, %arg4: memref<1x1x128xf32, #tpu.memory_space<vmem>>, %arg5: memref<1x1x128xf32, #tpu.memory_space<vmem>>) attributes {dimension_semantics = [#tpu.dimension_semantics<parallel>], iteration_bounds = array<i64: 1>, scalar_prefetch = 0 : i64, scratch_operands = 0 : i64, tpu.core_type = #tpu.core_type<tc>, window_params = [{transform_indices = @transform_0, window_bounds = array<i64: 512, 128>}, {pipeline_mode = #tpu.pipeline_mode<synchronous>, transform_indices = @transform_1, window_bounds = array<i64: 128, 128>}, {transform_indices = @transform_2, window_bounds = array<i64: 512, 128>}, {transform_indices = @transform_3, window_bounds = array<i64: 1, 1, 128>}, {transform_indices = @transform_4, window_bounds = array<i64: 1, 1, 128>}]} {
    %c0 = arith.constant 0 : index
    %c0_0 = arith.constant 0 : index
    %0 = vector.load %arg1[%c0, %c0_0] : memref<512x128xbf16, #tpu.memory_space<vmem>>, vector<512x128xbf16>
    %c0_1 = arith.constant 0 : index
    %c0_2 = arith.constant 0 : index
    %1 = vector.load %arg2[%c0_1, %c0_2] : memref<128x128xbf16, #tpu.memory_space<vmem>>, vector<128x128xbf16>
    %cst = arith.constant dense<0.000000e+00> : vector<512x128xf32>
    %2 = tpu.matmul %0, %1, %cst {dimension_numbers = #tpu.dot_dimension_numbers<[1], [0], [0], [1], [0, 0, 1, 1], [], []>} : vector<512x128xbf16>, vector<128x128xbf16>, vector<512x128xf32> -> vector<512x128xf32>
    %3 = arith.truncf %2 : vector<512x128xf32> to vector<512x128xbf16>
    %c0_3 = arith.constant 0 : index
    %c0_4 = arith.constant 0 : index
    %4 = vector.load %arg3[%c0_3, %c0_4] : memref<512x128xbf16, #tpu.memory_space<vmem>>, vector<512x128xbf16>
    tpu.vector_store %arg3[%c0_3, %c0_4], %3 {strides = array<i32>} : memref<512x128xbf16, #tpu.memory_space<vmem>>, vector<512x128xbf16>,
    %5 = arith.extf %3 : vector<512x128xbf16> to vector<512x128xf32>
    %cst_5 = arith.constant dense<0.000000e+00> : vector<128xf32>
    %6 = vector.multi_reduction <add>, %5, %cst_5 [0] : vector<512x128xf32> to vector<128xf32>
    %7 = vector.shape_cast %6 : vector<128xf32> to vector<1x128xf32>
    %c0_6 = arith.constant 0 : index
    %c0_7 = arith.constant 0 : index
    %c0_8 = arith.constant 0 : index
    %8 = vector.load %arg4[%c0_6, %c0_7, %c0_8] : memref<1x1x128xf32, #tpu.memory_space<vmem>>, vector<1x1x128xf32>
    %9 = vector.shape_cast %8 : vector<1x1x128xf32> to vector<1x128xf32>
    %10 = vector.shape_cast %7 : vector<1x128xf32> to vector<1x1x128xf32>
    tpu.vector_store %arg4[%c0_6, %c0_7, %c0_8], %10 {strides = array<i32>} : memref<1x1x128xf32, #tpu.memory_space<vmem>>, vector<1x1x128xf32>,
    %11 = arith.mulf %5, %5 : vector<512x128xf32>
    %cst_9 = arith.constant dense<0.000000e+00> : vector<128xf32>
    %12 = vector.multi_reduction <add>, %11, %cst_9 [0] : vector<512x128xf32> to vector<128xf32>
    %13 = vector.shape_cast %12 : vector<128xf32> to vector<1x128xf32>
    %c0_10 = arith.constant 0 : index
    %c0_11 = arith.constant 0 : index
    %c0_12 = arith.constant 0 : index
    %14 = vector.load %arg5[%c0_10, %c0_11, %c0_12] : memref<1x1x128xf32, #tpu.memory_space<vmem>>, vector<1x1x128xf32>
    %15 = vector.shape_cast %14 : vector<1x1x128xf32> to vector<1x128xf32>
    %16 = vector.shape_cast %13 : vector<1x128xf32> to vector<1x1x128xf32>
    tpu.vector_store %arg5[%c0_10, %c0_11, %c0_12], %16 {strides = array<i32>} : memref<1x1x128xf32, #tpu.memory_space<vmem>>, vector<1x1x128xf32>,
    return
  }
  func.func @transform_0(%arg0: i32) -> (i32, i32) {
    %c0_i32 = arith.constant 0 : i32
    %c0_i32_0 = arith.constant 0 : i32
    return %arg0, %c0_i32 : i32, i32
  }
  func.func @transform_1(%arg0: i32) -> (i32, i32) {
    %c0_i32 = arith.constant 0 : i32
    %c0_i32_0 = arith.constant 0 : i32
    %c0_i32_1 = arith.constant 0 : i32
    return %c0_i32, %c0_i32_0 : i32, i32
  }
  func.func @transform_2(%arg0: i32) -> (i32, i32) {
    %c0_i32 = arith.constant 0 : i32
    %c0_i32_0 = arith.constant 0 : i32
    return %arg0, %c0_i32 : i32, i32
  }
  func.func @transform_3(%arg0: i32) -> (i32, i32, i32) {
    %c0_i32 = arith.constant 0 : i32
    %c0_i32_0 = arith.constant 0 : i32
    %c0_i32_1 = arith.constant 0 : i32
    return %arg0, %c0_i32, %c0_i32_0 : i32, i32, i32
  }
  func.func @transform_4(%arg0: i32) -> (i32, i32, i32) {
    %c0_i32 = arith.constant 0 : i32
    %c0_i32_0 = arith.constant 0 : i32
    %c0_i32_1 = arith.constant 0 : i32
    return %arg0, %c0_i32, %c0_i32_0 : i32, i32, i32
  }
}

module attributes {stable_mosaic.version = 11 : i64} {
  func.func @_conv2_kernel(%arg0: i32, %arg1: memref<1x16x16x128xbf16, #tpu.memory_space<vmem>>, %arg2: memref<1x128xf32, #tpu.memory_space<vmem>>, %arg3: memref<1x128xf32, #tpu.memory_space<vmem>>, %arg4: memref<9x128x128xbf16, #tpu.memory_space<vmem>>, %arg5: memref<1x16x16x128xbf16, #tpu.memory_space<vmem>>, %arg6: memref<1x1x128xf32, #tpu.memory_space<vmem>>, %arg7: memref<1x1x128xf32, #tpu.memory_space<vmem>>, %arg8: memref<608x128xbf16, #tpu.memory_space<vmem>>, %arg9: memref<512x128xf32, #tpu.memory_space<vmem>>) attributes {dimension_semantics = [#tpu.dimension_semantics<parallel>], iteration_bounds = array<i64: 2>, scalar_prefetch = 0 : i64, scratch_operands = 2 : i64, tpu.core_type = #tpu.core_type<tc>, window_params = [{transform_indices = @transform_0, window_bounds = array<i64: 1, 16, 16, 128>}, {pipeline_mode = #tpu.pipeline_mode<synchronous>, transform_indices = @transform_1, window_bounds = array<i64: 1, 128>}, {pipeline_mode = #tpu.pipeline_mode<synchronous>, transform_indices = @transform_2, window_bounds = array<i64: 1, 128>}, {pipeline_mode = #tpu.pipeline_mode<synchronous>, transform_indices = @transform_3, window_bounds = array<i64: 9, 128, 128>}, {transform_indices = @transform_4, window_bounds = array<i64: 1, 16, 16, 128>}, {transform_indices = @transform_5, window_bounds = array<i64: 1, 1, 128>}, {transform_indices = @transform_6, window_bounds = array<i64: 1, 1, 128>}]} {
    %c0 = arith.constant 0 : index
    %c0_0 = arith.constant 0 : index
    %0 = vector.load %arg2[%c0, %c0_0] : memref<1x128xf32, #tpu.memory_space<vmem>>, vector<1x128xf32>
    %c0_1 = arith.constant 0 : index
    %c0_2 = arith.constant 0 : index
    %1 = vector.load %arg3[%c0_1, %c0_2] : memref<1x128xf32, #tpu.memory_space<vmem>>, vector<1x128xf32>
    %cst = arith.constant 0.000000e+00 : bf16
    %2 = vector.broadcast %cst : bf16 to vector<32x128xbf16>
    %c0_3 = arith.constant 0 : index
    %c0_4 = arith.constant 0 : index
    %3 = vector.load %arg8[%c0_3, %c0_4] : memref<608x128xbf16, #tpu.memory_space<vmem>>, vector<32x128xbf16>
    tpu.vector_store %arg8[%c0_3, %c0_4], %2 {strides = array<i32>} : memref<608x128xbf16, #tpu.memory_space<vmem>>, vector<32x128xbf16>,
    %cst_5 = arith.constant 0.000000e+00 : bf16
    %4 = vector.broadcast %cst_5 : bf16 to vector<64x128xbf16>
    %c544 = arith.constant 544 : index
    %c0_6 = arith.constant 0 : index
    %5 = vector.load %arg8[%c544, %c0_6] : memref<608x128xbf16, #tpu.memory_space<vmem>>, vector<64x128xbf16>
    tpu.vector_store %arg8[%c544, %c0_6], %4 {strides = array<i32>} : memref<608x128xbf16, #tpu.memory_space<vmem>>, vector<64x128xbf16>,
    %cst_7 = arith.constant 0.000000e+00 : bf16
    %6 = vector.broadcast %cst_7 : bf16 to vector<1x128xbf16>
    %cst_8 = arith.constant 0.000000e+00 : bf16
    %7 = vector.broadcast %cst_8 : bf16 to vector<15x128xbf16>
    %c0_9 = arith.constant 0 : index
    %c0_10 = arith.constant 0 : index
    %c0_11 = arith.constant 0 : index
    %c0_12 = arith.constant 0 : index
    %8 = vector.load %arg1[%c0_9, %c0_10, %c0_11, %c0_12] : memref<1x16x16x128xbf16, #tpu.memory_space<vmem>>, vector<1x1x16x128xbf16>
    %9 = vector.shape_cast %8 : vector<1x1x16x128xbf16> to vector<16x128xbf16>
    %10 = arith.extf %9 : vector<16x128xbf16> to vector<16x128xf32>
    %11 = vector.broadcast %0 : vector<1x128xf32> to vector<16x128xf32>
    %12 = arith.mulf %10, %11 : vector<16x128xf32>
    %13 = vector.broadcast %1 : vector<1x128xf32> to vector<16x128xf32>
    %14 = arith.addf %12, %13 : vector<16x128xf32>
    %cst_13 = arith.constant 0.000000e+00 : f32
    %15 = vector.broadcast %cst_13 : f32 to vector<16x128xf32>
    %16 = arith.maximumf %14, %15 : vector<16x128xf32>
    %17 = arith.truncf %16 : vector<16x128xf32> to vector<16x128xbf16>
    %18 = tpu.concatenate %6, %17, %7 in 0 : vector<1x128xbf16>, vector<16x128xbf16>, vector<15x128xbf16> -> vector<32x128xbf16>
    %c32 = arith.constant 32 : index
    %c0_14 = arith.constant 0 : index
    %19 = vector.load %arg8[%c32, %c0_14] : memref<608x128xbf16, #tpu.memory_space<vmem>>, vector<32x128xbf16>
    tpu.vector_store %arg8[%c32, %c0_14], %18 {strides = array<i32>} : memref<608x128xbf16, #tpu.memory_space<vmem>>, vector<32x128xbf16>,
    %c0_15 = arith.constant 0 : index
    %c1 = arith.constant 1 : index
    %c0_16 = arith.constant 0 : index
    %c0_17 = arith.constant 0 : index
    %20 = vector.load %arg1[%c0_15, %c1, %c0_16, %c0_17] : memref<1x16x16x128xbf16, #tpu.memory_space<vmem>>, vector<1x1x16x128xbf16>
    %21 = vector.shape_cast %20 : vector<1x1x16x128xbf16> to vector<16x128xbf16>
    %22 = arith.extf %21 : vector<16x128xbf16> to vector<16x128xf32>
    %23 = vector.broadcast %0 : vector<1x128xf32> to vector<16x128xf32>
    %24 = arith.mulf %22, %23 : vector<16x128xf32>
    %25 = vector.broadcast %1 : vector<1x128xf32> to vector<16x128xf32>
    %26 = arith.addf %24, %25 : vector<16x128xf32>
    %cst_18 = arith.constant 0.000000e+00 : f32
    %27 = vector.broadcast %cst_18 : f32 to vector<16x128xf32>
    %28 = arith.maximumf %26, %27 : vector<16x128xf32>
    %29 = arith.truncf %28 : vector<16x128xf32> to vector<16x128xbf16>
    %30 = tpu.concatenate %6, %29, %7 in 0 : vector<1x128xbf16>, vector<16x128xbf16>, vector<15x128xbf16> -> vector<32x128xbf16>
    %c64 = arith.constant 64 : index
    %c0_19 = arith.constant 0 : index
    %31 = vector.load %arg8[%c64, %c0_19] : memref<608x128xbf16, #tpu.memory_space<vmem>>, vector<32x128xbf16>
    tpu.vector_store %arg8[%c64, %c0_19], %30 {strides = array<i32>} : memref<608x128xbf16, #tpu.memory_space<vmem>>, vector<32x128xbf16>,
    %c0_20 = arith.constant 0 : index
    %c2 = arith.constant 2 : index
    %c0_21 = arith.constant 0 : index
    %c0_22 = arith.constant 0 : index
    %32 = vector.load %arg1[%c0_20, %c2, %c0_21, %c0_22] : memref<1x16x16x128xbf16, #tpu.memory_space<vmem>>, vector<1x1x16x128xbf16>
    %33 = vector.shape_cast %32 : vector<1x1x16x128xbf16> to vector<16x128xbf16>
    %34 = arith.extf %33 : vector<16x128xbf16> to vector<16x128xf32>
    %35 = vector.broadcast %0 : vector<1x128xf32> to vector<16x128xf32>
    %36 = arith.mulf %34, %35 : vector<16x128xf32>
    %37 = vector.broadcast %1 : vector<1x128xf32> to vector<16x128xf32>
    %38 = arith.addf %36, %37 : vector<16x128xf32>
    %cst_23 = arith.constant 0.000000e+00 : f32
    %39 = vector.broadcast %cst_23 : f32 to vector<16x128xf32>
    %40 = arith.maximumf %38, %39 : vector<16x128xf32>
    %41 = arith.truncf %40 : vector<16x128xf32> to vector<16x128xbf16>
    %42 = tpu.concatenate %6, %41, %7 in 0 : vector<1x128xbf16>, vector<16x128xbf16>, vector<15x128xbf16> -> vector<32x128xbf16>
    %c96 = arith.constant 96 : index
    %c0_24 = arith.constant 0 : index
    %43 = vector.load %arg8[%c96, %c0_24] : memref<608x128xbf16, #tpu.memory_space<vmem>>, vector<32x128xbf16>
    tpu.vector_store %arg8[%c96, %c0_24], %42 {strides = array<i32>} : memref<608x128xbf16, #tpu.memory_space<vmem>>, vector<32x128xbf16>,
    %c0_25 = arith.constant 0 : index
    %c3 = arith.constant 3 : index
    %c0_26 = arith.constant 0 : index
    %c0_27 = arith.constant 0 : index
    %44 = vector.load %arg1[%c0_25, %c3, %c0_26, %c0_27] : memref<1x16x16x128xbf16, #tpu.memory_space<vmem>>, vector<1x1x16x128xbf16>
    %45 = vector.shape_cast %44 : vector<1x1x16x128xbf16> to vector<16x128xbf16>
    %46 = arith.extf %45 : vector<16x128xbf16> to vector<16x128xf32>
    %47 = vector.broadcast %0 : vector<1x128xf32> to vector<16x128xf32>
    %48 = arith.mulf %46, %47 : vector<16x128xf32>
    %49 = vector.broadcast %1 : vector<1x128xf32> to vector<16x128xf32>
    %50 = arith.addf %48, %49 : vector<16x128xf32>
    %cst_28 = arith.constant 0.000000e+00 : f32
    %51 = vector.broadcast %cst_28 : f32 to vector<16x128xf32>
    %52 = arith.maximumf %50, %51 : vector<16x128xf32>
    %53 = arith.truncf %52 : vector<16x128xf32> to vector<16x128xbf16>
    %54 = tpu.concatenate %6, %53, %7 in 0 : vector<1x128xbf16>, vector<16x128xbf16>, vector<15x128xbf16> -> vector<32x128xbf16>
    %c128 = arith.constant 128 : index
    %c0_29 = arith.constant 0 : index
    %55 = vector.load %arg8[%c128, %c0_29] : memref<608x128xbf16, #tpu.memory_space<vmem>>, vector<32x128xbf16>
    tpu.vector_store %arg8[%c128, %c0_29], %54 {strides = array<i32>} : memref<608x128xbf16, #tpu.memory_space<vmem>>, vector<32x128xbf16>,
    %c0_30 = arith.constant 0 : index
    %c4 = arith.constant 4 : index
    %c0_31 = arith.constant 0 : index
    %c0_32 = arith.constant 0 : index
    %56 = vector.load %arg1[%c0_30, %c4, %c0_31, %c0_32] : memref<1x16x16x128xbf16, #tpu.memory_space<vmem>>, vector<1x1x16x128xbf16>
    %57 = vector.shape_cast %56 : vector<1x1x16x128xbf16> to vector<16x128xbf16>
    %58 = arith.extf %57 : vector<16x128xbf16> to vector<16x128xf32>
    %59 = vector.broadcast %0 : vector<1x128xf32> to vector<16x128xf32>
    %60 = arith.mulf %58, %59 : vector<16x128xf32>
    %61 = vector.broadcast %1 : vector<1x128xf32> to vector<16x128xf32>
    %62 = arith.addf %60, %61 : vector<16x128xf32>
    %cst_33 = arith.constant 0.000000e+00 : f32
    %63 = vector.broadcast %cst_33 : f32 to vector<16x128xf32>
    %64 = arith.maximumf %62, %63 : vector<16x128xf32>
    %65 = arith.truncf %64 : vector<16x128xf32> to vector<16x128xbf16>
    %66 = tpu.concatenate %6, %65, %7 in 0 : vector<1x128xbf16>, vector<16x128xbf16>, vector<15x128xbf16> -> vector<32x128xbf16>
    %c160 = arith.constant 160 : index
    %c0_34 = arith.constant 0 : index
    %67 = vector.load %arg8[%c160, %c0_34] : memref<608x128xbf16, #tpu.memory_space<vmem>>, vector<32x128xbf16>
    tpu.vector_store %arg8[%c160, %c0_34], %66 {strides = array<i32>} : memref<608x128xbf16, #tpu.memory_space<vmem>>, vector<32x128xbf16>,
    %c0_35 = arith.constant 0 : index
    %c5 = arith.constant 5 : index
    %c0_36 = arith.constant 0 : index
    %c0_37 = arith.constant 0 : index
    %68 = vector.load %arg1[%c0_35, %c5, %c0_36, %c0_37] : memref<1x16x16x128xbf16, #tpu.memory_space<vmem>>, vector<1x1x16x128xbf16>
    %69 = vector.shape_cast %68 : vector<1x1x16x128xbf16> to vector<16x128xbf16>
    %70 = arith.extf %69 : vector<16x128xbf16> to vector<16x128xf32>
    %71 = vector.broadcast %0 : vector<1x128xf32> to vector<16x128xf32>
    %72 = arith.mulf %70, %71 : vector<16x128xf32>
    %73 = vector.broadcast %1 : vector<1x128xf32> to vector<16x128xf32>
    %74 = arith.addf %72, %73 : vector<16x128xf32>
    %cst_38 = arith.constant 0.000000e+00 : f32
    %75 = vector.broadcast %cst_38 : f32 to vector<16x128xf32>
    %76 = arith.maximumf %74, %75 : vector<16x128xf32>
    %77 = arith.truncf %76 : vector<16x128xf32> to vector<16x128xbf16>
    %78 = tpu.concatenate %6, %77, %7 in 0 : vector<1x128xbf16>, vector<16x128xbf16>, vector<15x128xbf16> -> vector<32x128xbf16>
    %c192 = arith.constant 192 : index
    %c0_39 = arith.constant 0 : index
    %79 = vector.load %arg8[%c192, %c0_39] : memref<608x128xbf16, #tpu.memory_space<vmem>>, vector<32x128xbf16>
    tpu.vector_store %arg8[%c192, %c0_39], %78 {strides = array<i32>} : memref<608x128xbf16, #tpu.memory_space<vmem>>, vector<32x128xbf16>,
    %c0_40 = arith.constant 0 : index
    %c6 = arith.constant 6 : index
    %c0_41 = arith.constant 0 : index
    %c0_42 = arith.constant 0 : index
    %80 = vector.load %arg1[%c0_40, %c6, %c0_41, %c0_42] : memref<1x16x16x128xbf16, #tpu.memory_space<vmem>>, vector<1x1x16x128xbf16>
    %81 = vector.shape_cast %80 : vector<1x1x16x128xbf16> to vector<16x128xbf16>
    %82 = arith.extf %81 : vector<16x128xbf16> to vector<16x128xf32>
    %83 = vector.broadcast %0 : vector<1x128xf32> to vector<16x128xf32>
    %84 = arith.mulf %82, %83 : vector<16x128xf32>
    %85 = vector.broadcast %1 : vector<1x128xf32> to vector<16x128xf32>
    %86 = arith.addf %84, %85 : vector<16x128xf32>
    %cst_43 = arith.constant 0.000000e+00 : f32
    %87 = vector.broadcast %cst_43 : f32 to vector<16x128xf32>
    %88 = arith.maximumf %86, %87 : vector<16x128xf32>
    %89 = arith.truncf %88 : vector<16x128xf32> to vector<16x128xbf16>
    %90 = tpu.concatenate %6, %89, %7 in 0 : vector<1x128xbf16>, vector<16x128xbf16>, vector<15x128xbf16> -> vector<32x128xbf16>
    %c224 = arith.constant 224 : index
    %c0_44 = arith.constant 0 : index
    %91 = vector.load %arg8[%c224, %c0_44] : memref<608x128xbf16, #tpu.memory_space<vmem>>, vector<32x128xbf16>
    tpu.vector_store %arg8[%c224, %c0_44], %90 {strides = array<i32>} : memref<608x128xbf16, #tpu.memory_space<vmem>>, vector<32x128xbf16>,
    %c0_45 = arith.constant 0 : index
    %c7 = arith.constant 7 : index
    %c0_46 = arith.constant 0 : index
    %c0_47 = arith.constant 0 : index
    %92 = vector.load %arg1[%c0_45, %c7, %c0_46, %c0_47] : memref<1x16x16x128xbf16, #tpu.memory_space<vmem>>, vector<1x1x16x128xbf16>
    %93 = vector.shape_cast %92 : vector<1x1x16x128xbf16> to vector<16x128xbf16>
    %94 = arith.extf %93 : vector<16x128xbf16> to vector<16x128xf32>
    %95 = vector.broadcast %0 : vector<1x128xf32> to vector<16x128xf32>
    %96 = arith.mulf %94, %95 : vector<16x128xf32>
    %97 = vector.broadcast %1 : vector<1x128xf32> to vector<16x128xf32>
    %98 = arith.addf %96, %97 : vector<16x128xf32>
    %cst_48 = arith.constant 0.000000e+00 : f32
    %99 = vector.broadcast %cst_48 : f32 to vector<16x128xf32>
    %100 = arith.maximumf %98, %99 : vector<16x128xf32>
    %101 = arith.truncf %100 : vector<16x128xf32> to vector<16x128xbf16>
    %102 = tpu.concatenate %6, %101, %7 in 0 : vector<1x128xbf16>, vector<16x128xbf16>, vector<15x128xbf16> -> vector<32x128xbf16>
    %c256 = arith.constant 256 : index
    %c0_49 = arith.constant 0 : index
    %103 = vector.load %arg8[%c256, %c0_49] : memref<608x128xbf16, #tpu.memory_space<vmem>>, vector<32x128xbf16>
    tpu.vector_store %arg8[%c256, %c0_49], %102 {strides = array<i32>} : memref<608x128xbf16, #tpu.memory_space<vmem>>, vector<32x128xbf16>,
    %c0_50 = arith.constant 0 : index
    %c8 = arith.constant 8 : index
    %c0_51 = arith.constant 0 : index
    %c0_52 = arith.constant 0 : index
    %104 = vector.load %arg1[%c0_50, %c8, %c0_51, %c0_52] : memref<1x16x16x128xbf16, #tpu.memory_space<vmem>>, vector<1x1x16x128xbf16>
    %105 = vector.shape_cast %104 : vector<1x1x16x128xbf16> to vector<16x128xbf16>
    %106 = arith.extf %105 : vector<16x128xbf16> to vector<16x128xf32>
    %107 = vector.broadcast %0 : vector<1x128xf32> to vector<16x128xf32>
    %108 = arith.mulf %106, %107 : vector<16x128xf32>
    %109 = vector.broadcast %1 : vector<1x128xf32> to vector<16x128xf32>
    %110 = arith.addf %108, %109 : vector<16x128xf32>
    %cst_53 = arith.constant 0.000000e+00 : f32
    %111 = vector.broadcast %cst_53 : f32 to vector<16x128xf32>
    %112 = arith.maximumf %110, %111 : vector<16x128xf32>
    %113 = arith.truncf %112 : vector<16x128xf32> to vector<16x128xbf16>
    %114 = tpu.concatenate %6, %113, %7 in 0 : vector<1x128xbf16>, vector<16x128xbf16>, vector<15x128xbf16> -> vector<32x128xbf16>
    %c288 = arith.constant 288 : index
    %c0_54 = arith.constant 0 : index
    %115 = vector.load %arg8[%c288, %c0_54] : memref<608x128xbf16, #tpu.memory_space<vmem>>, vector<32x128xbf16>
    tpu.vector_store %arg8[%c288, %c0_54], %114 {strides = array<i32>} : memref<608x128xbf16, #tpu.memory_space<vmem>>, vector<32x128xbf16>,
    %c0_55 = arith.constant 0 : index
    %c9 = arith.constant 9 : index
    %c0_56 = arith.constant 0 : index
    %c0_57 = arith.constant 0 : index
    %116 = vector.load %arg1[%c0_55, %c9, %c0_56, %c0_57] : memref<1x16x16x128xbf16, #tpu.memory_space<vmem>>, vector<1x1x16x128xbf16>
    %117 = vector.shape_cast %116 : vector<1x1x16x128xbf16> to vector<16x128xbf16>
    %118 = arith.extf %117 : vector<16x128xbf16> to vector<16x128xf32>
    %119 = vector.broadcast %0 : vector<1x128xf32> to vector<16x128xf32>
    %120 = arith.mulf %118, %119 : vector<16x128xf32>
    %121 = vector.broadcast %1 : vector<1x128xf32> to vector<16x128xf32>
    %122 = arith.addf %120, %121 : vector<16x128xf32>
    %cst_58 = arith.constant 0.000000e+00 : f32
    %123 = vector.broadcast %cst_58 : f32 to vector<16x128xf32>
    %124 = arith.maximumf %122, %123 : vector<16x128xf32>
    %125 = arith.truncf %124 : vector<16x128xf32> to vector<16x128xbf16>
    %126 = tpu.concatenate %6, %125, %7 in 0 : vector<1x128xbf16>, vector<16x128xbf16>, vector<15x128xbf16> -> vector<32x128xbf16>
    %c320 = arith.constant 320 : index
    %c0_59 = arith.constant 0 : index
    %127 = vector.load %arg8[%c320, %c0_59] : memref<608x128xbf16, #tpu.memory_space<vmem>>, vector<32x128xbf16>
    tpu.vector_store %arg8[%c320, %c0_59], %126 {strides = array<i32>} : memref<608x128xbf16, #tpu.memory_space<vmem>>, vector<32x128xbf16>,
    %c0_60 = arith.constant 0 : index
    %c10 = arith.constant 10 : index
    %c0_61 = arith.constant 0 : index
    %c0_62 = arith.constant 0 : index
    %128 = vector.load %arg1[%c0_60, %c10, %c0_61, %c0_62] : memref<1x16x16x128xbf16, #tpu.memory_space<vmem>>, vector<1x1x16x128xbf16>
    %129 = vector.shape_cast %128 : vector<1x1x16x128xbf16> to vector<16x128xbf16>
    %130 = arith.extf %129 : vector<16x128xbf16> to vector<16x128xf32>
    %131 = vector.broadcast %0 : vector<1x128xf32> to vector<16x128xf32>
    %132 = arith.mulf %130, %131 : vector<16x128xf32>
    %133 = vector.broadcast %1 : vector<1x128xf32> to vector<16x128xf32>
    %134 = arith.addf %132, %133 : vector<16x128xf32>
    %cst_63 = arith.constant 0.000000e+00 : f32
    %135 = vector.broadcast %cst_63 : f32 to vector<16x128xf32>
    %136 = arith.maximumf %134, %135 : vector<16x128xf32>
    %137 = arith.truncf %136 : vector<16x128xf32> to vector<16x128xbf16>
    %138 = tpu.concatenate %6, %137, %7 in 0 : vector<1x128xbf16>, vector<16x128xbf16>, vector<15x128xbf16> -> vector<32x128xbf16>
    %c352 = arith.constant 352 : index
    %c0_64 = arith.constant 0 : index
    %139 = vector.load %arg8[%c352, %c0_64] : memref<608x128xbf16, #tpu.memory_space<vmem>>, vector<32x128xbf16>
    tpu.vector_store %arg8[%c352, %c0_64], %138 {strides = array<i32>} : memref<608x128xbf16, #tpu.memory_space<vmem>>, vector<32x128xbf16>,
    %c0_65 = arith.constant 0 : index
    %c11 = arith.constant 11 : index
    %c0_66 = arith.constant 0 : index
    %c0_67 = arith.constant 0 : index
    %140 = vector.load %arg1[%c0_65, %c11, %c0_66, %c0_67] : memref<1x16x16x128xbf16, #tpu.memory_space<vmem>>, vector<1x1x16x128xbf16>
    %141 = vector.shape_cast %140 : vector<1x1x16x128xbf16> to vector<16x128xbf16>
    %142 = arith.extf %141 : vector<16x128xbf16> to vector<16x128xf32>
    %143 = vector.broadcast %0 : vector<1x128xf32> to vector<16x128xf32>
    %144 = arith.mulf %142, %143 : vector<16x128xf32>
    %145 = vector.broadcast %1 : vector<1x128xf32> to vector<16x128xf32>
    %146 = arith.addf %144, %145 : vector<16x128xf32>
    %cst_68 = arith.constant 0.000000e+00 : f32
    %147 = vector.broadcast %cst_68 : f32 to vector<16x128xf32>
    %148 = arith.maximumf %146, %147 : vector<16x128xf32>
    %149 = arith.truncf %148 : vector<16x128xf32> to vector<16x128xbf16>
    %150 = tpu.concatenate %6, %149, %7 in 0 : vector<1x128xbf16>, vector<16x128xbf16>, vector<15x128xbf16> -> vector<32x128xbf16>
    %c384 = arith.constant 384 : index
    %c0_69 = arith.constant 0 : index
    %151 = vector.load %arg8[%c384, %c0_69] : memref<608x128xbf16, #tpu.memory_space<vmem>>, vector<32x128xbf16>
    tpu.vector_store %arg8[%c384, %c0_69], %150 {strides = array<i32>} : memref<608x128xbf16, #tpu.memory_space<vmem>>, vector<32x128xbf16>,
    %c0_70 = arith.constant 0 : index
    %c12 = arith.constant 12 : index
    %c0_71 = arith.constant 0 : index
    %c0_72 = arith.constant 0 : index
    %152 = vector.load %arg1[%c0_70, %c12, %c0_71, %c0_72] : memref<1x16x16x128xbf16, #tpu.memory_space<vmem>>, vector<1x1x16x128xbf16>
    %153 = vector.shape_cast %152 : vector<1x1x16x128xbf16> to vector<16x128xbf16>
    %154 = arith.extf %153 : vector<16x128xbf16> to vector<16x128xf32>
    %155 = vector.broadcast %0 : vector<1x128xf32> to vector<16x128xf32>
    %156 = arith.mulf %154, %155 : vector<16x128xf32>
    %157 = vector.broadcast %1 : vector<1x128xf32> to vector<16x128xf32>
    %158 = arith.addf %156, %157 : vector<16x128xf32>
    %cst_73 = arith.constant 0.000000e+00 : f32
    %159 = vector.broadcast %cst_73 : f32 to vector<16x128xf32>
    %160 = arith.maximumf %158, %159 : vector<16x128xf32>
    %161 = arith.truncf %160 : vector<16x128xf32> to vector<16x128xbf16>
    %162 = tpu.concatenate %6, %161, %7 in 0 : vector<1x128xbf16>, vector<16x128xbf16>, vector<15x128xbf16> -> vector<32x128xbf16>
    %c416 = arith.constant 416 : index
    %c0_74 = arith.constant 0 : index
    %163 = vector.load %arg8[%c416, %c0_74] : memref<608x128xbf16, #tpu.memory_space<vmem>>, vector<32x128xbf16>
    tpu.vector_store %arg8[%c416, %c0_74], %162 {strides = array<i32>} : memref<608x128xbf16, #tpu.memory_space<vmem>>, vector<32x128xbf16>,
    %c0_75 = arith.constant 0 : index
    %c13 = arith.constant 13 : index
    %c0_76 = arith.constant 0 : index
    %c0_77 = arith.constant 0 : index
    %164 = vector.load %arg1[%c0_75, %c13, %c0_76, %c0_77] : memref<1x16x16x128xbf16, #tpu.memory_space<vmem>>, vector<1x1x16x128xbf16>
    %165 = vector.shape_cast %164 : vector<1x1x16x128xbf16> to vector<16x128xbf16>
    %166 = arith.extf %165 : vector<16x128xbf16> to vector<16x128xf32>
    %167 = vector.broadcast %0 : vector<1x128xf32> to vector<16x128xf32>
    %168 = arith.mulf %166, %167 : vector<16x128xf32>
    %169 = vector.broadcast %1 : vector<1x128xf32> to vector<16x128xf32>
    %170 = arith.addf %168, %169 : vector<16x128xf32>
    %cst_78 = arith.constant 0.000000e+00 : f32
    %171 = vector.broadcast %cst_78 : f32 to vector<16x128xf32>
    %172 = arith.maximumf %170, %171 : vector<16x128xf32>
    %173 = arith.truncf %172 : vector<16x128xf32> to vector<16x128xbf16>
    %174 = tpu.concatenate %6, %173, %7 in 0 : vector<1x128xbf16>, vector<16x128xbf16>, vector<15x128xbf16> -> vector<32x128xbf16>
    %c448 = arith.constant 448 : index
    %c0_79 = arith.constant 0 : index
    %175 = vector.load %arg8[%c448, %c0_79] : memref<608x128xbf16, #tpu.memory_space<vmem>>, vector<32x128xbf16>
    tpu.vector_store %arg8[%c448, %c0_79], %174 {strides = array<i32>} : memref<608x128xbf16, #tpu.memory_space<vmem>>, vector<32x128xbf16>,
    %c0_80 = arith.constant 0 : index
    %c14 = arith.constant 14 : index
    %c0_81 = arith.constant 0 : index
    %c0_82 = arith.constant 0 : index
    %176 = vector.load %arg1[%c0_80, %c14, %c0_81, %c0_82] : memref<1x16x16x128xbf16, #tpu.memory_space<vmem>>, vector<1x1x16x128xbf16>
    %177 = vector.shape_cast %176 : vector<1x1x16x128xbf16> to vector<16x128xbf16>
    %178 = arith.extf %177 : vector<16x128xbf16> to vector<16x128xf32>
    %179 = vector.broadcast %0 : vector<1x128xf32> to vector<16x128xf32>
    %180 = arith.mulf %178, %179 : vector<16x128xf32>
    %181 = vector.broadcast %1 : vector<1x128xf32> to vector<16x128xf32>
    %182 = arith.addf %180, %181 : vector<16x128xf32>
    %cst_83 = arith.constant 0.000000e+00 : f32
    %183 = vector.broadcast %cst_83 : f32 to vector<16x128xf32>
    %184 = arith.maximumf %182, %183 : vector<16x128xf32>
    %185 = arith.truncf %184 : vector<16x128xf32> to vector<16x128xbf16>
    %186 = tpu.concatenate %6, %185, %7 in 0 : vector<1x128xbf16>, vector<16x128xbf16>, vector<15x128xbf16> -> vector<32x128xbf16>
    %c480 = arith.constant 480 : index
    %c0_84 = arith.constant 0 : index
    %187 = vector.load %arg8[%c480, %c0_84] : memref<608x128xbf16, #tpu.memory_space<vmem>>, vector<32x128xbf16>
    tpu.vector_store %arg8[%c480, %c0_84], %186 {strides = array<i32>} : memref<608x128xbf16, #tpu.memory_space<vmem>>, vector<32x128xbf16>,
    %c0_85 = arith.constant 0 : index
    %c15 = arith.constant 15 : index
    %c0_86 = arith.constant 0 : index
    %c0_87 = arith.constant 0 : index
    %188 = vector.load %arg1[%c0_85, %c15, %c0_86, %c0_87] : memref<1x16x16x128xbf16, #tpu.memory_space<vmem>>, vector<1x1x16x128xbf16>
    %189 = vector.shape_cast %188 : vector<1x1x16x128xbf16> to vector<16x128xbf16>
    %190 = arith.extf %189 : vector<16x128xbf16> to vector<16x128xf32>
    %191 = vector.broadcast %0 : vector<1x128xf32> to vector<16x128xf32>
    %192 = arith.mulf %190, %191 : vector<16x128xf32>
    %193 = vector.broadcast %1 : vector<1x128xf32> to vector<16x128xf32>
    %194 = arith.addf %192, %193 : vector<16x128xf32>
    %cst_88 = arith.constant 0.000000e+00 : f32
    %195 = vector.broadcast %cst_88 : f32 to vector<16x128xf32>
    %196 = arith.maximumf %194, %195 : vector<16x128xf32>
    %197 = arith.truncf %196 : vector<16x128xf32> to vector<16x128xbf16>
    %198 = tpu.concatenate %6, %197, %7 in 0 : vector<1x128xbf16>, vector<16x128xbf16>, vector<15x128xbf16> -> vector<32x128xbf16>
    %c512 = arith.constant 512 : index
    %c0_89 = arith.constant 0 : index
    %199 = vector.load %arg8[%c512, %c0_89] : memref<608x128xbf16, #tpu.memory_space<vmem>>, vector<32x128xbf16>
    tpu.vector_store %arg8[%c512, %c0_89], %198 {strides = array<i32>} : memref<608x128xbf16, #tpu.memory_space<vmem>>, vector<32x128xbf16>,
    %c0_90 = arith.constant 0 : index
    %c0_91 = arith.constant 0 : index
    %200 = vector.load %arg8[%c0_90, %c0_91] : memref<608x128xbf16, #tpu.memory_space<vmem>>, vector<512x128xbf16>
    %c0_92 = arith.constant 0 : index
    %c0_93 = arith.constant 0 : index
    %c0_94 = arith.constant 0 : index
    %201 = vector.load %arg4[%c0_92, %c0_93, %c0_94] : memref<9x128x128xbf16, #tpu.memory_space<vmem>>, vector<1x128x128xbf16>
    %202 = vector.shape_cast %201 : vector<1x128x128xbf16> to vector<128x128xbf16>
    %cst_95 = arith.constant dense<0.000000e+00> : vector<512x128xf32>
    %203 = tpu.matmul %200, %202, %cst_95 {dimension_numbers = #tpu.dot_dimension_numbers<[1], [0], [0], [1], [0, 0, 1, 1], [], []>} : vector<512x128xbf16>, vector<128x128xbf16>, vector<512x128xf32> -> vector<512x128xf32>
    %c0_96 = arith.constant 0 : index
    %c0_97 = arith.constant 0 : index
    %204 = vector.load %arg9[%c0_96, %c0_97] : memref<512x128xf32, #tpu.memory_space<vmem>>, vector<512x128xf32>
    tpu.vector_store %arg9[%c0_96, %c0_97], %203 {strides = array<i32>} : memref<512x128xf32, #tpu.memory_space<vmem>>, vector<512x128xf32>,
    %c1_98 = arith.constant 1 : index
    %c0_99 = arith.constant 0 : index
    %205 = vector.load %arg8[%c1_98, %c0_99] : memref<608x128xbf16, #tpu.memory_space<vmem>>, vector<512x128xbf16>
    %c1_100 = arith.constant 1 : index
    %c0_101 = arith.constant 0 : index
    %c0_102 = arith.constant 0 : index
    %206 = vector.load %arg4[%c1_100, %c0_101, %c0_102] : memref<9x128x128xbf16, #tpu.memory_space<vmem>>, vector<1x128x128xbf16>
    %207 = vector.shape_cast %206 : vector<1x128x128xbf16> to vector<128x128xbf16>
    %cst_103 = arith.constant dense<0.000000e+00> : vector<512x128xf32>
    %208 = tpu.matmul %205, %207, %cst_103 {dimension_numbers = #tpu.dot_dimension_numbers<[1], [0], [0], [1], [0, 0, 1, 1], [], []>} : vector<512x128xbf16>, vector<128x128xbf16>, vector<512x128xf32> -> vector<512x128xf32>
    %c0_104 = arith.constant 0 : index
    %c0_105 = arith.constant 0 : index
    %209 = vector.load %arg9[%c0_104, %c0_105] : memref<512x128xf32, #tpu.memory_space<vmem>>, vector<512x128xf32>
    %210 = arith.addf %209, %208 : vector<512x128xf32>
    %c0_106 = arith.constant 0 : index
    %c0_107 = arith.constant 0 : index
    %211 = vector.load %arg9[%c0_106, %c0_107] : memref<512x128xf32, #tpu.memory_space<vmem>>, vector<512x128xf32>
    tpu.vector_store %arg9[%c0_106, %c0_107], %210 {strides = array<i32>} : memref<512x128xf32, #tpu.memory_space<vmem>>, vector<512x128xf32>,
    %c2_108 = arith.constant 2 : index
    %c0_109 = arith.constant 0 : index
    %212 = vector.load %arg8[%c2_108, %c0_109] : memref<608x128xbf16, #tpu.memory_space<vmem>>, vector<512x128xbf16>
    %c2_110 = arith.constant 2 : index
    %c0_111 = arith.constant 0 : index
    %c0_112 = arith.constant 0 : index
    %213 = vector.load %arg4[%c2_110, %c0_111, %c0_112] : memref<9x128x128xbf16, #tpu.memory_space<vmem>>, vector<1x128x128xbf16>
    %214 = vector.shape_cast %213 : vector<1x128x128xbf16> to vector<128x128xbf16>
    %cst_113 = arith.constant dense<0.000000e+00> : vector<512x128xf32>
    %215 = tpu.matmul %212, %214, %cst_113 {dimension_numbers = #tpu.dot_dimension_numbers<[1], [0], [0], [1], [0, 0, 1, 1], [], []>} : vector<512x128xbf16>, vector<128x128xbf16>, vector<512x128xf32> -> vector<512x128xf32>
    %c0_114 = arith.constant 0 : index
    %c0_115 = arith.constant 0 : index
    %216 = vector.load %arg9[%c0_114, %c0_115] : memref<512x128xf32, #tpu.memory_space<vmem>>, vector<512x128xf32>
    %217 = arith.addf %216, %215 : vector<512x128xf32>
    %c0_116 = arith.constant 0 : index
    %c0_117 = arith.constant 0 : index
    %218 = vector.load %arg9[%c0_116, %c0_117] : memref<512x128xf32, #tpu.memory_space<vmem>>, vector<512x128xf32>
    tpu.vector_store %arg9[%c0_116, %c0_117], %217 {strides = array<i32>} : memref<512x128xf32, #tpu.memory_space<vmem>>, vector<512x128xf32>,
    %c32_118 = arith.constant 32 : index
    %c0_119 = arith.constant 0 : index
    %219 = vector.load %arg8[%c32_118, %c0_119] : memref<608x128xbf16, #tpu.memory_space<vmem>>, vector<512x128xbf16>
    %c3_120 = arith.constant 3 : index
    %c0_121 = arith.constant 0 : index
    %c0_122 = arith.constant 0 : index
    %220 = vector.load %arg4[%c3_120, %c0_121, %c0_122] : memref<9x128x128xbf16, #tpu.memory_space<vmem>>, vector<1x128x128xbf16>
    %221 = vector.shape_cast %220 : vector<1x128x128xbf16> to vector<128x128xbf16>
    %cst_123 = arith.constant dense<0.000000e+00> : vector<512x128xf32>
    %222 = tpu.matmul %219, %221, %cst_123 {dimension_numbers = #tpu.dot_dimension_numbers<[1], [0], [0], [1], [0, 0, 1, 1], [], []>} : vector<512x128xbf16>, vector<128x128xbf16>, vector<512x128xf32> -> vector<512x128xf32>
    %c0_124 = arith.constant 0 : index
    %c0_125 = arith.constant 0 : index
    %223 = vector.load %arg9[%c0_124, %c0_125] : memref<512x128xf32, #tpu.memory_space<vmem>>, vector<512x128xf32>
    %224 = arith.addf %223, %222 : vector<512x128xf32>
    %c0_126 = arith.constant 0 : index
    %c0_127 = arith.constant 0 : index
    %225 = vector.load %arg9[%c0_126, %c0_127] : memref<512x128xf32, #tpu.memory_space<vmem>>, vector<512x128xf32>
    tpu.vector_store %arg9[%c0_126, %c0_127], %224 {strides = array<i32>} : memref<512x128xf32, #tpu.memory_space<vmem>>, vector<512x128xf32>,
    %c33 = arith.constant 33 : index
    %c0_128 = arith.constant 0 : index
    %226 = vector.load %arg8[%c33, %c0_128] : memref<608x128xbf16, #tpu.memory_space<vmem>>, vector<512x128xbf16>
    %c4_129 = arith.constant 4 : index
    %c0_130 = arith.constant 0 : index
    %c0_131 = arith.constant 0 : index
    %227 = vector.load %arg4[%c4_129, %c0_130, %c0_131] : memref<9x128x128xbf16, #tpu.memory_space<vmem>>, vector<1x128x128xbf16>
    %228 = vector.shape_cast %227 : vector<1x128x128xbf16> to vector<128x128xbf16>
    %cst_132 = arith.constant dense<0.000000e+00> : vector<512x128xf32>
    %229 = tpu.matmul %226, %228, %cst_132 {dimension_numbers = #tpu.dot_dimension_numbers<[1], [0], [0], [1], [0, 0, 1, 1], [], []>} : vector<512x128xbf16>, vector<128x128xbf16>, vector<512x128xf32> -> vector<512x128xf32>
    %c0_133 = arith.constant 0 : index
    %c0_134 = arith.constant 0 : index
    %230 = vector.load %arg9[%c0_133, %c0_134] : memref<512x128xf32, #tpu.memory_space<vmem>>, vector<512x128xf32>
    %231 = arith.addf %230, %229 : vector<512x128xf32>
    %c0_135 = arith.constant 0 : index
    %c0_136 = arith.constant 0 : index
    %232 = vector.load %arg9[%c0_135, %c0_136] : memref<512x128xf32, #tpu.memory_space<vmem>>, vector<512x128xf32>
    tpu.vector_store %arg9[%c0_135, %c0_136], %231 {strides = array<i32>} : memref<512x128xf32, #tpu.memory_space<vmem>>, vector<512x128xf32>,
    %c34 = arith.constant 34 : index
    %c0_137 = arith.constant 0 : index
    %233 = vector.load %arg8[%c34, %c0_137] : memref<608x128xbf16, #tpu.memory_space<vmem>>, vector<512x128xbf16>
    %c5_138 = arith.constant 5 : index
    %c0_139 = arith.constant 0 : index
    %c0_140 = arith.constant 0 : index
    %234 = vector.load %arg4[%c5_138, %c0_139, %c0_140] : memref<9x128x128xbf16, #tpu.memory_space<vmem>>, vector<1x128x128xbf16>
    %235 = vector.shape_cast %234 : vector<1x128x128xbf16> to vector<128x128xbf16>
    %cst_141 = arith.constant dense<0.000000e+00> : vector<512x128xf32>
    %236 = tpu.matmul %233, %235, %cst_141 {dimension_numbers = #tpu.dot_dimension_numbers<[1], [0], [0], [1], [0, 0, 1, 1], [], []>} : vector<512x128xbf16>, vector<128x128xbf16>, vector<512x128xf32> -> vector<512x128xf32>
    %c0_142 = arith.constant 0 : index
    %c0_143 = arith.constant 0 : index
    %237 = vector.load %arg9[%c0_142, %c0_143] : memref<512x128xf32, #tpu.memory_space<vmem>>, vector<512x128xf32>
    %238 = arith.addf %237, %236 : vector<512x128xf32>
    %c0_144 = arith.constant 0 : index
    %c0_145 = arith.constant 0 : index
    %239 = vector.load %arg9[%c0_144, %c0_145] : memref<512x128xf32, #tpu.memory_space<vmem>>, vector<512x128xf32>
    tpu.vector_store %arg9[%c0_144, %c0_145], %238 {strides = array<i32>} : memref<512x128xf32, #tpu.memory_space<vmem>>, vector<512x128xf32>,
    %c64_146 = arith.constant 64 : index
    %c0_147 = arith.constant 0 : index
    %240 = vector.load %arg8[%c64_146, %c0_147] : memref<608x128xbf16, #tpu.memory_space<vmem>>, vector<512x128xbf16>
    %c6_148 = arith.constant 6 : index
    %c0_149 = arith.constant 0 : index
    %c0_150 = arith.constant 0 : index
    %241 = vector.load %arg4[%c6_148, %c0_149, %c0_150] : memref<9x128x128xbf16, #tpu.memory_space<vmem>>, vector<1x128x128xbf16>
    %242 = vector.shape_cast %241 : vector<1x128x128xbf16> to vector<128x128xbf16>
    %cst_151 = arith.constant dense<0.000000e+00> : vector<512x128xf32>
    %243 = tpu.matmul %240, %242, %cst_151 {dimension_numbers = #tpu.dot_dimension_numbers<[1], [0], [0], [1], [0, 0, 1, 1], [], []>} : vector<512x128xbf16>, vector<128x128xbf16>, vector<512x128xf32> -> vector<512x128xf32>
    %c0_152 = arith.constant 0 : index
    %c0_153 = arith.constant 0 : index
    %244 = vector.load %arg9[%c0_152, %c0_153] : memref<512x128xf32, #tpu.memory_space<vmem>>, vector<512x128xf32>
    %245 = arith.addf %244, %243 : vector<512x128xf32>
    %c0_154 = arith.constant 0 : index
    %c0_155 = arith.constant 0 : index
    %246 = vector.load %arg9[%c0_154, %c0_155] : memref<512x128xf32, #tpu.memory_space<vmem>>, vector<512x128xf32>
    tpu.vector_store %arg9[%c0_154, %c0_155], %245 {strides = array<i32>} : memref<512x128xf32, #tpu.memory_space<vmem>>, vector<512x128xf32>,
    %c65 = arith.constant 65 : index
    %c0_156 = arith.constant 0 : index
    %247 = vector.load %arg8[%c65, %c0_156] : memref<608x128xbf16, #tpu.memory_space<vmem>>, vector<512x128xbf16>
    %c7_157 = arith.constant 7 : index
    %c0_158 = arith.constant 0 : index
    %c0_159 = arith.constant 0 : index
    %248 = vector.load %arg4[%c7_157, %c0_158, %c0_159] : memref<9x128x128xbf16, #tpu.memory_space<vmem>>, vector<1x128x128xbf16>
    %249 = vector.shape_cast %248 : vector<1x128x128xbf16> to vector<128x128xbf16>
    %cst_160 = arith.constant dense<0.000000e+00> : vector<512x128xf32>
    %250 = tpu.matmul %247, %249, %cst_160 {dimension_numbers = #tpu.dot_dimension_numbers<[1], [0], [0], [1], [0, 0, 1, 1], [], []>} : vector<512x128xbf16>, vector<128x128xbf16>, vector<512x128xf32> -> vector<512x128xf32>
    %c0_161 = arith.constant 0 : index
    %c0_162 = arith.constant 0 : index
    %251 = vector.load %arg9[%c0_161, %c0_162] : memref<512x128xf32, #tpu.memory_space<vmem>>, vector<512x128xf32>
    %252 = arith.addf %251, %250 : vector<512x128xf32>
    %c0_163 = arith.constant 0 : index
    %c0_164 = arith.constant 0 : index
    %253 = vector.load %arg9[%c0_163, %c0_164] : memref<512x128xf32, #tpu.memory_space<vmem>>, vector<512x128xf32>
    tpu.vector_store %arg9[%c0_163, %c0_164], %252 {strides = array<i32>} : memref<512x128xf32, #tpu.memory_space<vmem>>, vector<512x128xf32>,
    %c66 = arith.constant 66 : index
    %c0_165 = arith.constant 0 : index
    %254 = vector.load %arg8[%c66, %c0_165] : memref<608x128xbf16, #tpu.memory_space<vmem>>, vector<512x128xbf16>
    %c8_166 = arith.constant 8 : index
    %c0_167 = arith.constant 0 : index
    %c0_168 = arith.constant 0 : index
    %255 = vector.load %arg4[%c8_166, %c0_167, %c0_168] : memref<9x128x128xbf16, #tpu.memory_space<vmem>>, vector<1x128x128xbf16>
    %256 = vector.shape_cast %255 : vector<1x128x128xbf16> to vector<128x128xbf16>
    %cst_169 = arith.constant dense<0.000000e+00> : vector<512x128xf32>
    %257 = tpu.matmul %254, %256, %cst_169 {dimension_numbers = #tpu.dot_dimension_numbers<[1], [0], [0], [1], [0, 0, 1, 1], [], []>} : vector<512x128xbf16>, vector<128x128xbf16>, vector<512x128xf32> -> vector<512x128xf32>
    %c0_170 = arith.constant 0 : index
    %c0_171 = arith.constant 0 : index
    %258 = vector.load %arg9[%c0_170, %c0_171] : memref<512x128xf32, #tpu.memory_space<vmem>>, vector<512x128xf32>
    %259 = arith.addf %258, %257 : vector<512x128xf32>
    %c0_172 = arith.constant 0 : index
    %c0_173 = arith.constant 0 : index
    %260 = vector.load %arg9[%c0_172, %c0_173] : memref<512x128xf32, #tpu.memory_space<vmem>>, vector<512x128xf32>
    tpu.vector_store %arg9[%c0_172, %c0_173], %259 {strides = array<i32>} : memref<512x128xf32, #tpu.memory_space<vmem>>, vector<512x128xf32>,
    %cst_174 = arith.constant 0.000000e+00 : f32
    %261 = vector.broadcast %cst_174 : f32 to vector<1x128xf32>
    %cst_175 = arith.constant 0.000000e+00 : f32
    %262 = vector.broadcast %cst_175 : f32 to vector<1x128xf32>
    %c0_176 = arith.constant 0 : index
    %c0_177 = arith.constant 0 : index
    %263 = vector.load %arg9[%c0_176, %c0_177] : memref<512x128xf32, #tpu.memory_space<vmem>>, vector<16x128xf32>
    %264 = arith.truncf %263 : vector<16x128xf32> to vector<16x128xbf16>
    %c0_178 = arith.constant 0 : index
    %c0_179 = arith.constant 0 : index
    %c0_180 = arith.constant 0 : index
    %c0_181 = arith.constant 0 : index
    %265 = vector.load %arg5[%c0_178, %c0_179, %c0_180, %c0_181] : memref<1x16x16x128xbf16, #tpu.memory_space<vmem>>, vector<1x1x16x128xbf16>
    %266 = vector.shape_cast %265 : vector<1x1x16x128xbf16> to vector<16x128xbf16>
    %267 = vector.shape_cast %264 : vector<16x128xbf16> to vector<1x1x16x128xbf16>
    tpu.vector_store %arg5[%c0_178, %c0_179, %c0_180, %c0_181], %267 {strides = array<i32>} : memref<1x16x16x128xbf16, #tpu.memory_space<vmem>>, vector<1x1x16x128xbf16>,
    %268 = arith.extf %264 : vector<16x128xbf16> to vector<16x128xf32>
    %cst_182 = arith.constant dense<0.000000e+00> : vector<128xf32>
    %269 = vector.multi_reduction <add>, %268, %cst_182 [0] : vector<16x128xf32> to vector<128xf32>
    %270 = vector.shape_cast %269 : vector<128xf32> to vector<1x128xf32>
    %271 = arith.addf %261, %270 : vector<1x128xf32>
    %272 = arith.mulf %268, %268 : vector<16x128xf32>
    %cst_183 = arith.constant dense<0.000000e+00> : vector<128xf32>
    %273 = vector.multi_reduction <add>, %272, %cst_183 [0] : vector<16x128xf32> to vector<128xf32>
    %274 = vector.shape_cast %273 : vector<128xf32> to vector<1x128xf32>
    %275 = arith.addf %262, %274 : vector<1x128xf32>
    %c32_184 = arith.constant 32 : index
    %c0_185 = arith.constant 0 : index
    %276 = vector.load %arg9[%c32_184, %c0_185] : memref<512x128xf32, #tpu.memory_space<vmem>>, vector<16x128xf32>
    %277 = arith.truncf %276 : vector<16x128xf32> to vector<16x128xbf16>
    %c0_186 = arith.constant 0 : index
    %c1_187 = arith.constant 1 : index
    %c0_188 = arith.constant 0 : index
    %c0_189 = arith.constant 0 : index
    %278 = vector.load %arg5[%c0_186, %c1_187, %c0_188, %c0_189] : memref<1x16x16x128xbf16, #tpu.memory_space<vmem>>, vector<1x1x16x128xbf16>
    %279 = vector.shape_cast %278 : vector<1x1x16x128xbf16> to vector<16x128xbf16>
    %280 = vector.shape_cast %277 : vector<16x128xbf16> to vector<1x1x16x128xbf16>
    tpu.vector_store %arg5[%c0_186, %c1_187, %c0_188, %c0_189], %280 {strides = array<i32>} : memref<1x16x16x128xbf16, #tpu.memory_space<vmem>>, vector<1x1x16x128xbf16>,
    %281 = arith.extf %277 : vector<16x128xbf16> to vector<16x128xf32>
    %cst_190 = arith.constant dense<0.000000e+00> : vector<128xf32>
    %282 = vector.multi_reduction <add>, %281, %cst_190 [0] : vector<16x128xf32> to vector<128xf32>
    %283 = vector.shape_cast %282 : vector<128xf32> to vector<1x128xf32>
    %284 = arith.addf %271, %283 : vector<1x128xf32>
    %285 = arith.mulf %281, %281 : vector<16x128xf32>
    %cst_191 = arith.constant dense<0.000000e+00> : vector<128xf32>
    %286 = vector.multi_reduction <add>, %285, %cst_191 [0] : vector<16x128xf32> to vector<128xf32>
    %287 = vector.shape_cast %286 : vector<128xf32> to vector<1x128xf32>
    %288 = arith.addf %275, %287 : vector<1x128xf32>
    %c64_192 = arith.constant 64 : index
    %c0_193 = arith.constant 0 : index
    %289 = vector.load %arg9[%c64_192, %c0_193] : memref<512x128xf32, #tpu.memory_space<vmem>>, vector<16x128xf32>
    %290 = arith.truncf %289 : vector<16x128xf32> to vector<16x128xbf16>
    %c0_194 = arith.constant 0 : index
    %c2_195 = arith.constant 2 : index
    %c0_196 = arith.constant 0 : index
    %c0_197 = arith.constant 0 : index
    %291 = vector.load %arg5[%c0_194, %c2_195, %c0_196, %c0_197] : memref<1x16x16x128xbf16, #tpu.memory_space<vmem>>, vector<1x1x16x128xbf16>
    %292 = vector.shape_cast %291 : vector<1x1x16x128xbf16> to vector<16x128xbf16>
    %293 = vector.shape_cast %290 : vector<16x128xbf16> to vector<1x1x16x128xbf16>
    tpu.vector_store %arg5[%c0_194, %c2_195, %c0_196, %c0_197], %293 {strides = array<i32>} : memref<1x16x16x128xbf16, #tpu.memory_space<vmem>>, vector<1x1x16x128xbf16>,
    %294 = arith.extf %290 : vector<16x128xbf16> to vector<16x128xf32>
    %cst_198 = arith.constant dense<0.000000e+00> : vector<128xf32>
    %295 = vector.multi_reduction <add>, %294, %cst_198 [0] : vector<16x128xf32> to vector<128xf32>
    %296 = vector.shape_cast %295 : vector<128xf32> to vector<1x128xf32>
    %297 = arith.addf %284, %296 : vector<1x128xf32>
    %298 = arith.mulf %294, %294 : vector<16x128xf32>
    %cst_199 = arith.constant dense<0.000000e+00> : vector<128xf32>
    %299 = vector.multi_reduction <add>, %298, %cst_199 [0] : vector<16x128xf32> to vector<128xf32>
    %300 = vector.shape_cast %299 : vector<128xf32> to vector<1x128xf32>
    %301 = arith.addf %288, %300 : vector<1x128xf32>
    %c96_200 = arith.constant 96 : index
    %c0_201 = arith.constant 0 : index
    %302 = vector.load %arg9[%c96_200, %c0_201] : memref<512x128xf32, #tpu.memory_space<vmem>>, vector<16x128xf32>
    %303 = arith.truncf %302 : vector<16x128xf32> to vector<16x128xbf16>
    %c0_202 = arith.constant 0 : index
    %c3_203 = arith.constant 3 : index
    %c0_204 = arith.constant 0 : index
    %c0_205 = arith.constant 0 : index
    %304 = vector.load %arg5[%c0_202, %c3_203, %c0_204, %c0_205] : memref<1x16x16x128xbf16, #tpu.memory_space<vmem>>, vector<1x1x16x128xbf16>
    %305 = vector.shape_cast %304 : vector<1x1x16x128xbf16> to vector<16x128xbf16>
    %306 = vector.shape_cast %303 : vector<16x128xbf16> to vector<1x1x16x128xbf16>
    tpu.vector_store %arg5[%c0_202, %c3_203, %c0_204, %c0_205], %306 {strides = array<i32>} : memref<1x16x16x128xbf16, #tpu.memory_space<vmem>>, vector<1x1x16x128xbf16>,
    %307 = arith.extf %303 : vector<16x128xbf16> to vector<16x128xf32>
    %cst_206 = arith.constant dense<0.000000e+00> : vector<128xf32>
    %308 = vector.multi_reduction <add>, %307, %cst_206 [0] : vector<16x128xf32> to vector<128xf32>
    %309 = vector.shape_cast %308 : vector<128xf32> to vector<1x128xf32>
    %310 = arith.addf %297, %309 : vector<1x128xf32>
    %311 = arith.mulf %307, %307 : vector<16x128xf32>
    %cst_207 = arith.constant dense<0.000000e+00> : vector<128xf32>
    %312 = vector.multi_reduction <add>, %311, %cst_207 [0] : vector<16x128xf32> to vector<128xf32>
    %313 = vector.shape_cast %312 : vector<128xf32> to vector<1x128xf32>
    %314 = arith.addf %301, %313 : vector<1x128xf32>
    %c128_208 = arith.constant 128 : index
    %c0_209 = arith.constant 0 : index
    %315 = vector.load %arg9[%c128_208, %c0_209] : memref<512x128xf32, #tpu.memory_space<vmem>>, vector<16x128xf32>
    %316 = arith.truncf %315 : vector<16x128xf32> to vector<16x128xbf16>
    %c0_210 = arith.constant 0 : index
    %c4_211 = arith.constant 4 : index
    %c0_212 = arith.constant 0 : index
    %c0_213 = arith.constant 0 : index
    %317 = vector.load %arg5[%c0_210, %c4_211, %c0_212, %c0_213] : memref<1x16x16x128xbf16, #tpu.memory_space<vmem>>, vector<1x1x16x128xbf16>
    %318 = vector.shape_cast %317 : vector<1x1x16x128xbf16> to vector<16x128xbf16>
    %319 = vector.shape_cast %316 : vector<16x128xbf16> to vector<1x1x16x128xbf16>
    tpu.vector_store %arg5[%c0_210, %c4_211, %c0_212, %c0_213], %319 {strides = array<i32>} : memref<1x16x16x128xbf16, #tpu.memory_space<vmem>>, vector<1x1x16x128xbf16>,
    %320 = arith.extf %316 : vector<16x128xbf16> to vector<16x128xf32>
    %cst_214 = arith.constant dense<0.000000e+00> : vector<128xf32>
    %321 = vector.multi_reduction <add>, %320, %cst_214 [0] : vector<16x128xf32> to vector<128xf32>
    %322 = vector.shape_cast %321 : vector<128xf32> to vector<1x128xf32>
    %323 = arith.addf %310, %322 : vector<1x128xf32>
    %324 = arith.mulf %320, %320 : vector<16x128xf32>
    %cst_215 = arith.constant dense<0.000000e+00> : vector<128xf32>
    %325 = vector.multi_reduction <add>, %324, %cst_215 [0] : vector<16x128xf32> to vector<128xf32>
    %326 = vector.shape_cast %325 : vector<128xf32> to vector<1x128xf32>
    %327 = arith.addf %314, %326 : vector<1x128xf32>
    %c160_216 = arith.constant 160 : index
    %c0_217 = arith.constant 0 : index
    %328 = vector.load %arg9[%c160_216, %c0_217] : memref<512x128xf32, #tpu.memory_space<vmem>>, vector<16x128xf32>
    %329 = arith.truncf %328 : vector<16x128xf32> to vector<16x128xbf16>
    %c0_218 = arith.constant 0 : index
    %c5_219 = arith.constant 5 : index
    %c0_220 = arith.constant 0 : index
    %c0_221 = arith.constant 0 : index
    %330 = vector.load %arg5[%c0_218, %c5_219, %c0_220, %c0_221] : memref<1x16x16x128xbf16, #tpu.memory_space<vmem>>, vector<1x1x16x128xbf16>
    %331 = vector.shape_cast %330 : vector<1x1x16x128xbf16> to vector<16x128xbf16>
    %332 = vector.shape_cast %329 : vector<16x128xbf16> to vector<1x1x16x128xbf16>
    tpu.vector_store %arg5[%c0_218, %c5_219, %c0_220, %c0_221], %332 {strides = array<i32>} : memref<1x16x16x128xbf16, #tpu.memory_space<vmem>>, vector<1x1x16x128xbf16>,
    %333 = arith.extf %329 : vector<16x128xbf16> to vector<16x128xf32>
    %cst_222 = arith.constant dense<0.000000e+00> : vector<128xf32>
    %334 = vector.multi_reduction <add>, %333, %cst_222 [0] : vector<16x128xf32> to vector<128xf32>
    %335 = vector.shape_cast %334 : vector<128xf32> to vector<1x128xf32>
    %336 = arith.addf %323, %335 : vector<1x128xf32>
    %337 = arith.mulf %333, %333 : vector<16x128xf32>
    %cst_223 = arith.constant dense<0.000000e+00> : vector<128xf32>
    %338 = vector.multi_reduction <add>, %337, %cst_223 [0] : vector<16x128xf32> to vector<128xf32>
    %339 = vector.shape_cast %338 : vector<128xf32> to vector<1x128xf32>
    %340 = arith.addf %327, %339 : vector<1x128xf32>
    %c192_224 = arith.constant 192 : index
    %c0_225 = arith.constant 0 : index
    %341 = vector.load %arg9[%c192_224, %c0_225] : memref<512x128xf32, #tpu.memory_space<vmem>>, vector<16x128xf32>
    %342 = arith.truncf %341 : vector<16x128xf32> to vector<16x128xbf16>
    %c0_226 = arith.constant 0 : index
    %c6_227 = arith.constant 6 : index
    %c0_228 = arith.constant 0 : index
    %c0_229 = arith.constant 0 : index
    %343 = vector.load %arg5[%c0_226, %c6_227, %c0_228, %c0_229] : memref<1x16x16x128xbf16, #tpu.memory_space<vmem>>, vector<1x1x16x128xbf16>
    %344 = vector.shape_cast %343 : vector<1x1x16x128xbf16> to vector<16x128xbf16>
    %345 = vector.shape_cast %342 : vector<16x128xbf16> to vector<1x1x16x128xbf16>
    tpu.vector_store %arg5[%c0_226, %c6_227, %c0_228, %c0_229], %345 {strides = array<i32>} : memref<1x16x16x128xbf16, #tpu.memory_space<vmem>>, vector<1x1x16x128xbf16>,
    %346 = arith.extf %342 : vector<16x128xbf16> to vector<16x128xf32>
    %cst_230 = arith.constant dense<0.000000e+00> : vector<128xf32>
    %347 = vector.multi_reduction <add>, %346, %cst_230 [0] : vector<16x128xf32> to vector<128xf32>
    %348 = vector.shape_cast %347 : vector<128xf32> to vector<1x128xf32>
    %349 = arith.addf %336, %348 : vector<1x128xf32>
    %350 = arith.mulf %346, %346 : vector<16x128xf32>
    %cst_231 = arith.constant dense<0.000000e+00> : vector<128xf32>
    %351 = vector.multi_reduction <add>, %350, %cst_231 [0] : vector<16x128xf32> to vector<128xf32>
    %352 = vector.shape_cast %351 : vector<128xf32> to vector<1x128xf32>
    %353 = arith.addf %340, %352 : vector<1x128xf32>
    %c224_232 = arith.constant 224 : index
    %c0_233 = arith.constant 0 : index
    %354 = vector.load %arg9[%c224_232, %c0_233] : memref<512x128xf32, #tpu.memory_space<vmem>>, vector<16x128xf32>
    %355 = arith.truncf %354 : vector<16x128xf32> to vector<16x128xbf16>
    %c0_234 = arith.constant 0 : index
    %c7_235 = arith.constant 7 : index
    %c0_236 = arith.constant 0 : index
    %c0_237 = arith.constant 0 : index
    %356 = vector.load %arg5[%c0_234, %c7_235, %c0_236, %c0_237] : memref<1x16x16x128xbf16, #tpu.memory_space<vmem>>, vector<1x1x16x128xbf16>
    %357 = vector.shape_cast %356 : vector<1x1x16x128xbf16> to vector<16x128xbf16>
    %358 = vector.shape_cast %355 : vector<16x128xbf16> to vector<1x1x16x128xbf16>
    tpu.vector_store %arg5[%c0_234, %c7_235, %c0_236, %c0_237], %358 {strides = array<i32>} : memref<1x16x16x128xbf16, #tpu.memory_space<vmem>>, vector<1x1x16x128xbf16>,
    %359 = arith.extf %355 : vector<16x128xbf16> to vector<16x128xf32>
    %cst_238 = arith.constant dense<0.000000e+00> : vector<128xf32>
    %360 = vector.multi_reduction <add>, %359, %cst_238 [0] : vector<16x128xf32> to vector<128xf32>
    %361 = vector.shape_cast %360 : vector<128xf32> to vector<1x128xf32>
    %362 = arith.addf %349, %361 : vector<1x128xf32>
    %363 = arith.mulf %359, %359 : vector<16x128xf32>
    %cst_239 = arith.constant dense<0.000000e+00> : vector<128xf32>
    %364 = vector.multi_reduction <add>, %363, %cst_239 [0] : vector<16x128xf32> to vector<128xf32>
    %365 = vector.shape_cast %364 : vector<128xf32> to vector<1x128xf32>
    %366 = arith.addf %353, %365 : vector<1x128xf32>
    %c256_240 = arith.constant 256 : index
    %c0_241 = arith.constant 0 : index
    %367 = vector.load %arg9[%c256_240, %c0_241] : memref<512x128xf32, #tpu.memory_space<vmem>>, vector<16x128xf32>
    %368 = arith.truncf %367 : vector<16x128xf32> to vector<16x128xbf16>
    %c0_242 = arith.constant 0 : index
    %c8_243 = arith.constant 8 : index
    %c0_244 = arith.constant 0 : index
    %c0_245 = arith.constant 0 : index
    %369 = vector.load %arg5[%c0_242, %c8_243, %c0_244, %c0_245] : memref<1x16x16x128xbf16, #tpu.memory_space<vmem>>, vector<1x1x16x128xbf16>
    %370 = vector.shape_cast %369 : vector<1x1x16x128xbf16> to vector<16x128xbf16>
    %371 = vector.shape_cast %368 : vector<16x128xbf16> to vector<1x1x16x128xbf16>
    tpu.vector_store %arg5[%c0_242, %c8_243, %c0_244, %c0_245], %371 {strides = array<i32>} : memref<1x16x16x128xbf16, #tpu.memory_space<vmem>>, vector<1x1x16x128xbf16>,
    %372 = arith.extf %368 : vector<16x128xbf16> to vector<16x128xf32>
    %cst_246 = arith.constant dense<0.000000e+00> : vector<128xf32>
    %373 = vector.multi_reduction <add>, %372, %cst_246 [0] : vector<16x128xf32> to vector<128xf32>
    %374 = vector.shape_cast %373 : vector<128xf32> to vector<1x128xf32>
    %375 = arith.addf %362, %374 : vector<1x128xf32>
    %376 = arith.mulf %372, %372 : vector<16x128xf32>
    %cst_247 = arith.constant dense<0.000000e+00> : vector<128xf32>
    %377 = vector.multi_reduction <add>, %376, %cst_247 [0] : vector<16x128xf32> to vector<128xf32>
    %378 = vector.shape_cast %377 : vector<128xf32> to vector<1x128xf32>
    %379 = arith.addf %366, %378 : vector<1x128xf32>
    %c288_248 = arith.constant 288 : index
    %c0_249 = arith.constant 0 : index
    %380 = vector.load %arg9[%c288_248, %c0_249] : memref<512x128xf32, #tpu.memory_space<vmem>>, vector<16x128xf32>
    %381 = arith.truncf %380 : vector<16x128xf32> to vector<16x128xbf16>
    %c0_250 = arith.constant 0 : index
    %c9_251 = arith.constant 9 : index
    %c0_252 = arith.constant 0 : index
    %c0_253 = arith.constant 0 : index
    %382 = vector.load %arg5[%c0_250, %c9_251, %c0_252, %c0_253] : memref<1x16x16x128xbf16, #tpu.memory_space<vmem>>, vector<1x1x16x128xbf16>
    %383 = vector.shape_cast %382 : vector<1x1x16x128xbf16> to vector<16x128xbf16>
    %384 = vector.shape_cast %381 : vector<16x128xbf16> to vector<1x1x16x128xbf16>
    tpu.vector_store %arg5[%c0_250, %c9_251, %c0_252, %c0_253], %384 {strides = array<i32>} : memref<1x16x16x128xbf16, #tpu.memory_space<vmem>>, vector<1x1x16x128xbf16>,
    %385 = arith.extf %381 : vector<16x128xbf16> to vector<16x128xf32>
    %cst_254 = arith.constant dense<0.000000e+00> : vector<128xf32>
    %386 = vector.multi_reduction <add>, %385, %cst_254 [0] : vector<16x128xf32> to vector<128xf32>
    %387 = vector.shape_cast %386 : vector<128xf32> to vector<1x128xf32>
    %388 = arith.addf %375, %387 : vector<1x128xf32>
    %389 = arith.mulf %385, %385 : vector<16x128xf32>
    %cst_255 = arith.constant dense<0.000000e+00> : vector<128xf32>
    %390 = vector.multi_reduction <add>, %389, %cst_255 [0] : vector<16x128xf32> to vector<128xf32>
    %391 = vector.shape_cast %390 : vector<128xf32> to vector<1x128xf32>
    %392 = arith.addf %379, %391 : vector<1x128xf32>
    %c320_256 = arith.constant 320 : index
    %c0_257 = arith.constant 0 : index
    %393 = vector.load %arg9[%c320_256, %c0_257] : memref<512x128xf32, #tpu.memory_space<vmem>>, vector<16x128xf32>
    %394 = arith.truncf %393 : vector<16x128xf32> to vector<16x128xbf16>
    %c0_258 = arith.constant 0 : index
    %c10_259 = arith.constant 10 : index
    %c0_260 = arith.constant 0 : index
    %c0_261 = arith.constant 0 : index
    %395 = vector.load %arg5[%c0_258, %c10_259, %c0_260, %c0_261] : memref<1x16x16x128xbf16, #tpu.memory_space<vmem>>, vector<1x1x16x128xbf16>
    %396 = vector.shape_cast %395 : vector<1x1x16x128xbf16> to vector<16x128xbf16>
    %397 = vector.shape_cast %394 : vector<16x128xbf16> to vector<1x1x16x128xbf16>
    tpu.vector_store %arg5[%c0_258, %c10_259, %c0_260, %c0_261], %397 {strides = array<i32>} : memref<1x16x16x128xbf16, #tpu.memory_space<vmem>>, vector<1x1x16x128xbf16>,
    %398 = arith.extf %394 : vector<16x128xbf16> to vector<16x128xf32>
    %cst_262 = arith.constant dense<0.000000e+00> : vector<128xf32>
    %399 = vector.multi_reduction <add>, %398, %cst_262 [0] : vector<16x128xf32> to vector<128xf32>
    %400 = vector.shape_cast %399 : vector<128xf32> to vector<1x128xf32>
    %401 = arith.addf %388, %400 : vector<1x128xf32>
    %402 = arith.mulf %398, %398 : vector<16x128xf32>
    %cst_263 = arith.constant dense<0.000000e+00> : vector<128xf32>
    %403 = vector.multi_reduction <add>, %402, %cst_263 [0] : vector<16x128xf32> to vector<128xf32>
    %404 = vector.shape_cast %403 : vector<128xf32> to vector<1x128xf32>
    %405 = arith.addf %392, %404 : vector<1x128xf32>
    %c352_264 = arith.constant 352 : index
    %c0_265 = arith.constant 0 : index
    %406 = vector.load %arg9[%c352_264, %c0_265] : memref<512x128xf32, #tpu.memory_space<vmem>>, vector<16x128xf32>
    %407 = arith.truncf %406 : vector<16x128xf32> to vector<16x128xbf16>
    %c0_266 = arith.constant 0 : index
    %c11_267 = arith.constant 11 : index
    %c0_268 = arith.constant 0 : index
    %c0_269 = arith.constant 0 : index
    %408 = vector.load %arg5[%c0_266, %c11_267, %c0_268, %c0_269] : memref<1x16x16x128xbf16, #tpu.memory_space<vmem>>, vector<1x1x16x128xbf16>
    %409 = vector.shape_cast %408 : vector<1x1x16x128xbf16> to vector<16x128xbf16>
    %410 = vector.shape_cast %407 : vector<16x128xbf16> to vector<1x1x16x128xbf16>
    tpu.vector_store %arg5[%c0_266, %c11_267, %c0_268, %c0_269], %410 {strides = array<i32>} : memref<1x16x16x128xbf16, #tpu.memory_space<vmem>>, vector<1x1x16x128xbf16>,
    %411 = arith.extf %407 : vector<16x128xbf16> to vector<16x128xf32>
    %cst_270 = arith.constant dense<0.000000e+00> : vector<128xf32>
    %412 = vector.multi_reduction <add>, %411, %cst_270 [0] : vector<16x128xf32> to vector<128xf32>
    %413 = vector.shape_cast %412 : vector<128xf32> to vector<1x128xf32>
    %414 = arith.addf %401, %413 : vector<1x128xf32>
    %415 = arith.mulf %411, %411 : vector<16x128xf32>
    %cst_271 = arith.constant dense<0.000000e+00> : vector<128xf32>
    %416 = vector.multi_reduction <add>, %415, %cst_271 [0] : vector<16x128xf32> to vector<128xf32>
    %417 = vector.shape_cast %416 : vector<128xf32> to vector<1x128xf32>
    %418 = arith.addf %405, %417 : vector<1x128xf32>
    %c384_272 = arith.constant 384 : index
    %c0_273 = arith.constant 0 : index
    %419 = vector.load %arg9[%c384_272, %c0_273] : memref<512x128xf32, #tpu.memory_space<vmem>>, vector<16x128xf32>
    %420 = arith.truncf %419 : vector<16x128xf32> to vector<16x128xbf16>
    %c0_274 = arith.constant 0 : index
    %c12_275 = arith.constant 12 : index
    %c0_276 = arith.constant 0 : index
    %c0_277 = arith.constant 0 : index
    %421 = vector.load %arg5[%c0_274, %c12_275, %c0_276, %c0_277] : memref<1x16x16x128xbf16, #tpu.memory_space<vmem>>, vector<1x1x16x128xbf16>
    %422 = vector.shape_cast %421 : vector<1x1x16x128xbf16> to vector<16x128xbf16>
    %423 = vector.shape_cast %420 : vector<16x128xbf16> to vector<1x1x16x128xbf16>
    tpu.vector_store %arg5[%c0_274, %c12_275, %c0_276, %c0_277], %423 {strides = array<i32>} : memref<1x16x16x128xbf16, #tpu.memory_space<vmem>>, vector<1x1x16x128xbf16>,
    %424 = arith.extf %420 : vector<16x128xbf16> to vector<16x128xf32>
    %cst_278 = arith.constant dense<0.000000e+00> : vector<128xf32>
    %425 = vector.multi_reduction <add>, %424, %cst_278 [0] : vector<16x128xf32> to vector<128xf32>
    %426 = vector.shape_cast %425 : vector<128xf32> to vector<1x128xf32>
    %427 = arith.addf %414, %426 : vector<1x128xf32>
    %428 = arith.mulf %424, %424 : vector<16x128xf32>
    %cst_279 = arith.constant dense<0.000000e+00> : vector<128xf32>
    %429 = vector.multi_reduction <add>, %428, %cst_279 [0] : vector<16x128xf32> to vector<128xf32>
    %430 = vector.shape_cast %429 : vector<128xf32> to vector<1x128xf32>
    %431 = arith.addf %418, %430 : vector<1x128xf32>
    %c416_280 = arith.constant 416 : index
    %c0_281 = arith.constant 0 : index
    %432 = vector.load %arg9[%c416_280, %c0_281] : memref<512x128xf32, #tpu.memory_space<vmem>>, vector<16x128xf32>
    %433 = arith.truncf %432 : vector<16x128xf32> to vector<16x128xbf16>
    %c0_282 = arith.constant 0 : index
    %c13_283 = arith.constant 13 : index
    %c0_284 = arith.constant 0 : index
    %c0_285 = arith.constant 0 : index
    %434 = vector.load %arg5[%c0_282, %c13_283, %c0_284, %c0_285] : memref<1x16x16x128xbf16, #tpu.memory_space<vmem>>, vector<1x1x16x128xbf16>
    %435 = vector.shape_cast %434 : vector<1x1x16x128xbf16> to vector<16x128xbf16>
    %436 = vector.shape_cast %433 : vector<16x128xbf16> to vector<1x1x16x128xbf16>
    tpu.vector_store %arg5[%c0_282, %c13_283, %c0_284, %c0_285], %436 {strides = array<i32>} : memref<1x16x16x128xbf16, #tpu.memory_space<vmem>>, vector<1x1x16x128xbf16>,
    %437 = arith.extf %433 : vector<16x128xbf16> to vector<16x128xf32>
    %cst_286 = arith.constant dense<0.000000e+00> : vector<128xf32>
    %438 = vector.multi_reduction <add>, %437, %cst_286 [0] : vector<16x128xf32> to vector<128xf32>
    %439 = vector.shape_cast %438 : vector<128xf32> to vector<1x128xf32>
    %440 = arith.addf %427, %439 : vector<1x128xf32>
    %441 = arith.mulf %437, %437 : vector<16x128xf32>
    %cst_287 = arith.constant dense<0.000000e+00> : vector<128xf32>
    %442 = vector.multi_reduction <add>, %441, %cst_287 [0] : vector<16x128xf32> to vector<128xf32>
    %443 = vector.shape_cast %442 : vector<128xf32> to vector<1x128xf32>
    %444 = arith.addf %431, %443 : vector<1x128xf32>
    %c448_288 = arith.constant 448 : index
    %c0_289 = arith.constant 0 : index
    %445 = vector.load %arg9[%c448_288, %c0_289] : memref<512x128xf32, #tpu.memory_space<vmem>>, vector<16x128xf32>
    %446 = arith.truncf %445 : vector<16x128xf32> to vector<16x128xbf16>
    %c0_290 = arith.constant 0 : index
    %c14_291 = arith.constant 14 : index
    %c0_292 = arith.constant 0 : index
    %c0_293 = arith.constant 0 : index
    %447 = vector.load %arg5[%c0_290, %c14_291, %c0_292, %c0_293] : memref<1x16x16x128xbf16, #tpu.memory_space<vmem>>, vector<1x1x16x128xbf16>
    %448 = vector.shape_cast %447 : vector<1x1x16x128xbf16> to vector<16x128xbf16>
    %449 = vector.shape_cast %446 : vector<16x128xbf16> to vector<1x1x16x128xbf16>
    tpu.vector_store %arg5[%c0_290, %c14_291, %c0_292, %c0_293], %449 {strides = array<i32>} : memref<1x16x16x128xbf16, #tpu.memory_space<vmem>>, vector<1x1x16x128xbf16>,
    %450 = arith.extf %446 : vector<16x128xbf16> to vector<16x128xf32>
    %cst_294 = arith.constant dense<0.000000e+00> : vector<128xf32>
    %451 = vector.multi_reduction <add>, %450, %cst_294 [0] : vector<16x128xf32> to vector<128xf32>
    %452 = vector.shape_cast %451 : vector<128xf32> to vector<1x128xf32>
    %453 = arith.addf %440, %452 : vector<1x128xf32>
    %454 = arith.mulf %450, %450 : vector<16x128xf32>
    %cst_295 = arith.constant dense<0.000000e+00> : vector<128xf32>
    %455 = vector.multi_reduction <add>, %454, %cst_295 [0] : vector<16x128xf32> to vector<128xf32>
    %456 = vector.shape_cast %455 : vector<128xf32> to vector<1x128xf32>
    %457 = arith.addf %444, %456 : vector<1x128xf32>
    %c480_296 = arith.constant 480 : index
    %c0_297 = arith.constant 0 : index
    %458 = vector.load %arg9[%c480_296, %c0_297] : memref<512x128xf32, #tpu.memory_space<vmem>>, vector<16x128xf32>
    %459 = arith.truncf %458 : vector<16x128xf32> to vector<16x128xbf16>
    %c0_298 = arith.constant 0 : index
    %c15_299 = arith.constant 15 : index
    %c0_300 = arith.constant 0 : index
    %c0_301 = arith.constant 0 : index
    %460 = vector.load %arg5[%c0_298, %c15_299, %c0_300, %c0_301] : memref<1x16x16x128xbf16, #tpu.memory_space<vmem>>, vector<1x1x16x128xbf16>
    %461 = vector.shape_cast %460 : vector<1x1x16x128xbf16> to vector<16x128xbf16>
    %462 = vector.shape_cast %459 : vector<16x128xbf16> to vector<1x1x16x128xbf16>
    tpu.vector_store %arg5[%c0_298, %c15_299, %c0_300, %c0_301], %462 {strides = array<i32>} : memref<1x16x16x128xbf16, #tpu.memory_space<vmem>>, vector<1x1x16x128xbf16>,
    %463 = arith.extf %459 : vector<16x128xbf16> to vector<16x128xf32>
    %cst_302 = arith.constant dense<0.000000e+00> : vector<128xf32>
    %464 = vector.multi_reduction <add>, %463, %cst_302 [0] : vector<16x128xf32> to vector<128xf32>
    %465 = vector.shape_cast %464 : vector<128xf32> to vector<1x128xf32>
    %466 = arith.addf %453, %465 : vector<1x128xf32>
    %467 = arith.mulf %463, %463 : vector<16x128xf32>
    %cst_303 = arith.constant dense<0.000000e+00> : vector<128xf32>
    %468 = vector.multi_reduction <add>, %467, %cst_303 [0] : vector<16x128xf32> to vector<128xf32>
    %469 = vector.shape_cast %468 : vector<128xf32> to vector<1x128xf32>
    %470 = arith.addf %457, %469 : vector<1x128xf32>
    %c0_304 = arith.constant 0 : index
    %c0_305 = arith.constant 0 : index
    %c0_306 = arith.constant 0 : index
    %471 = vector.load %arg6[%c0_304, %c0_305, %c0_306] : memref<1x1x128xf32, #tpu.memory_space<vmem>>, vector<1x1x128xf32>
    %472 = vector.shape_cast %471 : vector<1x1x128xf32> to vector<1x128xf32>
    %473 = vector.shape_cast %466 : vector<1x128xf32> to vector<1x1x128xf32>
    tpu.vector_store %arg6[%c0_304, %c0_305, %c0_306], %473 {strides = array<i32>} : memref<1x1x128xf32, #tpu.memory_space<vmem>>, vector<1x1x128xf32>,
    %c0_307 = arith.constant 0 : index
    %c0_308 = arith.constant 0 : index
    %c0_309 = arith.constant 0 : index
    %474 = vector.load %arg7[%c0_307, %c0_308, %c0_309] : memref<1x1x128xf32, #tpu.memory_space<vmem>>, vector<1x1x128xf32>
    %475 = vector.shape_cast %474 : vector<1x1x128xf32> to vector<1x128xf32>
    %476 = vector.shape_cast %470 : vector<1x128xf32> to vector<1x1x128xf32>
    tpu.vector_store %arg7[%c0_307, %c0_308, %c0_309], %476 {strides = array<i32>} : memref<1x1x128xf32, #tpu.memory_space<vmem>>, vector<1x1x128xf32>,
    return
  }
  func.func @transform_0(%arg0: i32) -> (i32, i32, i32, i32) {
    %c0_i32 = arith.constant 0 : i32
    %c0_i32_0 = arith.constant 0 : i32
    %c0_i32_1 = arith.constant 0 : i32
    %c0_i32_2 = arith.constant 0 : i32
    return %arg0, %c0_i32, %c0_i32_0, %c0_i32_1 : i32, i32, i32, i32
  }
  func.func @transform_1(%arg0: i32) -> (i32, i32) {
    %c0_i32 = arith.constant 0 : i32
    %c0_i32_0 = arith.constant 0 : i32
    %c0_i32_1 = arith.constant 0 : i32
    return %c0_i32, %c0_i32_0 : i32, i32
  }
  func.func @transform_2(%arg0: i32) -> (i32, i32) {
    %c0_i32 = arith.constant 0 : i32
    %c0_i32_0 = arith.constant 0 : i32
    %c0_i32_1 = arith.constant 0 : i32
    return %c0_i32, %c0_i32_0 : i32, i32
  }
  func.func @transform_3(%arg0: i32) -> (i32, i32, i32) {
    %c0_i32 = arith.constant 0 : i32
    %c0_i32_0 = arith.constant 0 : i32
    %c0_i32_1 = arith.constant 0 : i32
    %c0_i32_2 = arith.constant 0 : i32
    return %c0_i32, %c0_i32_0, %c0_i32_1 : i32, i32, i32
  }
  func.func @transform_4(%arg0: i32) -> (i32, i32, i32, i32) {
    %c0_i32 = arith.constant 0 : i32
    %c0_i32_0 = arith.constant 0 : i32
    %c0_i32_1 = arith.constant 0 : i32
    %c0_i32_2 = arith.constant 0 : i32
    return %arg0, %c0_i32, %c0_i32_0, %c0_i32_1 : i32, i32, i32, i32
  }
  func.func @transform_5(%arg0: i32) -> (i32, i32, i32) {
    %c0_i32 = arith.constant 0 : i32
    %c0_i32_0 = arith.constant 0 : i32
    %c0_i32_1 = arith.constant 0 : i32
    return %arg0, %c0_i32, %c0_i32_0 : i32, i32, i32
  }
  func.func @transform_6(%arg0: i32) -> (i32, i32, i32) {
    %c0_i32 = arith.constant 0 : i32
    %c0_i32_0 = arith.constant 0 : i32
    %c0_i32_1 = arith.constant 0 : i32
    return %arg0, %c0_i32, %c0_i32_0 : i32, i32, i32
  }
}

module attributes {stable_mosaic.version = 11 : i64} {
  func.func @_conv3_kernel(%arg0: i32, %arg1: memref<512x128xbf16, #tpu.memory_space<vmem>>, %arg2: memref<1x128xf32, #tpu.memory_space<vmem>>, %arg3: memref<1x128xf32, #tpu.memory_space<vmem>>, %arg4: memref<128x128xbf16, #tpu.memory_space<vmem>>, %arg5: memref<512x128xbf16, #tpu.memory_space<vmem>>, %arg6: memref<1x1x128xf32, #tpu.memory_space<vmem>>, %arg7: memref<1x1x128xf32, #tpu.memory_space<vmem>>) attributes {dimension_semantics = [#tpu.dimension_semantics<parallel>], iteration_bounds = array<i64: 1>, scalar_prefetch = 0 : i64, scratch_operands = 0 : i64, tpu.core_type = #tpu.core_type<tc>, window_params = [{transform_indices = @transform_0, window_bounds = array<i64: 512, 128>}, {pipeline_mode = #tpu.pipeline_mode<synchronous>, transform_indices = @transform_1, window_bounds = array<i64: 1, 128>}, {pipeline_mode = #tpu.pipeline_mode<synchronous>, transform_indices = @transform_2, window_bounds = array<i64: 1, 128>}, {pipeline_mode = #tpu.pipeline_mode<synchronous>, transform_indices = @transform_3, window_bounds = array<i64: 128, 128>}, {transform_indices = @transform_4, window_bounds = array<i64: 512, 128>}, {transform_indices = @transform_5, window_bounds = array<i64: 1, 1, 128>}, {transform_indices = @transform_6, window_bounds = array<i64: 1, 1, 128>}]} {
    %c0 = arith.constant 0 : index
    %c0_0 = arith.constant 0 : index
    %0 = vector.load %arg1[%c0, %c0_0] : memref<512x128xbf16, #tpu.memory_space<vmem>>, vector<512x128xbf16>
    %1 = arith.extf %0 : vector<512x128xbf16> to vector<512x128xf32>
    %c0_1 = arith.constant 0 : index
    %c0_2 = arith.constant 0 : index
    %2 = vector.load %arg2[%c0_1, %c0_2] : memref<1x128xf32, #tpu.memory_space<vmem>>, vector<1x128xf32>
    %3 = vector.broadcast %2 : vector<1x128xf32> to vector<512x128xf32>
    %4 = arith.mulf %1, %3 : vector<512x128xf32>
    %c0_3 = arith.constant 0 : index
    %c0_4 = arith.constant 0 : index
    %5 = vector.load %arg3[%c0_3, %c0_4] : memref<1x128xf32, #tpu.memory_space<vmem>>, vector<1x128xf32>
    %6 = vector.broadcast %5 : vector<1x128xf32> to vector<512x128xf32>
    %7 = arith.addf %4, %6 : vector<512x128xf32>
    %cst = arith.constant 0.000000e+00 : f32
    %8 = vector.broadcast %cst : f32 to vector<512x128xf32>
    %9 = arith.maximumf %7, %8 : vector<512x128xf32>
    %10 = arith.truncf %9 : vector<512x128xf32> to vector<512x128xbf16>
    %c0_5 = arith.constant 0 : index
    %c0_6 = arith.constant 0 : index
    %11 = vector.load %arg4[%c0_5, %c0_6] : memref<128x128xbf16, #tpu.memory_space<vmem>>, vector<128x128xbf16>
    %cst_7 = arith.constant dense<0.000000e+00> : vector<512x128xf32>
    %12 = tpu.matmul %10, %11, %cst_7 {dimension_numbers = #tpu.dot_dimension_numbers<[1], [0], [0], [1], [0, 0, 1, 1], [], []>} : vector<512x128xbf16>, vector<128x128xbf16>, vector<512x128xf32> -> vector<512x128xf32>
    %13 = arith.truncf %12 : vector<512x128xf32> to vector<512x128xbf16>
    %c0_8 = arith.constant 0 : index
    %c0_9 = arith.constant 0 : index
    %14 = vector.load %arg5[%c0_8, %c0_9] : memref<512x128xbf16, #tpu.memory_space<vmem>>, vector<512x128xbf16>
    tpu.vector_store %arg5[%c0_8, %c0_9], %13 {strides = array<i32>} : memref<512x128xbf16, #tpu.memory_space<vmem>>, vector<512x128xbf16>,
    %15 = arith.extf %13 : vector<512x128xbf16> to vector<512x128xf32>
    %cst_10 = arith.constant dense<0.000000e+00> : vector<128xf32>
    %16 = vector.multi_reduction <add>, %15, %cst_10 [0] : vector<512x128xf32> to vector<128xf32>
    %17 = vector.shape_cast %16 : vector<128xf32> to vector<1x128xf32>
    %c0_11 = arith.constant 0 : index
    %c0_12 = arith.constant 0 : index
    %c0_13 = arith.constant 0 : index
    %18 = vector.load %arg6[%c0_11, %c0_12, %c0_13] : memref<1x1x128xf32, #tpu.memory_space<vmem>>, vector<1x1x128xf32>
    %19 = vector.shape_cast %18 : vector<1x1x128xf32> to vector<1x128xf32>
    %20 = vector.shape_cast %17 : vector<1x128xf32> to vector<1x1x128xf32>
    tpu.vector_store %arg6[%c0_11, %c0_12, %c0_13], %20 {strides = array<i32>} : memref<1x1x128xf32, #tpu.memory_space<vmem>>, vector<1x1x128xf32>,
    %21 = arith.mulf %15, %15 : vector<512x128xf32>
    %cst_14 = arith.constant dense<0.000000e+00> : vector<128xf32>
    %22 = vector.multi_reduction <add>, %21, %cst_14 [0] : vector<512x128xf32> to vector<128xf32>
    %23 = vector.shape_cast %22 : vector<128xf32> to vector<1x128xf32>
    %c0_15 = arith.constant 0 : index
    %c0_16 = arith.constant 0 : index
    %c0_17 = arith.constant 0 : index
    %24 = vector.load %arg7[%c0_15, %c0_16, %c0_17] : memref<1x1x128xf32, #tpu.memory_space<vmem>>, vector<1x1x128xf32>
    %25 = vector.shape_cast %24 : vector<1x1x128xf32> to vector<1x128xf32>
    %26 = vector.shape_cast %23 : vector<1x128xf32> to vector<1x1x128xf32>
    tpu.vector_store %arg7[%c0_15, %c0_16, %c0_17], %26 {strides = array<i32>} : memref<1x1x128xf32, #tpu.memory_space<vmem>>, vector<1x1x128xf32>,
    return
  }
  func.func @transform_0(%arg0: i32) -> (i32, i32) {
    %c0_i32 = arith.constant 0 : i32
    %c0_i32_0 = arith.constant 0 : i32
    return %arg0, %c0_i32 : i32, i32
  }
  func.func @transform_1(%arg0: i32) -> (i32, i32) {
    %c0_i32 = arith.constant 0 : i32
    %c0_i32_0 = arith.constant 0 : i32
    %c0_i32_1 = arith.constant 0 : i32
    return %c0_i32, %c0_i32_0 : i32, i32
  }
  func.func @transform_2(%arg0: i32) -> (i32, i32) {
    %c0_i32 = arith.constant 0 : i32
    %c0_i32_0 = arith.constant 0 : i32
    %c0_i32_1 = arith.constant 0 : i32
    return %c0_i32, %c0_i32_0 : i32, i32
  }
  func.func @transform_3(%arg0: i32) -> (i32, i32) {
    %c0_i32 = arith.constant 0 : i32
    %c0_i32_0 = arith.constant 0 : i32
    %c0_i32_1 = arith.constant 0 : i32
    return %c0_i32, %c0_i32_0 : i32, i32
  }
  func.func @transform_4(%arg0: i32) -> (i32, i32) {
    %c0_i32 = arith.constant 0 : i32
    %c0_i32_0 = arith.constant 0 : i32
    return %arg0, %c0_i32 : i32, i32
  }
  func.func @transform_5(%arg0: i32) -> (i32, i32, i32) {
    %c0_i32 = arith.constant 0 : i32
    %c0_i32_0 = arith.constant 0 : i32
    %c0_i32_1 = arith.constant 0 : i32
    return %arg0, %c0_i32, %c0_i32_0 : i32, i32, i32
  }
  func.func @transform_6(%arg0: i32) -> (i32, i32, i32) {
    %c0_i32 = arith.constant 0 : i32
    %c0_i32_0 = arith.constant 0 : i32
    %c0_i32_1 = arith.constant 0 : i32
    return %arg0, %c0_i32, %c0_i32_0 : i32, i32, i32
  }
}

module attributes {stable_mosaic.version = 11 : i64} {
  func.func @_epilogue_kernel(%arg0: i32, %arg1: memref<512x128xbf16, #tpu.memory_space<vmem>>, %arg2: memref<512x128xbf16, #tpu.memory_space<vmem>>, %arg3: memref<1x128xf32, #tpu.memory_space<vmem>>, %arg4: memref<1x128xf32, #tpu.memory_space<vmem>>, %arg5: memref<512x128xf32, #tpu.memory_space<vmem>>) attributes {dimension_semantics = [#tpu.dimension_semantics<parallel>], iteration_bounds = array<i64: 1>, scalar_prefetch = 0 : i64, scratch_operands = 0 : i64, tpu.core_type = #tpu.core_type<tc>, window_params = [{transform_indices = @transform_0, window_bounds = array<i64: 512, 128>}, {transform_indices = @transform_1, window_bounds = array<i64: 512, 128>}, {pipeline_mode = #tpu.pipeline_mode<synchronous>, transform_indices = @transform_2, window_bounds = array<i64: 1, 128>}, {pipeline_mode = #tpu.pipeline_mode<synchronous>, transform_indices = @transform_3, window_bounds = array<i64: 1, 128>}, {transform_indices = @transform_4, window_bounds = array<i64: 512, 128>}]} {
    %c0 = arith.constant 0 : index
    %c0_0 = arith.constant 0 : index
    %0 = vector.load %arg1[%c0, %c0_0] : memref<512x128xbf16, #tpu.memory_space<vmem>>, vector<512x128xbf16>
    %1 = arith.extf %0 : vector<512x128xbf16> to vector<512x128xf32>
    %c0_1 = arith.constant 0 : index
    %c0_2 = arith.constant 0 : index
    %2 = vector.load %arg3[%c0_1, %c0_2] : memref<1x128xf32, #tpu.memory_space<vmem>>, vector<1x128xf32>
    %3 = vector.broadcast %2 : vector<1x128xf32> to vector<512x128xf32>
    %4 = arith.mulf %1, %3 : vector<512x128xf32>
    %c0_3 = arith.constant 0 : index
    %c0_4 = arith.constant 0 : index
    %5 = vector.load %arg4[%c0_3, %c0_4] : memref<1x128xf32, #tpu.memory_space<vmem>>, vector<1x128xf32>
    %6 = vector.broadcast %5 : vector<1x128xf32> to vector<512x128xf32>
    %7 = arith.addf %4, %6 : vector<512x128xf32>
    %c0_5 = arith.constant 0 : index
    %c0_6 = arith.constant 0 : index
    %8 = vector.load %arg2[%c0_5, %c0_6] : memref<512x128xbf16, #tpu.memory_space<vmem>>, vector<512x128xbf16>
    %9 = arith.extf %8 : vector<512x128xbf16> to vector<512x128xf32>
    %10 = arith.addf %7, %9 : vector<512x128xf32>
    %cst = arith.constant 0.000000e+00 : f32
    %11 = vector.broadcast %cst : f32 to vector<512x128xf32>
    %12 = arith.maximumf %10, %11 : vector<512x128xf32>
    %c0_7 = arith.constant 0 : index
    %c0_8 = arith.constant 0 : index
    %13 = vector.load %arg5[%c0_7, %c0_8] : memref<512x128xf32, #tpu.memory_space<vmem>>, vector<512x128xf32>
    tpu.vector_store %arg5[%c0_7, %c0_8], %12 {strides = array<i32>} : memref<512x128xf32, #tpu.memory_space<vmem>>, vector<512x128xf32>,
    return
  }
  func.func @transform_0(%arg0: i32) -> (i32, i32) {
    %c0_i32 = arith.constant 0 : i32
    %c0_i32_0 = arith.constant 0 : i32
    return %arg0, %c0_i32 : i32, i32
  }
  func.func @transform_1(%arg0: i32) -> (i32, i32) {
    %c0_i32 = arith.constant 0 : i32
    %c0_i32_0 = arith.constant 0 : i32
    return %arg0, %c0_i32 : i32, i32
  }
  func.func @transform_2(%arg0: i32) -> (i32, i32) {
    %c0_i32 = arith.constant 0 : i32
    %c0_i32_0 = arith.constant 0 : i32
    %c0_i32_1 = arith.constant 0 : i32
    return %c0_i32, %c0_i32_0 : i32, i32
  }
  func.func @transform_3(%arg0: i32) -> (i32, i32) {
    %c0_i32 = arith.constant 0 : i32
    %c0_i32_0 = arith.constant 0 : i32
    %c0_i32_1 = arith.constant 0 : i32
    return %c0_i32, %c0_i32_0 : i32, i32
  }
  func.func @transform_4(%arg0: i32) -> (i32, i32) {
    %c0_i32 = arith.constant 0 : i32
    %c0_i32_0 = arith.constant 0 : i32
    return %arg0, %c0_i32 : i32, i32
  }
}

</mosaic_0001>

<bundles_post_ra>
// kernel: bottleneck_forward.4
= control target key start
LH: loop header
LB: loop body
LE: loop exit
PB: predicated region body
PF: predicated region fallthrough
CT: control target
= control target key end

     0   :  { %s1819_s1 = inlined_call_operand.vmem [shape: bf16[128,128], index: 1, kind: input, shape index: {}]   ;;  %s1820_s0 = inlined_call_operand.vmem [shape: bf16[512,128], index: 0, kind: input, shape index: {}]   ;;  %s1821_s2 = inlined_call_operand.vmem [shape: bf16[512,128], index: 2, kind: output, shape index: {0}]   ;;  %s1822_s3 = inlined_call_operand.vmem [shape: f32[1,1,128], index: 3, kind: output, shape index: {1}]   ;;  %s1823_s4 = inlined_call_operand.vmem [shape: f32[1,1,128], index: 4, kind: output, shape index: {2}]  }
   0x1   :  { %v1110_v0 = vld [vmem:[%s1819_s1 + $0x38] sm:$0xff]  ;;  %v1109_v1 = vld [vmem:[%s1819_s1 + $0x30] sm:$0xff]  ;;  %v1108_v2 = vld [vmem:[%s1819_s1 + $0x28] sm:$0xff] }
   0x2   :  { %334 = vmatpush.bf16.msra.mxu0 %v1110_v0  ;;  %1302 = vmatpush.bf16.msra.mxu1 %v1110_v0  ;;  %v1107_v3 = vld [vmem:[%s1819_s1 + $0x20] sm:$0xff]  ;;  %v1106_v4 = vld [vmem:[%s1819_s1 + $0x18] sm:$0xff]  ;;  %v1105_v5 = vld [vmem:[%s1819_s1 + $0x10] sm:$0xff] }
   0x3   :  { %1303 = vmatpush.bf16.msra.mxu2 %v1110_v0  ;;  %1304 = vmatpush.bf16.msra.mxu3 %v1110_v0  ;;  %v1104_v6 = vld [vmem:[%s1819_s1 + $0x8] sm:$0xff]  ;;  %v1103_v7 = vld [vmem:[%s1819_s1] sm:$0xff]  ;;  %v1073_v13 = vld [vmem:[%s1820_s0 + $0x10] sm:$0xff] }
   0x4   :  { %v1071_v8 = vld [vmem:[%s1820_s0] sm:$0xff]  ;;  %v1072_v10 = vld [vmem:[%s1820_s0 + $0x8] sm:$0xff]  ;;  %v1081_v14 = vld [vmem:[%s1820_s0 + $0x50] sm:$0xff] }
   0x5   :  { %v1079_v9 = vld [vmem:[%s1820_s0 + $0x40] sm:$0xff]  ;;  %v1080_v11 = vld [vmem:[%s1820_s0 + $0x48] sm:$0xff]  ;;  %v1074_v16 = vld [vmem:[%s1820_s0 + $0x18] sm:$0xff] }
   0x6   :  { %335 = vmatpush.bf16.msra.mxu0 %v1109_v1  ;;  %1305 = vmatpush.bf16.msra.mxu1 %v1109_v1  ;;  %v1087_v12 = vld [vmem:[%s1820_s0 + $0x80] sm:$0xff]  ;;  %v1088_v15 = vld [vmem:[%s1820_s0 + $0x88] sm:$0xff]  ;;  %v1082_v17 = vld [vmem:[%s1820_s0 + $0x58] sm:$0xff] }
   0x7   :  { %1306 = vmatpush.bf16.msra.mxu2 %v1109_v1  ;;  %1307 = vmatpush.bf16.msra.mxu3 %v1109_v1  ;;  %v1089_v18 = vld [vmem:[%s1820_s0 + $0x90] sm:$0xff]  ;;  %v1095_v19 = vld [vmem:[%s1820_s0 + $0xc0] sm:$0xff]  ;;  %v1090_v22 = vld [vmem:[%s1820_s0 + $0x98] sm:$0xff] }
   0x8   :  { %v1075_v20 = vld [vmem:[%s1820_s0 + $0x20] sm:$0xff]  ;;  %v1096_v23 = vld [vmem:[%s1820_s0 + $0xc8] sm:$0xff]  ;;  %v1097_v27 = vld [vmem:[%s1820_s0 + $0xd0] sm:$0xff] }
   0x9   :  { %v1083_v21 = vld [vmem:[%s1820_s0 + $0x60] sm:$0xff]  ;;  %v1076_v24 = vld [vmem:[%s1820_s0 + $0x28] sm:$0xff]  ;;  %v1077_v28 = vld [vmem:[%s1820_s0 + $0x30] sm:$0xff] }
   0xa   :  { %336 = vmatpush.bf16.msra.mxu0 %v1108_v2  ;;  %1308 = vmatpush.bf16.msra.mxu1 %v1108_v2  ;;  %v1084_v25 = vld [vmem:[%s1820_s0 + $0x68] sm:$0xff]  ;;  %v1091_v26 = vld [vmem:[%s1820_s0 + $0xa0] sm:$0xff]  ;;  %v1085_v29 = vld [vmem:[%s1820_s0 + $0x70] sm:$0xff] }
   0xb   :  { %1309 = vmatpush.bf16.msra.mxu2 %v1108_v2  ;;  %1310 = vmatpush.bf16.msra.mxu3 %v1108_v2  ;;  %v1092_v30 = vld [vmem:[%s1820_s0 + $0xa8] sm:$0xff]  ;;  %v1098_v31 = vld [vmem:[%s1820_s0 + $0xd8] sm:$0xff]  ;;  %v1093_v34 = vld [vmem:[%s1820_s0 + $0xb0] sm:$0xff] }
   0xc   :  { %v1078_v32 = vld [vmem:[%s1820_s0 + $0x38] sm:$0xff]  ;;  %v1099_v35 = vld [vmem:[%s1820_s0 + $0xe0] sm:$0xff]  ;;  %v1100_v39 = vld [vmem:[%s1820_s0 + $0xe8] sm:$0xff] }
   0xd   :  { %v1086_v33 = vld [vmem:[%s1820_s0 + $0x78] sm:$0xff]  ;;  %v1101_v56 = vld [vmem:[%s1820_s0 + $0xf0] sm:$0xff] }
   0xe   :  { %337 = vmatpush.bf16.msra.mxu0 %v1107_v3  ;;  %1311 = vmatpush.bf16.msra.mxu1 %v1107_v3  ;;  %v1094_v38 = vld [vmem:[%s1820_s0 + $0xb8] sm:$0xff] }
   0xf   :  { %1312 = vmatpush.bf16.msra.mxu2 %v1107_v3  ;;  %1313 = vmatpush.bf16.msra.mxu3 %v1107_v3 }
  0x12   :  { %338 = vmatpush.bf16.msra.mxu0 %v1106_v4  ;;  %1314 = vmatpush.bf16.msra.mxu1 %v1106_v4 }
  0x13   :  { %1315 = vmatpush.bf16.msra.mxu2 %v1106_v4  ;;  %1316 = vmatpush.bf16.msra.mxu3 %v1106_v4 }
  0x16   :  { %339 = vmatpush.bf16.msra.mxu0 %v1105_v5  ;;  %1317 = vmatpush.bf16.msra.mxu1 %v1105_v5 }
  0x17   :  { %1318 = vmatpush.bf16.msra.mxu2 %v1105_v5  ;;  %1319 = vmatpush.bf16.msra.mxu3 %v1105_v5 }
  0x1a   :  { %340 = vmatpush.bf16.msra.mxu0 %v1104_v6  ;;  %1320 = vmatpush.bf16.msra.mxu1 %v1104_v6 }
  0x1b   :  { %1321 = vmatpush.bf16.msra.mxu2 %v1104_v6  ;;  %1322 = vmatpush.bf16.msra.mxu3 %v1104_v6 }
  0x1e   :  { %341 = vmatpush.bf16.msra.mxu0 %v1103_v7  ;;  %1323 = vmatpush.bf16.msra.mxu1 %v1103_v7 }
  0x1f   :  { %1324 = vmatpush.bf16.msra.mxu2 %v1103_v7  ;;  %1325 = vmatpush.bf16.msra.mxu3 %v1103_v7 }
  0x21   :  { %342 = vmatmul.bf16.vlgmr.msra.gmra.mxu0 %v1071_v8  ;;  %382 = vmatmul.bf16.vlgmr.msra.gmra.mxu1 %v1079_v9 }
  0x22   :  { %422 = vmatmul.bf16.vlgmr.msra.gmra.mxu2 %v1087_v12  ;;  %462 = vmatmul.bf16.vlgmr.msra.gmra.mxu3 %v1095_v19  ;;  %v1102_v12 = vld [vmem:[%s1820_s0 + $0xf8] sm:$0xff] }
  0x31   :  { %347 = vmatmul.bf16.gmra.mxu0 %v1072_v10  ;;  %387 = vmatmul.bf16.gmra.mxu1 %v1080_v11 }
  0x32   :  { %427 = vmatmul.bf16.gmra.mxu2 %v1088_v15  ;;  %467 = vmatmul.bf16.gmra.mxu3 %v1096_v23 }
  0x41   :  { %352 = vmatmul.bf16.gmra.mxu0 %v1073_v13  ;;  %392 = vmatmul.bf16.gmra.mxu1 %v1081_v14 }
  0x42   :  { %432 = vmatmul.bf16.gmra.mxu2 %v1089_v18  ;;  %472 = vmatmul.bf16.gmra.mxu3 %v1097_v27 }
  0x51   :  { %357 = vmatmul.bf16.gmra.mxu0 %v1074_v16  ;;  %397 = vmatmul.bf16.gmra.mxu1 %v1082_v17 }
  0x52   :  { %437 = vmatmul.bf16.gmra.mxu2 %v1090_v22  ;;  %477 = vmatmul.bf16.gmra.mxu3 %v1098_v31 }
  0x61   :  { %362 = vmatmul.bf16.gmra.mxu0 %v1075_v20  ;;  %402 = vmatmul.bf16.gmra.mxu1 %v1083_v21 }
  0x62   :  { %442 = vmatmul.bf16.gmra.mxu2 %v1091_v26  ;;  %482 = vmatmul.bf16.gmra.mxu3 %v1099_v35 }
  0x71   :  { %367 = vmatmul.bf16.gmra.mxu0 %v1076_v24  ;;  %407 = vmatmul.bf16.gmra.mxu1 %v1084_v25 }
  0x72   :  { %447 = vmatmul.bf16.gmra.mxu2 %v1092_v30  ;;  %487 = vmatmul.bf16.gmra.mxu3 %v1100_v39 }
  0x81   :  { %372 = vmatmul.bf16.gmra.mxu0 %v1077_v28  ;;  %412 = vmatmul.bf16.gmra.mxu1 %v1085_v29 }
  0x82   :  { %452 = vmatmul.bf16.gmra.mxu2 %v1093_v34  ;;  %492 = vmatmul.bf16.gmra.mxu3 %v1101_v56 }
  0x91   :  { %377 = vmatmul.bf16.gmra.mxu0 %v1078_v32  ;;  %417 = vmatmul.bf16.gmra.mxu1 %v1086_v33 }
  0x92   :  { %457 = vmatmul.bf16.gmra.mxu2 %v1094_v38  ;;  %497 = vmatmul.bf16.gmra.mxu3 %v1102_v12 }
  0x9e   :  { %v343_v36 = vpop.f32.mrf.mxu0  ;;  %v1459_v37 = vpop.f32.mrf.mxu1 }
  0x9f   :  { %v503_v40 = vpack.c.bf16 %v343_v36, %v343_v36 }
  0xa1   :  { %v631_v43 = vunpack.c.l.bf16 %v503_v40 }
  0xa3   :  { %v765_v48 = vmul.f32 %v631_v43, %v631_v43 }
  0xa5   :  { %v1486_v1 = vpop.f32.mrf.mxu2  ;;  %v1537_v30 = vpop.f32.mrf.mxu3 }
  0xa6   :  { %v345_v41 = vpop.f32.mrf.mxu0  ;;  %v1467_v42 = vpop.f32.mrf.mxu1 }
  0xa7   :  { %v504_v44 = vpack.c.bf16 %v345_v41, %v345_v41  ;;  %v1114_v45 = vpack.c.bf16 %v345_v41, %v343_v36  ;;  %v1154_v46 = vpack.c.bf16 %v1467_v42, %v1459_v37 }
  0xa9   :  { %1115 = vst [vmem:[%s1821_s2] sm:$0xff] %v1114_v45   ;;  %v632_v47 = vunpack.c.l.bf16 %v504_v44 }
  0xaa   :  { %1278 = vst [vmem:[%s1821_s2 + $0x40] sm:$0xff] %v1154_v46  }
  0xab   :  { %v695_v49 = vadd.f32 %v632_v47, %v631_v43  ;;  %v766_v50 = vmul.f32 %v632_v47, %v632_v47 }
  0xad   :  { %v829_v51 = vadd.f32 %v766_v50, %v765_v48  ;;  %v1496_v9 = vpop.f32.mrf.mxu2  ;;  %v1549_v34 = vpop.f32.mrf.mxu3 }
  0xae   :  { %v348_v52 = vpop.f32.mrf.mxu0  ;;  %v1477_v53 = vpop.f32.mrf.mxu1  ;;  %v1194_v10 = vpack.c.bf16 %v1496_v9, %v1486_v1  ;;  %v1234_v36 = vpack.c.bf16 %v1549_v34, %v1537_v30 }
  0xaf   :  { %v505_v54 = vpack.c.bf16 %v348_v52, %v348_v52 }
  0xb0   :  { %1286 = vst [vmem:[%s1821_s2 + $0x80] sm:$0xff] %v1194_v10  }
  0xb1   :  { %v633_v55 = vunpack.c.l.bf16 %v505_v54  ;;  %1294 = vst [vmem:[%s1821_s2 + $0xc0] sm:$0xff] %v1234_v36  }
  0xb3   :  { %v696_v57 = vadd.f32 %v695_v49, %v633_v55  ;;  %v767_v58 = vmul.f32 %v633_v55, %v633_v55 }
  0xb5   :  { %v830_v59 = vadd.f32 %v829_v51, %v767_v58  ;;  %v1514_v20 = vpop.f32.mrf.mxu2  ;;  %v1567_v44 = vpop.f32.mrf.mxu3 }
  0xb6   :  { %v350_v60 = vpop.f32.mrf.mxu0  ;;  %v1482_v61 = vpop.f32.mrf.mxu1 }
  0xb7   :  { %v506_v62 = vpack.c.bf16 %v350_v60, %v350_v60  ;;  %v1119_v63 = vpack.c.bf16 %v350_v60, %v348_v52  ;;  %v1159_v0 = vpack.c.bf16 %v1482_v61, %v1477_v53 }
  0xb9   :  { %1271 = vst [vmem:[%s1821_s2 + $0x8] sm:$0xff] %v1119_v63   ;;  %v634_v2 = vunpack.c.l.bf16 %v506_v62 }
  0xba   :  { %1279 = vst [vmem:[%s1821_s2 + $0x48] sm:$0xff] %v1159_v0  }
  0xbb   :  { %v697_v3 = vadd.f32 %v696_v57, %v634_v2  ;;  %v768_v4 = vmul.f32 %v634_v2, %v634_v2 }
  0xbd   :  { %v831_v5 = vadd.f32 %v830_v59, %v768_v4  ;;  %v1524_v23 = vpop.f32.mrf.mxu2  ;;  %v1579_v48 = vpop.f32.mrf.mxu3 }
  0xbe   :  { %v353_v6 = vpop.f32.mrf.mxu0  ;;  %v1494_v7 = vpop.f32.mrf.mxu1  ;;  %v1199_v24 = vpack.c.bf16 %v1524_v23, %v1514_v20  ;;  %v1239_v50 = vpack.c.bf16 %v1579_v48, %v1567_v44 }
  0xbf   :  { %v507_v8 = vpack.c.bf16 %v353_v6, %v353_v6 }
  0xc0   :  { %1287 = vst [vmem:[%s1821_s2 + $0x88] sm:$0xff] %v1199_v24  }
  0xc1   :  { %v635_v11 = vunpack.c.l.bf16 %v507_v8  ;;  %1295 = vst [vmem:[%s1821_s2 + $0xc8] sm:$0xff] %v1239_v50  }
  0xc3   :  { %v1506_v13 = vadd.f32 %v697_v3, %v635_v11  ;;  %v769_v14 = vmul.f32 %v635_v11, %v635_v11 }
  0xc5   :  { %v1508_v15 = vadd.f32 %v831_v5, %v769_v14  ;;  %v1535_v29 = vpop.f32.mrf.mxu2  ;;  %v1597_v57 = vpop.f32.mrf.mxu3 }
  0xc6   :  { %v355_v16 = vpop.f32.mrf.mxu0  ;;  %v1510_v17 = vpop.f32.mrf.mxu1 }
  0xc7   :  { %v1124_v18 = vpack.c.bf16 %v355_v16, %v353_v6  ;;  %v1164_v19 = vpack.c.bf16 %v1510_v17, %v1494_v7  ;;  %v508_v58 = vpack.c.bf16 %v355_v16, %v355_v16 }
  0xc9   :  { %1272 = vst [vmem:[%s1821_s2 + $0x10] sm:$0xff] %v1124_v18   ;;  %v636_v60 = vunpack.c.l.bf16 %v508_v58 }
  0xca   :  { %1280 = vst [vmem:[%s1821_s2 + $0x50] sm:$0xff] %v1164_v19  }
  0xcb   :  { %v770_v10 = vmul.f32 %v636_v60, %v636_v60  ;;  %v699_v18 = vadd.f32 %v1506_v13, %v636_v60 }
  0xcd   :  { %v1547_v33 = vpop.f32.mrf.mxu2  ;;  %v1609_v3 = vpop.f32.mrf.mxu3  ;;  %v833_v19 = vadd.f32 %v1508_v15, %v770_v10 }
  0xce   :  { %v358_v21 = vpop.f32.mrf.mxu0  ;;  %v1522_v22 = vpop.f32.mrf.mxu1  ;;  %v1204_v35 = vpack.c.bf16 %v1547_v33, %v1535_v29  ;;  %v1244_v5 = vpack.c.bf16 %v1609_v3, %v1597_v57 }
  0xcf   :  { %v509_v59 = vpack.c.bf16 %v358_v21, %v358_v21 }
  0xd0   :  { %1288 = vst [vmem:[%s1821_s2 + $0x90] sm:$0xff] %v1204_v35  }
  0xd1   :  { %v637_v6 = vunpack.c.l.bf16 %v509_v59  ;;  %1296 = vst [vmem:[%s1821_s2 + $0xd0] sm:$0xff] %v1244_v5  }
  0xd3   :  { %v771_v14 = vmul.f32 %v637_v6, %v637_v6 }
  0xd5   :  { %v1565_v43 = vpop.f32.mrf.mxu2 }
  0xd6   :  { %v360_v25 = vpop.f32.mrf.mxu0  ;;  %v1531_v26 = vpop.f32.mrf.mxu1 }
  0xd7   :  { %v1129_v27 = vpack.c.bf16 %v360_v25, %v358_v21  ;;  %v1169_v28 = vpack.c.bf16 %v1531_v26, %v1522_v22  ;;  %v510_v0 = vpack.c.bf16 %v360_v25, %v360_v25 }
  0xd9   :  { %1273 = vst [vmem:[%s1821_s2 + $0x18] sm:$0xff] %v1129_v27   ;;  %v638_v11 = vunpack.c.l.bf16 %v510_v0 }
  0xda   :  { %1281 = vst [vmem:[%s1821_s2 + $0x58] sm:$0xff] %v1169_v28  }
  0xdb   :  { %v772_v27 = vmul.f32 %v638_v11, %v638_v11 }
  0xdd   :  { %v1577_v47 = vpop.f32.mrf.mxu2 }
  0xde   :  { %v363_v31 = vpop.f32.mrf.mxu0  ;;  %v1545_v32 = vpop.f32.mrf.mxu1  ;;  %v1209_v49 = vpack.c.bf16 %v1577_v47, %v1565_v43 }
  0xdf   :  { %v511_v8 = vpack.c.bf16 %v363_v31, %v363_v31 }
  0xe0   :  { %1289 = vst [vmem:[%s1821_s2 + $0x98] sm:$0xff] %v1209_v49   ;;  %v834_v49 = vadd.f32 %v833_v19, %v771_v14 }
  0xe1   :  { %v639_v16 = vunpack.c.l.bf16 %v511_v8 }
  0xe3   :  { %v773_v13 = vmul.f32 %v639_v16, %v639_v16 }
  0xe5   :  { %v1595_v56 = vpop.f32.mrf.mxu2 }
  0xe6   :  { %v365_v38 = vpop.f32.mrf.mxu0  ;;  %v1561_v39 = vpop.f32.mrf.mxu1 }
  0xe7   :  { %v1134_v40 = vpack.c.bf16 %v365_v38, %v363_v31  ;;  %v1174_v41 = vpack.c.bf16 %v1561_v39, %v1545_v32  ;;  %v512_v12 = vpack.c.bf16 %v365_v38, %v365_v38  ;;  %v1629_v38 = vpop.f32.mrf.mxu3 }
  0xe9   :  { %1274 = vst [vmem:[%s1821_s2 + $0x20] sm:$0xff] %v1134_v40   ;;  %v640_v28 = vunpack.c.l.bf16 %v512_v12  ;;  %v700_v40 = vadd.f32 %v699_v18, %v637_v6 }
  0xea   :  { %1282 = vst [vmem:[%s1821_s2 + $0x60] sm:$0xff] %v1174_v41  }
  0xeb   :  { %v701_v15 = vadd.f32 %v700_v40, %v638_v11 }
  0xed   :  { %v1607_v2 = vpop.f32.mrf.mxu2  ;;  %v702_v58 = vadd.f32 %v701_v15, %v639_v16 }
  0xee   :  { %v368_v45 = vpop.f32.mrf.mxu0  ;;  %v1575_v46 = vpop.f32.mrf.mxu1  ;;  %v1214_v4 = vpack.c.bf16 %v1607_v2, %v1595_v56 }
  0xef   :  { %v513_v21 = vpack.c.bf16 %v368_v45, %v368_v45 }
  0xf0   :  { %1290 = vst [vmem:[%s1821_s2 + $0xa0] sm:$0xff] %v1214_v4  }
  0xf5   :  { %v1627_v36 = vpop.f32.mrf.mxu2 }
  0xf6   :  { %v370_v51 = vpop.f32.mrf.mxu0  ;;  %v1591_v52 = vpop.f32.mrf.mxu1 }
  0xf7   :  { %v1139_v54 = vpack.c.bf16 %v370_v51, %v368_v45  ;;  %v1179_v55 = vpack.c.bf16 %v1591_v52, %v1575_v46  ;;  %v514_v41 = vpack.c.bf16 %v370_v51, %v370_v51  ;;  %v641_v45 = vunpack.c.l.bf16 %v513_v21 }
  0xf8   :  { %v703_v51 = vadd.f32 %v702_v58, %v640_v28 }
  0xf9   :  { %1275 = vst [vmem:[%s1821_s2 + $0x28] sm:$0xff] %v1139_v54   ;;  %v835_v54 = vadd.f32 %v834_v49, %v772_v27  ;;  %v642_v59 = vunpack.c.l.bf16 %v514_v41  ;;  %v775_v4 = vmul.f32 %v641_v45, %v641_v45 }
  0xfa   :  { %1283 = vst [vmem:[%s1821_s2 + $0x68] sm:$0xff] %v1179_v55   ;;  %v774_v55 = vmul.f32 %v640_v28, %v640_v28  ;;  %v704_v14 = vadd.f32 %v703_v51, %v641_v45 }
  0xfb   :  { %v836_v60 = vadd.f32 %v835_v54, %v773_v13  ;;  %v776_v18 = vmul.f32 %v642_v59, %v642_v59  ;;  %v520_v13 = vpack.c.bf16 %v1467_v42, %v1467_v42 }
  0xfc   :  { %v705_v27 = vadd.f32 %v704_v14, %v642_v59 }
  0xfd   :  { %v837_v10 = vadd.f32 %v836_v60, %v774_v55  ;;  %v1639_v12 = vpop.f32.mrf.mxu2 }
  0xfe   :  { %v373_v62 = vpop.f32.mrf.mxu0  ;;  %v1605_v63 = vpop.f32.mrf.mxu1  ;;  %v1219_v16 = vpack.c.bf16 %v1639_v12, %v1627_v36 }
  0xff   :  { %v515_v50 = vpack.c.bf16 %v373_v62, %v373_v62 }
 0x100   :  { %1291 = vst [vmem:[%s1821_s2 + $0xa8] sm:$0xff] %v1219_v16  }
 0x101   :  { %v643_v5 = vunpack.c.l.bf16 %v515_v50 }
 0x103   :  { %v777_v28 = vmul.f32 %v643_v5, %v643_v5  ;;  %v706_v41 = vadd.f32 %v705_v27, %v643_v5 }
 0x106   :  { %v375_v24 = vpop.f32.mrf.mxu0  ;;  %v1623_v25 = vpop.f32.mrf.mxu1 }
 0x107   :  { %v1144_v31 = vpack.c.bf16 %v375_v24, %v373_v62  ;;  %v1184_v35 = vpack.c.bf16 %v1623_v25, %v1605_v63  ;;  %v516_v0 = vpack.c.bf16 %v375_v24, %v375_v24  ;;  %v1641_v62 = vpop.f32.mrf.mxu3  ;;  %v838_v24 = vadd.f32 %v837_v10, %v775_v4 }
 0x108   :  { %v1249_v19 = vpack.c.bf16 %v1641_v62, %v1629_v38  ;;  %v521_v4 = vpack.c.bf16 %v1477_v53, %v1477_v53  ;;  %v523_v53 = vpack.c.bf16 %v1494_v7, %v1494_v7 }
 0x109   :  { %1276 = vst [vmem:[%s1821_s2 + $0x30] sm:$0xff] %v1144_v31   ;;  %v644_v21 = vunpack.c.l.bf16 %v516_v0  ;;  %v839_v40 = vadd.f32 %v838_v24, %v776_v18  ;;  %v1661_v0 = vpop.f32.mrf.mxu2 }
 0x10a   :  { %1284 = vst [vmem:[%s1821_s2 + $0x70] sm:$0xff] %v1184_v35   ;;  %v519_v35 = vpack.c.bf16 %v1459_v37, %v1459_v37 }
 0x10b   :  { %1297 = vst [vmem:[%s1821_s2 + $0xd8] sm:$0xff] %v1249_v19   ;;  %v778_v49 = vmul.f32 %v644_v21, %v644_v21  ;;  %v840_v15 = vadd.f32 %v839_v40, %v777_v28  ;;  %v707_v45 = vadd.f32 %v706_v41, %v644_v21  ;;  %v649_v21 = vunpack.c.l.bf16 %v521_v4 }
 0x10c   :  { %v647_v51 = vunpack.c.l.bf16 %v519_v35  ;;  %v524_v28 = vpack.c.bf16 %v1510_v17, %v1510_v17 }
 0x10d   :  { %v841_v42 = vadd.f32 %v840_v15, %v778_v49 }
 0x10e   :  { %v378_v6 = vpop.f32.mrf.mxu0  ;;  %v1637_v8 = vpop.f32.mrf.mxu1  ;;  %v781_v19 = vmul.f32 %v647_v51, %v647_v51 }
 0x10f   :  { %v517_v11 = vpack.c.bf16 %v378_v6, %v378_v6  ;;  %v1663_v37 = vpop.f32.mrf.mxu3 }
 0x111   :  { %v645_v31 = vunpack.c.l.bf16 %v517_v11  ;;  %v648_v11 = vunpack.c.l.bf16 %v520_v13  ;;  %v1679_v49 = vpop.f32.mrf.mxu2  ;;  %v651_v13 = vunpack.c.l.bf16 %v523_v53 }
 0x112   :  { %v1224_v15 = vpack.c.bf16 %v1679_v49, %v1661_v0 }
 0x113   :  { %v779_v55 = vmul.f32 %v645_v31, %v645_v31  ;;  %v708_v5 = vadd.f32 %v707_v45, %v645_v31  ;;  %v782_v31 = vmul.f32 %v648_v11, %v648_v11  ;;  %v783_v45 = vmul.f32 %v649_v21, %v649_v21 }
 0x114   :  { %1292 = vst [vmem:[%s1821_s2 + $0xb0] sm:$0xff] %v1224_v15  }
 0x115   :  { %v842_v14 = vadd.f32 %v841_v42, %v779_v55  ;;  %v785_v42 = vmul.f32 %v651_v13, %v651_v13 }
 0x116   :  { %v380_v50 = vpop.f32.mrf.mxu0  ;;  %v1657_v54 = vpop.f32.mrf.mxu1 }
 0x117   :  { %v518_v58 = vpack.c.bf16 %v380_v50, %v380_v50  ;;  %v1149_v59 = vpack.c.bf16 %v380_v50, %v378_v6  ;;  %v1189_v60 = vpack.c.bf16 %v1657_v54, %v1637_v8  ;;  %v522_v6 = vpack.c.bf16 %v1482_v61, %v1482_v61  ;;  %v1681_v61 = vpop.f32.mrf.mxu3 }
 0x118   :  { %v1254_v7 = vpack.c.bf16 %v1681_v61, %v1663_v37  ;;  %v525_v50 = vpack.c.bf16 %v1522_v22, %v1522_v22  ;;  %v527_v22 = vpack.c.bf16 %v1545_v32, %v1545_v32 }
 0x119   :  { %1277 = vst [vmem:[%s1821_s2 + $0x38] sm:$0xff] %v1149_v59   ;;  %v646_v10 = vunpack.c.l.bf16 %v518_v58  ;;  %v650_v35 = vunpack.c.l.bf16 %v522_v6  ;;  %v652_v58 = vunpack.c.l.bf16 %v524_v28  ;;  %v1701_v53 = vpop.f32.mrf.mxu2 }
 0x11a   :  { %1285 = vst [vmem:[%s1821_s2 + $0x78] sm:$0xff] %v1189_v60   ;;  %v526_v60 = vpack.c.bf16 %v1531_v26, %v1531_v26 }
 0x11b   :  { %v709_v18 = vadd.f32 %v708_v5, %v646_v10  ;;  %v780_v16 = vmul.f32 %v646_v10, %v646_v10  ;;  %v784_v59 = vmul.f32 %v650_v35, %v650_v35  ;;  %1298 = vst [vmem:[%s1821_s2 + $0xe0] sm:$0xff] %v1254_v7   ;;  %v653_v5 = vunpack.c.l.bf16 %v525_v50 }
 0x11c   :  { %v786_v6 = vmul.f32 %v652_v58, %v652_v58  ;;  %v531_v7 = vpack.c.bf16 %v1605_v63, %v1605_v63 }
 0x11d   :  { %v710_v24 = vadd.f32 %v709_v18, %v647_v51  ;;  %v843_v27 = vadd.f32 %v842_v14, %v780_v16  ;;  %v654_v14 = vunpack.c.l.bf16 %v526_v60  ;;  %v528_v18 = vpack.c.bf16 %v1561_v39, %v1561_v39 }
 0x11f   :  { %v711_v40 = vadd.f32 %v710_v24, %v648_v11  ;;  %v844_v41 = vadd.f32 %v843_v27, %v781_v19  ;;  %v1703_v19 = vpop.f32.mrf.mxu3  ;;  %v787_v24 = vmul.f32 %v653_v5, %v653_v5  ;;  %v655_v27 = vunpack.c.l.bf16 %v527_v22 }
 0x121   :  { %v712_v17 = vadd.f32 %v711_v40, %v649_v21  ;;  %v845_v55 = vadd.f32 %v844_v41, %v782_v31  ;;  %v529_v21 = vpack.c.bf16 %v1575_v46, %v1575_v46  ;;  %v530_v31 = vpack.c.bf16 %v1591_v52, %v1591_v52  ;;  %v1713_v60 = vpop.f32.mrf.mxu2 }
 0x122   :  { %v656_v40 = vunpack.c.l.bf16 %v528_v18  ;;  %v789_v15 = vmul.f32 %v655_v27, %v655_v27  ;;  %v534_v18 = vpack.c.bf16 %v1657_v54, %v1657_v54 }
 0x123   :  { %v713_v51 = vadd.f32 %v712_v17, %v650_v35  ;;  %v846_v4 = vadd.f32 %v845_v55, %v783_v45  ;;  %v788_v35 = vmul.f32 %v654_v14, %v654_v14  ;;  %v658_v17 = vunpack.c.l.bf16 %v530_v31 }
 0x124   :  { %v790_v46 = vmul.f32 %v656_v40, %v656_v40 }
 0x125   :  { %v714_v10 = vadd.f32 %v713_v51, %v651_v13  ;;  %v847_v11 = vadd.f32 %v846_v4, %v784_v59  ;;  %v657_v13 = vunpack.c.l.bf16 %v529_v21  ;;  %v532_v59 = vpack.c.bf16 %v1623_v25, %v1623_v25 }
 0x126   :  { %v1229_v4 = vpack.c.bf16 %v1713_v60, %v1701_v53 }
 0x127   :  { %v715_v16 = vadd.f32 %v714_v10, %v652_v58  ;;  %v848_v26 = vadd.f32 %v847_v11, %v785_v42  ;;  %v1715_v52 = vpop.f32.mrf.mxu3  ;;  %v791_v51 = vmul.f32 %v657_v13, %v657_v13  ;;  %v659_v42 = vunpack.c.l.bf16 %v531_v7 }
 0x128   :  { %v1259_v63 = vpack.c.bf16 %v1715_v52, %v1703_v19  ;;  %v533_v10 = vpack.c.bf16 %v1637_v8, %v1637_v8  ;;  %v792_v11 = vmul.f32 %v658_v17, %v658_v17  ;;  %1293 = vst [vmem:[%s1821_s2 + $0xb8] sm:$0xff] %v1229_v4   ;;  %v538_v7 = vpack.c.bf16 %v1524_v23, %v1524_v23 }
 0x129   :  { %v849_v28 = vadd.f32 %v848_v26, %v786_v6  ;;  %v716_v32 = vadd.f32 %v715_v16, %v653_v5  ;;  %v535_v16 = vpack.c.bf16 %v1486_v1, %v1486_v1  ;;  %v793_v8 = vmul.f32 %v659_v42, %v659_v42 }
 0x12a   :  { %1299 = vst [vmem:[%s1821_s2 + $0xe8] sm:$0xff] %v1259_v63   ;;  %v666_v4 = vunpack.c.l.bf16 %v538_v7 }
 0x12b   :  { %v717_v41 = vadd.f32 %v716_v32, %v654_v14  ;;  %v850_v39 = vadd.f32 %v849_v28, %v787_v24  ;;  %v660_v14 = vunpack.c.l.bf16 %v532_v59  ;;  %v661_v24 = vunpack.c.l.bf16 %v533_v10 }
 0x12c   :  { %v663_v54 = vunpack.c.l.bf16 %v535_v16 }
 0x12d   :  { %v718_v45 = vadd.f32 %v717_v41, %v655_v27  ;;  %v851_v50 = vadd.f32 %v850_v39, %v788_v35  ;;  %v536_v27 = vpack.c.bf16 %v1496_v9, %v1496_v9  ;;  %v794_v31 = vmul.f32 %v660_v14, %v660_v14 }
 0x12e   :  { %v662_v35 = vunpack.c.l.bf16 %v534_v18  ;;  %v537_v41 = vpack.c.bf16 %v1514_v20, %v1514_v20  ;;  %v795_v1 = vmul.f32 %v661_v24, %v661_v24  ;;  %v540_v20 = vpack.c.bf16 %v1547_v33, %v1547_v33 }
 0x12f   :  { %v719_v55 = vadd.f32 %v718_v45, %v656_v40  ;;  %v852_v58 = vadd.f32 %v851_v50, %v789_v15  ;;  %v1735_v40 = vpop.f32.mrf.mxu3  ;;  %v664_v15 = vunpack.c.l.bf16 %v536_v27  ;;  %v800_v33 = vmul.f32 %v666_v4, %v666_v4 }
 0x130   :  { %v796_v9 = vmul.f32 %v662_v35, %v662_v35 }
 0x131   :  { %v720_v5 = vadd.f32 %v719_v55, %v657_v13  ;;  %v853_v22 = vadd.f32 %v852_v58, %v790_v46  ;;  %v797_v46 = vmul.f32 %v663_v54, %v663_v54  ;;  %v665_v55 = vunpack.c.l.bf16 %v537_v41 }
 0x133   :  { %v721_v25 = vadd.f32 %v720_v5, %v658_v17  ;;  %v854_v6 = vadd.f32 %v853_v22, %v791_v51  ;;  %v539_v17 = vpack.c.bf16 %v1535_v29, %v1535_v29  ;;  %v798_v51 = vmul.f32 %v664_v15, %v664_v15 }
 0x134   :  { %v799_v10 = vmul.f32 %v665_v55, %v665_v55  ;;  %v541_v29 = vpack.c.bf16 %v1565_v43, %v1565_v43 }
 0x135   :  { %v722_v26 = vadd.f32 %v721_v25, %v659_v42  ;;  %v855_v21 = vadd.f32 %v854_v6, %v792_v11  ;;  %v667_v23 = vunpack.c.l.bf16 %v539_v17  ;;  %v668_v6 = vunpack.c.l.bf16 %v540_v20 }
 0x137   :  { %v856_v28 = vadd.f32 %v855_v21, %v793_v8  ;;  %v723_v32 = vadd.f32 %v722_v26, %v660_v14  ;;  %v1745_v5 = vpop.f32.mrf.mxu3  ;;  %v542_v14 = vpack.c.bf16 %v1577_v47, %v1577_v47  ;;  %v801_v26 = vmul.f32 %v667_v23, %v667_v23 }
 0x138   :  { %v1264_v22 = vpack.c.bf16 %v1745_v5, %v1735_v40  ;;  %v669_v8 = vunpack.c.l.bf16 %v541_v29  ;;  %v543_v21 = vpack.c.bf16 %v1595_v56, %v1595_v56  ;;  %v802_v27 = vmul.f32 %v668_v6, %v668_v6 }
 0x139   :  { %v857_v39 = vadd.f32 %v856_v28, %v794_v31  ;;  %v724_v13 = vadd.f32 %v723_v32, %v661_v24  ;;  %v670_v28 = vunpack.c.l.bf16 %v542_v14  ;;  %v544_v32 = vpack.c.bf16 %v1607_v2, %v1607_v2 }
 0x13a   :  { %1300 = vst [vmem:[%s1821_s2 + $0xf0] sm:$0xff] %v1264_v22   ;;  %v545_v47 = vpack.c.bf16 %v1627_v36, %v1627_v36  ;;  %v803_v41 = vmul.f32 %v669_v8, %v669_v8  ;;  %v546_v56 = vpack.c.bf16 %v1639_v12, %v1639_v12 }
 0x13b   :  { %v858_v45 = vadd.f32 %v857_v39, %v795_v1  ;;  %v725_v50 = vadd.f32 %v724_v13, %v662_v35  ;;  %v671_v39 = vunpack.c.l.bf16 %v543_v21  ;;  %v672_v7 = vunpack.c.l.bf16 %v544_v32 }
 0x13d   :  { %v726_v58 = vadd.f32 %v725_v50, %v663_v54  ;;  %v859_v59 = vadd.f32 %v858_v45, %v796_v9  ;;  %v673_v9 = vunpack.c.l.bf16 %v545_v47  ;;  %v805_v2 = vmul.f32 %v671_v39, %v671_v39 }
 0x13e   :  { %v806_v36 = vmul.f32 %v672_v7, %v672_v7 }
 0x13f   :  { %v727_v63 = vadd.f32 %v726_v58, %v664_v15  ;;  %v860_v42 = vadd.f32 %v859_v59, %v797_v46  ;;  %v1760_v54 = vpop.f32.mrf.mxu3  ;;  %v804_v15 = vmul.f32 %v670_v28, %v670_v28  ;;  %v674_v58 = vunpack.c.l.bf16 %v546_v56 }
 0x140   :  { %v807_v12 = vmul.f32 %v673_v9, %v673_v9 }
 0x141   :  { %v728_v11 = vadd.f32 %v727_v63, %v665_v55  ;;  %v861_v25 = vadd.f32 %v860_v42, %v798_v51  ;;  %v547_v55 = vpack.c.bf16 %v1661_v0, %v1661_v0  ;;  %v548_v51 = vpack.c.bf16 %v1679_v49, %v1679_v49 }
 0x142   :  { %v808_v0 = vmul.f32 %v674_v58, %v674_v58 }
 0x143   :  { %v729_v18 = vadd.f32 %v728_v11, %v666_v4  ;;  %v862_v16 = vadd.f32 %v861_v25, %v799_v10  ;;  %v675_v22 = vunpack.c.l.bf16 %v547_v55  ;;  %v549_v10 = vpack.c.bf16 %v1701_v53, %v1701_v53 }
 0x144   :  { %v676_v49 = vunpack.c.l.bf16 %v548_v51  ;;  %v550_v25 = vpack.c.bf16 %v1713_v60, %v1713_v60  ;;  %v552_v53 = vpack.c.bf16 %v1549_v34, %v1549_v34  ;;  %v555_v34 = vpack.c.bf16 %v1597_v57, %v1597_v57 }
 0x145   :  { %v730_v24 = vadd.f32 %v729_v18, %v667_v23  ;;  %v863_v43 = vadd.f32 %v862_v16, %v800_v33  ;;  %v809_v18 = vmul.f32 %v675_v22, %v675_v22  ;;  %v677_v16 = vunpack.c.l.bf16 %v549_v10 }
 0x146   :  { %v810_v21 = vmul.f32 %v676_v49, %v676_v49  ;;  %v559_v51 = vpack.c.bf16 %v1663_v37, %v1663_v37 }
 0x147   :  { %v731_v31 = vadd.f32 %v730_v24, %v668_v6  ;;  %v864_v35 = vadd.f32 %v863_v43, %v801_v26  ;;  %v1770_v4 = vpop.f32.mrf.mxu3  ;;  %v551_v6 = vpack.c.bf16 %v1537_v30, %v1537_v30  ;;  %v678_v24 = vunpack.c.l.bf16 %v550_v25 }
 0x148   :  { %v1269_v63 = vpack.c.bf16 %v1770_v4, %v1760_v54  ;;  %v811_v32 = vmul.f32 %v677_v16, %v677_v16  ;;  %v554_v30 = vpack.c.bf16 %v1579_v48, %v1579_v48  ;;  %v557_v48 = vpack.c.bf16 %v1629_v38, %v1629_v38 }
 0x149   :  { %v865_v13 = vadd.f32 %v864_v35, %v802_v27  ;;  %v732_v1 = vadd.f32 %v731_v31, %v669_v8  ;;  %v679_v43 = vunpack.c.l.bf16 %v551_v6  ;;  %v553_v27 = vpack.c.bf16 %v1567_v44, %v1567_v44 }
 0x14a   :  { %1301 = vst [vmem:[%s1821_s2 + $0xf8] sm:$0xff] %v1269_v63   ;;  %v680_v31 = vunpack.c.l.bf16 %v552_v53  ;;  %v556_v44 = vpack.c.bf16 %v1609_v3, %v1609_v3  ;;  %v685_v3 = vunpack.c.l.bf16 %v557_v48  ;;  %v560_v38 = vpack.c.bf16 %v1681_v61, %v1681_v61 }
 0x14b   :  { %v733_v45 = vadd.f32 %v732_v1, %v670_v28  ;;  %v866_v50 = vadd.f32 %v865_v13, %v803_v41  ;;  %v812_v41 = vmul.f32 %v678_v24, %v678_v24  ;;  %v681_v13 = vunpack.c.l.bf16 %v553_v27 }
 0x14c   :  { %v684_v55 = vunpack.c.l.bf16 %v556_v44  ;;  %v562_v25 = vpack.c.bf16 %v1715_v52, %v1715_v52  ;;  %v688_v6 = vunpack.c.l.bf16 %v560_v38 }
 0x14d   :  { %v734_v17 = vadd.f32 %v733_v45, %v671_v39  ;;  %v867_v46 = vadd.f32 %v866_v50, %v804_v15  ;;  %v813_v39 = vmul.f32 %v679_v43, %v679_v43  ;;  %v814_v15 = vmul.f32 %v680_v31, %v680_v31 }
 0x14f   :  { %v735_v59 = vadd.f32 %v734_v17, %v672_v7  ;;  %v868_v20 = vadd.f32 %v867_v46, %v805_v2  ;;  %v682_v7 = vunpack.c.l.bf16 %v554_v30  ;;  %v815_v2 = vmul.f32 %v681_v13, %v681_v13 }
 0x151   :  { %v736_v42 = vadd.f32 %v735_v59, %v673_v9  ;;  %v869_v23 = vadd.f32 %v868_v20, %v806_v36  ;;  %v683_v9 = vunpack.c.l.bf16 %v555_v34  ;;  %v816_v57 = vmul.f32 %v682_v7, %v682_v7 }
 0x153   :  { %v737_v29 = vadd.f32 %v736_v42, %v674_v58  ;;  %v870_v11 = vadd.f32 %v869_v23, %v807_v12  ;;  %v558_v58 = vpack.c.bf16 %v1641_v62, %v1641_v62  ;;  %v817_v20 = vmul.f32 %v683_v9, %v683_v9 }
 0x154   :  { %v818_v42 = vmul.f32 %v684_v55, %v684_v55  ;;  %v819_v62 = vmul.f32 %v685_v3, %v685_v3 }
 0x155   :  { %v871_v33 = vadd.f32 %v870_v11, %v808_v0  ;;  %v738_v14 = vadd.f32 %v737_v29, %v675_v22  ;;  %v686_v23 = vunpack.c.l.bf16 %v558_v58  ;;  %v561_v0 = vpack.c.bf16 %v1703_v19, %v1703_v19 }
 0x156   :  { %v687_v29 = vunpack.c.l.bf16 %v559_v51  ;;  %v822_v19 = vmul.f32 %v688_v6, %v688_v6 }
 0x157   :  { %v872_v26 = vadd.f32 %v871_v33, %v809_v18  ;;  %v739_v8 = vadd.f32 %v738_v14, %v676_v49  ;;  %v820_v37 = vmul.f32 %v686_v23, %v686_v23  ;;  %v689_v18 = vunpack.c.l.bf16 %v561_v0 }
 0x159   :  { %v873_v28 = vadd.f32 %v872_v26, %v810_v21  ;;  %v740_v60 = vadd.f32 %v739_v8, %v677_v16  ;;  %v821_v16 = vmul.f32 %v687_v29, %v687_v29  ;;  %v563_v26 = vpack.c.bf16 %v1735_v40, %v1735_v40 }
 0x15a   :  { %v690_v8 = vunpack.c.l.bf16 %v562_v25  ;;  %v823_v27 = vmul.f32 %v689_v18, %v689_v18  ;;  %v566_v40 = vpack.c.bf16 %v1770_v4, %v1770_v4 }
 0x15b   :  { %v874_v35 = vadd.f32 %v873_v28, %v811_v32  ;;  %v741_v47 = vadd.f32 %v740_v60, %v678_v24  ;;  %v691_v60 = vunpack.c.l.bf16 %v563_v26  ;;  %v565_v32 = vpack.c.bf16 %v1760_v54, %v1760_v54 }
 0x15c   :  { %v694_v44 = vunpack.c.l.bf16 %v566_v40 }
 0x15d   :  { %v742_v1 = vadd.f32 %v741_v47, %v679_v43  ;;  %v875_v56 = vadd.f32 %v874_v35, %v812_v41  ;;  %v564_v43 = vpack.c.bf16 %v1745_v5, %v1745_v5 }
 0x15f   :  { %v743_v45 = vadd.f32 %v742_v1, %v680_v31  ;;  %v876_v50 = vadd.f32 %v875_v56, %v813_v39  ;;  %v824_v31 = vmul.f32 %v690_v8, %v690_v8  ;;  %v692_v47 = vunpack.c.l.bf16 %v564_v43 }
 0x160   :  { %v825_v39 = vmul.f32 %v691_v60, %v691_v60 }
 0x161   :  { %v744_v17 = vadd.f32 %v743_v45, %v681_v13  ;;  %v877_v46 = vadd.f32 %v876_v50, %v814_v15  ;;  %v693_v13 = vunpack.c.l.bf16 %v565_v32  ;;  %v826_v56 = vmul.f32 %v692_v47, %v692_v47 }
 0x163   :  { %v745_v36 = vadd.f32 %v744_v17, %v682_v7  ;;  %v878_v59 = vadd.f32 %v877_v46, %v815_v2  ;;  %v827_v45 = vmul.f32 %v693_v13, %v693_v13 }
 0x165   :  { %v746_v12 = vadd.f32 %v745_v36, %v683_v9  ;;  %v879_v63 = vadd.f32 %v878_v59, %v816_v57  ;;  %v828_v9 = vmul.f32 %v694_v44, %v694_v44 }
 0x167   :  { %v747_v22 = vadd.f32 %v746_v12, %v684_v55  ;;  %v880_v10 = vadd.f32 %v879_v63, %v817_v20 }
 0x169   :  { %v881_v11 = vadd.f32 %v880_v10, %v818_v42  ;;  %v748_v49 = vadd.f32 %v747_v22, %v685_v3 }
 0x16b   :  { %v749_v33 = vadd.f32 %v748_v49, %v686_v23  ;;  %v882_v14 = vadd.f32 %v881_v11, %v819_v62 }
 0x16d   :  { %v750_v53 = vadd.f32 %v749_v33, %v687_v29  ;;  %v883_v61 = vadd.f32 %v882_v14, %v820_v37 }
 0x16f   :  { %v751_v21 = vadd.f32 %v750_v53, %v688_v6  ;;  %v884_v24 = vadd.f32 %v883_v61, %v821_v16 }
 0x171   :  { %v752_v52 = vadd.f32 %v751_v21, %v689_v18  ;;  %v885_v28 = vadd.f32 %v884_v24, %v822_v19 }
 0x173   :  { %v753_v30 = vadd.f32 %v752_v52, %v690_v8  ;;  %v886_v35 = vadd.f32 %v885_v28, %v823_v27 }
 0x175   :  { %v887_v41 = vadd.f32 %v886_v35, %v824_v31  ;;  %v754_v34 = vadd.f32 %v753_v30, %v691_v60 }
 0x177   :  { %v888_v1 = vadd.f32 %v887_v41, %v825_v39  ;;  %v755_v5 = vadd.f32 %v754_v34, %v692_v47 }
 0x179   :  { %v889_v15 = vadd.f32 %v888_v1, %v826_v56  ;;  %v756_v7 = vadd.f32 %v755_v5, %v693_v13 }
 0x17b   :  { %v890_v50 = vadd.f32 %v889_v15, %v827_v45  ;;  %v757_v54 = vadd.f32 %v756_v7, %v694_v44 }
 0x17d   :  { %v758_v2 = vrot.slane %v757_v54, 4  ;;  %v891_v48 = vadd.f32 %v890_v50, %v828_v9 }
 0x17f   :  { %v759_v17 = vadd.f32 %v758_v2, %v757_v54  ;;  %v892_v46 = vrot.slane %v891_v48, 4 }
 0x181   :  { %v760_v55 = vrot.slane %v759_v17, 2  ;;  %v893_v4 = vadd.f32 %v892_v46, %v891_v48 }
 0x183   :  { %v761_v57 = vadd.f32 %v760_v55, %v759_v17  ;;  %v894_v58 = vrot.slane %v893_v4, 2 }
 0x185   :  { %v762_v36 = vrot.slane %v761_v57, 1  ;;  %v895_v59 = vadd.f32 %v894_v58, %v893_v4 }
 0x187   :  { %v763_v20 = vadd.f32 %v762_v36, %v761_v57  ;;  %v896_v3 = vrot.slane %v895_v59, 1 }
 0x189   :  { %764 = vst [vmem:[%s1822_s3] sm:$0x1] %v763_v20  ;;  %v897_v51 = vadd.f32 %v896_v3, %v895_v59 }
 0x18b   :  { %898 = vst [vmem:[%s1823_s4] sm:$0x1] %v897_v51 }

// kernel: bottleneck_forward.7
= control target key start
LH: loop header
LB: loop body
LE: loop exit
PB: predicated region body
PF: predicated region fallthrough
CT: control target
= control target key end

     0   :  { %s1330_s0 = inlined_call_operand.vmem [shape: bf16[512,128], index: 0, kind: input, shape index: {}]   ;;  %s1331_s1 = inlined_call_operand.vmem [shape: bf16[512,128], index: 1, kind: input, shape index: {}]   ;;  %s1332_s2 = inlined_call_operand.vmem [shape: f32[1,128], index: 2, kind: input, shape index: {}]   ;;  %s1333_s3 = inlined_call_operand.vmem [shape: f32[1,128], index: 3, kind: input, shape index: {}]   ;;  %s1334_s4 = inlined_call_operand.hbm [shape: f32[512,128], index: 4, kind: output, shape index: {}]  }
   0x1   :  { %v621_v0 = vld [vmem:[%s1330_s0] sm:$0xff]   ;;  %v876_v8 = vld [vmem:[%s1330_s0 + $0x8] sm:$0xff]   ;;  %v877_v10 = vld [vmem:[%s1330_s0 + $0x10] sm:$0xff]  }
   0x2   :  { %v1003_v1 = vld [vmem:[%s1332_s2] ss:$0 sm:$0xff]  ;;  %v622_v2 = vunpack.c.l.bf16 %v621_v0  ;;  %v623_v5 = vunpack.c.h.bf16 %v621_v0  ;;  %v907_v9 = vld [vmem:[%s1331_s1 + $0x8] sm:$0xff]   ;;  %v626_v13 = vunpack.c.l.bf16 %v876_v8  ;;  %v908_v15 = vld [vmem:[%s1331_s1 + $0x10] sm:$0xff]   ;;  %v627_v17 = vunpack.c.h.bf16 %v876_v8 }
   0x3   :  { %v1008_v3 = vld [vmem:[%s1333_s3] ss:$0 sm:$0xff]  ;;  %v754_v14 = vunpack.c.l.bf16 %v907_v9  ;;  %v878_v16 = vld [vmem:[%s1330_s0 + $0x18] sm:$0xff]   ;;  %v755_v18 = vunpack.c.h.bf16 %v907_v9  ;;  %v630_v19 = vunpack.c.l.bf16 %v877_v10  ;;  %v758_v20 = vunpack.c.l.bf16 %v908_v15  ;;  %v880_v52 = vld [vmem:[%s1330_s0 + $0x28] sm:$0xff]  }
   0x4   :  { %v749_v4 = vld [vmem:[%s1331_s1] sm:$0xff]   ;;  %v150_v11 = vmul.f32 %v1003_v1, %v622_v2  ;;  %v151_v12 = vmul.f32 %v1003_v1, %v623_v5  ;;  %v152_v23 = vmul.f32 %v1003_v1, %v626_v13  ;;  %v631_v24 = vunpack.c.h.bf16 %v877_v10  ;;  %v909_v25 = vld [vmem:[%s1331_s1 + $0x18] sm:$0xff]  }
   0x5   :  { %v750_v6 = vunpack.c.l.bf16 %v749_v4  ;;  %v751_v7 = vunpack.c.h.bf16 %v749_v4  ;;  %v153_v26 = vmul.f32 %v1003_v1, %v627_v17  ;;  %v154_v27 = vmul.f32 %v1003_v1, %v630_v19  ;;  %v879_v38 = vld [vmem:[%s1330_s0 + $0x20] sm:$0xff]  }
   0x6   :  { %v218_v21 = vadd.f32 %v1008_v3, %v150_v11  ;;  %v219_v22 = vadd.f32 %v1008_v3, %v151_v12  ;;  %v759_v28 = vunpack.c.h.bf16 %v908_v15  ;;  %v634_v29 = vunpack.c.l.bf16 %v878_v16  ;;  %v910_v47 = vld [vmem:[%s1331_s1 + $0x20] sm:$0xff]  }
   0x7   :  { %v220_v32 = vadd.f32 %v1008_v3, %v152_v23  ;;  %v155_v33 = vmul.f32 %v1003_v1, %v631_v24  ;;  %v221_v34 = vadd.f32 %v1008_v3, %v153_v26  ;;  %v222_v35 = vadd.f32 %v1008_v3, %v154_v27 }
   0x8   :  { %v410_v30 = vadd.f32 %v750_v6, %v218_v21  ;;  %v411_v31 = vadd.f32 %v751_v7, %v219_v22  ;;  %v156_v36 = vmul.f32 %v1003_v1, %v634_v29  ;;  %v762_v37 = vunpack.c.l.bf16 %v909_v25 }
   0x9   :  { %v412_v41 = vadd.f32 %v754_v14, %v220_v32  ;;  %v223_v42 = vadd.f32 %v1008_v3, %v155_v33  ;;  %v413_v43 = vadd.f32 %v755_v18, %v221_v34  ;;  %v414_v44 = vadd.f32 %v758_v20, %v222_v35 }
   0xa   :  { %v474_v39 = vmax.f32 %v410_v30, 0.0  ;;  %v475_v40 = vmax.f32 %v411_v31, 0.0  ;;  %v224_v45 = vadd.f32 %v1008_v3, %v156_v36  ;;  %v635_v46 = vunpack.c.h.bf16 %v878_v16 }
   0xb   :  { %v476_v48 = vmax.f32 %v412_v41, 0.0  ;;  %v415_v49 = vadd.f32 %v759_v28, %v223_v42  ;;  %v763_v50 = vunpack.c.h.bf16 %v909_v25  ;;  %v638_v51 = vunpack.c.l.bf16 %v879_v38 }
   0xc   :  { %538 = vst [vmem:[#allocation2] sm:$0xff] %v474_v39 }
   0xd   :  { %9 = vsyncpa [#allocation3], 0  ;;  %539 = vst [vmem:[#allocation2 + $0x8] sm:$0xff] %v475_v40  ;;  %v477_v53 = vmax.f32 %v413_v43, 0.0  ;;  %v478_v54 = vmax.f32 %v414_v44, 0.0  ;;  %v416_v55 = vadd.f32 %v762_v37, %v224_v45  ;;  %v157_v56 = vmul.f32 %v1003_v1, %v635_v46  ;;  %v911_v57 = vld [vmem:[%s1331_s1 + $0x28] sm:$0xff]  }
   0xe   :  { %540 = vst [vmem:[#allocation2 + $0x10] sm:$0xff] %v476_v48  ;;  %v479_v58 = vmax.f32 %v415_v49, 0.0  ;;  %v158_v59 = vmul.f32 %v1003_v1, %v638_v51  ;;  %v766_v60 = vunpack.c.l.bf16 %v910_v47  ;;  %v639_v61 = vunpack.c.h.bf16 %v879_v38  ;;  %v881_v62 = vld [vmem:[%s1330_s0 + $0x30] sm:$0xff]   ;;  %v882_v18 = vld [vmem:[%s1330_s0 + $0x38] sm:$0xff]   ;;  %v883_v32 = vld [vmem:[%s1330_s0 + $0x40] sm:$0xff]   ;;  %s608_s9 = sshll.u32 %s1334_s4, 4  ;;  %s609_s9 = int_to_ptr.hbm [resolvable:$true] %s608_s9 }
   0xf   :  { %541 = vst [vmem:[#allocation2 + $0x18] sm:$0xff] %v477_v53  ;;  %v480_v63 = vmax.f32 %v416_v55, 0.0  ;;  %v225_v0 = vadd.f32 %v1008_v3, %v157_v56  ;;  %v767_v2 = vunpack.c.h.bf16 %v910_v47  ;;  %v642_v4 = vunpack.c.l.bf16 %v880_v52  ;;  %v912_v5 = vld [vmem:[%s1331_s1 + $0x30] sm:$0xff]   ;;  %v913_v23 = vld [vmem:[%s1331_s1 + $0x38] sm:$0xff]   ;;  %v914_v37 = vld [vmem:[%s1331_s1 + $0x40] sm:$0xff]   ;;  %s970_s10 = smov 128  }
  0x10   :  { %542 = vst [vmem:[#allocation2 + $0x20] sm:$0xff] %v478_v54  ;;  %v226_v6 = vadd.f32 %v1008_v3, %v158_v59  ;;  %v159_v7 = vmul.f32 %v1003_v1, %v639_v61  ;;  %v770_v8 = vunpack.c.l.bf16 %v911_v57  ;;  %v643_v9 = vunpack.c.h.bf16 %v880_v52  ;;  %v884_v46 = vld [vmem:[%s1330_s0 + $0x48] sm:$0xff]   ;;  %v885_v56 = vld [vmem:[%s1330_s0 + $0x50] sm:$0xff]   ;;  %s971_s11 = smov 8  }
  0x11   :  { %543 = vst [vmem:[#allocation2 + $0x28] sm:$0xff] %v479_v58  ;;  %v417_v10 = vadd.f32 %v763_v50, %v225_v0  ;;  %v160_v11 = vmul.f32 %v1003_v1, %v642_v4  ;;  %v771_v12 = vunpack.c.h.bf16 %v911_v57  ;;  %v646_v13 = vunpack.c.l.bf16 %v881_v62  ;;  %v915_v47 = vld [vmem:[%s1331_s1 + $0x48] sm:$0xff]  }
  0x12   :  { %544 = vst [vmem:[#allocation2 + $0x30] sm:$0xff] %v480_v63  ;;  %v418_v14 = vadd.f32 %v766_v60, %v226_v6  ;;  %v227_v15 = vadd.f32 %v1008_v3, %v159_v7  ;;  %v161_v16 = vmul.f32 %v1003_v1, %v643_v9  ;;  %v774_v17 = vunpack.c.l.bf16 %v912_v5 }
  0x13   :  { %v481_v19 = vmax.f32 %v417_v10, 0.0  ;;  %v228_v20 = vadd.f32 %v1008_v3, %v160_v11  ;;  %v162_v21 = vmul.f32 %v1003_v1, %v646_v13  ;;  %v647_v22 = vunpack.c.h.bf16 %v881_v62 }
  0x14   :  { %v482_v24 = vmax.f32 %v418_v14, 0.0  ;;  %v419_v25 = vadd.f32 %v767_v2, %v227_v15  ;;  %v229_v26 = vadd.f32 %v1008_v3, %v161_v16  ;;  %v775_v27 = vunpack.c.h.bf16 %v912_v5  ;;  %v916_v2 = vld [vmem:[%s1331_s1 + $0x50] sm:$0xff]  }
  0x15   :  { %545 = vst [vmem:[#allocation2 + $0x38] sm:$0xff] %v481_v19  ;;  %v420_v28 = vadd.f32 %v770_v8, %v228_v20  ;;  %v230_v29 = vadd.f32 %v1008_v3, %v162_v21  ;;  %v163_v30 = vmul.f32 %v1003_v1, %v647_v22  ;;  %v650_v31 = vunpack.c.l.bf16 %v882_v18 }
  0x16   :  { %546 = vst [vmem:[#allocation2 + $0x40] sm:$0xff] %v482_v24  ;;  %v483_v33 = vmax.f32 %v419_v25, 0.0  ;;  %v421_v34 = vadd.f32 %v771_v12, %v229_v26  ;;  %v778_v35 = vunpack.c.l.bf16 %v913_v23  ;;  %v651_v36 = vunpack.c.h.bf16 %v882_v18  ;;  %v886_v12 = vld [vmem:[%s1330_s0 + $0x58] sm:$0xff]   ;;  %v887_v26 = vld [vmem:[%s1330_s0 + $0x60] sm:$0xff]  }
  0x17   :  { %v484_v38 = vmax.f32 %v420_v28, 0.0  ;;  %v422_v39 = vadd.f32 %v774_v17, %v230_v29  ;;  %v231_v40 = vadd.f32 %v1008_v3, %v163_v30  ;;  %v164_v41 = vmul.f32 %v1003_v1, %v650_v31  ;;  %v917_v17 = vld [vmem:[%s1331_s1 + $0x58] sm:$0xff]   ;;  %v918_v31 = vld [vmem:[%s1331_s1 + $0x60] sm:$0xff]  }
  0x18   :  { %547 = vst [vmem:[#allocation2 + $0x48] sm:$0xff] %v483_v33  ;;  %v485_v42 = vmax.f32 %v421_v34, 0.0  ;;  %v165_v43 = vmul.f32 %v1003_v1, %v651_v36  ;;  %v779_v44 = vunpack.c.h.bf16 %v913_v23  ;;  %v654_v45 = vunpack.c.l.bf16 %v883_v32 }
  0x19   :  { %548 = vst [vmem:[#allocation2 + $0x50] sm:$0xff] %v484_v38  ;;  %v486_v48 = vmax.f32 %v422_v39, 0.0  ;;  %v423_v49 = vadd.f32 %v775_v27, %v231_v40  ;;  %v232_v50 = vadd.f32 %v1008_v3, %v164_v41  ;;  %v782_v51 = vunpack.c.l.bf16 %v914_v37  ;;  %v888_v40 = vld [vmem:[%s1330_s0 + $0x68] sm:$0xff]  }
  0x1a   :  { %549 = vst [vmem:[#allocation2 + $0x58] sm:$0xff] %v485_v42  ;;  %v233_v52 = vadd.f32 %v1008_v3, %v165_v43  ;;  %v166_v53 = vmul.f32 %v1003_v1, %v654_v45  ;;  %v655_v54 = vunpack.c.h.bf16 %v883_v32  ;;  %v783_v55 = vunpack.c.h.bf16 %v914_v37  ;;  %v919_v41 = vld [vmem:[%s1331_s1 + $0x68] sm:$0xff]  }
  0x1b   :  { %550 = vst [vmem:[#allocation2 + $0x60] sm:$0xff] %v486_v48  ;;  %v487_v57 = vmax.f32 %v423_v49, 0.0  ;;  %v424_v58 = vadd.f32 %v778_v35, %v232_v50  ;;  %v658_v59 = vunpack.c.l.bf16 %v884_v46  ;;  %v786_v60 = vunpack.c.l.bf16 %v915_v47  ;;  %v889_v50 = vld [vmem:[%s1330_s0 + $0x70] sm:$0xff]  }
  0x1c   :  { %v425_v61 = vadd.f32 %v779_v44, %v233_v52  ;;  %v234_v62 = vadd.f32 %v1008_v3, %v166_v53  ;;  %v167_v63 = vmul.f32 %v1003_v1, %v655_v54  ;;  %v659_v0 = vunpack.c.h.bf16 %v884_v46 }
  0x1d   :  { %551 = vst [vmem:[#allocation2 + $0x68] sm:$0xff] %v487_v57  ;;  %v488_v4 = vmax.f32 %v424_v58, 0.0  ;;  %v168_v5 = vmul.f32 %v1003_v1, %v658_v59  ;;  %v787_v6 = vunpack.c.h.bf16 %v915_v47  ;;  %v662_v7 = vunpack.c.l.bf16 %v885_v56  ;;  %v920_v59 = vld [vmem:[%s1331_s1 + $0x70] sm:$0xff]  }
  0x1e   :  { %v489_v8 = vmax.f32 %v425_v61, 0.0  ;;  %v426_v9 = vadd.f32 %v782_v51, %v234_v62  ;;  %v235_v10 = vadd.f32 %v1008_v3, %v167_v63  ;;  %v169_v11 = vmul.f32 %v1003_v1, %v659_v0 }
  0x1f   :  { %552 = vst [vmem:[#allocation2 + $0x70] sm:$0xff] %v488_v4  ;;  %v236_v13 = vadd.f32 %v1008_v3, %v168_v5  ;;  %v170_v14 = vmul.f32 %v1003_v1, %v662_v7  ;;  %v790_v15 = vunpack.c.l.bf16 %v916_v2  ;;  %v663_v16 = vunpack.c.h.bf16 %v885_v56 }
  0x20   :  { %553 = vst [vmem:[#allocation2 + $0x78] sm:$0xff] %v489_v8  ;;  %v490_v18 = vmax.f32 %v426_v9, 0.0  ;;  %v427_v19 = vadd.f32 %v783_v55, %v235_v10  ;;  %v237_v20 = vadd.f32 %v1008_v3, %v169_v11  ;;  %v791_v21 = vunpack.c.h.bf16 %v916_v2  ;;  %v921_v11 = vld [vmem:[%s1331_s1 + $0x78] sm:$0xff]  }
  0x21   :  { %v428_v22 = vadd.f32 %v786_v60, %v236_v13  ;;  %v238_v23 = vadd.f32 %v1008_v3, %v170_v14  ;;  %v171_v24 = vmul.f32 %v1003_v1, %v663_v16  ;;  %v666_v25 = vunpack.c.l.bf16 %v886_v12 }
  0x22   :  { %554 = vst [vmem:[#allocation2 + $0x80] sm:$0xff] %v490_v18  ;;  %v491_v27 = vmax.f32 %v427_v19, 0.0  ;;  %v429_v28 = vadd.f32 %v787_v6, %v237_v20  ;;  %v794_v29 = vunpack.c.l.bf16 %v917_v17  ;;  %v667_v30 = vunpack.c.h.bf16 %v886_v12  ;;  %v890_v6 = vld [vmem:[%s1330_s0 + $0x78] sm:$0xff]   ;;  %v891_v20 = vld [vmem:[%s1330_s0 + $0x80] sm:$0xff]  }
  0x23   :  { %v492_v32 = vmax.f32 %v428_v22, 0.0  ;;  %v430_v33 = vadd.f32 %v790_v15, %v238_v23  ;;  %v239_v34 = vadd.f32 %v1008_v3, %v171_v24  ;;  %v172_v35 = vmul.f32 %v1003_v1, %v666_v25  ;;  %v922_v25 = vld [vmem:[%s1331_s1 + $0x80] sm:$0xff]  }
  0x24   :  { %555 = vst [vmem:[#allocation2 + $0x88] sm:$0xff] %v491_v27  ;;  %v493_v36 = vmax.f32 %v429_v28, 0.0  ;;  %v173_v37 = vmul.f32 %v1003_v1, %v667_v30  ;;  %v795_v38 = vunpack.c.h.bf16 %v917_v17  ;;  %v670_v39 = vunpack.c.l.bf16 %v887_v26 }
  0x25   :  { %556 = vst [vmem:[#allocation2 + $0x90] sm:$0xff] %v492_v32  ;;  %v494_v42 = vmax.f32 %v430_v33, 0.0  ;;  %v431_v43 = vadd.f32 %v791_v21, %v239_v34  ;;  %v240_v44 = vadd.f32 %v1008_v3, %v172_v35  ;;  %v798_v45 = vunpack.c.l.bf16 %v918_v31  ;;  %v892_v34 = vld [vmem:[%s1330_s0 + $0x88] sm:$0xff]  }
  0x26   :  { %557 = vst [vmem:[#allocation2 + $0x98] sm:$0xff] %v493_v36  ;;  %v241_v46 = vadd.f32 %v1008_v3, %v173_v37  ;;  %v174_v47 = vmul.f32 %v1003_v1, %v670_v39  ;;  %v671_v48 = vunpack.c.h.bf16 %v887_v26  ;;  %v799_v49 = vunpack.c.h.bf16 %v918_v31  ;;  %v923_v35 = vld [vmem:[%s1331_s1 + $0x88] sm:$0xff]  }
  0x27   :  { %558 = vst [vmem:[#allocation2 + $0xa0] sm:$0xff] %v494_v42  ;;  %v495_v51 = vmax.f32 %v431_v43, 0.0  ;;  %v432_v52 = vadd.f32 %v794_v29, %v240_v44  ;;  %v674_v53 = vunpack.c.l.bf16 %v888_v40  ;;  %v802_v54 = vunpack.c.l.bf16 %v919_v41  ;;  %v893_v44 = vld [vmem:[%s1330_s0 + $0x90] sm:$0xff]  }
  0x28   :  { %v433_v55 = vadd.f32 %v795_v38, %v241_v46  ;;  %v242_v56 = vadd.f32 %v1008_v3, %v174_v47  ;;  %v175_v57 = vmul.f32 %v1003_v1, %v671_v48  ;;  %v675_v58 = vunpack.c.h.bf16 %v888_v40 }
  0x29   :  { %559 = vst [vmem:[#allocation2 + $0xa8] sm:$0xff] %v495_v51  ;;  %v496_v60 = vmax.f32 %v432_v52, 0.0  ;;  %v176_v61 = vmul.f32 %v1003_v1, %v674_v53  ;;  %v803_v62 = vunpack.c.h.bf16 %v919_v41  ;;  %v678_v63 = vunpack.c.l.bf16 %v889_v50  ;;  %v924_v53 = vld [vmem:[%s1331_s1 + $0x90] sm:$0xff]  }
  0x2a   :  { %v497_v0 = vmax.f32 %v433_v55, 0.0  ;;  %v434_v2 = vadd.f32 %v798_v45, %v242_v56  ;;  %v243_v4 = vadd.f32 %v1008_v3, %v175_v57  ;;  %v177_v5 = vmul.f32 %v1003_v1, %v675_v58 }
  0x2b   :  { %560 = vst [vmem:[#allocation2 + $0xb0] sm:$0xff] %v496_v60  ;;  %v244_v7 = vadd.f32 %v1008_v3, %v176_v61  ;;  %v178_v8 = vmul.f32 %v1003_v1, %v678_v63  ;;  %v806_v9 = vunpack.c.l.bf16 %v920_v59  ;;  %v679_v10 = vunpack.c.h.bf16 %v889_v50 }
  0x2c   :  { %561 = vst [vmem:[#allocation2 + $0xb8] sm:$0xff] %v497_v0  ;;  %v498_v12 = vmax.f32 %v434_v2, 0.0  ;;  %v435_v13 = vadd.f32 %v799_v49, %v243_v4  ;;  %v245_v14 = vadd.f32 %v1008_v3, %v177_v5  ;;  %v807_v15 = vunpack.c.h.bf16 %v920_v59  ;;  %v925_v5 = vld [vmem:[%s1331_s1 + $0x98] sm:$0xff]  }
  0x2d   :  { %v436_v16 = vadd.f32 %v802_v54, %v244_v7  ;;  %v246_v17 = vadd.f32 %v1008_v3, %v178_v8  ;;  %v179_v18 = vmul.f32 %v1003_v1, %v679_v10  ;;  %v682_v19 = vunpack.c.l.bf16 %v890_v6 }
  0x2e   :  { %562 = vst [vmem:[#allocation2 + $0xc0] sm:$0xff] %v498_v12  ;;  %v499_v21 = vmax.f32 %v435_v13, 0.0  ;;  %v437_v22 = vadd.f32 %v803_v62, %v245_v14  ;;  %v810_v23 = vunpack.c.l.bf16 %v921_v11  ;;  %v683_v24 = vunpack.c.h.bf16 %v890_v6  ;;  %v894_v62 = vld [vmem:[%s1330_s0 + $0x98] sm:$0xff]   ;;  %v895_v14 = vld [vmem:[%s1330_s0 + $0xa0] sm:$0xff]  }
  0x2f   :  { %v500_v26 = vmax.f32 %v436_v16, 0.0  ;;  %v438_v27 = vadd.f32 %v806_v9, %v246_v17  ;;  %v247_v28 = vadd.f32 %v1008_v3, %v179_v18  ;;  %v180_v29 = vmul.f32 %v1003_v1, %v682_v19  ;;  %v926_v19 = vld [vmem:[%s1331_s1 + $0xa0] sm:$0xff]  }
  0x30   :  { %563 = vst [vmem:[#allocation2 + $0xc8] sm:$0xff] %v499_v21  ;;  %v501_v30 = vmax.f32 %v437_v22, 0.0  ;;  %v181_v31 = vmul.f32 %v1003_v1, %v683_v24  ;;  %v811_v32 = vunpack.c.h.bf16 %v921_v11  ;;  %v686_v33 = vunpack.c.l.bf16 %v891_v20 }
  0x31   :  { %564 = vst [vmem:[#allocation2 + $0xd0] sm:$0xff] %v500_v26  ;;  %v502_v36 = vmax.f32 %v438_v27, 0.0  ;;  %v439_v37 = vadd.f32 %v807_v15, %v247_v28  ;;  %v248_v38 = vadd.f32 %v1008_v3, %v180_v29  ;;  %v814_v39 = vunpack.c.l.bf16 %v922_v25  ;;  %v896_v28 = vld [vmem:[%s1330_s0 + $0xa8] sm:$0xff]  }
  0x32   :  { %565 = vst [vmem:[#allocation2 + $0xd8] sm:$0xff] %v501_v30  ;;  %v249_v40 = vadd.f32 %v1008_v3, %v181_v31  ;;  %v182_v41 = vmul.f32 %v1003_v1, %v686_v33  ;;  %v687_v42 = vunpack.c.h.bf16 %v891_v20  ;;  %v815_v43 = vunpack.c.h.bf16 %v922_v25  ;;  %v927_v29 = vld [vmem:[%s1331_s1 + $0xa8] sm:$0xff]  }
  0x33   :  { %566 = vst [vmem:[#allocation2 + $0xe0] sm:$0xff] %v502_v36  ;;  %v503_v45 = vmax.f32 %v439_v37, 0.0  ;;  %v440_v46 = vadd.f32 %v810_v23, %v248_v38  ;;  %v690_v47 = vunpack.c.l.bf16 %v892_v34  ;;  %v818_v48 = vunpack.c.l.bf16 %v923_v35  ;;  %v897_v38 = vld [vmem:[%s1330_s0 + $0xb0] sm:$0xff]  }
  0x34   :  { %v441_v49 = vadd.f32 %v811_v32, %v249_v40  ;;  %v250_v50 = vadd.f32 %v1008_v3, %v182_v41  ;;  %v183_v51 = vmul.f32 %v1003_v1, %v687_v42  ;;  %v691_v52 = vunpack.c.h.bf16 %v892_v34 }
  0x35   :  { %567 = vst [vmem:[#allocation2 + $0xe8] sm:$0xff] %v503_v45  ;;  %v504_v54 = vmax.f32 %v440_v46, 0.0  ;;  %v184_v55 = vmul.f32 %v1003_v1, %v690_v47  ;;  %v819_v56 = vunpack.c.h.bf16 %v923_v35  ;;  %v694_v57 = vunpack.c.l.bf16 %v893_v44  ;;  %v928_v47 = vld [vmem:[%s1331_s1 + $0xb0] sm:$0xff]  }
  0x36   :  { %v505_v58 = vmax.f32 %v441_v49, 0.0  ;;  %v442_v59 = vadd.f32 %v814_v39, %v250_v50  ;;  %v251_v60 = vadd.f32 %v1008_v3, %v183_v51  ;;  %v185_v61 = vmul.f32 %v1003_v1, %v691_v52 }
  0x37   :  { %568 = vst [vmem:[#allocation2 + $0xf0] sm:$0xff] %v504_v54  ;;  %v252_v63 = vadd.f32 %v1008_v3, %v184_v55  ;;  %v186_v0 = vmul.f32 %v1003_v1, %v694_v57  ;;  %v822_v2 = vunpack.c.l.bf16 %v924_v53  ;;  %v695_v4 = vunpack.c.h.bf16 %v893_v44 }
  0x38   :  { %569 = vst [vmem:[#allocation2 + $0xf8] sm:$0xff] %v505_v58  ;;  %v506_v6 = vmax.f32 %v442_v59, 0.0  ;;  %v443_v7 = vadd.f32 %v815_v43, %v251_v60  ;;  %v253_v8 = vadd.f32 %v1008_v3, %v185_v61  ;;  %v823_v9 = vunpack.c.h.bf16 %v924_v53  ;;  %v929_v61 = vld [vmem:[%s1331_s1 + $0xb8] sm:$0xff]  }
  0x39   :  { %v444_v10 = vadd.f32 %v818_v48, %v252_v63  ;;  %v254_v11 = vadd.f32 %v1008_v3, %v186_v0  ;;  %v187_v12 = vmul.f32 %v1003_v1, %v695_v4  ;;  %v698_v13 = vunpack.c.l.bf16 %v894_v62 }
  0x3a   :  { %570 = vst [vmem:[#allocation2 + $0x100] sm:$0xff] %v506_v6  ;;  %v507_v15 = vmax.f32 %v443_v7, 0.0  ;;  %v445_v16 = vadd.f32 %v819_v56, %v253_v8  ;;  %v826_v17 = vunpack.c.l.bf16 %v925_v5  ;;  %v699_v18 = vunpack.c.h.bf16 %v894_v62  ;;  %v898_v56 = vld [vmem:[%s1330_s0 + $0xb8] sm:$0xff]   ;;  %v899_v8 = vld [vmem:[%s1330_s0 + $0xc0] sm:$0xff]  }
  0x3b   :  { %v508_v20 = vmax.f32 %v444_v10, 0.0  ;;  %v446_v21 = vadd.f32 %v822_v2, %v254_v11  ;;  %v255_v22 = vadd.f32 %v1008_v3, %v187_v12  ;;  %v188_v23 = vmul.f32 %v1003_v1, %v698_v13  ;;  %v930_v13 = vld [vmem:[%s1331_s1 + $0xc0] sm:$0xff]  }
  0x3c   :  { %571 = vst [vmem:[#allocation2 + $0x108] sm:$0xff] %v507_v15  ;;  %v509_v24 = vmax.f32 %v445_v16, 0.0  ;;  %v189_v25 = vmul.f32 %v1003_v1, %v699_v18  ;;  %v827_v26 = vunpack.c.h.bf16 %v925_v5  ;;  %v702_v27 = vunpack.c.l.bf16 %v895_v14 }
  0x3d   :  { %572 = vst [vmem:[#allocation2 + $0x110] sm:$0xff] %v508_v20  ;;  %v510_v30 = vmax.f32 %v446_v21, 0.0  ;;  %v447_v31 = vadd.f32 %v823_v9, %v255_v22  ;;  %v256_v32 = vadd.f32 %v1008_v3, %v188_v23  ;;  %v830_v33 = vunpack.c.l.bf16 %v926_v19  ;;  %v900_v22 = vld [vmem:[%s1330_s0 + $0xc8] sm:$0xff]  }
  0x3e   :  { %573 = vst [vmem:[#allocation2 + $0x118] sm:$0xff] %v509_v24  ;;  %v257_v34 = vadd.f32 %v1008_v3, %v189_v25  ;;  %v190_v35 = vmul.f32 %v1003_v1, %v702_v27  ;;  %v703_v36 = vunpack.c.h.bf16 %v895_v14  ;;  %v831_v37 = vunpack.c.h.bf16 %v926_v19  ;;  %v931_v23 = vld [vmem:[%s1331_s1 + $0xc8] sm:$0xff]  }
  0x3f   :  { %574 = vst [vmem:[#allocation2 + $0x120] sm:$0xff] %v510_v30  ;;  %v511_v39 = vmax.f32 %v447_v31, 0.0  ;;  %v448_v40 = vadd.f32 %v826_v17, %v256_v32  ;;  %v706_v41 = vunpack.c.l.bf16 %v896_v28  ;;  %v834_v42 = vunpack.c.l.bf16 %v927_v29  ;;  %v901_v32 = vld [vmem:[%s1330_s0 + $0xd0] sm:$0xff]  }
  0x40   :  { %v449_v43 = vadd.f32 %v827_v26, %v257_v34  ;;  %v258_v44 = vadd.f32 %v1008_v3, %v190_v35  ;;  %v191_v45 = vmul.f32 %v1003_v1, %v703_v36  ;;  %v707_v46 = vunpack.c.h.bf16 %v896_v28 }
  0x41   :  { %575 = vst [vmem:[#allocation2 + $0x128] sm:$0xff] %v511_v39  ;;  %v512_v48 = vmax.f32 %v448_v40, 0.0  ;;  %v192_v49 = vmul.f32 %v1003_v1, %v706_v41  ;;  %v835_v50 = vunpack.c.h.bf16 %v927_v29  ;;  %v710_v51 = vunpack.c.l.bf16 %v897_v38  ;;  %v932_v41 = vld [vmem:[%s1331_s1 + $0xd0] sm:$0xff]  }
  0x42   :  { %v513_v52 = vmax.f32 %v449_v43, 0.0  ;;  %v450_v53 = vadd.f32 %v830_v33, %v258_v44  ;;  %v259_v54 = vadd.f32 %v1008_v3, %v191_v45  ;;  %v193_v55 = vmul.f32 %v1003_v1, %v707_v46 }
  0x43   :  { %576 = vst [vmem:[#allocation2 + $0x130] sm:$0xff] %v512_v48  ;;  %v260_v57 = vadd.f32 %v1008_v3, %v192_v49  ;;  %v194_v58 = vmul.f32 %v1003_v1, %v710_v51  ;;  %v838_v59 = vunpack.c.l.bf16 %v928_v47  ;;  %v711_v60 = vunpack.c.h.bf16 %v897_v38 }
  0x44   :  { %577 = vst [vmem:[#allocation2 + $0x138] sm:$0xff] %v513_v52  ;;  %v514_v62 = vmax.f32 %v450_v53, 0.0  ;;  %v451_v63 = vadd.f32 %v831_v37, %v259_v54  ;;  %v261_v0 = vadd.f32 %v1008_v3, %v193_v55  ;;  %v839_v2 = vunpack.c.h.bf16 %v928_v47  ;;  %v933_v55 = vld [vmem:[%s1331_s1 + $0xd8] sm:$0xff]  }
  0x45   :  { %v452_v4 = vadd.f32 %v834_v42, %v260_v57  ;;  %v262_v5 = vadd.f32 %v1008_v3, %v194_v58  ;;  %v195_v6 = vmul.f32 %v1003_v1, %v711_v60  ;;  %v714_v7 = vunpack.c.l.bf16 %v898_v56 }
  0x46   :  { %578 = vst [vmem:[#allocation2 + $0x140] sm:$0xff] %v514_v62  ;;  %v515_v9 = vmax.f32 %v451_v63, 0.0  ;;  %v453_v10 = vadd.f32 %v835_v50, %v261_v0  ;;  %v842_v11 = vunpack.c.l.bf16 %v929_v61  ;;  %v715_v12 = vunpack.c.h.bf16 %v898_v56  ;;  %v902_v50 = vld [vmem:[%s1330_s0 + $0xd8] sm:$0xff]   ;;  %v903_v0 = vld [vmem:[%s1330_s0 + $0xe0] sm:$0xff]  }
  0x47   :  { %v516_v14 = vmax.f32 %v452_v4, 0.0  ;;  %v454_v15 = vadd.f32 %v838_v59, %v262_v5  ;;  %v263_v16 = vadd.f32 %v1008_v3, %v195_v6  ;;  %v196_v17 = vmul.f32 %v1003_v1, %v714_v7  ;;  %v934_v7 = vld [vmem:[%s1331_s1 + $0xe0] sm:$0xff]  }
  0x48   :  { %579 = vst [vmem:[#allocation2 + $0x148] sm:$0xff] %v515_v9  ;;  %v517_v18 = vmax.f32 %v453_v10, 0.0  ;;  %v197_v19 = vmul.f32 %v1003_v1, %v715_v12  ;;  %v843_v20 = vunpack.c.h.bf16 %v929_v61  ;;  %v718_v21 = vunpack.c.l.bf16 %v899_v8 }
  0x49   :  { %580 = vst [vmem:[#allocation2 + $0x150] sm:$0xff] %v516_v14  ;;  %v518_v24 = vmax.f32 %v454_v15, 0.0  ;;  %v455_v25 = vadd.f32 %v839_v2, %v263_v16  ;;  %v264_v26 = vadd.f32 %v1008_v3, %v196_v17  ;;  %v846_v27 = vunpack.c.l.bf16 %v930_v13  ;;  %v904_v16 = vld [vmem:[%s1330_s0 + $0xe8] sm:$0xff]  }
  0x4a   :  { %581 = vst [vmem:[#allocation2 + $0x158] sm:$0xff] %v517_v18  ;;  %v265_v28 = vadd.f32 %v1008_v3, %v197_v19  ;;  %v198_v29 = vmul.f32 %v1003_v1, %v718_v21  ;;  %v719_v30 = vunpack.c.h.bf16 %v899_v8  ;;  %v847_v31 = vunpack.c.h.bf16 %v930_v13  ;;  %v935_v17 = vld [vmem:[%s1331_s1 + $0xe8] sm:$0xff]  }
  0x4b   :  { %582 = vst [vmem:[#allocation2 + $0x160] sm:$0xff] %v518_v24  ;;  %v519_v33 = vmax.f32 %v455_v25, 0.0  ;;  %v456_v34 = vadd.f32 %v842_v11, %v264_v26  ;;  %v722_v35 = vunpack.c.l.bf16 %v900_v22  ;;  %v850_v36 = vunpack.c.l.bf16 %v931_v23  ;;  %v905_v26 = vld [vmem:[%s1330_s0 + $0xf0] sm:$0xff]  }
  0x4c   :  { %v457_v37 = vadd.f32 %v843_v20, %v265_v28  ;;  %v266_v38 = vadd.f32 %v1008_v3, %v198_v29  ;;  %v199_v39 = vmul.f32 %v1003_v1, %v719_v30  ;;  %v723_v40 = vunpack.c.h.bf16 %v900_v22 }
  0x4d   :  { %583 = vst [vmem:[#allocation2 + $0x168] sm:$0xff] %v519_v33  ;;  %v520_v42 = vmax.f32 %v456_v34, 0.0  ;;  %v200_v43 = vmul.f32 %v1003_v1, %v722_v35  ;;  %v851_v44 = vunpack.c.h.bf16 %v931_v23  ;;  %v726_v45 = vunpack.c.l.bf16 %v901_v32  ;;  %v936_v35 = vld [vmem:[%s1331_s1 + $0xf0] sm:$0xff]  }
  0x4e   :  { %v521_v46 = vmax.f32 %v457_v37, 0.0  ;;  %v458_v47 = vadd.f32 %v846_v27, %v266_v38  ;;  %v267_v48 = vadd.f32 %v1008_v3, %v199_v39  ;;  %v201_v49 = vmul.f32 %v1003_v1, %v723_v40 }
  0x4f   :  { %584 = vst [vmem:[#allocation2 + $0x170] sm:$0xff] %v520_v42  ;;  %v268_v51 = vadd.f32 %v1008_v3, %v200_v43  ;;  %v202_v52 = vmul.f32 %v1003_v1, %v726_v45  ;;  %v854_v53 = vunpack.c.l.bf16 %v932_v41  ;;  %v727_v54 = vunpack.c.h.bf16 %v901_v32 }
  0x50   :  { %585 = vst [vmem:[#allocation2 + $0x178] sm:$0xff] %v521_v46  ;;  %v522_v56 = vmax.f32 %v458_v47, 0.0  ;;  %v459_v57 = vadd.f32 %v847_v31, %v267_v48  ;;  %v269_v58 = vadd.f32 %v1008_v3, %v201_v49  ;;  %v855_v59 = vunpack.c.h.bf16 %v932_v41  ;;  %v937_v49 = vld [vmem:[%s1331_s1 + $0xf8] sm:$0xff]  }
  0x51   :  { %v460_v60 = vadd.f32 %v850_v36, %v268_v51  ;;  %v270_v61 = vadd.f32 %v1008_v3, %v202_v52  ;;  %v203_v62 = vmul.f32 %v1003_v1, %v727_v54  ;;  %v730_v63 = vunpack.c.l.bf16 %v902_v50 }
  0x52   :  { %586 = vst [vmem:[#allocation2 + $0x180] sm:$0xff] %v522_v56  ;;  %v523_v2 = vmax.f32 %v459_v57, 0.0  ;;  %v461_v4 = vadd.f32 %v851_v44, %v269_v58  ;;  %v858_v5 = vunpack.c.l.bf16 %v933_v55  ;;  %v731_v6 = vunpack.c.h.bf16 %v902_v50  ;;  %v906_v44 = vld [vmem:[%s1330_s0 + $0xf8] sm:$0xff]   ;;  %s969_s0 = smov [#allocation2]  }
  0x53   :  { %v524_v8 = vmax.f32 %v460_v60, 0.0  ;;  %v462_v9 = vadd.f32 %v854_v53, %v270_v61  ;;  %v271_v10 = vadd.f32 %v1008_v3, %v203_v62  ;;  %v204_v11 = vmul.f32 %v1003_v1, %v730_v63  ;;  %s606_s1 = sshll.u32 %s969_s0, 4  ;;  %s607_s1 = int_to_ptr.vmem [resolvable:$true] %s606_s1 }
  0x54   :  { %587 = vst [vmem:[#allocation2 + $0x188] sm:$0xff] %v523_v2  ;;  %v525_v12 = vmax.f32 %v461_v4, 0.0  ;;  %v205_v13 = vmul.f32 %v1003_v1, %v731_v6  ;;  %v859_v14 = vunpack.c.h.bf16 %v933_v55  ;;  %v734_v15 = vunpack.c.l.bf16 %v903_v0 }
  0x55   :  { %588 = vst [vmem:[#allocation2 + $0x190] sm:$0xff] %v524_v8  ;;  %v526_v18 = vmax.f32 %v462_v9, 0.0  ;;  %v463_v19 = vadd.f32 %v855_v59, %v271_v10  ;;  %v272_v20 = vadd.f32 %v1008_v3, %v204_v11  ;;  %v862_v21 = vunpack.c.l.bf16 %v934_v7 }
  0x56   :  { %589 = vst [vmem:[#allocation2 + $0x198] sm:$0xff] %v525_v12  ;;  %v273_v22 = vadd.f32 %v1008_v3, %v205_v13  ;;  %v206_v23 = vmul.f32 %v1003_v1, %v734_v15  ;;  %v735_v24 = vunpack.c.h.bf16 %v903_v0  ;;  %v863_v25 = vunpack.c.h.bf16 %v934_v7 }
  0x57   :  { %590 = vst [vmem:[#allocation2 + $0x1a0] sm:$0xff] %v526_v18  ;;  %v527_v27 = vmax.f32 %v463_v19, 0.0  ;;  %v464_v28 = vadd.f32 %v858_v5, %v272_v20  ;;  %v738_v29 = vunpack.c.l.bf16 %v904_v16  ;;  %v866_v30 = vunpack.c.l.bf16 %v935_v17 }
  0x58   :  { %v465_v31 = vadd.f32 %v859_v14, %v273_v22  ;;  %v274_v32 = vadd.f32 %v1008_v3, %v206_v23  ;;  %v207_v33 = vmul.f32 %v1003_v1, %v735_v24  ;;  %v739_v34 = vunpack.c.h.bf16 %v904_v16 }
  0x59   :  { %591 = vst [vmem:[#allocation2 + $0x1a8] sm:$0xff] %v527_v27  ;;  %v528_v36 = vmax.f32 %v464_v28, 0.0  ;;  %v208_v37 = vmul.f32 %v1003_v1, %v738_v29  ;;  %v867_v38 = vunpack.c.h.bf16 %v935_v17  ;;  %v742_v39 = vunpack.c.l.bf16 %v905_v26 }
  0x5a   :  { %v529_v40 = vmax.f32 %v465_v31, 0.0  ;;  %v466_v41 = vadd.f32 %v862_v21, %v274_v32  ;;  %v275_v42 = vadd.f32 %v1008_v3, %v207_v33  ;;  %v209_v43 = vmul.f32 %v1003_v1, %v739_v34 }
  0x5b   :  { %592 = vst [vmem:[#allocation2 + $0x1b0] sm:$0xff] %v528_v36  ;;  %v276_v45 = vadd.f32 %v1008_v3, %v208_v37  ;;  %v210_v46 = vmul.f32 %v1003_v1, %v742_v39  ;;  %v870_v47 = vunpack.c.l.bf16 %v936_v35  ;;  %v743_v48 = vunpack.c.h.bf16 %v905_v26 }
  0x5c   :  { %593 = vst [vmem:[#allocation2 + $0x1b8] sm:$0xff] %v529_v40  ;;  %v530_v50 = vmax.f32 %v466_v41, 0.0  ;;  %v467_v51 = vadd.f32 %v863_v25, %v275_v42  ;;  %v277_v52 = vadd.f32 %v1008_v3, %v209_v43  ;;  %v871_v53 = vunpack.c.h.bf16 %v936_v35 }
  0x5d   :  { %v468_v54 = vadd.f32 %v866_v30, %v276_v45  ;;  %v278_v55 = vadd.f32 %v1008_v3, %v210_v46  ;;  %v211_v56 = vmul.f32 %v1003_v1, %v743_v48  ;;  %v746_v57 = vunpack.c.l.bf16 %v906_v44 }
  0x5e   :  { %594 = vst [vmem:[#allocation2 + $0x1c0] sm:$0xff] %v530_v50  ;;  %v531_v58 = vmax.f32 %v467_v51, 0.0  ;;  %v469_v59 = vadd.f32 %v867_v38, %v277_v52  ;;  %v874_v60 = vunpack.c.l.bf16 %v937_v49  ;;  %v747_v61 = vunpack.c.h.bf16 %v906_v44 }
  0x5f   :  { %v532_v62 = vmax.f32 %v468_v54, 0.0  ;;  %v470_v63 = vadd.f32 %v870_v47, %v278_v55  ;;  %v279_v0 = vadd.f32 %v1008_v3, %v211_v56  ;;  %v212_v2 = vmul.f32 %v1003_v1, %v746_v57 }
  0x60   :  { %595 = vst [vmem:[#allocation2 + $0x1c8] sm:$0xff] %v531_v58  ;;  %v533_v4 = vmax.f32 %v469_v59, 0.0  ;;  %v213_v5 = vmul.f32 %v1003_v1, %v747_v61  ;;  %v875_v6 = vunpack.c.h.bf16 %v937_v49 }
  0x61   :  { %596 = vst [vmem:[#allocation2 + $0x1d0] sm:$0xff] %v532_v62  ;;  %v534_v7 = vmax.f32 %v470_v63, 0.0  ;;  %v471_v8 = vadd.f32 %v871_v53, %v279_v0  ;;  %v280_v9 = vadd.f32 %v1008_v3, %v212_v2 }
  0x62   :  { %597 = vst [vmem:[#allocation2 + $0x1d8] sm:$0xff] %v533_v4  ;;  %v281_v10 = vadd.f32 %v1008_v3, %v213_v5 }
  0x63   :  { %598 = vst [vmem:[#allocation2 + $0x1e0] sm:$0xff] %v534_v7  ;;  %v535_v11 = vmax.f32 %v471_v8, 0.0  ;;  %v472_v12 = vadd.f32 %v874_v60, %v280_v9 }
  0x64   :  { %v473_v13 = vadd.f32 %v875_v6, %v281_v10 }
  0x65   :  { %599 = vst [vmem:[#allocation2 + $0x1e8] sm:$0xff] %v535_v11  ;;  %v536_v1 = vmax.f32 %v472_v12, 0.0 }
  0x66   :  { %v537_v14 = vmax.f32 %v473_v13, 0.0 }
  0x67   :  { %600 = vst [vmem:[#allocation2 + $0x1f0] sm:$0xff] %v536_v1 }
  0x68   :  { %601 = vst [vmem:[#allocation2 + $0x1f8] sm:$0xff] %v537_v14 }
  0x69   :  { %614 = dma.vmem_to_hbm [thread:$0]  %s607_s1, 8192, %s609_s9, [#allocation3], %s970_s10, %s970_s10, %s971_s11  }
  0x6a   :  { %967 = dma.done.wait [#allocation3], 8192  }
  0x6b   :  { %968 = vsyncadd [#allocation3], 4294959104 }
  0x6c   :  { %619 = vsyncpa [#allocation3], 1 }

// kernel: bottleneck_forward.6
= control target key start
LH: loop header
LB: loop body
LE: loop exit
PB: predicated region body
PF: predicated region fallthrough
CT: control target
= control target key end

     0   :  { %s2078_s3 = inlined_call_operand.vmem [shape: bf16[128,128], index: 3, kind: input, shape index: {}]   ;;  %s2079_s1 = inlined_call_operand.vmem [shape: f32[1,128], index: 1, kind: input, shape index: {}]   ;;  %s2080_s2 = inlined_call_operand.vmem [shape: f32[1,128], index: 2, kind: input, shape index: {}]   ;;  %s2081_s0 = inlined_call_operand.vmem [shape: bf16[512,128], index: 0, kind: input, shape index: {}]   ;;  %s2082_s4 = inlined_call_operand.vmem [shape: bf16[512,128], index: 4, kind: output, shape index: {0}]   ;;  %s2083_s5 = inlined_call_operand.vmem [shape: f32[1,1,128], index: 5, kind: output, shape index: {1}]   ;;  %s2084_s6 = inlined_call_operand.vmem [shape: f32[1,1,128], index: 6, kind: output, shape index: {2}]  }
   0x1   :  { %v1060_v0 = vld [vmem:[%s2078_s3 + $0x38] sm:$0xff]  ;;  %v1059_v1 = vld [vmem:[%s2078_s3 + $0x30] sm:$0xff]  ;;  %v1058_v2 = vld [vmem:[%s2078_s3 + $0x28] sm:$0xff] }
   0x2   :  { %444 = vmatpush.bf16.msra.mxu0 %v1060_v0  ;;  %1411 = vmatpush.bf16.msra.mxu1 %v1060_v0  ;;  %v1057_v3 = vld [vmem:[%s2078_s3 + $0x20] sm:$0xff]  ;;  %v1056_v8 = vld [vmem:[%s2078_s3 + $0x18] sm:$0xff]  ;;  %v1055_v17 = vld [vmem:[%s2078_s3 + $0x10] sm:$0xff] }
   0x3   :  { %1412 = vmatpush.bf16.msra.mxu2 %v1060_v0  ;;  %1413 = vmatpush.bf16.msra.mxu3 %v1060_v0  ;;  %v1062_v4 = vld [vmem:[%s2081_s0] sm:$0xff]   ;;  %v1054_v22 = vld [vmem:[%s2078_s3 + $0x8] sm:$0xff]  ;;  %v1350_v47 = vld [vmem:[%s2081_s0 + $0x10] sm:$0xff]  }
   0x4   :  { %v1063_v5 = vunpack.c.l.bf16 %v1062_v4  ;;  %v1064_v6 = vunpack.c.h.bf16 %v1062_v4  ;;  %v1490_v7 = vld [vmem:[%s2079_s1] ss:$0 sm:$0xff]  ;;  %v1349_v25 = vld [vmem:[%s2081_s0 + $0x8] sm:$0xff]   ;;  %v1071_v54 = vunpack.c.l.bf16 %v1350_v47  ;;  %v1072_v55 = vunpack.c.h.bf16 %v1350_v47  ;;  %v1358_v60 = vld [vmem:[%s2081_s0 + $0x50] sm:$0xff]  }
   0x5   :  { %v1356_v9 = vld [vmem:[%s2081_s0 + $0x40] sm:$0xff]   ;;  %v1067_v29 = vunpack.c.l.bf16 %v1349_v25  ;;  %v1068_v30 = vunpack.c.h.bf16 %v1349_v25  ;;  %v1357_v33 = vld [vmem:[%s2081_s0 + $0x48] sm:$0xff]   ;;  %v1103_v63 = vunpack.c.l.bf16 %v1358_v60  ;;  %v1104_v0 = vunpack.c.h.bf16 %v1358_v60 }
   0x6   :  { %445 = vmatpush.bf16.msra.mxu0 %v1059_v1  ;;  %1414 = vmatpush.bf16.msra.mxu1 %v1059_v1  ;;  %v1095_v10 = vunpack.c.l.bf16 %v1356_v9  ;;  %v1096_v11 = vunpack.c.h.bf16 %v1356_v9  ;;  %v152_v12 = vmul.f32 %v1490_v7, %v1063_v5  ;;  %v153_v13 = vmul.f32 %v1490_v7, %v1064_v6  ;;  %v1503_v14 = vld [vmem:[%s2080_s2] ss:$0 sm:$0xff] }
   0x7   :  { %1415 = vmatpush.bf16.msra.mxu2 %v1059_v1  ;;  %1416 = vmatpush.bf16.msra.mxu3 %v1059_v1  ;;  %v1053_v28 = vld [vmem:[%s2078_s3] sm:$0xff]  ;;  %v1099_v34 = vunpack.c.l.bf16 %v1357_v33  ;;  %v1100_v35 = vunpack.c.h.bf16 %v1357_v33  ;;  %v154_v36 = vmul.f32 %v1490_v7, %v1067_v29  ;;  %v155_v37 = vmul.f32 %v1490_v7, %v1068_v30 }
   0x8   :  { %v168_v15 = vmul.f32 %v1490_v7, %v1095_v10  ;;  %v169_v16 = vmul.f32 %v1490_v7, %v1096_v11  ;;  %v220_v18 = vadd.f32 %v1503_v14, %v152_v12  ;;  %v221_v19 = vadd.f32 %v1503_v14, %v153_v13  ;;  %v1364_v46 = vld [vmem:[%s2081_s0 + $0x80] sm:$0xff]   ;;  %v1365_v13 = vld [vmem:[%s2081_s0 + $0x88] sm:$0xff]  }
   0x9   :  { %v170_v38 = vmul.f32 %v1490_v7, %v1099_v34  ;;  %v171_v39 = vmul.f32 %v1490_v7, %v1100_v35  ;;  %v222_v40 = vadd.f32 %v1503_v14, %v154_v36  ;;  %v223_v41 = vadd.f32 %v1503_v14, %v155_v37  ;;  %v1372_v47 = vld [vmem:[%s2081_s0 + $0xc0] sm:$0xff]  }
   0xa   :  { %446 = vmatpush.bf16.msra.mxu0 %v1058_v2  ;;  %1417 = vmatpush.bf16.msra.mxu1 %v1058_v2  ;;  %v236_v20 = vadd.f32 %v1503_v14, %v168_v15  ;;  %v237_v21 = vadd.f32 %v1503_v14, %v169_v16  ;;  %v284_v23 = vmax.f32 %v220_v18, 0.0  ;;  %v285_v24 = vmax.f32 %v221_v19, 0.0  ;;  %v1351_v15 = vld [vmem:[%s2081_s0 + $0x18] sm:$0xff]  }
   0xb   :  { %1418 = vmatpush.bf16.msra.mxu2 %v1058_v2  ;;  %1419 = vmatpush.bf16.msra.mxu3 %v1058_v2  ;;  %v238_v42 = vadd.f32 %v1503_v14, %v170_v38  ;;  %v239_v43 = vadd.f32 %v1503_v14, %v171_v39  ;;  %v286_v44 = vmax.f32 %v222_v40, 0.0  ;;  %v287_v45 = vmax.f32 %v223_v41, 0.0 }
   0xc   :  { %v300_v26 = vmax.f32 %v236_v20, 0.0  ;;  %v301_v27 = vmax.f32 %v237_v21, 0.0  ;;  %v348_v31 = vpack.c.bf16 %v285_v24, %v284_v23  ;;  %v1127_v50 = vunpack.c.l.bf16 %v1364_v46 }
   0xd   :  { %v302_v48 = vmax.f32 %v238_v42, 0.0  ;;  %v303_v49 = vmax.f32 %v239_v43, 0.0  ;;  %v1128_v51 = vunpack.c.h.bf16 %v1364_v46  ;;  %v349_v56 = vpack.c.bf16 %v287_v45, %v286_v44  ;;  %v1366_v46 = vld [vmem:[%s2081_s0 + $0x90] sm:$0xff]  }
   0xe   :  { %447 = vmatpush.bf16.msra.mxu0 %v1057_v3  ;;  %1420 = vmatpush.bf16.msra.mxu1 %v1057_v3  ;;  %v356_v32 = vpack.c.bf16 %v301_v27, %v300_v26  ;;  %v184_v52 = vmul.f32 %v1490_v7, %v1127_v50  ;;  %v156_v1 = vmul.f32 %v1490_v7, %v1071_v54  ;;  %v1131_v18 = vunpack.c.l.bf16 %v1365_v13 }
   0xf   :  { %1421 = vmatpush.bf16.msra.mxu2 %v1057_v3  ;;  %1422 = vmatpush.bf16.msra.mxu3 %v1057_v3  ;;  %v185_v53 = vmul.f32 %v1490_v7, %v1128_v51  ;;  %v357_v57 = vpack.c.bf16 %v303_v49, %v302_v48  ;;  %v157_v2 = vmul.f32 %v1490_v7, %v1072_v55  ;;  %v1132_v19 = vunpack.c.h.bf16 %v1365_v13  ;;  %v1352_v48 = vld [vmem:[%s2081_s0 + $0x20] sm:$0xff]  }
  0x10   :  { %v252_v58 = vadd.f32 %v1503_v14, %v184_v52  ;;  %v172_v4 = vmul.f32 %v1490_v7, %v1103_v63  ;;  %v173_v5 = vmul.f32 %v1490_v7, %v1104_v0  ;;  %v224_v6 = vadd.f32 %v1503_v14, %v156_v1  ;;  %v1360_v1 = vld [vmem:[%s2081_s0 + $0x60] sm:$0xff]  }
  0x11   :  { %v253_v59 = vadd.f32 %v1503_v14, %v185_v53  ;;  %v186_v20 = vmul.f32 %v1490_v7, %v1131_v18  ;;  %v187_v21 = vmul.f32 %v1490_v7, %v1132_v19  ;;  %v1076_v23 = vunpack.c.h.bf16 %v1351_v15 }
  0x12   :  { %448 = vmatpush.bf16.msra.mxu0 %v1056_v8  ;;  %1423 = vmatpush.bf16.msra.mxu1 %v1056_v8  ;;  %v316_v61 = vmax.f32 %v252_v58, 0.0  ;;  %v240_v9 = vadd.f32 %v1503_v14, %v172_v4  ;;  %v241_v10 = vadd.f32 %v1503_v14, %v173_v5  ;;  %v288_v11 = vmax.f32 %v224_v6, 0.0 }
  0x13   :  { %1424 = vmatpush.bf16.msra.mxu2 %v1056_v8  ;;  %1425 = vmatpush.bf16.msra.mxu3 %v1056_v8  ;;  %v317_v62 = vmax.f32 %v253_v59, 0.0  ;;  %v225_v8 = vadd.f32 %v1503_v14, %v157_v2  ;;  %v254_v26 = vadd.f32 %v1503_v14, %v186_v20  ;;  %v255_v27 = vadd.f32 %v1503_v14, %v187_v21 }
  0x14   :  { %v304_v16 = vmax.f32 %v240_v9, 0.0  ;;  %v159_v34 = vmul.f32 %v1490_v7, %v1076_v23  ;;  %v1135_v49 = vunpack.c.l.bf16 %v1366_v46  ;;  %v1136_v50 = vunpack.c.h.bf16 %v1366_v46 }
  0x15   :  { %v364_v3 = vpack.c.bf16 %v317_v62, %v316_v61  ;;  %v289_v12 = vmax.f32 %v225_v8, 0.0  ;;  %v318_v29 = vmax.f32 %v254_v26, 0.0  ;;  %v319_v30 = vmax.f32 %v255_v27, 0.0  ;;  %v1353_v26 = vld [vmem:[%s2081_s0 + $0x28] sm:$0xff]  }
  0x16   :  { %449 = vmatpush.bf16.msra.mxu0 %v1055_v17  ;;  %1426 = vmatpush.bf16.msra.mxu1 %v1055_v17  ;;  %v227_v39 = vadd.f32 %v1503_v14, %v159_v34  ;;  %v1159_v51 = vunpack.c.l.bf16 %v1372_v47  ;;  %v1160_v52 = vunpack.c.h.bf16 %v1372_v47  ;;  %v188_v53 = vmul.f32 %v1490_v7, %v1135_v49 }
  0x17   :  { %1427 = vmatpush.bf16.msra.mxu2 %v1055_v17  ;;  %1428 = vmatpush.bf16.msra.mxu3 %v1055_v17  ;;  %v305_v17 = vmax.f32 %v241_v10, 0.0  ;;  %v350_v24 = vpack.c.bf16 %v289_v12, %v288_v11  ;;  %v365_v35 = vpack.c.bf16 %v319_v30, %v318_v29  ;;  %v189_v54 = vmul.f32 %v1490_v7, %v1136_v50 }
  0x18   :  { %v291_v43 = vmax.f32 %v227_v39, 0.0  ;;  %v200_v55 = vmul.f32 %v1490_v7, %v1159_v51  ;;  %v1079_v58 = vunpack.c.l.bf16 %v1352_v48  ;;  %v1080_v59 = vunpack.c.h.bf16 %v1352_v48 }
  0x19   :  { %v358_v25 = vpack.c.bf16 %v305_v17, %v304_v16  ;;  %v256_v61 = vadd.f32 %v1503_v14, %v188_v53  ;;  %v257_v62 = vadd.f32 %v1503_v14, %v189_v54  ;;  %v1111_v9 = vunpack.c.l.bf16 %v1360_v1 }
  0x1a   :  { %450 = vmatpush.bf16.msra.mxu0 %v1054_v22  ;;  %1429 = vmatpush.bf16.msra.mxu1 %v1054_v22  ;;  %v268_v63 = vadd.f32 %v1503_v14, %v200_v55  ;;  %v160_v6 = vmul.f32 %v1490_v7, %v1079_v58  ;;  %v161_v8 = vmul.f32 %v1490_v7, %v1080_v59  ;;  %v1112_v10 = vunpack.c.h.bf16 %v1360_v1  ;;  %v1374_v1 = vld [vmem:[%s2081_s0 + $0xd0] sm:$0xff]  }
  0x1b   :  { %1430 = vmatpush.bf16.msra.mxu2 %v1054_v22  ;;  %1431 = vmatpush.bf16.msra.mxu3 %v1054_v22  ;;  %v1075_v22 = vunpack.c.l.bf16 %v1351_v15  ;;  %v320_v2 = vmax.f32 %v256_v61, 0.0  ;;  %v176_v13 = vmul.f32 %v1490_v7, %v1111_v9 }
  0x1c   :  { %v332_v4 = vmax.f32 %v268_v63, 0.0  ;;  %v177_v15 = vmul.f32 %v1490_v7, %v1112_v10  ;;  %v228_v16 = vadd.f32 %v1503_v14, %v160_v6  ;;  %v229_v17 = vadd.f32 %v1503_v14, %v161_v8 }
  0x1d   :  { %v158_v33 = vmul.f32 %v1490_v7, %v1075_v22  ;;  %v244_v18 = vadd.f32 %v1503_v14, %v176_v13  ;;  %v1168_v6 = vunpack.c.h.bf16 %v1374_v1 }
  0x1e   :  { %451 = vmatpush.bf16.msra.mxu0 %v1053_v28  ;;  %1432 = vmatpush.bf16.msra.mxu1 %v1053_v28  ;;  %v245_v19 = vadd.f32 %v1503_v14, %v177_v15  ;;  %v292_v20 = vmax.f32 %v228_v16, 0.0  ;;  %v293_v21 = vmax.f32 %v229_v17, 0.0 }
  0x1f   :  { %1433 = vmatpush.bf16.msra.mxu2 %v1053_v28  ;;  %1434 = vmatpush.bf16.msra.mxu3 %v1053_v28  ;;  %v1359_v28 = vld [vmem:[%s2081_s0 + $0x58] sm:$0xff]   ;;  %v226_v38 = vadd.f32 %v1503_v14, %v158_v33  ;;  %v308_v22 = vmax.f32 %v244_v18, 0.0 }
  0x20   :  { %v309_v23 = vmax.f32 %v245_v19, 0.0 }
  0x21   :  { %452 = vmatmul.bf16.vlgmr.msra.gmra.mxu0 %v348_v31  ;;  %492 = vmatmul.bf16.vlgmr.msra.gmra.mxu1 %v356_v32  ;;  %v1107_v31 = vunpack.c.l.bf16 %v1359_v28  ;;  %v1108_v32 = vunpack.c.h.bf16 %v1359_v28  ;;  %v290_v42 = vmax.f32 %v226_v38, 0.0 }
  0x22   :  { %532 = vmatmul.bf16.vlgmr.msra.gmra.mxu2 %v364_v3  ;;  %v321_v3 = vmax.f32 %v257_v62, 0.0  ;;  %v360_v38 = vpack.c.bf16 %v309_v23, %v308_v22 }
  0x23   :  { %v174_v36 = vmul.f32 %v1490_v7, %v1107_v31  ;;  %v175_v37 = vmul.f32 %v1490_v7, %v1108_v32 }
  0x24   :  { %v366_v11 = vpack.c.bf16 %v321_v3, %v320_v2  ;;  %v1354_v2 = vld [vmem:[%s2081_s0 + $0x30] sm:$0xff]  }
  0x25   :  { %v242_v40 = vadd.f32 %v1503_v14, %v174_v36  ;;  %v243_v41 = vadd.f32 %v1503_v14, %v175_v37  ;;  %v1083_v36 = vunpack.c.l.bf16 %v1353_v26  ;;  %v1084_v37 = vunpack.c.h.bf16 %v1353_v26 }
  0x26   :  { %v1087_v13 = vunpack.c.l.bf16 %v1354_v2  ;;  %v1088_v15 = vunpack.c.h.bf16 %v1354_v2 }
  0x27   :  { %v306_v44 = vmax.f32 %v242_v40, 0.0  ;;  %v307_v45 = vmax.f32 %v243_v41, 0.0  ;;  %v162_v48 = vmul.f32 %v1490_v7, %v1083_v36  ;;  %v163_v49 = vmul.f32 %v1490_v7, %v1084_v37 }
  0x28   :  { %v164_v26 = vmul.f32 %v1490_v7, %v1087_v13 }
  0x29   :  { %v359_v60 = vpack.c.bf16 %v307_v45, %v306_v44 }
  0x31   :  { %457 = vmatmul.bf16.gmra.mxu0 %v349_v56  ;;  %497 = vmatmul.bf16.gmra.mxu1 %v357_v57  ;;  %v201_v56 = vmul.f32 %v1490_v7, %v1160_v52  ;;  %v351_v57 = vpack.c.bf16 %v291_v43, %v290_v42  ;;  %v1361_v43 = vld [vmem:[%s2081_s0 + $0x68] sm:$0xff]  }
  0x32   :  { %537 = vmatmul.bf16.gmra.mxu2 %v365_v35  ;;  %v352_v35 = vpack.c.bf16 %v293_v21, %v292_v20  ;;  %v1115_v50 = vunpack.c.l.bf16 %v1361_v43  ;;  %v1116_v51 = vunpack.c.h.bf16 %v1361_v43  ;;  %v1362_v21 = vld [vmem:[%s2081_s0 + $0x70] sm:$0xff]   ;;  %v1375_v43 = vld [vmem:[%s2081_s0 + $0xd8] sm:$0xff]  }
  0x33   :  { %v269_v0 = vadd.f32 %v1503_v14, %v201_v56  ;;  %v230_v56 = vadd.f32 %v1503_v14, %v162_v48  ;;  %v1172_v48 = vunpack.c.h.bf16 %v1375_v43 }
  0x34   :  { %v178_v54 = vmul.f32 %v1490_v7, %v1115_v50  ;;  %v179_v55 = vmul.f32 %v1490_v7, %v1116_v51 }
  0x35   :  { %v333_v5 = vmax.f32 %v269_v0, 0.0  ;;  %v1368_v0 = vld [vmem:[%s2081_s0 + $0xa0] sm:$0xff]  }
  0x36   :  { %v246_v58 = vadd.f32 %v1503_v14, %v178_v54  ;;  %v247_v59 = vadd.f32 %v1503_v14, %v179_v55  ;;  %v1143_v3 = vunpack.c.l.bf16 %v1368_v0 }
  0x37   :  { %v372_v12 = vpack.c.bf16 %v333_v5, %v332_v4  ;;  %v1144_v4 = vunpack.c.h.bf16 %v1368_v0  ;;  %v1167_v5 = vunpack.c.l.bf16 %v1374_v1 }
  0x38   :  { %v310_v62 = vmax.f32 %v246_v58, 0.0  ;;  %v311_v63 = vmax.f32 %v247_v59, 0.0  ;;  %v192_v8 = vmul.f32 %v1490_v7, %v1143_v3 }
  0x39   :  { %572 = vmatmul.bf16.vlgmr.msra.gmra.mxu3 %v372_v12  ;;  %v193_v9 = vmul.f32 %v1490_v7, %v1144_v4  ;;  %v204_v10 = vmul.f32 %v1490_v7, %v1167_v5 }
  0x3a   :  { %v361_v16 = vpack.c.bf16 %v311_v63, %v310_v62  ;;  %v260_v17 = vadd.f32 %v1503_v14, %v192_v8 }
  0x3b   :  { %v261_v18 = vadd.f32 %v1503_v14, %v193_v9  ;;  %v272_v19 = vadd.f32 %v1503_v14, %v204_v10 }
  0x3c   :  { %v324_v22 = vmax.f32 %v260_v17, 0.0 }
  0x3d   :  { %v325_v23 = vmax.f32 %v261_v18, 0.0 }
  0x41   :  { %462 = vmatmul.bf16.gmra.mxu0 %v350_v24  ;;  %502 = vmatmul.bf16.gmra.mxu1 %v358_v25  ;;  %v1367_v24 = vld [vmem:[%s2081_s0 + $0x98] sm:$0xff]   ;;  %v1373_v25 = vld [vmem:[%s2081_s0 + $0xc8] sm:$0xff]  }
  0x42   :  { %542 = vmatmul.bf16.gmra.mxu2 %v366_v11  ;;  %v1139_v27 = vunpack.c.l.bf16 %v1367_v24  ;;  %v1140_v28 = vunpack.c.h.bf16 %v1367_v24  ;;  %v1163_v29 = vunpack.c.l.bf16 %v1373_v25  ;;  %v1164_v30 = vunpack.c.h.bf16 %v1373_v25 }
  0x43   :  { %v205_v11 = vmul.f32 %v1490_v7, %v1168_v6  ;;  %v336_v24 = vmax.f32 %v272_v19, 0.0 }
  0x44   :  { %v190_v31 = vmul.f32 %v1490_v7, %v1139_v27  ;;  %v191_v32 = vmul.f32 %v1490_v7, %v1140_v28  ;;  %v202_v33 = vmul.f32 %v1490_v7, %v1163_v29  ;;  %v203_v34 = vmul.f32 %v1490_v7, %v1164_v30 }
  0x45   :  { %v273_v20 = vadd.f32 %v1503_v14, %v205_v11  ;;  %v165_v27 = vmul.f32 %v1490_v7, %v1088_v15  ;;  %v1119_v28 = vunpack.c.l.bf16 %v1362_v21  ;;  %v1120_v29 = vunpack.c.h.bf16 %v1362_v21  ;;  %v1376_v21 = vld [vmem:[%s2081_s0 + $0xe0] sm:$0xff]  }
  0x46   :  { %v258_v39 = vadd.f32 %v1503_v14, %v190_v31  ;;  %v259_v40 = vadd.f32 %v1503_v14, %v191_v32  ;;  %v270_v41 = vadd.f32 %v1503_v14, %v202_v33  ;;  %v271_v42 = vadd.f32 %v1503_v14, %v203_v34 }
  0x47   :  { %v337_v25 = vmax.f32 %v273_v20, 0.0  ;;  %v368_v30 = vpack.c.bf16 %v325_v23, %v324_v22  ;;  %v180_v32 = vmul.f32 %v1490_v7, %v1119_v28  ;;  %v181_v33 = vmul.f32 %v1490_v7, %v1120_v29  ;;  %v1370_v20 = vld [vmem:[%s2081_s0 + $0xb0] sm:$0xff]  }
  0x48   :  { %v322_v44 = vmax.f32 %v258_v39, 0.0  ;;  %v323_v45 = vmax.f32 %v259_v40, 0.0  ;;  %v334_v46 = vmax.f32 %v270_v41, 0.0  ;;  %v335_v47 = vmax.f32 %v271_v42, 0.0  ;;  %v1369_v42 = vld [vmem:[%s2081_s0 + $0xa8] sm:$0xff]  }
  0x49   :  { %v374_v31 = vpack.c.bf16 %v337_v25, %v336_v24  ;;  %v232_v34 = vadd.f32 %v1503_v14, %v164_v26  ;;  %v248_v36 = vadd.f32 %v1503_v14, %v180_v32  ;;  %v249_v37 = vadd.f32 %v1503_v14, %v181_v33 }
  0x4a   :  { %v367_v52 = vpack.c.bf16 %v323_v45, %v322_v44  ;;  %v373_v53 = vpack.c.bf16 %v335_v47, %v334_v46  ;;  %v1355_v44 = vld [vmem:[%s2081_s0 + $0x38] sm:$0xff]   ;;  %v1147_v45 = vunpack.c.l.bf16 %v1369_v42  ;;  %v1148_v46 = vunpack.c.h.bf16 %v1369_v42 }
  0x4b   :  { %v312_v40 = vmax.f32 %v248_v36, 0.0  ;;  %v313_v41 = vmax.f32 %v249_v37, 0.0  ;;  %v1171_v47 = vunpack.c.l.bf16 %v1375_v43  ;;  %v1091_v54 = vunpack.c.l.bf16 %v1355_v44  ;;  %v1371_v42 = vld [vmem:[%s2081_s0 + $0xb8] sm:$0xff]   ;;  %v1377_v43 = vld [vmem:[%s2081_s0 + $0xe8] sm:$0xff]  }
  0x4c   :  { %577 = vmatmul.bf16.gmra.mxu3 %v373_v53  ;;  %v195_v50 = vmul.f32 %v1490_v7, %v1148_v46  ;;  %v1092_v55 = vunpack.c.h.bf16 %v1355_v44  ;;  %v1151_v22 = vunpack.c.l.bf16 %v1370_v20  ;;  %v1152_v23 = vunpack.c.h.bf16 %v1370_v20 }
  0x4d   :  { %v206_v51 = vmul.f32 %v1490_v7, %v1171_v47  ;;  %v166_v2 = vmul.f32 %v1490_v7, %v1091_v54  ;;  %v1175_v24 = vunpack.c.l.bf16 %v1376_v21  ;;  %v1176_v25 = vunpack.c.h.bf16 %v1376_v21 }
  0x4e   :  { %v263_v58 = vadd.f32 %v1503_v14, %v195_v50  ;;  %v167_v3 = vmul.f32 %v1490_v7, %v1092_v55  ;;  %v196_v26 = vmul.f32 %v1490_v7, %v1151_v22  ;;  %v1155_v44 = vunpack.c.l.bf16 %v1371_v42 }
  0x4f   :  { %v274_v59 = vadd.f32 %v1503_v14, %v206_v51  ;;  %v234_v11 = vadd.f32 %v1503_v14, %v166_v2  ;;  %v208_v28 = vmul.f32 %v1490_v7, %v1175_v24  ;;  %v209_v29 = vmul.f32 %v1490_v7, %v1176_v25 }
  0x50   :  { %v327_v63 = vmax.f32 %v263_v58, 0.0  ;;  %v264_v32 = vadd.f32 %v1503_v14, %v196_v26  ;;  %v1179_v46 = vunpack.c.l.bf16 %v1377_v43  ;;  %v1180_v47 = vunpack.c.h.bf16 %v1377_v43 }
  0x51   :  { %467 = vmatmul.bf16.gmra.mxu0 %v351_v57  ;;  %507 = vmatmul.bf16.gmra.mxu1 %v359_v60  ;;  %v231_v57 = vadd.f32 %v1503_v14, %v163_v49  ;;  %v294_v60 = vmax.f32 %v230_v56, 0.0  ;;  %v194_v49 = vmul.f32 %v1490_v7, %v1147_v45  ;;  %v362_v56 = vpack.c.bf16 %v313_v41, %v312_v40 }
  0x52   :  { %547 = vmatmul.bf16.gmra.mxu2 %v367_v52  ;;  %v207_v52 = vmul.f32 %v1490_v7, %v1172_v48  ;;  %v338_v0 = vmax.f32 %v274_v59, 0.0  ;;  %v328_v36 = vmax.f32 %v264_v32, 0.0  ;;  %v1156_v45 = vunpack.c.h.bf16 %v1371_v42 }
  0x53   :  { %v295_v61 = vmax.f32 %v231_v57, 0.0  ;;  %v262_v57 = vadd.f32 %v1503_v14, %v194_v49  ;;  %v198_v48 = vmul.f32 %v1490_v7, %v1155_v44  ;;  %v210_v50 = vmul.f32 %v1490_v7, %v1179_v46 }
  0x54   :  { %v199_v49 = vmul.f32 %v1490_v7, %v1156_v45  ;;  %v211_v51 = vmul.f32 %v1490_v7, %v1180_v47 }
  0x55   :  { %v353_v12 = vpack.c.bf16 %v295_v61, %v294_v60  ;;  %v275_v60 = vadd.f32 %v1503_v14, %v207_v52  ;;  %v1363_v61 = vld [vmem:[%s2081_s0 + $0x78] sm:$0xff]   ;;  %v326_v62 = vmax.f32 %v262_v57, 0.0  ;;  %v266_v52 = vadd.f32 %v1503_v14, %v198_v48 }
  0x56   :  { %v1123_v4 = vunpack.c.l.bf16 %v1363_v61  ;;  %v1124_v5 = vunpack.c.h.bf16 %v1363_v61  ;;  %v278_v54 = vadd.f32 %v1503_v14, %v210_v50  ;;  %v279_v55 = vadd.f32 %v1503_v14, %v211_v51 }
  0x57   :  { %v339_v1 = vmax.f32 %v275_v60, 0.0  ;;  %v369_v6 = vpack.c.bf16 %v327_v63, %v326_v62  ;;  %v330_v58 = vmax.f32 %v266_v52, 0.0 }
  0x58   :  { %v182_v9 = vmul.f32 %v1490_v7, %v1123_v4  ;;  %v183_v10 = vmul.f32 %v1490_v7, %v1124_v5  ;;  %v342_v60 = vmax.f32 %v278_v54, 0.0  ;;  %v343_v61 = vmax.f32 %v279_v55, 0.0 }
  0x59   :  { %v375_v8 = vpack.c.bf16 %v339_v1, %v338_v0 }
  0x5a   :  { %v250_v13 = vadd.f32 %v1503_v14, %v182_v9  ;;  %v251_v15 = vadd.f32 %v1503_v14, %v183_v10  ;;  %v377_v63 = vpack.c.bf16 %v343_v61, %v342_v60 }
  0x5c   :  { %582 = vmatmul.bf16.gmra.mxu3 %v374_v31  ;;  %v314_v18 = vmax.f32 %v250_v13, 0.0  ;;  %v315_v19 = vmax.f32 %v251_v15, 0.0 }
  0x5e   :  { %v363_v31 = vpack.c.bf16 %v315_v19, %v314_v18 }
  0x61   :  { %472 = vmatmul.bf16.gmra.mxu0 %v352_v35  ;;  %512 = vmatmul.bf16.gmra.mxu1 %v360_v38  ;;  %v233_v35 = vadd.f32 %v1503_v14, %v165_v27  ;;  %v296_v38 = vmax.f32 %v232_v34, 0.0  ;;  %v197_v27 = vmul.f32 %v1490_v7, %v1152_v23  ;;  %v276_v34 = vadd.f32 %v1503_v14, %v208_v28 }
  0x62   :  { %552 = vmatmul.bf16.gmra.mxu2 %v368_v30 }
  0x63   :  { %v297_v39 = vmax.f32 %v233_v35, 0.0  ;;  %v265_v33 = vadd.f32 %v1503_v14, %v197_v27  ;;  %v277_v35 = vadd.f32 %v1503_v14, %v209_v29 }
  0x65   :  { %v354_v53 = vpack.c.bf16 %v297_v39, %v296_v38  ;;  %v329_v37 = vmax.f32 %v265_v33, 0.0  ;;  %v340_v38 = vmax.f32 %v276_v34, 0.0  ;;  %v341_v39 = vmax.f32 %v277_v35, 0.0 }
  0x67   :  { %v370_v40 = vpack.c.bf16 %v329_v37, %v328_v36  ;;  %v376_v41 = vpack.c.bf16 %v341_v39, %v340_v38  ;;  %v1379_v37 = vld [vmem:[%s2081_s0 + $0xf8] sm:$0xff]  }
  0x68   :  { %v1187_v39 = vunpack.c.l.bf16 %v1379_v37 }
  0x6a   :  { %v214_v43 = vmul.f32 %v1490_v7, %v1187_v39 }
  0x6c   :  { %587 = vmatmul.bf16.gmra.mxu3 %v375_v8  ;;  %v1378_v8 = vld [vmem:[%s2081_s0 + $0xf0] sm:$0xff]   ;;  %v282_v46 = vadd.f32 %v1503_v14, %v214_v43 }
  0x6d   :  { %v1183_v10 = vunpack.c.l.bf16 %v1378_v8 }
  0x6e   :  { %v346_v52 = vmax.f32 %v282_v46, 0.0 }
  0x71   :  { %477 = vmatmul.bf16.gmra.mxu0 %v353_v12  ;;  %517 = vmatmul.bf16.gmra.mxu1 %v361_v16  ;;  %v235_v12 = vadd.f32 %v1503_v14, %v167_v3  ;;  %v298_v16 = vmax.f32 %v234_v11, 0.0  ;;  %v1184_v11 = vunpack.c.h.bf16 %v1378_v8 }
  0x72   :  { %557 = vmatmul.bf16.gmra.mxu2 %v369_v6 }
  0x73   :  { %v299_v17 = vmax.f32 %v235_v12, 0.0 }
  0x75   :  { %v355_v30 = vpack.c.bf16 %v299_v17, %v298_v16  ;;  %v212_v16 = vmul.f32 %v1490_v7, %v1183_v10  ;;  %v213_v17 = vmul.f32 %v1490_v7, %v1184_v11 }
  0x77   :  { %v280_v19 = vadd.f32 %v1503_v14, %v212_v16  ;;  %v281_v22 = vadd.f32 %v1503_v14, %v213_v17 }
  0x79   :  { %v344_v24 = vmax.f32 %v280_v19, 0.0  ;;  %v345_v25 = vmax.f32 %v281_v22, 0.0 }
  0x7b   :  { %v378_v27 = vpack.c.bf16 %v345_v25, %v344_v24 }
  0x7c   :  { %592 = vmatmul.bf16.gmra.mxu3 %v376_v41 }
  0x81   :  { %482 = vmatmul.bf16.gmra.mxu0 %v354_v53  ;;  %522 = vmatmul.bf16.gmra.mxu1 %v362_v56  ;;  %v267_v53 = vadd.f32 %v1503_v14, %v199_v49 }
  0x82   :  { %562 = vmatmul.bf16.gmra.mxu2 %v370_v40  ;;  %v1188_v40 = vunpack.c.h.bf16 %v1379_v37 }
  0x83   :  { %v331_v59 = vmax.f32 %v267_v53, 0.0 }
  0x84   :  { %v215_v44 = vmul.f32 %v1490_v7, %v1188_v40 }
  0x85   :  { %v371_v62 = vpack.c.bf16 %v331_v59, %v330_v58 }
  0x86   :  { %v283_v49 = vadd.f32 %v1503_v14, %v215_v44 }
  0x88   :  { %v347_v54 = vmax.f32 %v283_v49, 0.0 }
  0x8a   :  { %v379_v7 = vpack.c.bf16 %v347_v54, %v346_v52 }
  0x8c   :  { %597 = vmatmul.bf16.gmra.mxu3 %v377_v63 }
  0x91   :  { %487 = vmatmul.bf16.gmra.mxu0 %v355_v30  ;;  %527 = vmatmul.bf16.gmra.mxu1 %v363_v31 }
  0x92   :  { %567 = vmatmul.bf16.gmra.mxu2 %v371_v62 }
  0x9c   :  { %602 = vmatmul.bf16.gmra.mxu3 %v378_v27 }
  0x9e   :  { %v453_v56 = vpop.f32.mrf.mxu0  ;;  %v1716_v57 = vpop.f32.mrf.mxu1 }
  0x9f   :  { %v613_v0 = vpack.c.bf16 %v453_v56, %v453_v56 }
  0xa1   :  { %v741_v3 = vunpack.c.l.bf16 %v613_v0 }
  0xa3   :  { %v875_v12 = vmul.f32 %v741_v3, %v741_v3 }
  0xa5   :  { %v1741_v36 = vpop.f32.mrf.mxu2 }
  0xa6   :  { %v455_v1 = vpop.f32.mrf.mxu0  ;;  %v1718_v2 = vpop.f32.mrf.mxu1 }
  0xa7   :  { %v614_v4 = vpack.c.bf16 %v455_v1, %v455_v1  ;;  %v1192_v5 = vpack.c.bf16 %v455_v1, %v453_v56  ;;  %v1232_v6 = vpack.c.bf16 %v1718_v2, %v1716_v57 }
  0xa9   :  { %1193 = vst [vmem:[%s2082_s4] sm:$0xff] %v1192_v5   ;;  %v742_v9 = vunpack.c.l.bf16 %v614_v4 }
  0xaa   :  { %1387 = vst [vmem:[%s2082_s4 + $0x40] sm:$0xff] %v1232_v6  }
  0xab   :  { %v805_v13 = vadd.f32 %v742_v9, %v741_v3  ;;  %v876_v15 = vmul.f32 %v742_v9, %v742_v9 }
  0xac   :  { %607 = vmatmul.bf16.gmra.mxu3 %v379_v7 }
  0xad   :  { %v939_v18 = vadd.f32 %v876_v15, %v875_v12  ;;  %v1758_v51 = vpop.f32.mrf.mxu2 }
  0xae   :  { %v458_v20 = vpop.f32.mrf.mxu0  ;;  %v1734_v21 = vpop.f32.mrf.mxu1  ;;  %v1272_v53 = vpack.c.bf16 %v1758_v51, %v1741_v36 }
  0xaf   :  { %v615_v23 = vpack.c.bf16 %v458_v20, %v458_v20 }
  0xb0   :  { %1395 = vst [vmem:[%s2082_s4 + $0x80] sm:$0xff] %v1272_v53  }
  0xb1   :  { %v743_v26 = vunpack.c.l.bf16 %v615_v23 }
  0xb3   :  { %v806_v28 = vadd.f32 %v805_v13, %v743_v26  ;;  %v877_v29 = vmul.f32 %v743_v26, %v743_v26 }
  0xb5   :  { %v940_v30 = vadd.f32 %v939_v18, %v877_v29  ;;  %v1773_v63 = vpop.f32.mrf.mxu2 }
  0xb6   :  { %v460_v31 = vpop.f32.mrf.mxu0  ;;  %v1737_v32 = vpop.f32.mrf.mxu1 }
  0xb7   :  { %v616_v33 = vpack.c.bf16 %v460_v31, %v460_v31  ;;  %v1197_v34 = vpack.c.bf16 %v460_v31, %v458_v20  ;;  %v1237_v35 = vpack.c.bf16 %v1737_v32, %v1734_v21 }
  0xb9   :  { %1380 = vst [vmem:[%s2082_s4 + $0x8] sm:$0xff] %v1197_v34   ;;  %v744_v38 = vunpack.c.l.bf16 %v616_v33 }
  0xba   :  { %1388 = vst [vmem:[%s2082_s4 + $0x48] sm:$0xff] %v1237_v35  }
  0xbb   :  { %v807_v41 = vadd.f32 %v806_v28, %v744_v38  ;;  %v878_v42 = vmul.f32 %v744_v38, %v744_v38 }
  0xbc   :  { %v1796_v11 = vpop.f32.mrf.mxu3 }
  0xbd   :  { %v941_v45 = vadd.f32 %v940_v30, %v878_v42  ;;  %v1783_v3 = vpop.f32.mrf.mxu2 }
  0xbe   :  { %v463_v47 = vpop.f32.mrf.mxu0  ;;  %v1755_v48 = vpop.f32.mrf.mxu1  ;;  %v1277_v4 = vpack.c.bf16 %v1783_v3, %v1773_v63 }
  0xbf   :  { %v617_v50 = vpack.c.bf16 %v463_v47, %v463_v47 }
  0xc0   :  { %1396 = vst [vmem:[%s2082_s4 + $0x88] sm:$0xff] %v1277_v4  }
  0xc1   :  { %v745_v55 = vunpack.c.l.bf16 %v617_v50 }
  0xc3   :  { %v1765_v56 = vadd.f32 %v807_v41, %v745_v55  ;;  %v879_v58 = vmul.f32 %v745_v55, %v745_v55 }
  0xc4   :  { %v1808_v16 = vpop.f32.mrf.mxu3 }
  0xc5   :  { %v1767_v59 = vadd.f32 %v941_v45, %v879_v58  ;;  %v1794_v10 = vpop.f32.mrf.mxu2  ;;  %v1312_v18 = vpack.c.bf16 %v1808_v16, %v1796_v11 }
  0xc6   :  { %v465_v14 = vpop.f32.mrf.mxu0  ;;  %v1769_v60 = vpop.f32.mrf.mxu1 }
  0xc7   :  { %v1202_v61 = vpack.c.bf16 %v465_v14, %v463_v47  ;;  %v1242_v62 = vpack.c.bf16 %v1769_v60, %v1755_v48  ;;  %1403 = vst [vmem:[%s2082_s4 + $0xc0] sm:$0xff] %v1312_v18   ;;  %v618_v40 = vpack.c.bf16 %v465_v14, %v465_v14 }
  0xc9   :  { %1381 = vst [vmem:[%s2082_s4 + $0x10] sm:$0xff] %v1202_v61   ;;  %v746_v42 = vunpack.c.l.bf16 %v618_v40 }
  0xca   :  { %1389 = vst [vmem:[%s2082_s4 + $0x50] sm:$0xff] %v1242_v62  }
  0xcb   :  { %v880_v54 = vmul.f32 %v746_v42, %v746_v42  ;;  %v809_v61 = vadd.f32 %v1765_v56, %v746_v42 }
  0xcd   :  { %v1806_v15 = vpop.f32.mrf.mxu2  ;;  %v943_v62 = vadd.f32 %v1767_v59, %v880_v54 }
  0xce   :  { %v468_v0 = vpop.f32.mrf.mxu0  ;;  %v1781_v1 = vpop.f32.mrf.mxu1  ;;  %v1282_v17 = vpack.c.bf16 %v1806_v15, %v1794_v10 }
  0xcf   :  { %v1826_v25 = vpop.f32.mrf.mxu3  ;;  %v619_v41 = vpack.c.bf16 %v468_v0, %v468_v0 }
  0xd0   :  { %1397 = vst [vmem:[%s2082_s4 + $0x90] sm:$0xff] %v1282_v17  }
  0xd1   :  { %v747_v52 = vunpack.c.l.bf16 %v619_v41 }
  0xd3   :  { %v881_v58 = vmul.f32 %v747_v52, %v747_v52 }
  0xd5   :  { %v1824_v24 = vpop.f32.mrf.mxu2 }
  0xd6   :  { %v470_v5 = vpop.f32.mrf.mxu0  ;;  %v1790_v6 = vpop.f32.mrf.mxu1 }
  0xd7   :  { %v1207_v8 = vpack.c.bf16 %v470_v5, %v468_v0  ;;  %v1247_v9 = vpack.c.bf16 %v1790_v6, %v1781_v1  ;;  %v1838_v29 = vpop.f32.mrf.mxu3  ;;  %v620_v45 = vpack.c.bf16 %v470_v5, %v470_v5 }
  0xd8   :  { %v1317_v31 = vpack.c.bf16 %v1838_v29, %v1826_v25 }
  0xd9   :  { %1382 = vst [vmem:[%s2082_s4 + $0x18] sm:$0xff] %v1207_v8   ;;  %v748_v55 = vunpack.c.l.bf16 %v620_v45 }
  0xda   :  { %1390 = vst [vmem:[%s2082_s4 + $0x58] sm:$0xff] %v1247_v9  }
  0xdb   :  { %1404 = vst [vmem:[%s2082_s4 + $0xc8] sm:$0xff] %v1317_v31   ;;  %v882_v8 = vmul.f32 %v748_v55, %v748_v55 }
  0xdd   :  { %v1836_v28 = vpop.f32.mrf.mxu2 }
  0xde   :  { %v473_v12 = vpop.f32.mrf.mxu0  ;;  %v1804_v13 = vpop.f32.mrf.mxu1  ;;  %v1287_v30 = vpack.c.bf16 %v1836_v28, %v1824_v24 }
  0xdf   :  { %v1856_v39 = vpop.f32.mrf.mxu3  ;;  %v621_v53 = vpack.c.bf16 %v473_v12, %v473_v12 }
  0xe0   :  { %1398 = vst [vmem:[%s2082_s4 + $0x98] sm:$0xff] %v1287_v30   ;;  %v944_v30 = vadd.f32 %v943_v62, %v881_v58 }
  0xe1   :  { %v749_v14 = vunpack.c.l.bf16 %v621_v53 }
  0xe3   :  { %v883_v56 = vmul.f32 %v749_v14, %v749_v14 }
  0xe5   :  { %v1854_v38 = vpop.f32.mrf.mxu2 }
  0xe6   :  { %v475_v19 = vpop.f32.mrf.mxu0  ;;  %v1820_v20 = vpop.f32.mrf.mxu1 }
  0xe7   :  { %v1212_v22 = vpack.c.bf16 %v475_v19, %v473_v12  ;;  %v1252_v23 = vpack.c.bf16 %v1820_v20, %v1804_v13  ;;  %v1868_v47 = vpop.f32.mrf.mxu3  ;;  %v622_v7 = vpack.c.bf16 %v475_v19, %v475_v19 }
  0xe8   :  { %v1322_v50 = vpack.c.bf16 %v1868_v47, %v1856_v39 }
  0xe9   :  { %1383 = vst [vmem:[%s2082_s4 + $0x20] sm:$0xff] %v1212_v22   ;;  %v750_v9 = vunpack.c.l.bf16 %v622_v7  ;;  %v810_v22 = vadd.f32 %v809_v61, %v747_v52 }
  0xea   :  { %1391 = vst [vmem:[%s2082_s4 + $0x60] sm:$0xff] %v1252_v23  }
  0xeb   :  { %1405 = vst [vmem:[%s2082_s4 + $0xd0] sm:$0xff] %v1322_v50   ;;  %v811_v59 = vadd.f32 %v810_v22, %v748_v55 }
  0xed   :  { %v1866_v46 = vpop.f32.mrf.mxu2  ;;  %v812_v40 = vadd.f32 %v811_v59, %v749_v14 }
  0xee   :  { %v478_v26 = vpop.f32.mrf.mxu0  ;;  %v1834_v27 = vpop.f32.mrf.mxu1  ;;  %v1292_v49 = vpack.c.bf16 %v1866_v46, %v1854_v38 }
  0xef   :  { %v623_v0 = vpack.c.bf16 %v478_v26, %v478_v26  ;;  %v1888_v19 = vpop.f32.mrf.mxu3 }
  0xf0   :  { %1399 = vst [vmem:[%s2082_s4 + $0xa0] sm:$0xff] %v1292_v49  }
  0xf5   :  { %v1886_v18 = vpop.f32.mrf.mxu2 }
  0xf6   :  { %v480_v33 = vpop.f32.mrf.mxu0  ;;  %v1850_v34 = vpop.f32.mrf.mxu1 }
  0xf7   :  { %v1217_v35 = vpack.c.bf16 %v480_v33, %v478_v26  ;;  %v1257_v37 = vpack.c.bf16 %v1850_v34, %v1834_v27  ;;  %v624_v23 = vpack.c.bf16 %v480_v33, %v480_v33  ;;  %v751_v26 = vunpack.c.l.bf16 %v623_v0 }
  0xf8   :  { %v813_v33 = vadd.f32 %v812_v40, %v750_v9 }
  0xf9   :  { %1384 = vst [vmem:[%s2082_s4 + $0x28] sm:$0xff] %v1217_v35   ;;  %v945_v35 = vadd.f32 %v944_v30, %v882_v8  ;;  %v752_v41 = vunpack.c.l.bf16 %v624_v23  ;;  %v885_v49 = vmul.f32 %v751_v26, %v751_v26 }
  0xfa   :  { %1392 = vst [vmem:[%s2082_s4 + $0x68] sm:$0xff] %v1257_v37   ;;  %v884_v37 = vmul.f32 %v750_v9, %v750_v9  ;;  %v814_v58 = vadd.f32 %v813_v33, %v751_v26 }
  0xfb   :  { %v946_v42 = vadd.f32 %v945_v35, %v883_v56  ;;  %v886_v61 = vmul.f32 %v752_v41, %v752_v41  ;;  %v630_v56 = vpack.c.bf16 %v1718_v2, %v1718_v2 }
  0xfc   :  { %v815_v8 = vadd.f32 %v814_v58, %v752_v41 }
  0xfd   :  { %v947_v54 = vadd.f32 %v946_v42, %v884_v37  ;;  %v1898_v7 = vpop.f32.mrf.mxu2 }
  0xfe   :  { %v483_v43 = vpop.f32.mrf.mxu0  ;;  %v1864_v44 = vpop.f32.mrf.mxu1  ;;  %v1297_v14 = vpack.c.bf16 %v1898_v7, %v1886_v18 }
  0xff   :  { %v625_v31 = vpack.c.bf16 %v483_v43, %v483_v43 }
 0x100   :  { %1400 = vst [vmem:[%s2082_s4 + $0xa8] sm:$0xff] %v1297_v14  }
 0x101   :  { %v753_v50 = vunpack.c.l.bf16 %v625_v31 }
 0x103   :  { %v887_v9 = vmul.f32 %v753_v50, %v753_v50  ;;  %v816_v23 = vadd.f32 %v815_v8, %v753_v50 }
 0x106   :  { %v485_v4 = vpop.f32.mrf.mxu0  ;;  %v1882_v5 = vpop.f32.mrf.mxu1 }
 0x107   :  { %v1222_v12 = vpack.c.bf16 %v485_v4, %v483_v43  ;;  %v1262_v17 = vpack.c.bf16 %v1882_v5, %v1864_v44  ;;  %v626_v45 = vpack.c.bf16 %v485_v4, %v485_v4  ;;  %v1900_v43 = vpop.f32.mrf.mxu3  ;;  %v948_v4 = vadd.f32 %v947_v54, %v885_v49 }
 0x108   :  { %v1327_v62 = vpack.c.bf16 %v1900_v43, %v1888_v19  ;;  %v631_v49 = vpack.c.bf16 %v1734_v21, %v1734_v21  ;;  %v633_v21 = vpack.c.bf16 %v1755_v48, %v1755_v48 }
 0x109   :  { %1385 = vst [vmem:[%s2082_s4 + $0x30] sm:$0xff] %v1222_v12   ;;  %v754_v0 = vunpack.c.l.bf16 %v626_v45  ;;  %v949_v22 = vadd.f32 %v948_v4, %v886_v61  ;;  %v1920_v45 = vpop.f32.mrf.mxu2 }
 0x10a   :  { %1393 = vst [vmem:[%s2082_s4 + $0x70] sm:$0xff] %v1262_v17   ;;  %v629_v17 = vpack.c.bf16 %v1716_v57, %v1716_v57 }
 0x10b   :  { %1406 = vst [vmem:[%s2082_s4 + $0xd8] sm:$0xff] %v1327_v62   ;;  %v888_v30 = vmul.f32 %v754_v0, %v754_v0  ;;  %v950_v59 = vadd.f32 %v949_v22, %v887_v9  ;;  %v817_v26 = vadd.f32 %v816_v23, %v754_v0  ;;  %v759_v0 = vunpack.c.l.bf16 %v631_v49 }
 0x10c   :  { %v757_v33 = vunpack.c.l.bf16 %v629_v17  ;;  %v634_v9 = vpack.c.bf16 %v1769_v60, %v1769_v60 }
 0x10d   :  { %v951_v2 = vadd.f32 %v950_v59, %v888_v30 }
 0x10e   :  { %v488_v52 = vpop.f32.mrf.mxu0  ;;  %v1896_v53 = vpop.f32.mrf.mxu1  ;;  %v891_v62 = vmul.f32 %v757_v33, %v757_v33 }
 0x10f   :  { %v627_v55 = vpack.c.bf16 %v488_v52, %v488_v52  ;;  %v1922_v57 = vpop.f32.mrf.mxu3 }
 0x111   :  { %v755_v12 = vunpack.c.l.bf16 %v627_v55  ;;  %v758_v55 = vunpack.c.l.bf16 %v630_v56  ;;  %v1938_v30 = vpop.f32.mrf.mxu2  ;;  %v761_v56 = vunpack.c.l.bf16 %v633_v21 }
 0x112   :  { %v1302_v59 = vpack.c.bf16 %v1938_v30, %v1920_v45 }
 0x113   :  { %v889_v37 = vmul.f32 %v755_v12, %v755_v12  ;;  %v818_v50 = vadd.f32 %v817_v26, %v755_v12  ;;  %v892_v12 = vmul.f32 %v758_v55, %v758_v55  ;;  %v893_v26 = vmul.f32 %v759_v0, %v759_v0 }
 0x114   :  { %1401 = vst [vmem:[%s2082_s4 + $0xb0] sm:$0xff] %v1302_v59  }
 0x115   :  { %v952_v58 = vadd.f32 %v951_v2, %v889_v37  ;;  %v895_v2 = vmul.f32 %v761_v56, %v761_v56 }
 0x116   :  { %v490_v31 = vpop.f32.mrf.mxu0  ;;  %v1916_v35 = vpop.f32.mrf.mxu1 }
 0x117   :  { %v628_v40 = vpack.c.bf16 %v490_v31, %v490_v31  ;;  %v1227_v41 = vpack.c.bf16 %v490_v31, %v488_v52  ;;  %v1267_v42 = vpack.c.bf16 %v1916_v35, %v1896_v53  ;;  %v632_v52 = vpack.c.bf16 %v1737_v32, %v1737_v32  ;;  %v1940_v32 = vpop.f32.mrf.mxu3 }
 0x118   :  { %v1332_v48 = vpack.c.bf16 %v1940_v32, %v1922_v57  ;;  %v635_v31 = vpack.c.bf16 %v1781_v1, %v1781_v1  ;;  %v637_v1 = vpack.c.bf16 %v1804_v13, %v1804_v13 }
 0x119   :  { %1386 = vst [vmem:[%s2082_s4 + $0x38] sm:$0xff] %v1227_v41   ;;  %v756_v54 = vunpack.c.l.bf16 %v628_v40  ;;  %v760_v17 = vunpack.c.l.bf16 %v632_v52  ;;  %v762_v40 = vunpack.c.l.bf16 %v634_v9  ;;  %v1960_v21 = vpop.f32.mrf.mxu2 }
 0x11a   :  { %1394 = vst [vmem:[%s2082_s4 + $0x78] sm:$0xff] %v1267_v42   ;;  %v636_v42 = vpack.c.bf16 %v1790_v6, %v1790_v6 }
 0x11b   :  { %v819_v61 = vadd.f32 %v818_v50, %v756_v54  ;;  %v890_v14 = vmul.f32 %v756_v54, %v756_v54  ;;  %v894_v41 = vmul.f32 %v760_v17, %v760_v17  ;;  %1407 = vst [vmem:[%s2082_s4 + $0xe0] sm:$0xff] %v1332_v48   ;;  %v763_v50 = vunpack.c.l.bf16 %v635_v31 }
 0x11c   :  { %v896_v52 = vmul.f32 %v762_v40, %v762_v40  ;;  %v641_v48 = vpack.c.bf16 %v1864_v44, %v1864_v44 }
 0x11d   :  { %v820_v4 = vadd.f32 %v819_v61, %v757_v33  ;;  %v953_v8 = vadd.f32 %v952_v58, %v890_v14  ;;  %v764_v58 = vunpack.c.l.bf16 %v636_v42  ;;  %v638_v61 = vpack.c.bf16 %v1820_v20, %v1820_v20 }
 0x11f   :  { %v821_v22 = vadd.f32 %v820_v4, %v758_v55  ;;  %v954_v23 = vadd.f32 %v953_v8, %v891_v62  ;;  %v1962_v62 = vpop.f32.mrf.mxu3  ;;  %v897_v4 = vmul.f32 %v763_v50, %v763_v50  ;;  %v765_v8 = vunpack.c.l.bf16 %v637_v1 }
 0x121   :  { %v822_v60 = vadd.f32 %v821_v22, %v759_v0  ;;  %v955_v37 = vadd.f32 %v954_v23, %v892_v12  ;;  %v639_v0 = vpack.c.bf16 %v1834_v27, %v1834_v27  ;;  %v640_v12 = vpack.c.bf16 %v1850_v34, %v1850_v34  ;;  %v1972_v42 = vpop.f32.mrf.mxu2 }
 0x122   :  { %v766_v22 = vunpack.c.l.bf16 %v638_v61  ;;  %v899_v59 = vmul.f32 %v765_v8, %v765_v8  ;;  %v644_v61 = vpack.c.bf16 %v1916_v35, %v1916_v35 }
 0x123   :  { %v823_v33 = vadd.f32 %v822_v60, %v760_v17  ;;  %v956_v49 = vadd.f32 %v955_v37, %v893_v26  ;;  %v898_v17 = vmul.f32 %v764_v58, %v764_v58  ;;  %v768_v60 = vunpack.c.l.bf16 %v640_v12 }
 0x124   :  { %v900_v27 = vmul.f32 %v766_v22, %v766_v22 }
 0x125   :  { %v824_v54 = vadd.f32 %v823_v33, %v761_v56  ;;  %v957_v55 = vadd.f32 %v956_v49, %v894_v41  ;;  %v767_v56 = vunpack.c.l.bf16 %v639_v0  ;;  %v642_v41 = vpack.c.bf16 %v1882_v5, %v1882_v5 }
 0x126   :  { %v1307_v49 = vpack.c.bf16 %v1972_v42, %v1960_v21 }
 0x127   :  { %v825_v14 = vadd.f32 %v824_v54, %v762_v40  ;;  %v958_v6 = vadd.f32 %v957_v55, %v895_v2  ;;  %v1974_v34 = vpop.f32.mrf.mxu3  ;;  %v901_v33 = vmul.f32 %v767_v56, %v767_v56  ;;  %v769_v2 = vunpack.c.l.bf16 %v641_v48 }
 0x128   :  { %v1337_v44 = vpack.c.bf16 %v1974_v34, %v1962_v62  ;;  %v643_v54 = vpack.c.bf16 %v1896_v53, %v1896_v53  ;;  %v902_v55 = vmul.f32 %v768_v60, %v768_v60  ;;  %1402 = vst [vmem:[%s2082_s4 + $0xb8] sm:$0xff] %v1307_v49   ;;  %v648_v48 = vpack.c.bf16 %v1783_v3, %v1783_v3 }
 0x129   :  { %v959_v9 = vadd.f32 %v958_v6, %v896_v52  ;;  %v826_v13 = vadd.f32 %v825_v14, %v763_v50  ;;  %v645_v14 = vpack.c.bf16 %v1741_v36, %v1741_v36  ;;  %v903_v53 = vmul.f32 %v769_v2, %v769_v2 }
 0x12a   :  { %1408 = vst [vmem:[%s2082_s4 + $0xe8] sm:$0xff] %v1337_v44   ;;  %v776_v49 = vunpack.c.l.bf16 %v648_v48 }
 0x12b   :  { %v827_v23 = vadd.f32 %v826_v13, %v764_v58  ;;  %v960_v20 = vadd.f32 %v959_v9, %v897_v4  ;;  %v770_v58 = vunpack.c.l.bf16 %v642_v41  ;;  %v771_v4 = vunpack.c.l.bf16 %v643_v54 }
 0x12c   :  { %v773_v35 = vunpack.c.l.bf16 %v645_v14 }
 0x12d   :  { %v828_v26 = vadd.f32 %v827_v23, %v765_v8  ;;  %v961_v31 = vadd.f32 %v960_v20, %v898_v17  ;;  %v646_v8 = vpack.c.bf16 %v1758_v51, %v1758_v51  ;;  %v904_v12 = vmul.f32 %v770_v58, %v770_v58 }
 0x12e   :  { %v772_v17 = vunpack.c.l.bf16 %v644_v61  ;;  %v647_v23 = vpack.c.bf16 %v1773_v63, %v1773_v63  ;;  %v905_v36 = vmul.f32 %v771_v4, %v771_v4  ;;  %v650_v63 = vpack.c.bf16 %v1806_v15, %v1806_v15 }
 0x12f   :  { %v829_v37 = vadd.f32 %v828_v26, %v766_v22  ;;  %v962_v40 = vadd.f32 %v961_v31, %v899_v59  ;;  %v1994_v22 = vpop.f32.mrf.mxu3  ;;  %v774_v59 = vunpack.c.l.bf16 %v646_v8  ;;  %v910_v15 = vmul.f32 %v776_v49, %v776_v49 }
 0x130   :  { %v906_v51 = vmul.f32 %v772_v17, %v772_v17 }
 0x131   :  { %v830_v50 = vadd.f32 %v829_v37, %v767_v56  ;;  %v963_v1 = vadd.f32 %v962_v40, %v900_v27  ;;  %v907_v27 = vmul.f32 %v773_v35, %v773_v35  ;;  %v775_v37 = vunpack.c.l.bf16 %v647_v23 }
 0x133   :  { %v831_v5 = vadd.f32 %v830_v50, %v768_v60  ;;  %v964_v52 = vadd.f32 %v963_v1, %v901_v33  ;;  %v649_v60 = vpack.c.bf16 %v1794_v10, %v1794_v10  ;;  %v908_v33 = vmul.f32 %v774_v59, %v774_v59 }
 0x134   :  { %v909_v54 = vmul.f32 %v775_v37, %v775_v37  ;;  %v651_v10 = vpack.c.bf16 %v1824_v24, %v1824_v24 }
 0x135   :  { %v832_v6 = vadd.f32 %v831_v5, %v769_v2  ;;  %v965_v0 = vadd.f32 %v964_v52, %v902_v55  ;;  %v777_v3 = vunpack.c.l.bf16 %v649_v60  ;;  %v778_v52 = vunpack.c.l.bf16 %v650_v63 }
 0x137   :  { %v966_v9 = vadd.f32 %v965_v0, %v903_v53  ;;  %v833_v13 = vadd.f32 %v832_v6, %v770_v58  ;;  %v2004_v50 = vpop.f32.mrf.mxu3  ;;  %v652_v58 = vpack.c.bf16 %v1836_v28, %v1836_v28  ;;  %v911_v6 = vmul.f32 %v777_v3, %v777_v3 }
 0x138   :  { %v1342_v1 = vpack.c.bf16 %v2004_v50, %v1994_v22  ;;  %v779_v53 = vunpack.c.l.bf16 %v651_v10  ;;  %v653_v0 = vpack.c.bf16 %v1854_v38, %v1854_v38  ;;  %v912_v8 = vmul.f32 %v778_v52, %v778_v52 }
 0x139   :  { %v967_v20 = vadd.f32 %v966_v9, %v904_v12  ;;  %v834_v56 = vadd.f32 %v833_v13, %v771_v4  ;;  %v780_v9 = vunpack.c.l.bf16 %v652_v58  ;;  %v654_v13 = vpack.c.bf16 %v1866_v46, %v1866_v46 }
 0x13a   :  { %1409 = vst [vmem:[%s2082_s4 + $0xf0] sm:$0xff] %v1342_v1   ;;  %v655_v28 = vpack.c.bf16 %v1886_v18, %v1886_v18  ;;  %v913_v23 = vmul.f32 %v779_v53, %v779_v53  ;;  %v656_v38 = vpack.c.bf16 %v1898_v7, %v1898_v7 }
 0x13b   :  { %v968_v26 = vadd.f32 %v967_v20, %v905_v36  ;;  %v835_v31 = vadd.f32 %v834_v56, %v772_v17  ;;  %v781_v20 = vunpack.c.l.bf16 %v653_v0  ;;  %v782_v48 = vunpack.c.l.bf16 %v654_v13 }
 0x13d   :  { %v836_v40 = vadd.f32 %v835_v31, %v773_v35  ;;  %v969_v41 = vadd.f32 %v968_v26, %v906_v51  ;;  %v783_v51 = vunpack.c.l.bf16 %v655_v28  ;;  %v915_v46 = vmul.f32 %v781_v20, %v781_v20 }
 0x13e   :  { %v916_v18 = vmul.f32 %v782_v48, %v782_v48 }
 0x13f   :  { %v837_v44 = vadd.f32 %v836_v40, %v774_v59  ;;  %v970_v2 = vadd.f32 %v969_v41, %v907_v27  ;;  %v2019_v35 = vpop.f32.mrf.mxu3  ;;  %v914_v59 = vmul.f32 %v780_v9, %v780_v9  ;;  %v784_v40 = vunpack.c.l.bf16 %v656_v38 }
 0x140   :  { %v917_v7 = vmul.f32 %v783_v51, %v783_v51 }
 0x141   :  { %v838_v55 = vadd.f32 %v837_v44, %v775_v37  ;;  %v971_v5 = vadd.f32 %v970_v2, %v908_v33  ;;  %v657_v37 = vpack.c.bf16 %v1920_v45, %v1920_v45  ;;  %v658_v33 = vpack.c.bf16 %v1938_v30, %v1938_v30 }
 0x142   :  { %v918_v45 = vmul.f32 %v784_v40, %v784_v40 }
 0x143   :  { %v839_v61 = vadd.f32 %v838_v55, %v776_v49  ;;  %v972_v14 = vadd.f32 %v971_v5, %v909_v54  ;;  %v785_v1 = vunpack.c.l.bf16 %v657_v37  ;;  %v659_v54 = vpack.c.bf16 %v1960_v21, %v1960_v21 }
 0x144   :  { %v786_v30 = vunpack.c.l.bf16 %v658_v33  ;;  %v660_v5 = vpack.c.bf16 %v1972_v42, %v1972_v42  ;;  %v662_v21 = vpack.c.bf16 %v1808_v16, %v1808_v16  ;;  %v665_v16 = vpack.c.bf16 %v1856_v39, %v1856_v39 }
 0x145   :  { %v840_v4 = vadd.f32 %v839_v61, %v777_v3  ;;  %v973_v24 = vadd.f32 %v972_v14, %v910_v15  ;;  %v919_v61 = vmul.f32 %v785_v1, %v785_v1  ;;  %v787_v14 = vunpack.c.l.bf16 %v659_v54 }
 0x146   :  { %v920_v0 = vmul.f32 %v786_v30, %v786_v30  ;;  %v669_v33 = vpack.c.bf16 %v1922_v57, %v1922_v57 }
 0x147   :  { %v841_v12 = vadd.f32 %v840_v4, %v778_v52  ;;  %v974_v17 = vadd.f32 %v973_v24, %v911_v6  ;;  %v2029_v49 = vpop.f32.mrf.mxu3  ;;  %v661_v52 = vpack.c.bf16 %v1796_v11, %v1796_v11  ;;  %v788_v4 = vunpack.c.l.bf16 %v660_v5 }
 0x148   :  { %v1347_v44 = vpack.c.bf16 %v2029_v49, %v2019_v35  ;;  %v921_v13 = vmul.f32 %v787_v14, %v787_v14  ;;  %v664_v11 = vpack.c.bf16 %v1838_v29, %v1838_v29  ;;  %v667_v29 = vpack.c.bf16 %v1888_v19, %v1888_v19 }
 0x149   :  { %v975_v56 = vadd.f32 %v974_v17, %v912_v8  ;;  %v842_v36 = vadd.f32 %v841_v12, %v779_v53  ;;  %v789_v24 = vunpack.c.l.bf16 %v661_v52  ;;  %v663_v8 = vpack.c.bf16 %v1826_v25, %v1826_v25 }
 0x14a   :  { %1410 = vst [vmem:[%s2082_s4 + $0xf8] sm:$0xff] %v1347_v44   ;;  %v790_v12 = vunpack.c.l.bf16 %v662_v21  ;;  %v666_v25 = vpack.c.bf16 %v1868_v47, %v1868_v47  ;;  %v795_v47 = vunpack.c.l.bf16 %v667_v29  ;;  %v670_v19 = vpack.c.bf16 %v1940_v32, %v1940_v32 }
 0x14b   :  { %v843_v26 = vadd.f32 %v842_v36, %v780_v9  ;;  %v976_v31 = vadd.f32 %v975_v56, %v913_v23  ;;  %v922_v23 = vmul.f32 %v788_v4, %v788_v4  ;;  %v791_v56 = vunpack.c.l.bf16 %v663_v8 }
 0x14c   :  { %v794_v37 = vunpack.c.l.bf16 %v666_v25  ;;  %v672_v5 = vpack.c.bf16 %v1974_v34, %v1974_v34  ;;  %v798_v52 = vunpack.c.l.bf16 %v670_v19 }
 0x14d   :  { %v844_v60 = vadd.f32 %v843_v26, %v781_v20  ;;  %v977_v27 = vadd.f32 %v976_v31, %v914_v59  ;;  %v923_v20 = vmul.f32 %v789_v24, %v789_v24  ;;  %v924_v59 = vmul.f32 %v790_v12, %v790_v12 }
 0x14f   :  { %v845_v41 = vadd.f32 %v844_v60, %v782_v48  ;;  %v978_v63 = vadd.f32 %v977_v27, %v915_v46  ;;  %v792_v48 = vunpack.c.l.bf16 %v664_v11  ;;  %v925_v46 = vmul.f32 %v791_v56, %v791_v56 }
 0x151   :  { %v846_v2 = vadd.f32 %v845_v41, %v783_v51  ;;  %v979_v3 = vadd.f32 %v978_v63, %v916_v18  ;;  %v793_v51 = vunpack.c.l.bf16 %v665_v16  ;;  %v926_v39 = vmul.f32 %v792_v48, %v792_v48 }
 0x153   :  { %v847_v10 = vadd.f32 %v846_v2, %v784_v40  ;;  %v980_v55 = vadd.f32 %v979_v3, %v917_v7  ;;  %v668_v40 = vpack.c.bf16 %v1900_v43, %v1900_v43  ;;  %v927_v63 = vmul.f32 %v793_v51, %v793_v51 }
 0x154   :  { %v928_v2 = vmul.f32 %v794_v37, %v794_v37  ;;  %v929_v43 = vmul.f32 %v795_v47, %v795_v47 }
 0x155   :  { %v981_v15 = vadd.f32 %v980_v55, %v918_v45  ;;  %v848_v58 = vadd.f32 %v847_v10, %v785_v1  ;;  %v796_v3 = vunpack.c.l.bf16 %v668_v40  ;;  %v671_v45 = vpack.c.bf16 %v1962_v62, %v1962_v62 }
 0x156   :  { %v797_v10 = vunpack.c.l.bf16 %v669_v33  ;;  %v932_v62 = vmul.f32 %v798_v52, %v798_v52 }
 0x157   :  { %v982_v6 = vadd.f32 %v981_v15, %v919_v61  ;;  %v849_v53 = vadd.f32 %v848_v58, %v786_v30  ;;  %v930_v57 = vmul.f32 %v796_v3, %v796_v3  ;;  %v799_v61 = vunpack.c.l.bf16 %v671_v45 }
 0x159   :  { %v983_v9 = vadd.f32 %v982_v6, %v920_v0  ;;  %v850_v42 = vadd.f32 %v849_v53, %v787_v14  ;;  %v931_v14 = vmul.f32 %v797_v10, %v797_v10  ;;  %v673_v6 = vpack.c.bf16 %v1994_v22, %v1994_v22 }
 0x15a   :  { %v800_v53 = vunpack.c.l.bf16 %v672_v5  ;;  %v933_v8 = vmul.f32 %v799_v61, %v799_v61  ;;  %v676_v22 = vpack.c.bf16 %v2029_v49, %v2029_v49 }
 0x15b   :  { %v984_v17 = vadd.f32 %v983_v9, %v921_v13  ;;  %v851_v28 = vadd.f32 %v850_v42, %v788_v4  ;;  %v801_v42 = vunpack.c.l.bf16 %v673_v6  ;;  %v675_v13 = vpack.c.bf16 %v2019_v35, %v2019_v35 }
 0x15c   :  { %v804_v25 = vunpack.c.l.bf16 %v676_v22 }
 0x15d   :  { %v852_v36 = vadd.f32 %v851_v28, %v789_v24  ;;  %v985_v38 = vadd.f32 %v984_v17, %v922_v23  ;;  %v674_v24 = vpack.c.bf16 %v2004_v50, %v2004_v50 }
 0x15f   :  { %v853_v26 = vadd.f32 %v852_v36, %v790_v12  ;;  %v986_v31 = vadd.f32 %v985_v38, %v923_v20  ;;  %v934_v12 = vmul.f32 %v800_v53, %v800_v53  ;;  %v802_v28 = vunpack.c.l.bf16 %v674_v24 }
 0x160   :  { %v935_v20 = vmul.f32 %v801_v42, %v801_v42 }
 0x161   :  { %v854_v60 = vadd.f32 %v853_v26, %v791_v56  ;;  %v987_v27 = vadd.f32 %v986_v31, %v924_v59  ;;  %v803_v56 = vunpack.c.l.bf16 %v675_v13  ;;  %v936_v38 = vmul.f32 %v802_v28, %v802_v28 }
 0x163   :  { %v855_v18 = vadd.f32 %v854_v60, %v792_v48  ;;  %v988_v41 = vadd.f32 %v987_v27, %v925_v46  ;;  %v937_v26 = vmul.f32 %v803_v56, %v803_v56 }
 0x165   :  { %v856_v7 = vadd.f32 %v855_v18, %v793_v51  ;;  %v989_v44 = vadd.f32 %v988_v41, %v926_v39  ;;  %v938_v51 = vmul.f32 %v804_v25, %v804_v25 }
 0x167   :  { %v857_v1 = vadd.f32 %v856_v7, %v794_v37  ;;  %v990_v54 = vadd.f32 %v989_v44, %v927_v63 }
 0x169   :  { %v991_v55 = vadd.f32 %v990_v54, %v928_v2  ;;  %v858_v30 = vadd.f32 %v857_v1, %v795_v47 }
 0x16b   :  { %v859_v15 = vadd.f32 %v858_v30, %v796_v3  ;;  %v992_v58 = vadd.f32 %v991_v55, %v929_v43 }
 0x16d   :  { %v860_v21 = vadd.f32 %v859_v15, %v797_v10  ;;  %v993_v32 = vadd.f32 %v992_v58, %v930_v57 }
 0x16f   :  { %v861_v0 = vadd.f32 %v860_v21, %v798_v52  ;;  %v994_v4 = vadd.f32 %v993_v32, %v931_v14 }
 0x171   :  { %v862_v34 = vadd.f32 %v861_v0, %v799_v61  ;;  %v995_v9 = vadd.f32 %v994_v4, %v932_v62 }
 0x173   :  { %v863_v11 = vadd.f32 %v862_v34, %v800_v53  ;;  %v996_v17 = vadd.f32 %v995_v9, %v933_v8 }
 0x175   :  { %v997_v23 = vadd.f32 %v996_v17, %v934_v12  ;;  %v864_v16 = vadd.f32 %v863_v11, %v801_v42 }
 0x177   :  { %v998_v36 = vadd.f32 %v997_v23, %v935_v20  ;;  %v865_v50 = vadd.f32 %v864_v16, %v802_v28 }
 0x179   :  { %v999_v59 = vadd.f32 %v998_v36, %v936_v38  ;;  %v866_v48 = vadd.f32 %v865_v50, %v803_v56 }
 0x17b   :  { %v1000_v31 = vadd.f32 %v999_v59, %v937_v26  ;;  %v867_v35 = vadd.f32 %v866_v48, %v804_v25 }
 0x17d   :  { %v868_v46 = vrot.slane %v867_v35, 4  ;;  %v1001_v29 = vadd.f32 %v1000_v31, %v938_v51 }
 0x17f   :  { %v869_v60 = vadd.f32 %v868_v46, %v867_v35  ;;  %v1002_v27 = vrot.slane %v1001_v29, 4 }
 0x181   :  { %v870_v37 = vrot.slane %v869_v60, 2  ;;  %v1003_v49 = vadd.f32 %v1002_v27, %v1001_v29 }
 0x183   :  { %v871_v39 = vadd.f32 %v870_v37, %v869_v60  ;;  %v1004_v40 = vrot.slane %v1003_v49, 2 }
 0x185   :  { %v872_v18 = vrot.slane %v871_v39, 1  ;;  %v1005_v41 = vadd.f32 %v1004_v40, %v1003_v49 }
 0x187   :  { %v873_v63 = vadd.f32 %v872_v18, %v871_v39  ;;  %v1006_v47 = vrot.slane %v1005_v41, 1 }
 0x189   :  { %874 = vst [vmem:[%s2083_s5] sm:$0x1] %v873_v63  ;;  %v1007_v33 = vadd.f32 %v1006_v47, %v1005_v41 }
 0x18b   :  { %1008 = vst [vmem:[%s2084_s6] sm:$0x1] %v1007_v33 }

// kernel: bottleneck_forward.5
= control target key start
LH: loop header
LB: loop body
LE: loop exit
PB: predicated region body
PF: predicated region fallthrough
CT: control target
= control target key end

     0   :  { %s10849_s21 = smov 0   ;;  %s11903_s0 = inlined_call_operand.vmem [shape: bf16[2,16,16,128], index: 0, kind: input, shape index: {}]   ;;  %s11904_s1 = inlined_call_operand.vmem [shape: f32[1,128], index: 1, kind: input, shape index: {}]   ;;  %s11905_s2 = inlined_call_operand.vmem [shape: f32[1,128], index: 2, kind: input, shape index: {}]   ;;  %s11906_s3 = inlined_call_operand.vmem [shape: bf16[9,128,128], index: 3, kind: input, shape index: {}]   ;;  %s11907_s4 = inlined_call_operand.vmem [shape: bf16[2,16,16,128], index: 4, kind: output, shape index: {0}]   ;;  %s11908_s5 = inlined_call_operand.vmem [shape: f32[2,1,128], index: 5, kind: output, shape index: {1}]   ;;  %s11909_s6 = inlined_call_operand.vmem [shape: f32[2,1,128], index: 6, kind: output, shape index: {2}]  }
   0x1 LB: > { %s8592_s22 = sadd.s32 4294967295, %s10811_s21   ;;  %p8596_p0 = scmp.ge.s32.totalorder %s10811_s21, 1  ;;  %s10811_s21 = sphi %s10849_s21, %s17_s21  }
   0x2   : > { %p217_p1 = scmp.lt.s32.totalorder %s10811_s21, 3 }
   0x4   : > { %p218_p2 = pnand %p8596_p0, %p217_p1 }
   0x5   : > { %p253_p3 = scmp.lt.s32.totalorder (!%p218_p2), %s8592_s22, 1 }
   0x6   : > { %221 = sbr.rel (%p218_p2) target bundleno = 1340 (0x53c), region = 36 }
   0xb   : > { %v10272_v0 = vld [vmem:[%s11906_s3 + $0x38] sm:$0xff]  ;;  %v10271_v1 = vld [vmem:[%s11906_s3 + $0x30] sm:$0xff]  ;;  %s11913_s22 = smov (!%p253_p3, %s8592_s22), 1  ;;  %v10270_v2 = vld [vmem:[%s11906_s3 + $0x28] sm:$0xff]  ;;  %v10813_v12 = vmov 0   ;;  %vm316_vm0 = vcmask 1040384  }
   0xc   : > { %10767 = vmatpush.bf16.msra.mxu1 %v10272_v0  ;;  %10768 = vmatpush.bf16.msra.mxu2 %v10272_v0  ;;  %s10231_s27 = sshll.u32 %s11913_s22, 7  ;;  %v10879_v3 = vld [vmem:[%s11904_s1] ss:$0 sm:$0xff]  ;;  %272 = vst [vmem:[#allocation2] sm:$0xf] %v10813_v12  ;;  %v10268_v34 = vld [vmem:[%s11906_s3 + $0x18] sm:$0xff]  ;;  %s265_s20 = scalar_lea.vmem %s11908_s5, %s11913_s22 }
   0xd   : > { %10769 = vmatpush.bf16.msra.mxu3 %v10272_v0  ;;  %1364 = vmatpush.bf16.msra.mxu0 %v10272_v0  ;;  %s10874_s8 = scalar_lea.vmem %s11903_s0, %s10231_s27  ;;  %v10887_v7 = vld [vmem:[%s11905_s2] ss:$0 sm:$0xff]  ;;  %273 = vst [vmem:[#allocation2 + $0x4] sm:$0xf] %v10813_v12  ;;  %v10267_v51 = vld [vmem:[%s11906_s3 + $0x10] sm:$0xff]  ;;  %vm2789_vm4 = vcmask 1046528   ;;  %s11619_s18 = scalar_lea.vmem %s11907_s4, %s10231_s27 }
   0xe   : > { %v10739_v4 = vld [vmem:[%s10874_s8 + $0x18] sm:$0xff]   ;;  %v10269_v19 = vld [vmem:[%s11906_s3 + $0x20] sm:$0xff]  ;;  %274 = vst [vmem:[#allocation2 + $0x8] sm:$0xf] %v10813_v12  ;;  %vm317_vm1 = vsmask.f32 256  ;;  %s268_s25 = scalar_lea.vmem %s11909_s6, %s11913_s22 }
   0xf   : > { %v10743_v5 = vld [vmem:[%s10874_s8 + $0x38] sm:$0xff]   ;;  %v10607_v8 = vunpack.c.l.bf16 %v10739_v4  ;;  %v10608_v9 = vunpack.c.h.bf16 %v10739_v4  ;;  %v10740_v25 = vld [vmem:[%s10874_s8 + $0x20] sm:$0xff]   ;;  %275 = vst [vmem:[#allocation2 + $0xc] sm:$0xf] %v10813_v12  ;;  %vm10926_vm2 = vmand %vm316_vm0, %vm317_vm1  ;;  %vm1842_vm3 = vsmask.f32 7424 }
  0x10   : > { %10770 = vmatpush.bf16.msra.mxu1 %v10271_v1  ;;  %10771 = vmatpush.bf16.msra.mxu2 %v10271_v1  ;;  %v10747_v6 = vld [vmem:[%s10874_s8 + $0x58] sm:$0xff]   ;;  %v10623_v10 = vunpack.c.l.bf16 %v10743_v5  ;;  %v10624_v11 = vunpack.c.h.bf16 %v10743_v5  ;;  %v10611_v29 = vunpack.c.l.bf16 %v10740_v25  ;;  %v10612_v33 = vunpack.c.h.bf16 %v10740_v25  ;;  %276 = vst [vmem:[#allocation2 + $0x110] sm:$0xf] %v10813_v12  ;;  %v10744_v46 = vld [vmem:[%s10874_s8 + $0x40] sm:$0xff]   ;;  %v10266_v5 = vld [vmem:[%s11906_s3 + $0x8] sm:$0xff] }
  0x11   : > { %10772 = vmatpush.bf16.msra.mxu3 %v10271_v1  ;;  %1365 = vmatpush.bf16.msra.mxu0 %v10271_v1  ;;  %v10639_v13 = vunpack.c.l.bf16 %v10747_v6  ;;  %v10640_v14 = vunpack.c.h.bf16 %v10747_v6  ;;  %v438_v15 = vmul.f32 %v10879_v3, %v10607_v8  ;;  %v439_v16 = vmul.f32 %v10879_v3, %v10608_v9  ;;  %277 = vst [vmem:[#allocation2 + $0x114] sm:$0xf] %v10813_v12  ;;  %v10918_v4 = vld [vmem:[%s10874_s8 + $0x60] sm:$0xff]  }
  0x12   : > { %v626_v17 = vmul.f32 %v10879_v3, %v10623_v10  ;;  %v627_v18 = vmul.f32 %v10879_v3, %v10624_v11  ;;  %v485_v38 = vmul.f32 %v10879_v3, %v10611_v29  ;;  %278 = vst [vmem:[#allocation2 + $0x118] sm:$0xf] %v10813_v12  ;;  %v486_v45 = vmul.f32 %v10879_v3, %v10612_v33 }
  0x13   : > { %v814_v20 = vmul.f32 %v10879_v3, %v10639_v13  ;;  %v815_v21 = vmul.f32 %v10879_v3, %v10640_v14  ;;  %v440_v22 = vadd.f32 %v10887_v7, %v438_v15  ;;  %v441_v23 = vadd.f32 %v10887_v7, %v439_v16  ;;  %279 = vst [vmem:[#allocation2 + $0x11c] sm:$0xf] %v10813_v12 }
  0x14   : > { %10773 = vmatpush.bf16.msra.mxu1 %v10270_v2  ;;  %10774 = vmatpush.bf16.msra.mxu2 %v10270_v2  ;;  %v628_v24 = vadd.f32 %v10887_v7, %v626_v17  ;;  %v629_v26 = vadd.f32 %v10887_v7, %v627_v18  ;;  %v487_v50 = vadd.f32 %v10887_v7, %v485_v38  ;;  %v10627_v58 = vunpack.c.l.bf16 %v10744_v46  ;;  %v10392_v38 = vld [vmem:[%s11906_s3 + $0xf8] sm:$0xff] }
  0x15   : > { %10775 = vmatpush.bf16.msra.mxu3 %v10270_v2  ;;  %1366 = vmatpush.bf16.msra.mxu0 %v10270_v2  ;;  %v816_v27 = vadd.f32 %v10887_v7, %v814_v20  ;;  %v817_v28 = vadd.f32 %v10887_v7, %v815_v21  ;;  %v442_v30 = vmax.f32 %v440_v22, 0.0  ;;  %v443_v31 = vmax.f32 %v441_v23, 0.0  ;;  %280 = vst [vmem:[#allocation2 + $0x120] sm:$0xf] %v10813_v12 }
  0x16   : > { %v630_v32 = vmax.f32 %v628_v24, 0.0  ;;  %v631_v35 = vmax.f32 %v629_v26, 0.0  ;;  %v488_v55 = vadd.f32 %v10887_v7, %v486_v45  ;;  %v489_v57 = vmax.f32 %v487_v50, 0.0  ;;  %v10265_v24 = vld [vmem:[%s11906_s3] sm:$0xff] }
  0x17   : > { %v818_v36 = vmax.f32 %v816_v27, 0.0  ;;  %v819_v37 = vmax.f32 %v817_v28, 0.0  ;;  %v444_v39 = vpack.c.bf16 %v442_v30, %v442_v30  ;;  %v445_v40 = vpack.c.bf16 %v443_v31, %v443_v31 }
  0x18   : > { %10776 = vmatpush.bf16.msra.mxu1 %v10269_v19  ;;  %10777 = vmatpush.bf16.msra.mxu2 %v10269_v19  ;;  %v632_v41 = vpack.c.bf16 %v630_v32, %v630_v32  ;;  %v633_v42 = vpack.c.bf16 %v631_v35, %v631_v35  ;;  %v10628_v59 = vunpack.c.h.bf16 %v10744_v46  ;;  %v490_v62 = vmax.f32 %v488_v55, 0.0 }
  0x19   : > { %10778 = vmatpush.bf16.msra.mxu3 %v10269_v19  ;;  %1367 = vmatpush.bf16.msra.mxu0 %v10269_v19  ;;  %v820_v43 = vpack.c.bf16 %v818_v36, %v818_v36  ;;  %v821_v44 = vpack.c.bf16 %v819_v37, %v819_v37  ;;  %v448_v47 = vunpack.c.l.b16 %v444_v39  ;;  %v449_v48 = vunpack.c.l.b16 %v445_v40  ;;  %v10352_v37 = vld [vmem:[%s11906_s3 + $0xb8] sm:$0xff] }
  0x1a   : > { %v636_v49 = vunpack.c.l.b16 %v632_v41  ;;  %v637_v52 = vunpack.c.l.b16 %v633_v42  ;;  %v491_v1 = vpack.c.bf16 %v489_v57, %v489_v57  ;;  %v673_v2 = vmul.f32 %v10879_v3, %v10627_v58  ;;  %v10351_v57 = vld [vmem:[%s11906_s3 + $0xb0] sm:$0xff] }
  0x1b   : > { %v824_v53 = vunpack.c.l.b16 %v820_v43  ;;  %v825_v54 = vunpack.c.l.b16 %v821_v44  ;;  %v450_v56 = vpack.c.b16 %v449_v48, %v448_v47  ;;  %v492_v12 = vpack.c.bf16 %v490_v62, %v490_v62  ;;  %v10312_v43 = vld [vmem:[%s11906_s3 + $0x78] sm:$0xff]  ;;  %v10233_v47 = vld [vmem:[#allocation2] sm:$0xff]  ;;  %v10391_v58 = vld [vmem:[%s11906_s3 + $0xf0] sm:$0xff] }
  0x1c   : > { %10779 = vmatpush.bf16.msra.mxu1 %v10268_v34  ;;  %10780 = vmatpush.bf16.msra.mxu2 %v10268_v34  ;;  %v638_v60 = vpack.c.b16 %v637_v52, %v636_v49  ;;  %v495_v13 = vunpack.c.l.b16 %v491_v1  ;;  %v674_v14 = vmul.f32 %v10879_v3, %v10628_v59  ;;  %v10931_v18 = vadd.f32 %v10887_v7, %v673_v2  ;;  %v10432_v44 = vld [vmem:[%s11906_s3 + $0x138] sm:$0xff]  ;;  %v10311_v62 = vld [vmem:[%s11906_s3 + $0x70] sm:$0xff] }
  0x1d   : > { %10781 = vmatpush.bf16.msra.mxu3 %v10268_v34  ;;  %1368 = vmatpush.bf16.msra.mxu0 %v10268_v34  ;;  %v826_v61 = vpack.c.b16 %v825_v54, %v824_v53  ;;  %v452_v63 = vshrl.u32 %v450_v56, 16  ;;  %v455_v0 = vshll.u32 %v450_v56, 16  ;;  %v10643_v19 = vunpack.c.l.bf16 %v10918_v4 }
  0x1e   : > { %v640_v6 = vshrl.u32 %v638_v60, 16  ;;  %v643_v8 = vshll.u32 %v638_v60, 16  ;;  %v496_v22 = vunpack.c.l.b16 %v492_v12  ;;  %v10644_v23 = vunpack.c.h.bf16 %v10918_v4 }
  0x1f   : > { %v828_v9 = vshrl.u32 %v826_v61, 16  ;;  %v831_v10 = vshll.u32 %v826_v61, 16  ;;  %v454_v11 = vrot.slane %v452_v63, 7  ;;  %v10941_v28 = vadd.f32 %v10887_v7, %v674_v14  ;;  %v10431_v63 = vld [vmem:[%s11906_s3 + $0x130] sm:$0xff] }
  0x20   : > { %10782 = vmatpush.bf16.msra.mxu1 %v10267_v51  ;;  %10783 = vmatpush.bf16.msra.mxu2 %v10267_v51  ;;  %v642_v16 = vrot.slane %v640_v6, 7  ;;  %v10947_v32 = vpack.c.b16 %v496_v22, %v495_v13  ;;  %v677_v2 = vmax.f32 %v10931_v18, 0.0  ;;  %v861_v6 = vmul.f32 %v10879_v3, %v10643_v19 }
  0x21   : > { %10784 = vmatpush.bf16.msra.mxu3 %v10267_v51  ;;  %1369 = vmatpush.bf16.msra.mxu0 %v10267_v51  ;;  %v830_v17 = vrot.slane %v828_v9, 7  ;;  %v457_v20 = vor.u32 %v455_v0, %v454_v11  ;;  %v461_v21 = vsel %vm10926_vm2, %v454_v11, 0  ;;  %v862_v12 = vmul.f32 %v10879_v3, %v10644_v23 }
  0x22   : > { %v645_v25 = vor.u32 %v643_v8, %v642_v16  ;;  %v466_v27 = vunpack.c.l.b16 %v461_v21  ;;  %v467_v30 = vunpack.c.h.b16 %v461_v21  ;;  %v649_v31 = vsel %vm10926_vm2, %v642_v16, 0  ;;  %v10594_v8 = vld [vmem:[%s10874_s8] sm:$0xff]  }
  0x23   : > { %v833_v26 = vor.u32 %v831_v10, %v830_v17  ;;  %v460_v29 = vsel %vm10926_vm2, 0, %v457_v20  ;;  %v654_v48 = vunpack.c.l.b16 %v649_v31  ;;  %v837_v49 = vsel %vm10926_vm2, %v830_v17, 0 }
  0x24   : > { %10785 = vmatpush.bf16.msra.mxu1 %v10266_v5  ;;  %10786 = vmatpush.bf16.msra.mxu2 %v10266_v5  ;;  %v464_v33 = vunpack.c.l.b16 %v460_v29  ;;  %v465_v34 = vunpack.c.h.b16 %v460_v29  ;;  %v648_v35 = vsel %vm10926_vm2, 0, %v645_v25  ;;  %v470_v52 = vpack.c.b16 %v466_v27, %v466_v27 }
  0x25   : > { %10787 = vmatpush.bf16.msra.mxu3 %v10266_v5  ;;  %1370 = vmatpush.bf16.msra.mxu0 %v10266_v5  ;;  %v836_v36 = vsel %vm10926_vm2, 0, %v833_v26  ;;  %v652_v39 = vunpack.c.l.b16 %v648_v35  ;;  %v653_v40 = vunpack.c.h.b16 %v648_v35  ;;  %v655_v53 = vunpack.c.h.b16 %v649_v31 }
  0x26   : > { %v840_v41 = vunpack.c.l.b16 %v836_v36  ;;  %v841_v42 = vunpack.c.h.b16 %v836_v36  ;;  %v468_v45 = vpack.c.b16 %v464_v33, %v464_v33  ;;  %v469_v46 = vpack.c.b16 %v465_v34, %v465_v34  ;;  %478 = vst [vmem:[#allocation2 + $0x48] sm:$0xf] %v470_v52 }
  0x27   : > { %v656_v50 = vpack.c.b16 %v652_v39, %v652_v39  ;;  %v657_v51 = vpack.c.b16 %v653_v40, %v653_v40  ;;  %v471_v56 = vpack.c.b16 %v467_v30, %v467_v30  ;;  %v658_v59 = vpack.c.b16 %v654_v48, %v654_v48 }
  0x28   : > { %10788 = vmatpush.bf16.msra.mxu1 %v10265_v24  ;;  %10789 = vmatpush.bf16.msra.mxu2 %v10265_v24  ;;  %476 = vst [vmem:[#allocation2 + $0x40] sm:$0xf] %v468_v45  ;;  %v844_v54 = vpack.c.b16 %v840_v41, %v840_v41  ;;  %v845_v55 = vpack.c.b16 %v841_v42, %v841_v42  ;;  %v842_v60 = vunpack.c.l.b16 %v837_v49  ;;  %v843_v61 = vunpack.c.h.b16 %v837_v49  ;;  %v10741_v45 = vld [vmem:[%s10874_s8 + $0x28] sm:$0xff]  }
  0x29   : > { %10790 = vmatpush.bf16.msra.mxu3 %v10265_v24  ;;  %1371 = vmatpush.bf16.msra.mxu0 %v10265_v24  ;;  %477 = vst [vmem:[#allocation2 + $0x44] sm:$0xf] %v469_v46  ;;  %v499_v0 = vshrl.u32 %v10947_v32, 16  ;;  %v502_v1 = vshll.u32 %v10947_v32, 16  ;;  %v678_v5 = vmax.f32 %v10941_v28, 0.0  ;;  %v659_v9 = vpack.c.b16 %v655_v53, %v655_v53  ;;  %v11003_v46 = vld [vmem:[%s10874_s8 + $0x48] sm:$0xff]  }
  0x2a   : > { %664 = vst [vmem:[#allocation2 + $0x80] sm:$0xf] %v656_v50  ;;  %v846_v10 = vpack.c.b16 %v842_v60, %v842_v60  ;;  %v679_v13 = vpack.c.bf16 %v677_v2, %v677_v2  ;;  %v863_v16 = vadd.f32 %v10887_v7, %v861_v6  ;;  %v864_v18 = vadd.f32 %v10887_v7, %v862_v12  ;;  %v10430_v6 = vld [vmem:[%s11906_s3 + $0x128] sm:$0xff] }
  0x2b   : > { %665 = vst [vmem:[#allocation2 + $0x84] sm:$0xf] %v657_v51  ;;  %v10987_v11 = vrot.slane %v499_v0, 7  ;;  %v680_v14 = vpack.c.bf16 %v678_v5, %v678_v5  ;;  %v10595_v19 = vunpack.c.l.bf16 %v10594_v8  ;;  %v10596_v20 = vunpack.c.h.bf16 %v10594_v8  ;;  %v10310_v5 = vld [vmem:[%s11906_s3 + $0x68] sm:$0xff] }
  0x2c   : > { %2935 = vmatpush.bf16.msrb.mxu2 %v10352_v37  ;;  %2183 = vmatpush.bf16.msrb.mxu1 %v10312_v43  ;;  %852 = vst [vmem:[#allocation2 + $0xc0] sm:$0xf] %v844_v54  ;;  %v847_v4 = vpack.c.b16 %v843_v61, %v843_v61  ;;  %v683_v21 = vunpack.c.l.b16 %v679_v13  ;;  %v865_v23 = vmax.f32 %v863_v16, 0.0  ;;  %v866_v25 = vmax.f32 %v864_v18, 0.0 }
  0x2d   : > { %3617 = vmatpush.bf16.msrb.mxu3 %v10392_v38  ;;  %4563 = vmatpush.bf16.msrb.mxu0 %v10432_v44  ;;  %853 = vst [vmem:[#allocation2 + $0xc4] sm:$0xf] %v845_v55  ;;  %v504_v17 = vor.u32 %v502_v1, %v10987_v11  ;;  %v684_v22 = vunpack.c.l.b16 %v680_v14  ;;  %v291_v26 = vmul.f32 %v10879_v3, %v10595_v19  ;;  %v10615_v49 = vunpack.c.l.bf16 %v10741_v45 }
  0x2e   : > { %1372 = vmatmul.bf16.vlgmr.msra.gmra.mxu0 %v10233_v47  ;;  %479 = vst [vmem:[#allocation2 + $0x4c] sm:$0xf] %v471_v56  ;;  %v292_v27 = vmul.f32 %v10879_v3, %v10596_v20  ;;  %v867_v32 = vpack.c.bf16 %v865_v23, %v865_v23  ;;  %v868_v33 = vpack.c.bf16 %v866_v25, %v866_v25  ;;  %v10616_v50 = vunpack.c.h.bf16 %v10741_v45  ;;  %v10234_v56 = vld [vmem:[#allocation2 + $0x8] sm:$0xff] }
  0x2f   : > { %v507_v24 = vsel %vm10926_vm2, 0, %v504_v17  ;;  %666 = vst [vmem:[#allocation2 + $0x88] sm:$0xf] %v658_v59  ;;  %v685_v31 = vpack.c.b16 %v684_v22, %v683_v21  ;;  %v296_v34 = vadd.f32 %v10887_v7, %v291_v26  ;;  %v10631_v51 = vunpack.c.l.bf16 %v11003_v46  ;;  %v10390_v59 = vld [vmem:[%s11906_s3 + $0xe8] sm:$0xff] }
  0x30   : > { %2936 = vmatpush.bf16.msrb.mxu2 %v10351_v57  ;;  %2184 = vmatpush.bf16.msrb.mxu1 %v10311_v62  ;;  %v10241_v28 = vld [vmem:[#allocation2 + $0x40] sm:$0xff]  ;;  %v511_v29 = vunpack.c.l.b16 %v507_v24  ;;  %v512_v30 = vunpack.c.h.b16 %v507_v24  ;;  %667 = vst [vmem:[#allocation2 + $0x8c] sm:$0xf] %v659_v9  ;;  %v297_v35 = vadd.f32 %v10887_v7, %v292_v27  ;;  %v871_v41 = vunpack.c.l.b16 %v867_v32 }
  0x31   : > { %3618 = vmatpush.bf16.msrb.mxu3 %v10391_v58  ;;  %4564 = vmatpush.bf16.msrb.mxu0 %v10431_v63  ;;  %854 = vst [vmem:[#allocation2 + $0xc8] sm:$0xf] %v846_v10  ;;  %v687_v39 = vshrl.u32 %v685_v31, 16  ;;  %v690_v40 = vshll.u32 %v685_v31, 16  ;;  %v872_v42 = vunpack.c.l.b16 %v868_v33  ;;  %v298_v43 = vmax.f32 %v296_v34, 0.0  ;;  %v10350_v58 = vld [vmem:[%s11906_s3 + $0xa8] sm:$0xff] }
  0x32   : > { %1412 = vmatmul.bf16.vlgmr.msra.gmra.mxu1 %v10241_v28  ;;  %v10249_v36 = vld [vmem:[#allocation2 + $0x80] sm:$0xff]  ;;  %v515_v37 = vpack.c.b16 %v511_v29, %v511_v29  ;;  %v516_v38 = vpack.c.b16 %v512_v30, %v512_v30  ;;  %855 = vst [vmem:[#allocation2 + $0xcc] sm:$0xf] %v847_v4  ;;  %v299_v44 = vmax.f32 %v297_v35, 0.0  ;;  %v10632_v55 = vunpack.c.h.bf16 %v11003_v46 }
  0x33   : > { %1452 = vmatmul.bf16.vlgmr.msra.gmra.mxu2 %v10249_v36  ;;  %v689_v48 = vrot.slane %v687_v39, 7  ;;  %v873_v52 = vpack.c.b16 %v872_v42, %v871_v41  ;;  %v300_v53 = vpack.c.bf16 %v298_v43, %v298_v43  ;;  %v508_v60 = vsel %vm10926_vm2, %v10987_v11, 0  ;;  %v10349_v46 = vld [vmem:[%s11906_s3 + $0xa0] sm:$0xff] }
  0x34   : > { %v10257_v47 = vld [vmem:[#allocation2 + $0xc0] sm:$0xff]  ;;  %523 = vst [vmem:[#allocation2 + $0x50] sm:$0xf] %v515_v37  ;;  %v301_v54 = vpack.c.bf16 %v299_v44, %v299_v44  ;;  %v532_v61 = vmul.f32 %v10879_v3, %v10615_v49  ;;  %v533_v62 = vmul.f32 %v10879_v3, %v10616_v50  ;;  %2937 = vmatpush.bf16.msrb.mxu2 %v10350_v58  ;;  %v513_v9 = vunpack.c.l.b16 %v508_v60 }
  0x35   : > { %524 = vst [vmem:[#allocation2 + $0x54] sm:$0xf] %v516_v38  ;;  %1492 = vmatmul.bf16.vlgmr.msra.gmra.mxu3 %v10257_v47  ;;  %v692_v57 = vor.u32 %v690_v40, %v689_v48  ;;  %v875_v63 = vshrl.u32 %v873_v52, 16  ;;  %v878_v0 = vshll.u32 %v873_v52, 16  ;;  %v304_v1 = vunpack.c.l.b16 %v300_v53  ;;  %2185 = vmatpush.bf16.msrb.mxu1 %v10310_v5  ;;  %v10242_v32 = vld [vmem:[#allocation2 + $0x48] sm:$0xff] }
  0x36   : > { %v305_v2 = vunpack.c.l.b16 %v301_v54  ;;  %3619 = vmatpush.bf16.msrb.mxu3 %v10390_v59  ;;  %v514_v10 = vunpack.c.h.b16 %v508_v60  ;;  %v696_v11 = vsel %vm10926_vm2, %v689_v48, 0  ;;  %4565 = vmatpush.bf16.msrb.mxu0 %v10430_v6  ;;  %v517_v17 = vpack.c.b16 %v513_v9, %v513_v9  ;;  %v10749_v52 = vld [vmem:[%s10874_s8 + $0x68] sm:$0xff]  }
  0x37   : > { %v695_v8 = vsel %vm10926_vm2, 0, %v692_v57  ;;  %v877_v14 = vrot.slane %v875_v63, 7  ;;  %v701_v19 = vunpack.c.l.b16 %v696_v11  ;;  %v702_v20 = vunpack.c.h.b16 %v696_v11  ;;  %v10250_v41 = vld [vmem:[#allocation2 + $0x88] sm:$0xff] }
  0x38   : > { %v699_v12 = vunpack.c.l.b16 %v695_v8  ;;  %v700_v13 = vunpack.c.h.b16 %v695_v8  ;;  %v306_v16 = vpack.c.b16 %v305_v2, %v304_v1  ;;  %v518_v18 = vpack.c.b16 %v514_v10, %v514_v10  ;;  %525 = vst [vmem:[#allocation2 + $0x58] sm:$0xf] %v517_v17  ;;  %v10737_v63 = vld [vmem:[%s10874_s8 + $0x8] sm:$0xff]   ;;  %2938 = vmatpush.bf16.msrb.mxu2 %v10349_v46 }
  0x39   : > { %v880_v22 = vor.u32 %v878_v0, %v877_v14  ;;  %v705_v25 = vpack.c.b16 %v701_v19, %v701_v19  ;;  %v706_v26 = vpack.c.b16 %v702_v20, %v702_v20  ;;  %v884_v27 = vsel %vm10926_vm2, %v877_v14, 0  ;;  %v10258_v53 = vld [vmem:[#allocation2 + $0xc8] sm:$0xff]  ;;  %v10309_v14 = vld [vmem:[%s11906_s3 + $0x60] sm:$0xff] }
  0x3a   : > { %v703_v4 = vpack.c.b16 %v699_v12, %v699_v12  ;;  %v704_v21 = vpack.c.b16 %v700_v13, %v700_v13  ;;  %v308_v23 = vshrl.u32 %v306_v16, 16  ;;  %v311_v24 = vshll.u32 %v306_v16, 16  ;;  %526 = vst [vmem:[#allocation2 + $0x5c] sm:$0xf] %v518_v18  ;;  %v10429_v16 = vld [vmem:[%s11906_s3 + $0x120] sm:$0xff]  ;;  %2186 = vmatpush.bf16.msrb.mxu1 %v10309_v14  ;;  %v10348_v14 = vld [vmem:[%s11906_s3 + $0x98] sm:$0xff] }
  0x3b   : > { %v883_v28 = vsel %vm10926_vm2, 0, %v880_v22  ;;  %v889_v30 = vunpack.c.l.b16 %v884_v27  ;;  %v890_v31 = vunpack.c.h.b16 %v884_v27  ;;  %v534_v35 = vadd.f32 %v10887_v7, %v532_v61  ;;  %713 = vst [vmem:[#allocation2 + $0x98] sm:$0xf] %v705_v25  ;;  %4566 = vmatpush.bf16.msrb.mxu0 %v10429_v16  ;;  %v10388_v16 = vld [vmem:[%s11906_s3 + $0xd8] sm:$0xff] }
  0x3c   : > { %711 = vst [vmem:[#allocation2 + $0x90] sm:$0xf] %v703_v4  ;;  %v310_v29 = vrot.slane %v308_v23, 7  ;;  %v887_v33 = vunpack.c.l.b16 %v883_v28  ;;  %v888_v34 = vunpack.c.h.b16 %v883_v28  ;;  %v535_v36 = vadd.f32 %v10887_v7, %v533_v62  ;;  %2939 = vmatpush.bf16.msrb.mxu2 %v10348_v14 }
  0x3d   : > { %712 = vst [vmem:[#allocation2 + $0x94] sm:$0xf] %v704_v21  ;;  %v893_v38 = vpack.c.b16 %v889_v30, %v889_v30  ;;  %v894_v39 = vpack.c.b16 %v890_v31, %v890_v31  ;;  %v536_v48 = vmax.f32 %v534_v35, 0.0  ;;  %v720_v50 = vmul.f32 %v10879_v3, %v10631_v51 }
  0x3e   : > { %1377 = vmatmul.bf16.gmra.mxu0 %v10234_v56  ;;  %v313_v37 = vor.u32 %v311_v24, %v310_v29  ;;  %v320_v40 = vsel %vm10926_vm2, %v310_v29, 0  ;;  %v891_v42 = vpack.c.b16 %v887_v33, %v887_v33  ;;  %v892_v43 = vpack.c.b16 %v888_v34, %v888_v34  ;;  %714 = vst [vmem:[#allocation2 + $0x9c] sm:$0xf] %v706_v26 }
  0x3f   : > { %v325_v44 = vunpack.c.l.b16 %v320_v40  ;;  %v326_v45 = vunpack.c.h.b16 %v320_v40  ;;  %v537_v49 = vmax.f32 %v535_v36, 0.0  ;;  %v538_v59 = vpack.c.bf16 %v536_v48, %v536_v48  ;;  %901 = vst [vmem:[#allocation2 + $0xd8] sm:$0xf] %v893_v38  ;;  %v10243_v38 = vld [vmem:[#allocation2 + $0x50] sm:$0xff] }
  0x40   : > { %v319_v47 = vsel %vm10926_vm2, 0, %v313_v37  ;;  %899 = vst [vmem:[#allocation2 + $0xd0] sm:$0xf] %v891_v42  ;;  %v721_v61 = vmul.f32 %v10879_v3, %v10632_v55  ;;  %v722_v62 = vadd.f32 %v10887_v7, %v720_v50  ;;  %v10647_v1 = vunpack.c.l.bf16 %v10749_v52  ;;  %v10389_v55 = vld [vmem:[%s11906_s3 + $0xe0] sm:$0xff] }
  0x41   : > { %v323_v54 = vunpack.c.l.b16 %v319_v47  ;;  %v324_v56 = vunpack.c.h.b16 %v319_v47  ;;  %v329_v57 = vpack.c.b16 %v325_v44, %v325_v44  ;;  %v330_v58 = vpack.c.b16 %v326_v45, %v326_v45  ;;  %900 = vst [vmem:[#allocation2 + $0xd4] sm:$0xf] %v892_v43  ;;  %3620 = vmatpush.bf16.msrb.mxu3 %v10389_v55 }
  0x42   : > { %1417 = vmatmul.bf16.gmra.mxu1 %v10242_v32  ;;  %v539_v60 = vpack.c.bf16 %v537_v49, %v537_v49  ;;  %v10648_v2 = vunpack.c.h.bf16 %v10749_v52  ;;  %902 = vst [vmem:[#allocation2 + $0xdc] sm:$0xf] %v894_v39  ;;  %v542_v5 = vunpack.c.l.b16 %v538_v59  ;;  %v723_v8 = vadd.f32 %v10887_v7, %v721_v61 }
  0x43   : > { %1457 = vmatmul.bf16.gmra.mxu2 %v10250_v41  ;;  %v327_v51 = vpack.c.b16 %v323_v54, %v323_v54  ;;  %v328_v0 = vpack.c.b16 %v324_v56, %v324_v56  ;;  %v724_v9 = vmax.f32 %v722_v62, 0.0  ;;  %v908_v10 = vmul.f32 %v10879_v3, %v10647_v1  ;;  %337 = vst [vmem:[#allocation2 + $0x18] sm:$0xf] %v329_v57  ;;  %v11077_v1 = vld [vmem:[%s10874_s8 + $0x70] sm:$0xff]  }
  0x44   : > { %v543_v6 = vunpack.c.l.b16 %v539_v60  ;;  %v909_v11 = vmul.f32 %v10879_v3, %v10648_v2  ;;  %v10599_v12 = vunpack.c.l.bf16 %v10737_v63  ;;  %v10600_v13 = vunpack.c.h.bf16 %v10737_v63  ;;  %338 = vst [vmem:[#allocation2 + $0x1c] sm:$0xf] %v330_v58  ;;  %v10251_v48 = vld [vmem:[#allocation2 + $0x90] sm:$0xff] }
  0x45   : > { %1497 = vmatmul.bf16.gmra.mxu3 %v10258_v53  ;;  %335 = vst [vmem:[#allocation2 + $0x10] sm:$0xf] %v327_v51  ;;  %v725_v18 = vmax.f32 %v723_v8, 0.0  ;;  %v726_v19 = vpack.c.bf16 %v724_v9, %v724_v9  ;;  %v910_v20 = vadd.f32 %v10887_v7, %v908_v10  ;;  %v11071_v51 = vld [vmem:[%s10874_s8 + $0x30] sm:$0xff]   ;;  %v10651_v10 = vunpack.c.l.bf16 %v11077_v1 }
  0x46   : > { %336 = vst [vmem:[#allocation2 + $0x14] sm:$0xf] %v328_v0  ;;  %v544_v17 = vpack.c.b16 %v543_v6, %v542_v5  ;;  %v911_v4 = vadd.f32 %v10887_v7, %v909_v11  ;;  %v344_v21 = vmul.f32 %v10879_v3, %v10599_v12  ;;  %v345_v28 = vmul.f32 %v10879_v3, %v10600_v13  ;;  %v11074_v0 = vld [vmem:[%s10874_s8 + $0x50] sm:$0xff]  }
  0x47   : > { %v727_v24 = vpack.c.bf16 %v725_v18, %v725_v18  ;;  %v730_v25 = vunpack.c.l.b16 %v726_v19  ;;  %v912_v26 = vmax.f32 %v910_v20, 0.0  ;;  %v10619_v5 = vunpack.c.l.bf16 %v11071_v51  ;;  %3621 = vmatpush.bf16.msrb.mxu3 %v10388_v16 }
  0x48   : > { %v546_v22 = vshrl.u32 %v544_v17, 16  ;;  %v549_v23 = vshll.u32 %v544_v17, 16  ;;  %v913_v27 = vmax.f32 %v911_v4, 0.0  ;;  %v346_v29 = vadd.f32 %v10887_v7, %v344_v21  ;;  %v10259_v57 = vld [vmem:[#allocation2 + $0xd0] sm:$0xff]  ;;  %v10308_v17 = vld [vmem:[%s11906_s3 + $0x58] sm:$0xff] }
  0x49   : > { %v731_v31 = vunpack.c.l.b16 %v727_v24  ;;  %v914_v32 = vpack.c.bf16 %v912_v26, %v912_v26  ;;  %v347_v34 = vadd.f32 %v10887_v7, %v345_v28  ;;  %v10620_v6 = vunpack.c.h.bf16 %v11071_v51  ;;  %v10428_v4 = vld [vmem:[%s11906_s3 + $0x118] sm:$0xff]  ;;  %2187 = vmatpush.bf16.msrb.mxu1 %v10308_v17 }
  0x4a   : > { %v548_v30 = vrot.slane %v546_v22, 7  ;;  %v915_v33 = vpack.c.bf16 %v913_v27, %v913_v27  ;;  %v348_v35 = vmax.f32 %v346_v29, 0.0  ;;  %v10635_v8 = vunpack.c.l.bf16 %v11074_v0  ;;  %4567 = vmatpush.bf16.msrb.mxu0 %v10428_v4 }
  0x4b   : > { %v732_v37 = vpack.c.b16 %v731_v31, %v730_v25  ;;  %v918_v40 = vunpack.c.l.b16 %v914_v32  ;;  %v349_v42 = vmax.f32 %v347_v34, 0.0  ;;  %v10636_v55 = vunpack.c.h.bf16 %v11074_v0 }
  0x4c   : > { %v551_v36 = vor.u32 %v549_v23, %v548_v30  ;;  %v919_v41 = vunpack.c.l.b16 %v915_v33  ;;  %v350_v43 = vpack.c.bf16 %v348_v35, %v348_v35  ;;  %v555_v18 = vsel %vm10926_vm2, %v548_v30, 0 }
  0x4d   : > { %v10235_v39 = vld [vmem:[#allocation2 + $0x10] sm:$0xff]  ;;  %v734_v45 = vshrl.u32 %v732_v37, 16  ;;  %v737_v47 = vshll.u32 %v732_v37, 16  ;;  %v351_v53 = vpack.c.bf16 %v349_v42, %v349_v42  ;;  %v560_v21 = vunpack.c.l.b16 %v555_v18 }
  0x4e   : > { %v554_v44 = vsel %vm10926_vm2, 0, %v551_v36  ;;  %1382 = vmatmul.bf16.gmra.mxu0 %v10235_v39  ;;  %v920_v52 = vpack.c.b16 %v919_v41, %v918_v40  ;;  %v354_v56 = vunpack.c.l.b16 %v350_v43  ;;  %v561_v22 = vunpack.c.h.b16 %v555_v18  ;;  %v10236_v39 = vld [vmem:[#allocation2 + $0x18] sm:$0xff] }
  0x4f   : > { %v558_v49 = vunpack.c.l.b16 %v554_v44  ;;  %v559_v50 = vunpack.c.h.b16 %v554_v44  ;;  %v736_v54 = vrot.slane %v734_v45, 7  ;;  %v355_v63 = vunpack.c.l.b16 %v351_v53 }
  0x50   : > { %v922_v60 = vshrl.u32 %v920_v52, 16  ;;  %v925_v61 = vshll.u32 %v920_v52, 16  ;;  %v564_v30 = vpack.c.b16 %v560_v21, %v560_v21  ;;  %v565_v31 = vpack.c.b16 %v561_v22, %v561_v22  ;;  %v10347_v22 = vld [vmem:[%s11906_s3 + $0x90] sm:$0xff] }
  0x51   : > { %v562_v58 = vpack.c.b16 %v558_v49, %v558_v49  ;;  %v563_v59 = vpack.c.b16 %v559_v50, %v559_v50  ;;  %v739_v62 = vor.u32 %v737_v47, %v736_v54  ;;  %v356_v46 = vpack.c.b16 %v355_v63, %v354_v56  ;;  %v10244_v49 = vld [vmem:[#allocation2 + $0x58] sm:$0xff]  ;;  %2940 = vmatpush.bf16.msrb.mxu2 %v10347_v22 }
  0x52   : > { %1422 = vmatmul.bf16.gmra.mxu1 %v10243_v38  ;;  %v924_v2 = vrot.slane %v922_v60, 7  ;;  %v743_v26 = vsel %vm10926_vm2, %v736_v54, 0  ;;  %572 = vst [vmem:[#allocation2 + $0x68] sm:$0xf] %v564_v30  ;;  %v579_v54 = vmul.f32 %v10879_v3, %v10619_v5  ;;  %v10738_v60 = vld [vmem:[%s10874_s8 + $0x10] sm:$0xff]  }
  0x53   : > { %1462 = vmatmul.bf16.gmra.mxu2 %v10251_v48  ;;  %570 = vst [vmem:[#allocation2 + $0x60] sm:$0xf] %v562_v58  ;;  %v742_v9 = vsel %vm10926_vm2, 0, %v739_v62  ;;  %v358_v19 = vshrl.u32 %v356_v46, 16  ;;  %v361_v20 = vshll.u32 %v356_v46, 16  ;;  %v748_v32 = vunpack.c.l.b16 %v743_v26  ;;  %v10260_v46 = vld [vmem:[#allocation2 + $0xd8] sm:$0xff] }
  0x54   : > { %571 = vst [vmem:[#allocation2 + $0x64] sm:$0xf] %v563_v59  ;;  %v746_v11 = vunpack.c.l.b16 %v742_v9  ;;  %v747_v12 = vunpack.c.h.b16 %v742_v9  ;;  %v927_v13 = vor.u32 %v925_v61, %v924_v2  ;;  %v749_v33 = vunpack.c.h.b16 %v743_v26  ;;  %v10252_v61 = vld [vmem:[#allocation2 + $0x98] sm:$0xff] }
  0x55   : > { %1502 = vmatmul.bf16.gmra.mxu3 %v10259_v57  ;;  %v360_v29 = vrot.slane %v358_v19, 7  ;;  %v931_v34 = vsel %vm10926_vm2, %v924_v2, 0  ;;  %v752_v40 = vpack.c.b16 %v748_v32, %v748_v32  ;;  %573 = vst [vmem:[#allocation2 + $0x6c] sm:$0xf] %v565_v31  ;;  %v580_v58 = vmul.f32 %v10879_v3, %v10620_v6 }
  0x56   : > { %v750_v23 = vpack.c.b16 %v746_v11, %v746_v11  ;;  %v751_v24 = vpack.c.b16 %v747_v12, %v747_v12  ;;  %v930_v25 = vsel %vm10926_vm2, 0, %v927_v13  ;;  %v936_v38 = vunpack.c.l.b16 %v931_v34 }
  0x57   : > { %v934_v27 = vunpack.c.l.b16 %v930_v25  ;;  %v935_v28 = vunpack.c.h.b16 %v930_v25  ;;  %v363_v37 = vor.u32 %v361_v20, %v360_v29  ;;  %v753_v41 = vpack.c.b16 %v749_v33, %v749_v33  ;;  %760 = vst [vmem:[#allocation2 + $0xa8] sm:$0xf] %v752_v40 }
  0x58   : > { %758 = vst [vmem:[#allocation2 + $0xa0] sm:$0xf] %v750_v23  ;;  %v937_v42 = vunpack.c.h.b16 %v931_v34  ;;  %v367_v43 = vsel %vm10926_vm2, %v360_v29, 0  ;;  %v940_v45 = vpack.c.b16 %v936_v38, %v936_v38  ;;  %v767_v59 = vmul.f32 %v10879_v3, %v10635_v8  ;;  %v10387_v23 = vld [vmem:[%s11906_s3 + $0xd0] sm:$0xff] }
  0x59   : > { %759 = vst [vmem:[#allocation2 + $0xa4] sm:$0xf] %v751_v24  ;;  %v938_v35 = vpack.c.b16 %v934_v27, %v934_v27  ;;  %v939_v36 = vpack.c.b16 %v935_v28, %v935_v28  ;;  %v366_v44 = vsel %vm10926_vm2, 0, %v363_v37  ;;  %v372_v47 = vunpack.c.l.b16 %v367_v43  ;;  %v10307_v28 = vld [vmem:[%s11906_s3 + $0x50] sm:$0xff]  ;;  %3622 = vmatpush.bf16.msrb.mxu3 %v10387_v23  ;;  %v10426_v23 = vld [vmem:[%s11906_s3 + $0x108] sm:$0xff] }
  0x5a   : > { %v373_v48 = vunpack.c.h.b16 %v367_v43  ;;  %v370_v50 = vunpack.c.l.b16 %v366_v44  ;;  %v371_v52 = vunpack.c.h.b16 %v366_v44  ;;  %v941_v53 = vpack.c.b16 %v937_v42, %v937_v42  ;;  %761 = vst [vmem:[#allocation2 + $0xac] sm:$0xf] %v753_v41  ;;  %v10427_v29 = vld [vmem:[%s11906_s3 + $0x110] sm:$0xff]  ;;  %2188 = vmatpush.bf16.msrb.mxu1 %v10307_v28 }
  0x5b   : > { %946 = vst [vmem:[#allocation2 + $0xe0] sm:$0xf] %v938_v35  ;;  %v376_v56 = vpack.c.b16 %v372_v47, %v372_v47  ;;  %v581_v51 = vadd.f32 %v10887_v7, %v579_v54  ;;  %v10652_v2 = vunpack.c.h.bf16 %v11077_v1  ;;  %v582_v5 = vadd.f32 %v10887_v7, %v580_v58  ;;  %4568 = vmatpush.bf16.msrb.mxu0 %v10427_v29  ;;  %v10245_v54 = vld [vmem:[#allocation2 + $0x60] sm:$0xff] }
  0x5c   : > { %947 = vst [vmem:[#allocation2 + $0xe4] sm:$0xf] %v939_v36  ;;  %v377_v57 = vpack.c.b16 %v373_v48, %v373_v48  ;;  %v374_v62 = vpack.c.b16 %v370_v50, %v370_v50  ;;  %v375_v63 = vpack.c.b16 %v371_v52, %v371_v52  ;;  %v768_v9 = vmul.f32 %v10879_v3, %v10636_v55 }
  0x5d   : > { %v769_v6 = vadd.f32 %v10887_v7, %v767_v59  ;;  %v955_v8 = vmul.f32 %v10879_v3, %v10651_v10  ;;  %v583_v11 = vmax.f32 %v581_v51, 0.0  ;;  %v956_v12 = vmul.f32 %v10879_v3, %v10652_v2  ;;  %948 = vst [vmem:[#allocation2 + $0xe8] sm:$0xf] %v940_v45 }
  0x5e   : > { %1387 = vmatmul.bf16.gmra.mxu0 %v10236_v39  ;;  %382 = vst [vmem:[#allocation2 + $0x20] sm:$0xf] %v374_v62  ;;  %v10603_v13 = vunpack.c.l.bf16 %v10738_v60  ;;  %v10604_v14 = vunpack.c.h.bf16 %v10738_v60  ;;  %v584_v16 = vmax.f32 %v582_v5, 0.0  ;;  %v770_v0 = vadd.f32 %v10887_v7, %v768_v9 }
  0x5f   : > { %383 = vst [vmem:[#allocation2 + $0x24] sm:$0xf] %v375_v63  ;;  %v771_v17 = vmax.f32 %v769_v6, 0.0  ;;  %v957_v55 = vadd.f32 %v10887_v7, %v955_v8  ;;  %v585_v1 = vpack.c.bf16 %v583_v11, %v583_v11  ;;  %v958_v10 = vadd.f32 %v10887_v7, %v956_v12  ;;  %4569 = vmatpush.bf16.msrb.mxu0 %v10426_v23  ;;  %v10314_v23 = vld [vmem:[#allocation2 + $0x8] sm:$0xff] }
  0x60   : > { %v391_v18 = vmul.f32 %v10879_v3, %v10603_v13  ;;  %949 = vst [vmem:[#allocation2 + $0xec] sm:$0xf] %v941_v53  ;;  %v586_v19 = vpack.c.bf16 %v584_v16, %v584_v16  ;;  %v772_v20 = vmax.f32 %v770_v0, 0.0  ;;  %v392_v26 = vmul.f32 %v10879_v3, %v10604_v14  ;;  %v10802_v3 = vld [vmem:[%s11905_s2] ss:$0 sm:$0xff] }
  0x61   : > { %v773_v4 = vpack.c.bf16 %v771_v17, %v771_v17  ;;  %v959_v21 = vmax.f32 %v957_v55, 0.0  ;;  %384 = vst [vmem:[#allocation2 + $0x28] sm:$0xf] %v376_v56  ;;  %v589_v24 = vunpack.c.l.b16 %v585_v1  ;;  %v960_v25 = vmax.f32 %v958_v10, 0.0 }
  0x62   : > { %1427 = vmatmul.bf16.gmra.mxu1 %v10244_v49  ;;  %v393_v27 = vadd.f32 %v10887_v7, %v391_v18  ;;  %385 = vst [vmem:[#allocation2 + $0x2c] sm:$0xf] %v377_v57  ;;  %v590_v30 = vunpack.c.l.b16 %v586_v19  ;;  %v774_v31 = vpack.c.bf16 %v772_v20, %v772_v20  ;;  %v394_v7 = vadd.f32 %v10802_v3, %v392_v26  ;;  %v10346_v20 = vld [vmem:[%s11906_s3 + $0x88] sm:$0xff] }
  0x63   : > { %1467 = vmatmul.bf16.gmra.mxu2 %v10252_v61  ;;  %v777_v32 = vunpack.c.l.b16 %v773_v4  ;;  %v961_v33 = vpack.c.bf16 %v959_v21, %v959_v21  ;;  %v962_v34 = vpack.c.bf16 %v960_v25, %v960_v25  ;;  %v10253_v61 = vld [vmem:[#allocation2 + $0xa0] sm:$0xff]  ;;  %v10386_v4 = vld [vmem:[%s11906_s3 + $0xc8] sm:$0xff] }
  0x64   : > { %v395_v35 = vmax.f32 %v393_v27, 0.0  ;;  %v591_v36 = vpack.c.b16 %v590_v30, %v589_v24  ;;  %v778_v37 = vunpack.c.l.b16 %v774_v31  ;;  %v396_v40 = vmax.f32 %v394_v7, 0.0  ;;  %v10261_v5 = vld [vmem:[#allocation2 + $0xe0] sm:$0xff]  ;;  %v10306_v21 = vld [vmem:[%s11906_s3 + $0x48] sm:$0xff]  ;;  %2941 = vmatpush.bf16.msrb.mxu2 %v10346_v20  ;;  %3623 = vmatpush.bf16.msrb.mxu3 %v10386_v4 }
  0x65   : > { %1507 = vmatmul.bf16.gmra.mxu3 %v10260_v46  ;;  %v965_v38 = vunpack.c.l.b16 %v961_v33  ;;  %v966_v39 = vunpack.c.l.b16 %v962_v34  ;;  %2189 = vmatpush.bf16.msrb.mxu1 %v10306_v21 }
  0x66   : > { %v397_v41 = vpack.c.bf16 %v395_v35, %v395_v35  ;;  %v593_v42 = vshrl.u32 %v591_v36, 16  ;;  %v596_v43 = vshll.u32 %v591_v36, 16  ;;  %v779_v44 = vpack.c.b16 %v778_v37, %v777_v32  ;;  %v10237_v45 = vld [vmem:[#allocation2 + $0x20] sm:$0xff] }
  0x67   : > { %v967_v47 = vpack.c.b16 %v966_v39, %v965_v38  ;;  %v398_v48 = vpack.c.bf16 %v396_v40, %v396_v40 }
  0x68   : > { %v401_v49 = vunpack.c.l.b16 %v397_v41  ;;  %v595_v50 = vrot.slane %v593_v42, 7  ;;  %v781_v52 = vshrl.u32 %v779_v44, 16  ;;  %v784_v53 = vshll.u32 %v779_v44, 16  ;;  %v10246_v44 = vld [vmem:[#allocation2 + $0x68] sm:$0xff] }
  0x69   : > { %v969_v56 = vshrl.u32 %v967_v47, 16  ;;  %v972_v57 = vshll.u32 %v967_v47, 16  ;;  %v402_v58 = vunpack.c.l.b16 %v398_v48  ;;  %v10238_v38 = vld [vmem:[#allocation2 + $0x28] sm:$0xff] }
  0x6a   : > { %v598_v59 = vor.u32 %v596_v43, %v595_v50  ;;  %v783_v60 = vrot.slane %v781_v52, 7  ;;  %v602_v24 = vsel %vm10926_vm2, %v595_v50, 0  ;;  %v10254_v50 = vld [vmem:[#allocation2 + $0xa8] sm:$0xff] }
  0x6b   : > { %v971_v62 = vrot.slane %v969_v56, 7  ;;  %v403_v63 = vpack.c.b16 %v402_v58, %v401_v49  ;;  %v607_v27 = vunpack.c.l.b16 %v602_v24  ;;  %v608_v28 = vunpack.c.h.b16 %v602_v24  ;;  %v10345_v56 = vld [vmem:[%s11906_s3 + $0x80] sm:$0xff] }
  0x6c   : > { %v601_v51 = vsel %vm10926_vm2, 0, %v598_v59  ;;  %v786_v2 = vor.u32 %v784_v53, %v783_v60  ;;  %v790_v30 = vsel %vm10926_vm2, %v783_v60, 0  ;;  %v10305_v58 = vld [vmem:[%s11906_s3 + $0x40] sm:$0xff]  ;;  %2942 = vmatpush.bf16.msrb.mxu2 %v10345_v56 }
  0x6d   : > { %v605_v9 = vunpack.c.l.b16 %v601_v51  ;;  %v606_v6 = vunpack.c.h.b16 %v601_v51  ;;  %v974_v8 = vor.u32 %v972_v57, %v971_v62  ;;  %v405_v46 = vshrl.u32 %v403_v63, 16  ;;  %v10385_v57 = vld [vmem:[%s11906_s3 + $0xc0] sm:$0xff]  ;;  %2190 = vmatpush.bf16.msrb.mxu1 %v10305_v58  ;;  %v10512_v51 = vld [vmem:[%s11906_s3 + $0x1b8] sm:$0xff] }
  0x6e   : > { %1392 = vmatmul.bf16.gmra.mxu0 %v10237_v45  ;;  %v789_v11 = vsel %vm10926_vm2, 0, %v786_v2  ;;  %v408_v12 = vshll.u32 %v403_v63, 16  ;;  %v978_v31 = vsel %vm10926_vm2, %v971_v62, 0  ;;  %v611_v34 = vpack.c.b16 %v607_v27, %v607_v27  ;;  %v10425_v59 = vld [vmem:[%s11906_s3 + $0x100] sm:$0xff]  ;;  %3624 = vmatpush.bf16.msrb.mxu3 %v10385_v57  ;;  %v10552_v2 = vld [vmem:[%s11906_s3 + $0x1f8] sm:$0xff] }
  0x6f   : > { %v609_v13 = vpack.c.b16 %v605_v9, %v605_v9  ;;  %v610_v14 = vpack.c.b16 %v606_v6, %v606_v6  ;;  %v793_v16 = vunpack.c.l.b16 %v789_v11  ;;  %v794_v0 = vunpack.c.h.b16 %v789_v11  ;;  %4570 = vmatpush.bf16.msrb.mxu0 %v10425_v59  ;;  %v10592_v9 = vld [vmem:[%s11906_s3 + $0x238] sm:$0xff]  ;;  %v10273_v11 = vld [vmem:[#allocation2] sm:$0xff] }
  0x70   : > { %v977_v17 = vsel %vm10926_vm2, 0, %v974_v8  ;;  %v407_v55 = vrot.slane %v405_v46, 7  ;;  %v612_v3 = vpack.c.b16 %v608_v28, %v608_v28  ;;  %v795_v7 = vunpack.c.l.b16 %v790_v30  ;;  %619 = vst [vmem:[#allocation2 + $0x78] sm:$0xf] %v611_v34  ;;  %5996 = vmatpush.bf16.msra.mxu2 %v10512_v51  ;;  %v10393_v8 = vld [vmem:[#allocation2 + $0x10] sm:$0xff] }
  0x71   : > { %617 = vst [vmem:[#allocation2 + $0x70] sm:$0xf] %v609_v13  ;;  %v797_v1 = vpack.c.b16 %v793_v16, %v793_v16  ;;  %v798_v10 = vpack.c.b16 %v794_v0, %v794_v0  ;;  %v981_v18 = vunpack.c.l.b16 %v977_v17  ;;  %v982_v19 = vunpack.c.h.b16 %v977_v17  ;;  %v10394_v13 = vld [vmem:[#allocation2 + $0x18] sm:$0xff]  ;;  %v10274_v0 = vld [vmem:[#allocation2 + $0x8] sm:$0xff] }
  0x72   : > { %1432 = vmatmul.bf16.gmra.mxu1 %v10245_v54  ;;  %618 = vst [vmem:[#allocation2 + $0x74] sm:$0xf] %v610_v14  ;;  %v410_v22 = vor.u32 %v408_v12, %v407_v55  ;;  %v796_v35 = vunpack.c.h.b16 %v790_v30  ;;  %v983_v36 = vunpack.c.l.b16 %v978_v31  ;;  %v984_v37 = vunpack.c.h.b16 %v978_v31  ;;  %v10262_v54 = vld [vmem:[#allocation2 + $0xe8] sm:$0xff]  ;;  %6942 = vmatpush.bf16.msra.mxu3 %v10552_v2 }
  0x73   : > { %1472 = vmatmul.bf16.gmra.mxu2 %v10253_v61  ;;  %805 = vst [vmem:[#allocation2 + $0xb0] sm:$0xf] %v797_v1  ;;  %v985_v25 = vpack.c.b16 %v981_v18, %v981_v18  ;;  %v986_v26 = vpack.c.b16 %v982_v19, %v982_v19  ;;  %v414_v41 = vsel %vm10926_vm2, %v407_v55, 0  ;;  %v799_v42 = vpack.c.b16 %v795_v7, %v795_v7  ;;  %v8985_v18 = vld [vmem:[#allocation2] sm:$0xe] }
  0x74   : > { %806 = vst [vmem:[#allocation2 + $0xb4] sm:$0xf] %v798_v10  ;;  %v413_v29 = vsel %vm10926_vm2, 0, %v410_v22  ;;  %v800_v43 = vpack.c.b16 %v796_v35, %v796_v35  ;;  %v987_v45 = vpack.c.b16 %v983_v36, %v983_v36  ;;  %v419_v47 = vunpack.c.l.b16 %v414_v41  ;;  %7693 = vmatpush.bf16.msra.mxu0 %v10592_v9  ;;  %v10313_v19 = vld [vmem:[#allocation2] sm:$0xf0]  ;;  %v10353_v35 = vld [vmem:[#allocation2 + $0x10] sm:$0xff] }
  0x75   : > { %1512 = vmatmul.bf16.gmra.mxu3 %v10261_v5  ;;  %993 = vst [vmem:[#allocation2 + $0xf0] sm:$0xf] %v985_v25  ;;  %v417_v32 = vunpack.c.l.b16 %v413_v29  ;;  %v418_v33 = vunpack.c.h.b16 %v413_v29  ;;  %v420_v48 = vunpack.c.h.b16 %v414_v41  ;;  %v988_v49 = vpack.c.b16 %v984_v37, %v984_v37  ;;  %v10472_v5 = vld [vmem:[%s11906_s3 + $0x178] sm:$0xff]  ;;  %v10395_v7 = vld [vmem:[#allocation2 + $0x20] sm:$0xff]  ;;  %v10275_v36 = vld [vmem:[#allocation2 + $0x10] sm:$0xff] }
  0x76   : > { %994 = vst [vmem:[#allocation2 + $0xf4] sm:$0xf] %v986_v26  ;;  %v423_v52 = vpack.c.b16 %v419_v47, %v419_v47  ;;  %5314 = vmatpush.bf16.msra.mxu1 %v10472_v5  ;;  %v4226_v14 = vshll.u32 %v10393_v8, 16  ;;  %v1846_v17 = vshll.u32 %v10273_v11, 16  ;;  %v4224_v55 = vshrl.u32 %v10393_v8, 16 }
  0x77   : > { %v421_v39 = vpack.c.b16 %v417_v32, %v417_v32  ;;  %v422_v40 = vpack.c.b16 %v418_v33, %v418_v33  ;;  %620 = vst [vmem:[#allocation2 + $0x7c] sm:$0xf] %v612_v3  ;;  %v424_v53 = vpack.c.b16 %v420_v48, %v420_v48  ;;  %v4231_v10 = vshll.u32 %v10394_v13, 16 }
  0x78   : > { %807 = vst [vmem:[#allocation2 + $0xb8] sm:$0xf] %v799_v42  ;;  %v4228_v1 = vrot.slane %v4226_v14, 1  ;;  %v1844_v4 = vshrl.u32 %v10273_v11, 16  ;;  %v1848_v21 = vrot.slane %v1846_v17, 1  ;;  %v1851_v22 = vshll.u32 %v10274_v0, 16 }
  0x79   : > { %429 = vst [vmem:[#allocation2 + $0x30] sm:$0xf] %v421_v39  ;;  %v10247_v61 = vld [vmem:[#allocation2 + $0x70] sm:$0xff]  ;;  %v8986_v24 = vor.u32 %v10313_v19, %v8985_v18  ;;  %v4233_v26 = vrot.slane %v4231_v10, 1  ;;  %v2791_v30 = vrot.slane %v10314_v23, 1  ;;  %v4235_v37 = vshrl.u32 %v10394_v13, 16 }
  0x7a   : > { %430 = vst [vmem:[#allocation2 + $0x34] sm:$0xf] %v422_v40  ;;  %v4229_v25 = vor.u32 %v4228_v1, %v4224_v55  ;;  %v1849_v27 = vor.u32 %v1848_v21, %v1844_v4  ;;  %v1853_v28 = vrot.slane %v1851_v22, 1  ;;  %v1855_v41 = vshrl.u32 %v10274_v0, 16  ;;  %v10316_v11 = vld [vmem:[#allocation2 + $0x18] sm:$0xff]  ;;  %v10355_v22 = vld [vmem:[#allocation2 + $0x20] sm:$0xff] }
  0x7b   : > { %808 = vst [vmem:[#allocation2 + $0xbc] sm:$0xf] %v800_v43  ;;  %v10255_v62 = vld [vmem:[#allocation2 + $0xb0] sm:$0xff]  ;;  %v2790_v29 = vrot.slane %v8986_v24, 1  ;;  %v1859_v42 = vshll.u32 %v10275_v36, 16  ;;  %v4237_v47 = vor.u32 %v4235_v37, %v4233_v26  ;;  %v4243_v51 = vshrl.u32 %v10395_v7, 16 }
  0x7c   : > { %995 = vst [vmem:[#allocation2 + $0xf8] sm:$0xf] %v987_v45  ;;  %v4234_v31 = vsel %vm1842_vm3, %v4229_v25, %v4233_v26  ;;  %v1854_v33 = vsel %vm1842_vm3, %v1849_v27, %v1853_v28  ;;  %v10315_v45 = vld [vmem:[#allocation2 + $0x10] sm:$0xff]  ;;  %v2795_v17 = vrot.slane %v10316_v11, 1  ;;  %v10277_v23 = vld [vmem:[#allocation2 + $0x20] sm:$0xff] }
  0x7d   : > { %996 = vst [vmem:[#allocation2 + $0xfc] sm:$0xf] %v988_v49  ;;  %v10263_v63 = vld [vmem:[#allocation2 + $0xf0] sm:$0xff]  ;;  %v2792_v3 = vsel %vm2789_vm4, %v2790_v29, %v2791_v30  ;;  %v1857_v49 = vor.u32 %v1855_v41, %v1853_v28 }
  0x7e   : > { %1397 = vmatmul.bf16.gmra.mxu0 %v10238_v38  ;;  %431 = vst [vmem:[#allocation2 + $0x38] sm:$0xf] %v423_v52  ;;  %v10248_v46 = vld [vmem:[#allocation2 + $0x78] sm:$0xff]  ;;  %v4239_v38 = vshll.u32 %v10395_v7, 16  ;;  %v2793_v52 = vrot.slane %v10315_v45, 1  ;;  %v10511_v27 = vld [vmem:[%s11906_s3 + $0x1b0] sm:$0xff] }
  0x7f   : > { %432 = vst [vmem:[#allocation2 + $0x3c] sm:$0xf] %v424_v53  ;;  %v10551_v28 = vld [vmem:[%s11906_s3 + $0x1f0] sm:$0xff]  ;;  %5997 = vmatpush.bf16.msra.mxu2 %v10511_v27  ;;  %v10317_v7 = vld [vmem:[#allocation2 + $0x20] sm:$0xff] }
  0x80   : > { %v4241_v48 = vrot.slane %v4239_v38, 1  ;;  %v2796_v4 = vsel %vm2789_vm4, %v2793_v52, %v2795_v17  ;;  %6943 = vmatpush.bf16.msra.mxu3 %v10551_v28  ;;  %v10471_v37 = vld [vmem:[%s11906_s3 + $0x170] sm:$0xff]  ;;  %v2797_v45 = vrot.slane %v10317_v7, 1 }
  0x81   : > { %v10239_v60 = vld [vmem:[#allocation2 + $0x30] sm:$0xff]  ;;  %5315 = vmatpush.bf16.msra.mxu1 %v10471_v37 }
  0x82   : > { %1437 = vmatmul.bf16.gmra.mxu1 %v10246_v44  ;;  %v10256_v12 = vld [vmem:[#allocation2 + $0xb8] sm:$0xff]  ;;  %v4242_v53 = vsel %vm1842_vm3, %v4237_v47, %v4241_v48  ;;  %v10397_v21 = vld [vmem:[#allocation2 + $0x30] sm:$0xff] }
  0x83   : > { %1477 = vmatmul.bf16.gmra.mxu2 %v10254_v50  ;;  %v1861_v50 = vrot.slane %v1859_v42, 1  ;;  %v4255_v26 = vshll.u32 %v10397_v21, 16  ;;  %v10591_v38 = vld [vmem:[%s11906_s3 + $0x230] sm:$0xff] }
  0x84   : > { %v10264_v16 = vld [vmem:[#allocation2 + $0xf8] sm:$0xff]  ;;  %7694 = vmatpush.bf16.msra.mxu0 %v10591_v38 }
  0x85   : > { %1517 = vmatmul.bf16.gmra.mxu3 %v10262_v54  ;;  %v1862_v57 = vsel %vm1842_vm3, %v1857_v49, %v1861_v50 }
  0x86   : > { %v10240_v6 = vld [vmem:[#allocation2 + $0x38] sm:$0xff] }
  0x8e   : > { %1402 = vmatmul.bf16.gmra.mxu0 %v10239_v60  ;;  %v2794_v60 = vsel %vm2789_vm4, %v2791_v30, %v2793_v52 }
  0x92   : > { %1442 = vmatmul.bf16.gmra.mxu1 %v10247_v61  ;;  %v10396_v61 = vld [vmem:[#allocation2 + $0x28] sm:$0xff] }
  0x93   : > { %1482 = vmatmul.bf16.gmra.mxu2 %v10255_v62  ;;  %v10354_v62 = vld [vmem:[#allocation2 + $0x18] sm:$0xff]  ;;  %v4247_v2 = vshll.u32 %v10396_v61, 16  ;;  %v4251_v25 = vshrl.u32 %v10396_v61, 16  ;;  %v4259_v61 = vshrl.u32 %v10397_v21, 16  ;;  %v10357_v21 = vld [vmem:[#allocation2 + $0x30] sm:$0xff] }
  0x95   : > { %1522 = vmatmul.bf16.gmra.mxu3 %v10263_v63  ;;  %v10276_v63 = vld [vmem:[#allocation2 + $0x18] sm:$0xff]  ;;  %v4249_v13 = vrot.slane %v4247_v2, 1  ;;  %v1879_v2 = vshrl.u32 %v10277_v23, 16 }
  0x96   : > { %v1867_v8 = vshll.u32 %v10276_v63, 16 }
  0x9e   : > { %1407 = vmatmul.bf16.gmra.mxu0 %v10240_v6  ;;  %v1863_v6 = vshrl.u32 %v10275_v36, 16  ;;  %v4257_v36 = vrot.slane %v4255_v26, 1 }
  0xa0   : > { %v1865_v14 = vor.u32 %v1863_v6, %v1861_v50  ;;  %v10318_v6 = vld [vmem:[#allocation2 + $0x28] sm:$0xff] }
  0xa2   : > { %1447 = vmatmul.bf16.gmra.mxu1 %v10248_v46 }
  0xa3   : > { %1487 = vmatmul.bf16.gmra.mxu2 %v10256_v12  ;;  %v4245_v12 = vor.u32 %v4243_v51, %v4241_v48 }
  0xa5   : > { %1527 = vmatmul.bf16.gmra.mxu3 %v10264_v16  ;;  %v1869_v16 = vrot.slane %v1867_v8, 1  ;;  %v4250_v55 = vsel %vm1842_vm3, %v4245_v12, %v4249_v13  ;;  %v4261_v8 = vor.u32 %v4259_v61, %v4257_v36 }
  0xa7   : > { %v1870_v18 = vsel %vm1842_vm3, %v1865_v14, %v1869_v16  ;;  %v2799_v14 = vrot.slane %v10318_v6, 1 }
  0xab   : > { %v11198_v20 = vpop.f32.mrf.mxu0 }
  0xae   : > { %4571 = vmatmul.bf16.vlgmr.msrb.gmra.mxu0 %v4234_v31  ;;  %v1871_v31 = vshrl.u32 %v10276_v63, 16 }
  0xaf   : > { %v11201_v32 = vpop.f32.mrf.mxu1 }
  0xb0   : > { %v1873_v41 = vor.u32 %v1871_v31, %v1869_v16 }
  0xb2   : > { %2191 = vmatmul.bf16.vlgmr.msrb.gmra.mxu1 %v1854_v33  ;;  %v1875_v33 = vshll.u32 %v10277_v23, 16 }
  0xb3   : > { %v11204_v34 = vpop.f32.mrf.mxu0  ;;  %2943 = vmatmul.bf16.vlgmr.msrb.gmra.mxu2 %v2792_v3 }
  0xb4   : > { %v1877_v42 = vrot.slane %v1875_v33, 1 }
  0xb5   : > { %3625 = vmatmul.bf16.vlgmr.msrb.gmra.mxu3 %v10353_v35  ;;  %v4253_v35 = vor.u32 %v4251_v25, %v4249_v13 }
  0xb6   : > { %v11207_v39 = vpop.f32.mrf.mxu2  ;;  %v1878_v50 = vsel %vm1842_vm3, %v1873_v41, %v1877_v42  ;;  %v1881_v11 = vor.u32 %v1879_v2, %v1877_v42 }
  0xb7   : > { %v11209_v40 = vpop.f32.mrf.mxu1  ;;  %v4258_v47 = vsel %vm1842_vm3, %v4253_v35, %v4257_v36  ;;  %v10319_v35 = vld [vmem:[#allocation2 + $0x30] sm:$0xff] }
  0xb8   : > { %v11211_v44 = vpop.f32.mrf.mxu3 }
  0xbb   : > { %v1378_v43 = vpop.f32.mrf.mxu0 }
  0xbe   : > { %v11214_v54 = vpop.f32.mrf.mxu2  ;;  %4576 = vmatmul.bf16.gmra.mxu0 %v4242_v53  ;;  %v2798_v53 = vsel %vm2789_vm4, %v2795_v17, %v2797_v45 }
  0xbf   : > { %v1418_v56 = vpop.f32.mrf.mxu1 }
  0xc0   : > { %v11217_v59 = vpop.f32.mrf.mxu3  ;;  %v10398_v56 = vld [vmem:[#allocation2 + $0x38] sm:$0xff] }
  0xc1   : > { %v4267_v25 = vshrl.u32 %v10398_v56, 16 }
  0xc2   : > { %2196 = vmatmul.bf16.gmra.mxu1 %v1862_v57  ;;  %v10356_v57 = vld [vmem:[#allocation2 + $0x28] sm:$0xff] }
  0xc3   : > { %v1380_v58 = vpop.f32.mrf.mxu0  ;;  %2948 = vmatmul.bf16.gmra.mxu2 %v2794_v60 }
  0xc4   : > { %v10278_v58 = vld [vmem:[#allocation2 + $0x28] sm:$0xff] }
  0xc5   : > { %3630 = vmatmul.bf16.gmra.mxu3 %v10354_v62  ;;  %v4263_v62 = vshll.u32 %v10398_v56, 16  ;;  %v1887_v31 = vshrl.u32 %v10278_v58, 16 }
  0xc6   : > { %v1458_v5 = vpop.f32.mrf.mxu2 }
  0xc7   : > { %v1420_v9 = vpop.f32.mrf.mxu1  ;;  %v1883_v5 = vshll.u32 %v10278_v58, 16  ;;  %v10358_v58 = vld [vmem:[#allocation2 + $0x38] sm:$0xff] }
  0xc8   : > { %v1498_v46 = vpop.f32.mrf.mxu3 }
  0xc9   : > { %v4265_v46 = vrot.slane %v4263_v62, 1  ;;  %v1885_v12 = vrot.slane %v1883_v5, 1 }
  0xcb   : > { %v11220_v0 = vpop.f32.mrf.mxu0  ;;  %v4266_v16 = vsel %vm1842_vm3, %v4261_v8, %v4265_v46  ;;  %v4269_v36 = vor.u32 %v4267_v25, %v4265_v46  ;;  %v1889_v38 = vor.u32 %v1887_v31, %v1885_v12  ;;  %v10320_v8 = vld [vmem:[#allocation2 + $0x38] sm:$0xff]  ;;  %v10401_v25 = vld [vmem:[#allocation2 + $0x50] sm:$0xff]  ;;  %v10281_v31 = vld [vmem:[#allocation2 + $0x40] sm:$0xff] }
  0xce   : > { %v1460_v1 = vpop.f32.mrf.mxu2  ;;  %4581 = vmatmul.bf16.gmra.mxu0 %v4250_v55 }
  0xcf   : > { %v11223_v10 = vpop.f32.mrf.mxu1  ;;  %v1886_v1 = vsel %vm1842_vm3, %v1881_v11, %v1885_v12 }
  0xd0   : > { %v1500_v19 = vpop.f32.mrf.mxu3 }
  0xd1   : > { %v2800_v19 = vsel %vm2789_vm4, %v2797_v45, %v2799_v14 }
  0xd2   : > { %2201 = vmatmul.bf16.gmra.mxu1 %v1870_v18 }
  0xd3   : > { %2953 = vmatmul.bf16.gmra.mxu2 %v2796_v4  ;;  %v11227_v24 = vpop.f32.mrf.mxu0  ;;  %v10399_v4 = vld [vmem:[#allocation2 + $0x40] sm:$0xff] }
  0xd4   : > { %v4271_v26 = vshll.u32 %v10399_v4, 16  ;;  %v4275_v62 = vshrl.u32 %v10399_v4, 16 }
  0xd5   : > { %3635 = vmatmul.bf16.gmra.mxu3 %v10355_v22  ;;  %v10279_v22 = vld [vmem:[#allocation2 + $0x30] sm:$0xff] }
  0xd6   : > { %v11235_v29 = vpop.f32.mrf.mxu2  ;;  %v1891_v33 = vshll.u32 %v10279_v22, 16  ;;  %v4273_v37 = vrot.slane %v4271_v26, 1  ;;  %v1895_v5 = vshrl.u32 %v10279_v22, 16  ;;  %v10359_v26 = vld [vmem:[#allocation2 + $0x40] sm:$0xff] }
  0xd7   : > { %v11237_v30 = vpop.f32.mrf.mxu1 }
  0xd8   : > { %v11239_v3 = vpop.f32.mrf.mxu3  ;;  %v1893_v41 = vrot.slane %v1891_v33, 1  ;;  %v4274_v45 = vsel %vm1842_vm3, %v4269_v36, %v4273_v37  ;;  %v4277_v46 = vor.u32 %v4275_v62, %v4273_v37  ;;  %v4287_v36 = vshll.u32 %v10401_v25, 16  ;;  %v10510_v37 = vld [vmem:[%s11906_s3 + $0x1a8] sm:$0xff] }
  0xd9   : > { %5998 = vmatpush.bf16.msra.mxu2 %v10510_v37  ;;  %v10322_v37 = vld [vmem:[#allocation2 + $0x48] sm:$0xff] }
  0xda   : > { %v1897_v12 = vor.u32 %v1895_v5, %v1893_v41 }
  0xdb   : > { %v1388_v43 = vpop.f32.mrf.mxu0 }
  0xdc   : > { %v2801_v43 = vrot.slane %v10319_v35, 1 }
  0xde   : > { %v11248_v48 = vpop.f32.mrf.mxu2  ;;  %4586 = vmatmul.bf16.gmra.mxu0 %v4258_v47  ;;  %v2802_v56 = vsel %vm2789_vm4, %v2799_v14, %v2801_v43 }
  0xdf   : > { %v1428_v49 = vpop.f32.mrf.mxu1 }
  0xe0   : > { %v11251_v52 = vpop.f32.mrf.mxu3 }
  0xe2   : > { %2206 = vmatmul.bf16.gmra.mxu1 %v1878_v50  ;;  %v1894_v50 = vsel %vm1842_vm3, %v1889_v38, %v1893_v41  ;;  %v10550_v38 = vld [vmem:[%s11906_s3 + $0x1e8] sm:$0xff] }
  0xe3   : > { %2958 = vmatmul.bf16.gmra.mxu2 %v2798_v53  ;;  %v1390_v60 = vpop.f32.mrf.mxu0  ;;  %6944 = vmatpush.bf16.msra.mxu3 %v10550_v38 }
  0xe4   : > { %v10280_v60 = vld [vmem:[#allocation2 + $0x38] sm:$0xff] }
  0xe5   : > { %3640 = vmatmul.bf16.gmra.mxu3 %v10356_v57  ;;  %v10400_v57 = vld [vmem:[#allocation2 + $0x48] sm:$0xff] }
  0xe6   : > { %v1468_v63 = vpop.f32.mrf.mxu2  ;;  %v4283_v35 = vshrl.u32 %v10400_v57, 16 }
  0xe7   : > { %v1430_v51 = vpop.f32.mrf.mxu1  ;;  %v4279_v63 = vshll.u32 %v10400_v57, 16  ;;  %v4289_v57 = vrot.slane %v4287_v36, 1 }
  0xe8   : > { %v1508_v9 = vpop.f32.mrf.mxu3 }
  0xe9   : > { %v1899_v9 = vshll.u32 %v10280_v60, 16  ;;  %v4281_v11 = vrot.slane %v4279_v63, 1 }
  0xeb   : > { %v11254_v13 = vpop.f32.mrf.mxu0 }
  0xee   : > { %v1470_v17 = vpop.f32.mrf.mxu2  ;;  %4591 = vmatmul.bf16.gmra.mxu0 %v4266_v16  ;;  %v1901_v16 = vrot.slane %v1899_v9, 1 }
  0xef   : > { %v11257_v55 = vpop.f32.mrf.mxu1  ;;  %v2803_v17 = vrot.slane %v10320_v8, 1 }
  0xf0   : > { %v1510_v18 = vpop.f32.mrf.mxu3  ;;  %v1902_v4 = vsel %vm1842_vm3, %v1897_v12, %v1901_v16  ;;  %v10360_v12 = vld [vmem:[#allocation2 + $0x48] sm:$0xff] }
  0xf1   : > { %v2804_v22 = vsel %vm2789_vm4, %v2801_v43, %v2803_v17  ;;  %v1903_v43 = vshrl.u32 %v10280_v60, 16 }
  0xf2   : > { %2211 = vmatmul.bf16.gmra.mxu1 %v1886_v1  ;;  %v4282_v1 = vsel %vm1842_vm3, %v4277_v46, %v4281_v11 }
  0xf3   : > { %2963 = vmatmul.bf16.gmra.mxu2 %v2800_v19  ;;  %v11261_v23 = vpop.f32.mrf.mxu0  ;;  %v1905_v62 = vor.u32 %v1903_v43, %v1901_v16  ;;  %v10282_v16 = vld [vmem:[#allocation2 + $0x48] sm:$0xff] }
  0xf5   : > { %3645 = vmatmul.bf16.gmra.mxu3 %v10357_v21 }
  0xf6   : > { %v11263_v27 = vpop.f32.mrf.mxu2 }
  0xf7   : > { %v11265_v28 = vpop.f32.mrf.mxu1 }
  0xf8   : > { %v11267_v7 = vpop.f32.mrf.mxu3 }
  0xfb   : > { %v1398_v42 = vpop.f32.mrf.mxu0 }
  0xfe   : > { %v11270_v47 = vpop.f32.mrf.mxu2  ;;  %4596 = vmatmul.bf16.gmra.mxu0 %v4274_v45  ;;  %v1907_v45 = vshll.u32 %v10281_v31, 16 }
  0xff   : > { %v1438_v49 = vpop.f32.mrf.mxu1 }
 0x100   : > { %v11273_v53 = vpop.f32.mrf.mxu3  ;;  %v1909_v63 = vrot.slane %v1907_v45, 1 }
 0x102   : > { %2216 = vmatmul.bf16.gmra.mxu1 %v1894_v50  ;;  %v10321_v50 = vld [vmem:[#allocation2 + $0x40] sm:$0xff] }
 0x103   : > { %2968 = vmatmul.bf16.gmra.mxu2 %v2802_v56  ;;  %v1400_v61 = vpop.f32.mrf.mxu0  ;;  %v4285_v56 = vor.u32 %v4283_v35, %v4281_v11  ;;  %v10402_v11 = vld [vmem:[#allocation2 + $0x58] sm:$0xff]  ;;  %v1915_v35 = vshll.u32 %v10282_v16, 16 }
 0x104   : > { %v10590_v61 = vld [vmem:[%s11906_s3 + $0x228] sm:$0xff] }
 0x105   : > { %3650 = vmatmul.bf16.gmra.mxu3 %v10358_v58  ;;  %v10470_v58 = vld [vmem:[%s11906_s3 + $0x168] sm:$0xff]  ;;  %7695 = vmatpush.bf16.msra.mxu0 %v10590_v61 }
 0x106   : > { %v1478_v51 = vpop.f32.mrf.mxu2  ;;  %5316 = vmatpush.bf16.msra.mxu1 %v10470_v58 }
 0x107   : > { %v1440_v2 = vpop.f32.mrf.mxu1  ;;  %v2805_v51 = vrot.slane %v10321_v50, 1  ;;  %v1917_v50 = vrot.slane %v1915_v35, 1  ;;  %v10323_v35 = vld [vmem:[#allocation2 + $0x50] sm:$0xff] }
 0x108   : > { %v1518_v6 = vpop.f32.mrf.mxu3  ;;  %v4290_v2 = vsel %vm1842_vm3, %v4285_v56, %v4289_v57  ;;  %v2807_v56 = vrot.slane %v10322_v37, 1 }
 0x109   : > { %v1910_v6 = vsel %vm1842_vm3, %v1905_v62, %v1909_v63  ;;  %v2806_v46 = vsel %vm2789_vm4, %v2803_v17, %v2805_v51 }
 0x10b   : > { %v11276_v14 = vpop.f32.mrf.mxu0 }
 0x10e   : > { %v1480_v18 = vpop.f32.mrf.mxu2  ;;  %4601 = vmatmul.bf16.gmra.mxu0 %v4282_v1 }
 0x10f   : > { %v11279_v19 = vpop.f32.mrf.mxu1  ;;  %v4291_v18 = vshrl.u32 %v10401_v25, 16 }
 0x110   : > { %v1520_v21 = vpop.f32.mrf.mxu3 }
 0x111   : > { %v4293_v38 = vor.u32 %v4291_v18, %v4289_v57 }
 0x112   : > { %2221 = vmatmul.bf16.gmra.mxu1 %v1902_v4  ;;  %v4295_v4 = vshll.u32 %v10402_v11, 16 }
 0x113   : > { %2973 = vmatmul.bf16.gmra.mxu2 %v2804_v22  ;;  %v11283_v33 = vpop.f32.mrf.mxu0 }
 0x114   : > { %v4297_v43 = vrot.slane %v4295_v4, 1  ;;  %v1919_v4 = vshrl.u32 %v10282_v16, 16 }
 0x115   : > { %3655 = vmatmul.bf16.gmra.mxu3 %v10359_v26  ;;  %v1911_v26 = vshrl.u32 %v10281_v31, 16  ;;  %v10403_v31 = vld [vmem:[#allocation2 + $0x60] sm:$0xff] }
 0x116   : > { %v11291_v41 = vpop.f32.mrf.mxu2  ;;  %v4298_v58 = vsel %vm1842_vm3, %v4293_v38, %v4297_v43  ;;  %v1921_v38 = vor.u32 %v1919_v4, %v1917_v50  ;;  %v4307_v4 = vshrl.u32 %v10403_v31, 16 }
 0x117   : > { %v11293_v42 = vpop.f32.mrf.mxu1  ;;  %v1913_v45 = vor.u32 %v1911_v26, %v1909_v63  ;;  %v4299_v63 = vshrl.u32 %v10402_v11, 16  ;;  %v2809_v11 = vrot.slane %v10323_v35, 1 }
 0x118   : > { %v11295_v49 = vpop.f32.mrf.mxu3 }
 0x119   : > { %v1918_v25 = vsel %vm1842_vm3, %v1913_v45, %v1917_v50 }
 0x11b   : > { %v1408_v60 = vpop.f32.mrf.mxu0 }
 0x11e   : > { %v11304_v5 = vpop.f32.mrf.mxu2  ;;  %4606 = vmatmul.bf16.gmra.mxu0 %v4290_v2  ;;  %v2808_v2 = vsel %vm2789_vm4, %v2805_v51, %v2807_v56 }
 0x11f   : > { %v1448_v9 = vpop.f32.mrf.mxu1 }
 0x120   : > { %v11307_v8 = vpop.f32.mrf.mxu3  ;;  %v10361_v9 = vld [vmem:[#allocation2 + $0x50] sm:$0xff] }
 0x122   : > { %2226 = vmatmul.bf16.gmra.mxu1 %v1910_v6  ;;  %v10283_v6 = vld [vmem:[#allocation2 + $0x50] sm:$0xff] }
 0x123   : > { %2978 = vmatmul.bf16.gmra.mxu2 %v2806_v46  ;;  %v1410_v1 = vpop.f32.mrf.mxu0  ;;  %v4303_v46 = vshll.u32 %v10403_v31, 16 }
 0x125   : > { %3660 = vmatmul.bf16.gmra.mxu3 %v10360_v12  ;;  %v4305_v51 = vrot.slane %v4303_v46, 1  ;;  %v10284_v46 = vld [vmem:[#allocation2 + $0x58] sm:$0xff] }
 0x126   : > { %v1488_v21 = vpop.f32.mrf.mxu2 }
 0x127   : > { %v1450_v22 = vpop.f32.mrf.mxu1  ;;  %v1923_v21 = vshll.u32 %v10283_v6, 16 }
 0x128   : > { %v1528_v36 = vpop.f32.mrf.mxu3 }
 0x129   : > { %v4301_v36 = vor.u32 %v4299_v63, %v4297_v43  ;;  %v1925_v45 = vrot.slane %v1923_v21, 1  ;;  %v2810_v43 = vsel %vm2789_vm4, %v2807_v56, %v2809_v11  ;;  %v10404_v63 = vld [vmem:[#allocation2 + $0x68] sm:$0xff] }
 0x12b   : > { %v4572_v17 = vpop.f32.mrf.mxu0  ;;  %v1926_v16 = vsel %vm1842_vm3, %v1921_v38, %v1925_v45 }
 0x12e   : > { %v1490_v61 = vpop.f32.mrf.mxu2  ;;  %4611 = vmatmul.bf16.gmra.mxu0 %v4298_v58 }
 0x12f   : > { %v2192_v62 = vpop.f32.mrf.mxu1 }
 0x130   : > { %v1530_v60 = vpop.f32.mrf.mxu3  ;;  %v2416_v12 = vadd.f32 %v2192_v62, %v11198_v20 }
 0x132   : > { %2231 = vmatmul.bf16.gmra.mxu1 %v1918_v25  ;;  %v4306_v25 = vsel %vm1842_vm3, %v4301_v36, %v4305_v51  ;;  %v10324_v36 = vld [vmem:[#allocation2 + $0x58] sm:$0xff] }
 0x133   : > { %2983 = vmatmul.bf16.gmra.mxu2 %v2808_v2  ;;  %v4574_v57 = vpop.f32.mrf.mxu0 }
 0x135   : > { %3665 = vmatmul.bf16.gmra.mxu3 %v10361_v9 }
 0x136   : > { %v2944_v1 = vpop.f32.mrf.mxu2 }
 0x137   : > { %v2194_v18 = vpop.f32.mrf.mxu1  ;;  %v3168_v22 = vadd.f32 %v2944_v1, %v2416_v12 }
 0x138   : > { %v3626_v26 = vpop.f32.mrf.mxu3  ;;  %v2417_v20 = vadd.f32 %v2194_v18, %v11204_v34  ;;  %v4311_v34 = vshll.u32 %v10404_v63, 16 }
 0x139   : > { %v3850_v37 = vadd.f32 %v3626_v26, %v3168_v22  ;;  %v1927_v22 = vshrl.u32 %v10283_v6, 16  ;;  %v1931_v26 = vshll.u32 %v10284_v46, 16  ;;  %v10405_v6 = vld [vmem:[#allocation2 + $0x70] sm:$0xff] }
 0x13a   : > { %v4313_v56 = vrot.slane %v4311_v34, 1 }
 0x13b   : > { %v11314_v58 = vadd.f32 %v4572_v17, %v3850_v37  ;;  %v4577_v61 = vpop.f32.mrf.mxu0  ;;  %v10362_v17 = vld [vmem:[#allocation2 + $0x58] sm:$0xff]  ;;  %v4309_v37 = vor.u32 %v4307_v4, %v4305_v51  ;;  %v1929_v38 = vor.u32 %v1927_v22, %v1925_v45  ;;  %v4315_v45 = vshrl.u32 %v10404_v63, 16  ;;  %v10549_v4 = vld [vmem:[%s11906_s3 + $0x1e0] sm:$0xff] }
 0x13c   : > { %v1933_v61 = vrot.slane %v1931_v26, 1  ;;  %6945 = vmatpush.bf16.msra.mxu3 %v10549_v4  ;;  %v10325_v26 = vld [vmem:[#allocation2 + $0x60] sm:$0xff] }
 0x13e   : > { %v2946_v62 = vpop.f32.mrf.mxu2  ;;  %4616 = vmatmul.bf16.gmra.mxu0 %v4306_v25  ;;  %v1934_v31 = vsel %vm1842_vm3, %v1929_v38, %v1933_v61  ;;  %v10589_v38 = vld [vmem:[%s11906_s3 + $0x220] sm:$0xff] }
 0x13f   : > { %v2197_v60 = vpop.f32.mrf.mxu1  ;;  %v3169_v2 = vadd.f32 %v2946_v62, %v2417_v20  ;;  %v2811_v20 = vrot.slane %v10324_v36, 1  ;;  %v4314_v62 = vsel %vm1842_vm3, %v4309_v37, %v4313_v56  ;;  %v10469_v37 = vld [vmem:[%s11906_s3 + $0x160] sm:$0xff]  ;;  %7696 = vmatpush.bf16.msra.mxu0 %v10589_v38 }
 0x140   : > { %v3628_v9 = vpop.f32.mrf.mxu3  ;;  %5317 = vmatpush.bf16.msra.mxu1 %v10469_v37  ;;  %v10326_v37 = vld [vmem:[#allocation2 + $0x68] sm:$0xff] }
 0x141   : > { %v3851_v50 = vadd.f32 %v3628_v9, %v3169_v2  ;;  %v2812_v2 = vsel %vm2789_vm4, %v2809_v11, %v2811_v20  ;;  %v10363_v9 = vld [vmem:[#allocation2 + $0x60] sm:$0xff] }
 0x142   : > { %2236 = vmatmul.bf16.gmra.mxu1 %v1926_v16 }
 0x143   : > { %2988 = vmatmul.bf16.gmra.mxu2 %v2810_v43  ;;  %v11320_v12 = vadd.f32 %v4574_v57, %v3851_v50  ;;  %v4579_v1 = vpop.f32.mrf.mxu0  ;;  %v10285_v43 = vld [vmem:[#allocation2 + $0x60] sm:$0xff]  ;;  %v4319_v50 = vshll.u32 %v10405_v6, 16 }
 0x144   : > { %v10509_v1 = vld [vmem:[%s11906_s3 + $0x1a0] sm:$0xff] }
 0x145   : > { %3670 = vmatmul.bf16.gmra.mxu3 %v10362_v17  ;;  %5999 = vmatpush.bf16.msra.mxu2 %v10509_v1  ;;  %v10406_v1 = vld [vmem:[#allocation2 + $0x78] sm:$0xff] }
 0x146   : > { %v2949_v18 = vpop.f32.mrf.mxu2 }
 0x147   : > { %v2199_v21 = vpop.f32.mrf.mxu1  ;;  %v1935_v18 = vshrl.u32 %v10284_v46, 16 }
 0x148   : > { %v3631_v35 = vpop.f32.mrf.mxu3  ;;  %v1939_v21 = vshll.u32 %v10285_v43, 16 }
 0x149   : > { %v4317_v35 = vor.u32 %v4315_v45, %v4313_v56 }
 0x14b   : > { %v4582_v25 = vpop.f32.mrf.mxu0 }
 0x14e   : > { %v2951_v57 = vpop.f32.mrf.mxu2  ;;  %4621 = vmatmul.bf16.gmra.mxu0 %v4314_v62  ;;  %v1937_v62 = vor.u32 %v1935_v18, %v1933_v61 }
 0x14f   : > { %v2202_v60 = vpop.f32.mrf.mxu1  ;;  %v1941_v57 = vrot.slane %v1939_v21, 1 }
 0x150   : > { %v3633_v16 = vpop.f32.mrf.mxu3  ;;  %v2420_v17 = vadd.f32 %v2202_v60, %v11220_v0  ;;  %v4321_v0 = vrot.slane %v4319_v50, 1 }
 0x151   : > { %v1942_v45 = vsel %vm1842_vm3, %v1937_v62, %v1941_v57 }
 0x152   : > { %2241 = vmatmul.bf16.gmra.mxu1 %v1934_v31  ;;  %v2813_v31 = vrot.slane %v10325_v26, 1  ;;  %v4322_v56 = vsel %vm1842_vm3, %v4317_v35, %v4321_v0  ;;  %v1943_v26 = vshrl.u32 %v10285_v43, 16  ;;  %v10407_v43 = vld [vmem:[#allocation2 + $0x80] sm:$0xff] }
 0x153   : > { %2993 = vmatmul.bf16.gmra.mxu2 %v2812_v2  ;;  %v4584_v51 = vpop.f32.mrf.mxu0 }
 0x154   : > { %v2814_v61 = vsel %vm2789_vm4, %v2811_v20, %v2813_v31  ;;  %v1945_v62 = vor.u32 %v1943_v26, %v1941_v57  ;;  %v4331_v57 = vshrl.u32 %v10406_v1, 16 }
 0x155   : > { %3675 = vmatmul.bf16.gmra.mxu3 %v10363_v9 }
 0x156   : > { %v2954_v11 = vpop.f32.mrf.mxu2 }
 0x157   : > { %v2204_v34 = vpop.f32.mrf.mxu1  ;;  %v3172_v22 = vadd.f32 %v2954_v11, %v2420_v17  ;;  %v10286_v11 = vld [vmem:[#allocation2 + $0x68] sm:$0xff] }
 0x158   : > { %v3636_v63 = vpop.f32.mrf.mxu3  ;;  %v2421_v16 = vadd.f32 %v2204_v34, %v11227_v24  ;;  %v4327_v24 = vshll.u32 %v10406_v1, 16  ;;  %v1947_v35 = vshll.u32 %v10286_v11, 16 }
 0x159   : > { %v3854_v36 = vadd.f32 %v3636_v63, %v3172_v22  ;;  %v4323_v22 = vshrl.u32 %v10405_v6, 16 }
 0x15a   : > { %v4329_v20 = vrot.slane %v4327_v24, 1  ;;  %v1951_v24 = vshrl.u32 %v10286_v11, 16 }
 0x15b   : > { %v11338_v46 = vadd.f32 %v4582_v25, %v3854_v36  ;;  %v4587_v60 = vpop.f32.mrf.mxu0  ;;  %v10364_v25 = vld [vmem:[#allocation2 + $0x68] sm:$0xff]  ;;  %v4325_v38 = vor.u32 %v4323_v22, %v4321_v0 }
 0x15c   : > { %v1949_v60 = vrot.slane %v1947_v35, 1  ;;  %v10327_v35 = vld [vmem:[#allocation2 + $0x70] sm:$0xff] }
 0x15d   : > { %v2817_v1 = vrot.slane %v10327_v35, 1 }
 0x15e   : > { %v2956_v2 = vpop.f32.mrf.mxu2  ;;  %4626 = vmatmul.bf16.gmra.mxu0 %v4322_v56  ;;  %v1950_v6 = vsel %vm1842_vm3, %v1945_v62, %v1949_v60 }
 0x15f   : > { %v2207_v9 = vpop.f32.mrf.mxu1  ;;  %v3173_v50 = vadd.f32 %v2956_v2, %v2421_v16  ;;  %v2815_v16 = vrot.slane %v10326_v37, 1  ;;  %v4330_v2 = vsel %vm1842_vm3, %v4325_v38, %v4329_v20  ;;  %v1953_v38 = vor.u32 %v1951_v24, %v1949_v60 }
 0x160   : > { %v3638_v17 = vpop.f32.mrf.mxu3  ;;  %v4339_v24 = vshrl.u32 %v10407_v43, 16 }
 0x161   : > { %v3855_v4 = vadd.f32 %v3638_v17, %v3173_v50  ;;  %v2816_v50 = vsel %vm2789_vm4, %v2813_v31, %v2815_v16  ;;  %v10365_v17 = vld [vmem:[#allocation2 + $0x70] sm:$0xff] }
 0x162   : > { %2246 = vmatmul.bf16.gmra.mxu1 %v1942_v45 }
 0x163   : > { %2998 = vmatmul.bf16.gmra.mxu2 %v2814_v61  ;;  %v11344_v18 = vadd.f32 %v4584_v51, %v3855_v4  ;;  %v4589_v21 = vpop.f32.mrf.mxu0  ;;  %v10287_v61 = vld [vmem:[#allocation2 + $0x70] sm:$0xff]  ;;  %v4335_v4 = vshll.u32 %v10407_v43, 16 }
 0x165   : > { %3680 = vmatmul.bf16.gmra.mxu3 %v10364_v25  ;;  %v4337_v31 = vrot.slane %v4335_v4, 1  ;;  %v10288_v4 = vld [vmem:[#allocation2 + $0x78] sm:$0xff] }
 0x166   : > { %v2959_v34 = vpop.f32.mrf.mxu2 }
 0x167   : > { %v2209_v63 = vpop.f32.mrf.mxu1  ;;  %v1955_v34 = vshll.u32 %v10287_v61, 16 }
 0x168   : > { %v3641_v36 = vpop.f32.mrf.mxu3 }
 0x169   : > { %v4333_v36 = vor.u32 %v4331_v57, %v4329_v20  ;;  %v1957_v62 = vrot.slane %v1955_v34, 1  ;;  %v2818_v20 = vsel %vm2789_vm4, %v2815_v16, %v2817_v1  ;;  %v10408_v57 = vld [vmem:[#allocation2 + $0x88] sm:$0xff] }
 0x16b   : > { %v4592_v56 = vpop.f32.mrf.mxu0  ;;  %v1958_v11 = vsel %vm1842_vm3, %v1953_v38, %v1957_v62 }
 0x16e   : > { %v2961_v51 = vpop.f32.mrf.mxu2  ;;  %4631 = vmatmul.bf16.gmra.mxu0 %v4330_v2 }
 0x16f   : > { %v2212_v9 = vpop.f32.mrf.mxu1 }
 0x170   : > { %v3643_v45 = vpop.f32.mrf.mxu3  ;;  %v2424_v25 = vadd.f32 %v2212_v9, %v11254_v13 }
 0x172   : > { %2251 = vmatmul.bf16.gmra.mxu1 %v1950_v6  ;;  %v4338_v6 = vsel %vm1842_vm3, %v4333_v36, %v4337_v31  ;;  %v10328_v36 = vld [vmem:[#allocation2 + $0x78] sm:$0xff] }
 0x173   : > { %3003 = vmatmul.bf16.gmra.mxu2 %v2816_v50  ;;  %v4594_v0 = vpop.f32.mrf.mxu0 }
 0x175   : > { %3685 = vmatmul.bf16.gmra.mxu3 %v10365_v17 }
 0x176   : > { %v2964_v21 = vpop.f32.mrf.mxu2 }
 0x177   : > { %v2214_v22 = vpop.f32.mrf.mxu1  ;;  %v3176_v63 = vadd.f32 %v2964_v21, %v2424_v25 }
 0x178   : > { %v3646_v26 = vpop.f32.mrf.mxu3  ;;  %v2425_v13 = vadd.f32 %v2214_v22, %v11261_v23  ;;  %v4343_v23 = vshll.u32 %v10408_v57, 16 }
 0x179   : > { %v3858_v37 = vadd.f32 %v3646_v26, %v3176_v63  ;;  %v1959_v63 = vshrl.u32 %v10287_v61, 16  ;;  %v1963_v26 = vshll.u32 %v10288_v4, 16  ;;  %v10409_v61 = vld [vmem:[#allocation2 + $0x90] sm:$0xff] }
 0x17a   : > { %v4345_v16 = vrot.slane %v4343_v23, 1 }
 0x17b   : > { %v11350_v2 = vadd.f32 %v4592_v56, %v3858_v37  ;;  %v4597_v51 = vpop.f32.mrf.mxu0  ;;  %v10366_v56 = vld [vmem:[#allocation2 + $0x78] sm:$0xff]  ;;  %v4341_v37 = vor.u32 %v4339_v24, %v4337_v31  ;;  %v1961_v38 = vor.u32 %v1959_v63, %v1957_v62  ;;  %v4347_v62 = vshrl.u32 %v10408_v57, 16 }
 0x17c   : > { %v1965_v51 = vrot.slane %v1963_v26, 1  ;;  %v10548_v24 = vld [vmem:[%s11906_s3 + $0x1d8] sm:$0xff]  ;;  %v10329_v26 = vld [vmem:[#allocation2 + $0x80] sm:$0xff] }
 0x17d   : > { %6946 = vmatpush.bf16.msra.mxu3 %v10548_v24 }
 0x17e   : > { %v2966_v9 = vpop.f32.mrf.mxu2  ;;  %4636 = vmatmul.bf16.gmra.mxu0 %v4338_v6  ;;  %v1966_v43 = vsel %vm1842_vm3, %v1961_v38, %v1965_v51  ;;  %v10588_v38 = vld [vmem:[%s11906_s3 + $0x218] sm:$0xff] }
 0x17f   : > { %v2217_v45 = vpop.f32.mrf.mxu1  ;;  %v3177_v50 = vadd.f32 %v2966_v9, %v2425_v13  ;;  %v2819_v13 = vrot.slane %v10328_v36, 1  ;;  %v4346_v9 = vsel %vm1842_vm3, %v4341_v37, %v4345_v16  ;;  %v10468_v37 = vld [vmem:[%s11906_s3 + $0x158] sm:$0xff]  ;;  %7697 = vmatpush.bf16.msra.mxu0 %v10588_v38 }
 0x180   : > { %v3648_v17 = vpop.f32.mrf.mxu3  ;;  %5318 = vmatpush.bf16.msra.mxu1 %v10468_v37  ;;  %v10330_v37 = vld [vmem:[#allocation2 + $0x88] sm:$0xff] }
 0x181   : > { %v3859_v60 = vadd.f32 %v3648_v17, %v3177_v50  ;;  %v2820_v50 = vsel %vm2789_vm4, %v2817_v1, %v2819_v13  ;;  %v10367_v17 = vld [vmem:[#allocation2 + $0x80] sm:$0xff] }
 0x182   : > { %2256 = vmatmul.bf16.gmra.mxu1 %v1958_v11 }
 0x183   : > { %3008 = vmatmul.bf16.gmra.mxu2 %v2818_v20  ;;  %v11356_v25 = vadd.f32 %v4594_v0, %v3859_v60  ;;  %v4599_v21 = vpop.f32.mrf.mxu0  ;;  %v10289_v20 = vld [vmem:[#allocation2 + $0x80] sm:$0xff]  ;;  %v4351_v60 = vshll.u32 %v10409_v61, 16 }
 0x184   : > { %v10508_v21 = vld [vmem:[%s11906_s3 + $0x198] sm:$0xff] }
 0x185   : > { %3690 = vmatmul.bf16.gmra.mxu3 %v10366_v56  ;;  %6000 = vmatpush.bf16.msra.mxu2 %v10508_v21  ;;  %v10410_v21 = vld [vmem:[#allocation2 + $0x98] sm:$0xff] }
 0x186   : > { %v2969_v22 = vpop.f32.mrf.mxu2 }
 0x187   : > { %v2219_v34 = vpop.f32.mrf.mxu1  ;;  %v1967_v22 = vshrl.u32 %v10288_v4, 16 }
 0x188   : > { %v3651_v35 = vpop.f32.mrf.mxu3  ;;  %v1971_v34 = vshll.u32 %v10289_v20, 16 }
 0x189   : > { %v4349_v35 = vor.u32 %v4347_v62, %v4345_v16 }
 0x18b   : > { %v4602_v6 = vpop.f32.mrf.mxu0 }
 0x18e   : > { %v2971_v0 = vpop.f32.mrf.mxu2  ;;  %4641 = vmatmul.bf16.gmra.mxu0 %v4346_v9  ;;  %v1969_v9 = vor.u32 %v1967_v22, %v1965_v51 }
 0x18f   : > { %v2222_v45 = vpop.f32.mrf.mxu1  ;;  %v1973_v0 = vrot.slane %v1971_v34, 1 }
 0x190   : > { %v3653_v11 = vpop.f32.mrf.mxu3  ;;  %v2428_v56 = vadd.f32 %v2222_v45, %v11276_v14  ;;  %v4353_v14 = vrot.slane %v4351_v60, 1 }
 0x191   : > { %v1974_v62 = vsel %vm1842_vm3, %v1969_v9, %v1973_v0 }
 0x192   : > { %2261 = vmatmul.bf16.gmra.mxu1 %v1966_v43  ;;  %v2821_v43 = vrot.slane %v10329_v26, 1  ;;  %v4354_v16 = vsel %vm1842_vm3, %v4349_v35, %v4353_v14  ;;  %v1975_v26 = vshrl.u32 %v10289_v20, 16  ;;  %v10411_v20 = vld [vmem:[#allocation2 + $0xa0] sm:$0xff] }
 0x193   : > { %3013 = vmatmul.bf16.gmra.mxu2 %v2820_v50  ;;  %v4604_v31 = vpop.f32.mrf.mxu0 }
 0x194   : > { %v2822_v51 = vsel %vm2789_vm4, %v2819_v13, %v2821_v43  ;;  %v1977_v9 = vor.u32 %v1975_v26, %v1973_v0  ;;  %v4363_v0 = vshrl.u32 %v10410_v21, 16 }
 0x195   : > { %3695 = vmatmul.bf16.gmra.mxu3 %v10367_v17 }
 0x196   : > { %v2974_v1 = vpop.f32.mrf.mxu2 }
 0x197   : > { %v2224_v23 = vpop.f32.mrf.mxu1  ;;  %v3180_v63 = vadd.f32 %v2974_v1, %v2428_v56  ;;  %v10290_v1 = vld [vmem:[#allocation2 + $0x88] sm:$0xff] }
 0x198   : > { %v3656_v57 = vpop.f32.mrf.mxu3  ;;  %v2429_v11 = vadd.f32 %v2224_v23, %v11283_v33  ;;  %v4359_v33 = vshll.u32 %v10410_v21, 16  ;;  %v1979_v35 = vshll.u32 %v10290_v1, 16 }
 0x199   : > { %v3862_v36 = vadd.f32 %v3656_v57, %v3180_v63  ;;  %v4355_v63 = vshrl.u32 %v10409_v61, 16 }
 0x19a   : > { %v4361_v13 = vrot.slane %v4359_v33, 1  ;;  %v1983_v33 = vshrl.u32 %v10290_v1, 16 }
 0x19b   : > { %v11374_v4 = vadd.f32 %v4602_v6, %v3862_v36  ;;  %v4607_v45 = vpop.f32.mrf.mxu0  ;;  %v10368_v6 = vld [vmem:[#allocation2 + $0x88] sm:$0xff]  ;;  %v4357_v38 = vor.u32 %v4355_v63, %v4353_v14 }
 0x19c   : > { %v1981_v45 = vrot.slane %v1979_v35, 1  ;;  %v10331_v35 = vld [vmem:[#allocation2 + $0x90] sm:$0xff] }
 0x19d   : > { %v2825_v21 = vrot.slane %v10331_v35, 1 }
 0x19e   : > { %v2976_v50 = vpop.f32.mrf.mxu2  ;;  %4646 = vmatmul.bf16.gmra.mxu0 %v4354_v16  ;;  %v1982_v61 = vsel %vm1842_vm3, %v1977_v9, %v1981_v45 }
 0x19f   : > { %v2227_v17 = vpop.f32.mrf.mxu1  ;;  %v3181_v60 = vadd.f32 %v2976_v50, %v2429_v11  ;;  %v2823_v11 = vrot.slane %v10330_v37, 1  ;;  %v4362_v50 = vsel %vm1842_vm3, %v4357_v38, %v4361_v13  ;;  %v1985_v38 = vor.u32 %v1983_v33, %v1981_v45 }
 0x1a0   : > { %v3658_v56 = vpop.f32.mrf.mxu3  ;;  %v4371_v33 = vshrl.u32 %v10411_v20, 16 }
 0x1a1   : > { %v3863_v24 = vadd.f32 %v3658_v56, %v3181_v60  ;;  %v2824_v60 = vsel %vm2789_vm4, %v2821_v43, %v2823_v11  ;;  %v10369_v56 = vld [vmem:[#allocation2 + $0x90] sm:$0xff] }
 0x1a2   : > { %2266 = vmatmul.bf16.gmra.mxu1 %v1974_v62 }
 0x1a3   : > { %3018 = vmatmul.bf16.gmra.mxu2 %v2822_v51  ;;  %v11380_v22 = vadd.f32 %v4604_v31, %v3863_v24  ;;  %v4609_v34 = vpop.f32.mrf.mxu0  ;;  %v10291_v51 = vld [vmem:[#allocation2 + $0x90] sm:$0xff]  ;;  %v4367_v24 = vshll.u32 %v10411_v20, 16 }
 0x1a5   : > { %3700 = vmatmul.bf16.gmra.mxu3 %v10368_v6  ;;  %v4369_v43 = vrot.slane %v4367_v24, 1  ;;  %v10292_v24 = vld [vmem:[#allocation2 + $0x98] sm:$0xff] }
 0x1a6   : > { %v2979_v23 = vpop.f32.mrf.mxu2 }
 0x1a7   : > { %v2229_v57 = vpop.f32.mrf.mxu1  ;;  %v1987_v23 = vshll.u32 %v10291_v51, 16 }
 0x1a8   : > { %v3661_v36 = vpop.f32.mrf.mxu3 }
 0x1a9   : > { %v4365_v36 = vor.u32 %v4363_v0, %v4361_v13  ;;  %v1989_v9 = vrot.slane %v1987_v23, 1  ;;  %v2826_v13 = vsel %vm2789_vm4, %v2823_v11, %v2825_v21  ;;  %v10412_v0 = vld [vmem:[#allocation2 + $0xa8] sm:$0xff] }
 0x1ab   : > { %v4612_v16 = vpop.f32.mrf.mxu0  ;;  %v1990_v1 = vsel %vm1842_vm3, %v1985_v38, %v1989_v9 }
 0x1ae   : > { %v2981_v31 = vpop.f32.mrf.mxu2  ;;  %4651 = vmatmul.bf16.gmra.mxu0 %v4362_v50 }
 0x1af   : > { %v2232_v17 = vpop.f32.mrf.mxu1 }
 0x1b0   : > { %v3663_v62 = vpop.f32.mrf.mxu3  ;;  %v2432_v6 = vadd.f32 %v2232_v17, %v11201_v32 }
 0x1b2   : > { %2271 = vmatmul.bf16.gmra.mxu1 %v1982_v61  ;;  %v4370_v61 = vsel %vm1842_vm3, %v4365_v36, %v4369_v43  ;;  %v10332_v36 = vld [vmem:[#allocation2 + $0x98] sm:$0xff] }
 0x1b3   : > { %3023 = vmatmul.bf16.gmra.mxu2 %v2824_v60  ;;  %v4614_v14 = vpop.f32.mrf.mxu0 }
 0x1b5   : > { %3705 = vmatmul.bf16.gmra.mxu3 %v10369_v56 }
 0x1b6   : > { %v2984_v34 = vpop.f32.mrf.mxu2 }
 0x1b7   : > { %v2234_v63 = vpop.f32.mrf.mxu1  ;;  %v3184_v57 = vadd.f32 %v2984_v34, %v2432_v6 }
 0x1b8   : > { %v3666_v26 = vpop.f32.mrf.mxu3  ;;  %v2433_v32 = vadd.f32 %v2234_v63, %v11209_v40  ;;  %v4375_v40 = vshll.u32 %v10412_v0, 16 }
 0x1b9   : > { %v3866_v37 = vadd.f32 %v3666_v26, %v3184_v57  ;;  %v1991_v57 = vshrl.u32 %v10291_v51, 16  ;;  %v1995_v26 = vshll.u32 %v10292_v24, 16  ;;  %v10413_v51 = vld [vmem:[#allocation2 + $0xb0] sm:$0xff] }
 0x1ba   : > { %v4377_v11 = vrot.slane %v4375_v40, 1 }
 0x1bb   : > { %v11386_v50 = vadd.f32 %v4612_v16, %v3866_v37  ;;  %v4617_v31 = vpop.f32.mrf.mxu0  ;;  %v10370_v16 = vld [vmem:[#allocation2 + $0x98] sm:$0xff]  ;;  %v4373_v37 = vor.u32 %v4371_v33, %v4369_v43  ;;  %v1993_v38 = vor.u32 %v1991_v57, %v1989_v9  ;;  %v4379_v9 = vshrl.u32 %v10412_v0, 16  ;;  %v10547_v33 = vld [vmem:[%s11906_s3 + $0x1d0] sm:$0xff] }
 0x1bc   : > { %v1997_v31 = vrot.slane %v1995_v26, 1  ;;  %6947 = vmatpush.bf16.msra.mxu3 %v10547_v33  ;;  %v10333_v26 = vld [vmem:[#allocation2 + $0xa0] sm:$0xff] }
 0x1be   : > { %v2986_v17 = vpop.f32.mrf.mxu2  ;;  %4656 = vmatmul.bf16.gmra.mxu0 %v4370_v61  ;;  %v1998_v20 = vsel %vm1842_vm3, %v1993_v38, %v1997_v31  ;;  %v10587_v38 = vld [vmem:[%s11906_s3 + $0x210] sm:$0xff] }
 0x1bf   : > { %v2237_v62 = vpop.f32.mrf.mxu1  ;;  %v3185_v60 = vadd.f32 %v2986_v17, %v2433_v32  ;;  %v2827_v32 = vrot.slane %v10332_v36, 1  ;;  %v4378_v17 = vsel %vm1842_vm3, %v4373_v37, %v4377_v11  ;;  %v10467_v37 = vld [vmem:[%s11906_s3 + $0x150] sm:$0xff]  ;;  %7698 = vmatpush.bf16.msra.mxu0 %v10587_v38 }
 0x1c0   : > { %v3668_v56 = vpop.f32.mrf.mxu3  ;;  %5319 = vmatpush.bf16.msra.mxu1 %v10467_v37  ;;  %v10334_v37 = vld [vmem:[#allocation2 + $0xa8] sm:$0xff] }
 0x1c1   : > { %v3867_v45 = vadd.f32 %v3668_v56, %v3185_v60  ;;  %v2828_v60 = vsel %vm2789_vm4, %v2825_v21, %v2827_v32  ;;  %v10371_v56 = vld [vmem:[#allocation2 + $0xa0] sm:$0xff] }
 0x1c2   : > { %2276 = vmatmul.bf16.gmra.mxu1 %v1990_v1 }
 0x1c3   : > { %3028 = vmatmul.bf16.gmra.mxu2 %v2826_v13  ;;  %v11392_v6 = vadd.f32 %v4614_v14, %v3867_v45  ;;  %v4619_v34 = vpop.f32.mrf.mxu0  ;;  %v10293_v13 = vld [vmem:[#allocation2 + $0xa0] sm:$0xff]  ;;  %v4383_v45 = vshll.u32 %v10413_v51, 16 }
 0x1c4   : > { %v10507_v34 = vld [vmem:[%s11906_s3 + $0x190] sm:$0xff] }
 0x1c5   : > { %3710 = vmatmul.bf16.gmra.mxu3 %v10370_v16  ;;  %6001 = vmatpush.bf16.msra.mxu2 %v10507_v34  ;;  %v10414_v34 = vld [vmem:[#allocation2 + $0xb8] sm:$0xff] }
 0x1c6   : > { %v2989_v63 = vpop.f32.mrf.mxu2 }
 0x1c7   : > { %v2239_v23 = vpop.f32.mrf.mxu1  ;;  %v1999_v63 = vshrl.u32 %v10292_v24, 16 }
 0x1c8   : > { %v3671_v35 = vpop.f32.mrf.mxu3  ;;  %v2003_v23 = vshll.u32 %v10293_v13, 16 }
 0x1c9   : > { %v4381_v35 = vor.u32 %v4379_v9, %v4377_v11 }
 0x1cb   : > { %v4622_v61 = vpop.f32.mrf.mxu0 }
 0x1ce   : > { %v2991_v14 = vpop.f32.mrf.mxu2  ;;  %4661 = vmatmul.bf16.gmra.mxu0 %v4378_v17  ;;  %v2001_v17 = vor.u32 %v1999_v63, %v1997_v31 }
 0x1cf   : > { %v2242_v62 = vpop.f32.mrf.mxu1  ;;  %v2005_v14 = vrot.slane %v2003_v23, 1 }
 0x1d0   : > { %v3673_v1 = vpop.f32.mrf.mxu3  ;;  %v2436_v16 = vadd.f32 %v2242_v62, %v11223_v10  ;;  %v4385_v10 = vrot.slane %v4383_v45, 1 }
 0x1d1   : > { %v2006_v9 = vsel %vm1842_vm3, %v2001_v17, %v2005_v14 }
 0x1d2   : > { %2281 = vmatmul.bf16.gmra.mxu1 %v1998_v20  ;;  %v2829_v20 = vrot.slane %v10333_v26, 1  ;;  %v4386_v11 = vsel %vm1842_vm3, %v4381_v35, %v4385_v10  ;;  %v2007_v26 = vshrl.u32 %v10293_v13, 16  ;;  %v10415_v13 = vld [vmem:[#allocation2 + $0xc0] sm:$0xff] }
 0x1d3   : > { %3033 = vmatmul.bf16.gmra.mxu2 %v2828_v60  ;;  %v4624_v43 = vpop.f32.mrf.mxu0 }
 0x1d4   : > { %v2830_v31 = vsel %vm2789_vm4, %v2827_v32, %v2829_v20  ;;  %v2009_v17 = vor.u32 %v2007_v26, %v2005_v14  ;;  %v4395_v14 = vshrl.u32 %v10414_v34, 16 }
 0x1d5   : > { %3715 = vmatmul.bf16.gmra.mxu3 %v10371_v56 }
 0x1d6   : > { %v2994_v21 = vpop.f32.mrf.mxu2 }
 0x1d7   : > { %v2244_v40 = vpop.f32.mrf.mxu1  ;;  %v3188_v57 = vadd.f32 %v2994_v21, %v2436_v16  ;;  %v10294_v21 = vld [vmem:[#allocation2 + $0xa8] sm:$0xff] }
 0x1d8   : > { %v3676_v0 = vpop.f32.mrf.mxu3  ;;  %v2437_v1 = vadd.f32 %v2244_v40, %v11237_v30  ;;  %v4391_v30 = vshll.u32 %v10414_v34, 16  ;;  %v2011_v35 = vshll.u32 %v10294_v21, 16 }
 0x1d9   : > { %v3870_v36 = vadd.f32 %v3676_v0, %v3188_v57  ;;  %v4387_v57 = vshrl.u32 %v10413_v51, 16 }
 0x1da   : > { %v4393_v32 = vrot.slane %v4391_v30, 1  ;;  %v2015_v30 = vshrl.u32 %v10294_v21, 16 }
 0x1db   : > { %v11410_v24 = vadd.f32 %v4622_v61, %v3870_v36  ;;  %v4627_v62 = vpop.f32.mrf.mxu0  ;;  %v10372_v61 = vld [vmem:[#allocation2 + $0xa8] sm:$0xff]  ;;  %v4389_v38 = vor.u32 %v4387_v57, %v4385_v10 }
 0x1dc   : > { %v2013_v62 = vrot.slane %v2011_v35, 1  ;;  %v10335_v35 = vld [vmem:[#allocation2 + $0xb0] sm:$0xff] }
 0x1dd   : > { %v2833_v34 = vrot.slane %v10335_v35, 1 }
 0x1de   : > { %v2996_v60 = vpop.f32.mrf.mxu2  ;;  %4666 = vmatmul.bf16.gmra.mxu0 %v4386_v11  ;;  %v2014_v51 = vsel %vm1842_vm3, %v2009_v17, %v2013_v62 }
 0x1df   : > { %v2247_v56 = vpop.f32.mrf.mxu1  ;;  %v3189_v45 = vadd.f32 %v2996_v60, %v2437_v1  ;;  %v2831_v1 = vrot.slane %v10334_v37, 1  ;;  %v4394_v60 = vsel %vm1842_vm3, %v4389_v38, %v4393_v32  ;;  %v2017_v38 = vor.u32 %v2015_v30, %v2013_v62 }
 0x1e0   : > { %v3678_v16 = vpop.f32.mrf.mxu3  ;;  %v4403_v30 = vshrl.u32 %v10415_v13, 16 }
 0x1e1   : > { %v3871_v33 = vadd.f32 %v3678_v16, %v3189_v45  ;;  %v2832_v45 = vsel %vm2789_vm4, %v2829_v20, %v2831_v1  ;;  %v10373_v16 = vld [vmem:[#allocation2 + $0xb0] sm:$0xff] }
 0x1e2   : > { %2286 = vmatmul.bf16.gmra.mxu1 %v2006_v9 }
 0x1e3   : > { %3038 = vmatmul.bf16.gmra.mxu2 %v2830_v31  ;;  %v11416_v63 = vadd.f32 %v4624_v43, %v3871_v33  ;;  %v4629_v23 = vpop.f32.mrf.mxu0  ;;  %v10295_v31 = vld [vmem:[#allocation2 + $0xb0] sm:$0xff]  ;;  %v4399_v33 = vshll.u32 %v10415_v13, 16 }
 0x1e5   : > { %3720 = vmatmul.bf16.gmra.mxu3 %v10372_v61  ;;  %v4401_v20 = vrot.slane %v4399_v33, 1  ;;  %v10296_v33 = vld [vmem:[#allocation2 + $0xb8] sm:$0xff] }
 0x1e6   : > { %v2999_v40 = vpop.f32.mrf.mxu2 }
 0x1e7   : > { %v2249_v0 = vpop.f32.mrf.mxu1  ;;  %v2019_v40 = vshll.u32 %v10295_v31, 16 }
 0x1e8   : > { %v3681_v36 = vpop.f32.mrf.mxu3 }
 0x1e9   : > { %v4397_v36 = vor.u32 %v4395_v14, %v4393_v32  ;;  %v2021_v17 = vrot.slane %v2019_v40, 1  ;;  %v2834_v32 = vsel %vm2789_vm4, %v2831_v1, %v2833_v34  ;;  %v10416_v14 = vld [vmem:[#allocation2 + $0xc8] sm:$0xff] }
 0x1eb   : > { %v4632_v11 = vpop.f32.mrf.mxu0  ;;  %v2022_v21 = vsel %vm1842_vm3, %v2017_v38, %v2021_v17 }
 0x1ee   : > { %v3001_v43 = vpop.f32.mrf.mxu2  ;;  %4671 = vmatmul.bf16.gmra.mxu0 %v4394_v60 }
 0x1ef   : > { %v2252_v56 = vpop.f32.mrf.mxu1 }
 0x1f0   : > { %v3683_v9 = vpop.f32.mrf.mxu3  ;;  %v2440_v61 = vadd.f32 %v2252_v56, %v11257_v55 }
 0x1f2   : > { %2291 = vmatmul.bf16.gmra.mxu1 %v2014_v51  ;;  %v4402_v51 = vsel %vm1842_vm3, %v4397_v36, %v4401_v20  ;;  %v10336_v36 = vld [vmem:[#allocation2 + $0xb8] sm:$0xff] }
 0x1f3   : > { %3043 = vmatmul.bf16.gmra.mxu2 %v2832_v45  ;;  %v4634_v10 = vpop.f32.mrf.mxu0 }
 0x1f5   : > { %3725 = vmatmul.bf16.gmra.mxu3 %v10373_v16 }
 0x1f6   : > { %v3004_v23 = vpop.f32.mrf.mxu2 }
 0x1f7   : > { %v2254_v57 = vpop.f32.mrf.mxu1  ;;  %v3192_v0 = vadd.f32 %v3004_v23, %v2440_v61 }
 0x1f8   : > { %v3686_v26 = vpop.f32.mrf.mxu3  ;;  %v2441_v55 = vadd.f32 %v2254_v57, %v11265_v28  ;;  %v4407_v28 = vshll.u32 %v10416_v14, 16 }
 0x1f9   : > { %v3874_v37 = vadd.f32 %v3686_v26, %v3192_v0  ;;  %v2023_v0 = vshrl.u32 %v10295_v31, 16  ;;  %v2027_v26 = vshll.u32 %v10296_v33, 16  ;;  %v10417_v31 = vld [vmem:[#allocation2 + $0xd0] sm:$0xff] }
 0x1fa   : > { %v4409_v1 = vrot.slane %v4407_v28, 1 }
 0x1fb   : > { %v11422_v60 = vadd.f32 %v4632_v11, %v3874_v37  ;;  %v4637_v43 = vpop.f32.mrf.mxu0  ;;  %v10374_v11 = vld [vmem:[#allocation2 + $0xb8] sm:$0xff]  ;;  %v4405_v37 = vor.u32 %v4403_v30, %v4401_v20  ;;  %v2025_v38 = vor.u32 %v2023_v0, %v2021_v17  ;;  %v4411_v17 = vshrl.u32 %v10416_v14, 16  ;;  %v10546_v30 = vld [vmem:[%s11906_s3 + $0x1c8] sm:$0xff] }
 0x1fc   : > { %v2029_v43 = vrot.slane %v2027_v26, 1  ;;  %6948 = vmatpush.bf16.msra.mxu3 %v10546_v30  ;;  %v10337_v26 = vld [vmem:[#allocation2 + $0xc0] sm:$0xff] }
 0x1fe   : > { %v3006_v56 = vpop.f32.mrf.mxu2  ;;  %4676 = vmatmul.bf16.gmra.mxu0 %v4402_v51  ;;  %v2030_v13 = vsel %vm1842_vm3, %v2025_v38, %v2029_v43  ;;  %v10586_v38 = vld [vmem:[%s11906_s3 + $0x208] sm:$0xff] }
 0x1ff   : > { %v2257_v9 = vpop.f32.mrf.mxu1  ;;  %v3193_v45 = vadd.f32 %v3006_v56, %v2441_v55  ;;  %v2835_v55 = vrot.slane %v10336_v36, 1  ;;  %v4410_v56 = vsel %vm1842_vm3, %v4405_v37, %v4409_v1  ;;  %v10466_v37 = vld [vmem:[%s11906_s3 + $0x148] sm:$0xff]  ;;  %7699 = vmatpush.bf16.msra.mxu0 %v10586_v38 }
 0x200   : > { %v3688_v16 = vpop.f32.mrf.mxu3  ;;  %5320 = vmatpush.bf16.msra.mxu1 %v10466_v37  ;;  %v10338_v37 = vld [vmem:[#allocation2 + $0xc8] sm:$0xff] }
 0x201   : > { %v3875_v62 = vadd.f32 %v3688_v16, %v3193_v45  ;;  %v2836_v45 = vsel %vm2789_vm4, %v2833_v34, %v2835_v55  ;;  %v10375_v16 = vld [vmem:[#allocation2 + $0xc0] sm:$0xff] }
 0x202   : > { %2296 = vmatmul.bf16.gmra.mxu1 %v2022_v21 }
 0x203   : > { %3048 = vmatmul.bf16.gmra.mxu2 %v2834_v32  ;;  %v11428_v61 = vadd.f32 %v4634_v10, %v3875_v62  ;;  %v4639_v23 = vpop.f32.mrf.mxu0  ;;  %v10297_v32 = vld [vmem:[#allocation2 + $0xc0] sm:$0xff]  ;;  %v4415_v62 = vshll.u32 %v10417_v31, 16 }
 0x204   : > { %v10506_v23 = vld [vmem:[%s11906_s3 + $0x188] sm:$0xff] }
 0x205   : > { %3730 = vmatmul.bf16.gmra.mxu3 %v10374_v11  ;;  %6002 = vmatpush.bf16.msra.mxu2 %v10506_v23  ;;  %v10418_v23 = vld [vmem:[#allocation2 + $0xd8] sm:$0xff] }
 0x206   : > { %v3009_v57 = vpop.f32.mrf.mxu2 }
 0x207   : > { %v2259_v40 = vpop.f32.mrf.mxu1  ;;  %v2031_v57 = vshrl.u32 %v10296_v33, 16 }
 0x208   : > { %v3691_v35 = vpop.f32.mrf.mxu3  ;;  %v2035_v40 = vshll.u32 %v10297_v32, 16 }
 0x209   : > { %v4413_v35 = vor.u32 %v4411_v17, %v4409_v1 }
 0x20b   : > { %v4642_v51 = vpop.f32.mrf.mxu0 }
 0x20e   : > { %v3011_v10 = vpop.f32.mrf.mxu2  ;;  %4681 = vmatmul.bf16.gmra.mxu0 %v4410_v56  ;;  %v2033_v56 = vor.u32 %v2031_v57, %v2029_v43 }
 0x20f   : > { %v2262_v9 = vpop.f32.mrf.mxu1  ;;  %v2037_v10 = vrot.slane %v2035_v40, 1 }
 0x210   : > { %v3693_v21 = vpop.f32.mrf.mxu3  ;;  %v2444_v11 = vadd.f32 %v2262_v9, %v11279_v19  ;;  %v4417_v19 = vrot.slane %v4415_v62, 1 }
 0x211   : > { %v2038_v17 = vsel %vm1842_vm3, %v2033_v56, %v2037_v10 }
 0x212   : > { %2301 = vmatmul.bf16.gmra.mxu1 %v2030_v13  ;;  %v2837_v13 = vrot.slane %v10337_v26, 1  ;;  %v4418_v1 = vsel %vm1842_vm3, %v4413_v35, %v4417_v19  ;;  %v2039_v26 = vshrl.u32 %v10297_v32, 16  ;;  %v11457_v32 = vld [vmem:[#allocation2 + $0xe0] sm:$0xff] }
 0x213   : > { %3053 = vmatmul.bf16.gmra.mxu2 %v2836_v45  ;;  %v4644_v20 = vpop.f32.mrf.mxu0 }
 0x214   : > { %v2838_v43 = vsel %vm2789_vm4, %v2835_v55, %v2837_v13  ;;  %v2041_v56 = vor.u32 %v2039_v26, %v2037_v10  ;;  %v11464_v26 = vld [vmem:[#allocation2 + $0xd0] sm:$0xff] }
 0x215   : > { %3735 = vmatmul.bf16.gmra.mxu3 %v10375_v16 }
 0x216   : > { %v3014_v34 = vpop.f32.mrf.mxu2 }
 0x217   : > { %v2264_v28 = vpop.f32.mrf.mxu1  ;;  %v3196_v0 = vadd.f32 %v3014_v34, %v2444_v11  ;;  %v10298_v34 = vld [vmem:[#allocation2 + $0xc8] sm:$0xff] }
 0x218   : > { %v3696_v14 = vpop.f32.mrf.mxu3  ;;  %v2445_v21 = vadd.f32 %v2264_v28, %v11293_v42  ;;  %v4423_v42 = vshll.u32 %v10418_v23, 16  ;;  %v2043_v35 = vshll.u32 %v10298_v34, 16 }
 0x219   : > { %v3878_v36 = vadd.f32 %v3696_v14, %v3196_v0  ;;  %v4419_v0 = vshrl.u32 %v10417_v31, 16 }
 0x21a   : > { %v4425_v55 = vrot.slane %v4423_v42, 1  ;;  %v2047_v42 = vshrl.u32 %v10298_v34, 16 }
 0x21b   : > { %v11446_v33 = vadd.f32 %v4642_v51, %v3878_v36  ;;  %v4647_v9 = vpop.f32.mrf.mxu0  ;;  %v10376_v51 = vld [vmem:[#allocation2 + $0xc8] sm:$0xff]  ;;  %v4421_v38 = vor.u32 %v4419_v0, %v4417_v19  ;;  %v11459_v19 = vld [vmem:[#allocation2 + $0xd0] sm:$0xff] }
 0x21c   : > { %v2045_v9 = vrot.slane %v2043_v35, 1 }
 0x21e   : > { %v3016_v45 = vpop.f32.mrf.mxu2  ;;  %4686 = vmatmul.bf16.gmra.mxu0 %v4418_v1  ;;  %v2046_v31 = vsel %vm1842_vm3, %v2041_v56, %v2045_v9 }
 0x21f   : > { %v2267_v16 = vpop.f32.mrf.mxu1  ;;  %v3197_v62 = vadd.f32 %v3016_v45, %v2445_v21  ;;  %v2839_v21 = vrot.slane %v10338_v37, 1  ;;  %v4426_v45 = vsel %vm1842_vm3, %v4421_v38, %v4425_v55  ;;  %v2049_v38 = vor.u32 %v2047_v42, %v2045_v9  ;;  %v11476_v42 = vld [vmem:[#allocation2 + $0xd8] sm:$0xff] }
 0x220   : > { %v3698_v11 = vpop.f32.mrf.mxu3 }
 0x221   : > { %v3879_v30 = vadd.f32 %v3698_v11, %v3197_v62  ;;  %v2840_v62 = vsel %vm2789_vm4, %v2837_v13, %v2839_v21  ;;  %v10377_v11 = vld [vmem:[#allocation2 + $0xd0] sm:$0xff] }
 0x222   : > { %2306 = vmatmul.bf16.gmra.mxu1 %v2038_v17 }
 0x223   : > { %3058 = vmatmul.bf16.gmra.mxu2 %v2838_v43  ;;  %v11452_v57 = vadd.f32 %v4644_v20, %v3879_v30  ;;  %v4649_v40 = vpop.f32.mrf.mxu0  ;;  %v4427_v43 = vshrl.u32 %v10418_v23, 16  ;;  %v4431_v30 = vshll.u32 %v11457_v32, 16 }
 0x225   : > { %3740 = vmatmul.bf16.gmra.mxu3 %v10376_v51  ;;  %v4429_v35 = vor.u32 %v4427_v43, %v4425_v55  ;;  %v10751_v55 = vld [vmem:[%s10874_s8 + $0x78] sm:$0xff]   ;;  %v11474_v43 = vld [vmem:[#allocation2 + $0xe8] sm:$0xff] }
 0x226   : > { %v3019_v28 = vpop.f32.mrf.mxu2 }
 0x227   : > { %v2269_v14 = vpop.f32.mrf.mxu1  ;;  %v2051_v28 = vshll.u32 %v11459_v19, 16 }
 0x228   : > { %v3701_v36 = vpop.f32.mrf.mxu3 }
 0x229   : > { %v4433_v36 = vrot.slane %v4431_v30, 1  ;;  %v2053_v23 = vrot.slane %v2051_v28, 1  ;;  %v10656_v30 = vunpack.c.h.bf16 %v10751_v55 }
 0x22b   : > { %v4652_v1 = vpop.f32.mrf.mxu0 }
 0x22e   : > { %v3021_v20 = vpop.f32.mrf.mxu2  ;;  %4691 = vmatmul.bf16.gmra.mxu0 %v4426_v45 }
 0x22f   : > { %v2272_v16 = vpop.f32.mrf.mxu1  ;;  %v4434_v20 = vsel %vm1842_vm3, %v4429_v35, %v4433_v36  ;;  %v10804_v35 = vld [vmem:[%s11905_s2] ss:$0 sm:$0xff] }
 0x230   : > { %v3703_v17 = vpop.f32.mrf.mxu3  ;;  %v2448_v51 = vadd.f32 %v2272_v16, %v11207_v39  ;;  %v2841_v39 = vrot.slane %v11464_v26, 1  ;;  %v4439_v26 = vshll.u32 %v11474_v43, 16 }
 0x231   : > { %v2054_v17 = vsel %vm1842_vm3, %v2049_v38, %v2053_v23 }
 0x232   : > { %2311 = vmatmul.bf16.gmra.mxu1 %v2046_v31  ;;  %v2842_v9 = vsel %vm2789_vm4, %v2839_v21, %v2841_v39  ;;  %v4435_v21 = vshrl.u32 %v11457_v32, 16 }
 0x233   : > { %3063 = vmatmul.bf16.gmra.mxu2 %v2840_v62  ;;  %v4654_v10 = vpop.f32.mrf.mxu0 }
 0x234   : > { %v4437_v32 = vor.u32 %v4435_v21, %v4433_v36 }
 0x235   : > { %3745 = vmatmul.bf16.gmra.mxu3 %v10377_v11 }
 0x236   : > { %v3024_v40 = vpop.f32.mrf.mxu2 }
 0x237   : > { %v2274_v0 = vpop.f32.mrf.mxu1  ;;  %v3200_v13 = vadd.f32 %v3024_v40, %v2448_v51  ;;  %v10378_v40 = vld [vmem:[#allocation2 + $0xd8] sm:$0xff] }
 0x238   : > { %v3706_v14 = vpop.f32.mrf.mxu3  ;;  %v2449_v34 = vadd.f32 %v2274_v0, %v11214_v54  ;;  %v10803_v54 = vld [vmem:[%s11904_s1] ss:$0 sm:$0xff] }
 0x239   : > { %v3882_v37 = vadd.f32 %v3706_v14, %v3200_v13  ;;  %v1003_v28 = vmul.f32 %v10803_v54, %v10656_v30 }
 0x23b   : > { %v11466_v56 = vadd.f32 %v4652_v1, %v3882_v37  ;;  %v4657_v45 = vpop.f32.mrf.mxu0  ;;  %v10655_v1 = vunpack.c.l.bf16 %v10751_v55  ;;  %v1005_v38 = vadd.f32 %v10804_v35, %v1003_v28  ;;  %v4441_v55 = vrot.slane %v4439_v26, 1  ;;  %v11496_v26 = vld [vmem:[#allocation2 + $0xf0] sm:$0xff] }
 0x23d   : > { %v1002_v0 = vmul.f32 %v10803_v54, %v10655_v1 }
 0x23e   : > { %v3026_v16 = vpop.f32.mrf.mxu2  ;;  %4696 = vmatmul.bf16.gmra.mxu0 %v4434_v20 }
 0x23f   : > { %v2277_v31 = vpop.f32.mrf.mxu1  ;;  %v3201_v62 = vadd.f32 %v3026_v16, %v2449_v34  ;;  %v1004_v37 = vadd.f32 %v10804_v35, %v1002_v0  ;;  %v2055_v34 = vshrl.u32 %v11459_v19, 16  ;;  %v2059_v16 = vshll.u32 %v11476_v42, 16 }
 0x240   : > { %v3708_v11 = vpop.f32.mrf.mxu3  ;;  %v1007_v31 = vmax.f32 %v1005_v38, 0.0  ;;  %v4442_v19 = vsel %vm1842_vm3, %v4437_v32, %v4441_v55  ;;  %v10545_v32 = vld [vmem:[%s11906_s3 + $0x1c0] sm:$0xff] }
 0x241   : > { %v3883_v51 = vadd.f32 %v3708_v11, %v3201_v62  ;;  %v11490_v62 = vld [vmem:[#allocation2 + $0xd8] sm:$0xff]  ;;  %v2057_v1 = vor.u32 %v2055_v34, %v2053_v23  ;;  %v2061_v30 = vrot.slane %v2059_v16, 1  ;;  %v11498_v34 = vld [vmem:[#allocation2 + $0xe0] sm:$0xff]  ;;  %6949 = vmatpush.bf16.msra.mxu3 %v10545_v32 }
 0x242   : > { %2316 = vmatmul.bf16.gmra.mxu1 %v2054_v17  ;;  %v2843_v0 = vrot.slane %v11490_v62, 1 }
 0x243   : > { %3068 = vmatmul.bf16.gmra.mxu2 %v2842_v9  ;;  %v11481_v13 = vadd.f32 %v4654_v10, %v3883_v51  ;;  %v4659_v14 = vpop.f32.mrf.mxu0  ;;  %v1006_v10 = vmax.f32 %v1004_v37, 0.0  ;;  %v1009_v9 = vpack.c.bf16 %v1007_v31, %v1007_v31  ;;  %v2062_v37 = vsel %vm1842_vm3, %v2057_v1, %v2061_v30 }
 0x244   : > { %v2844_v21 = vsel %vm2789_vm4, %v2841_v39, %v2843_v0  ;;  %v4443_v31 = vshrl.u32 %v11474_v43, 16  ;;  %v10505_v39 = vld [vmem:[%s11906_s3 + $0x180] sm:$0xff]  ;;  %v2063_v43 = vshrl.u32 %v11476_v42, 16 }
 0x245   : > { %3750 = vmatmul.bf16.gmra.mxu3 %v10378_v40  ;;  %v1008_v11 = vpack.c.bf16 %v1006_v10, %v1006_v10  ;;  %v1013_v40 = vunpack.c.l.b16 %v1009_v9  ;;  %6003 = vmatpush.bf16.msra.mxu2 %v10505_v39  ;;  %v10585_v42 = vld [vmem:[%s11906_s3 + $0x200] sm:$0xff] }
 0x246   : > { %v3029_v45 = vpop.f32.mrf.mxu2  ;;  %7700 = vmatpush.bf16.msra.mxu0 %v10585_v42 }
 0x247   : > { %v2279_v20 = vpop.f32.mrf.mxu1  ;;  %v1012_v51 = vunpack.c.l.b16 %v1008_v11  ;;  %v10379_v45 = vld [vmem:[#allocation2 + $0xe0] sm:$0xff] }
 0x248   : > { %v3711_v17 = vpop.f32.mrf.mxu3 }
 0x249   : > { %v1014_v28 = vpack.c.b16 %v1013_v40, %v1012_v51  ;;  %v4447_v17 = vshll.u32 %v11496_v26, 16  ;;  %v2067_v51 = vshll.u32 %v11498_v34, 16 }
 0x24b   : > { %v4662_v54 = vpop.f32.mrf.mxu0  ;;  %v1016_v38 = vshrl.u32 %v1014_v28, 16  ;;  %v1019_v23 = vshll.u32 %v1014_v28, 16 }
 0x24d   : > { %v1018_v20 = vrot.slane %v1016_v38, 7 }
 0x24e   : > { %v3031_v14 = vpop.f32.mrf.mxu2  ;;  %4701 = vmatmul.bf16.gmra.mxu0 %v4442_v19 }
 0x24f   : > { %v2282_v35 = vpop.f32.mrf.mxu1  ;;  %v1021_v16 = vor.u32 %v1019_v23, %v1018_v20  ;;  %v11513_v14 = vld [vmem:[#allocation2 + $0xe0] sm:$0xff] }
 0x250   : > { %v3713_v36 = vpop.f32.mrf.mxu3  ;;  %v2452_v62 = vadd.f32 %v2282_v35, %v11235_v29  ;;  %v4445_v35 = vor.u32 %v4443_v31, %v4441_v55  ;;  %v10465_v23 = vld [vmem:[%s11906_s3 + $0x140] sm:$0xff]  ;;  %v2845_v31 = vrot.slane %v11513_v14, 1 }
 0x251   : > { %v1024_v11 = vsel %vm10926_vm2, 0, %v1021_v16  ;;  %v2069_v16 = vrot.slane %v2067_v51, 1  ;;  %5321 = vmatpush.bf16.msra.mxu1 %v10465_v23  ;;  %v10422_v51 = vld [vmem:[#allocation2 + $0xf8] sm:$0xff] }
 0x252   : > { %2321 = vmatmul.bf16.gmra.mxu1 %v2062_v37  ;;  %v1028_v40 = vunpack.c.l.b16 %v1024_v11  ;;  %v1029_v29 = vunpack.c.h.b16 %v1024_v11  ;;  %v4449_v37 = vrot.slane %v4447_v17, 1 }
 0x253   : > { %3073 = vmatmul.bf16.gmra.mxu2 %v2844_v21  ;;  %v4664_v10 = vpop.f32.mrf.mxu0 }
 0x254   : > { %v1032_v38 = vpack.c.b16 %v1028_v40, %v1028_v40  ;;  %v1033_v36 = vpack.c.b16 %v1029_v29, %v1029_v29  ;;  %v4450_v17 = vsel %vm1842_vm3, %v4445_v35, %v4449_v37  ;;  %v1025_v35 = vsel %vm10926_vm2, %v1018_v20, 0 }
 0x255   : > { %3755 = vmatmul.bf16.gmra.mxu3 %v10379_v45  ;;  %v2065_v45 = vor.u32 %v2063_v43, %v2061_v30  ;;  %v2846_v43 = vsel %vm2789_vm4, %v2843_v0, %v2845_v31  ;;  %v2071_v0 = vshrl.u32 %v11498_v34, 16  ;;  %v1030_v23 = vunpack.c.l.b16 %v1025_v35 }
 0x256   : > { %v3034_v9 = vpop.f32.mrf.mxu2  ;;  %1040 = vst [vmem:[#allocation2 + $0x100] sm:$0xf] %v1032_v38  ;;  %v1031_v42 = vunpack.c.h.b16 %v1025_v35 }
 0x257   : > { %v2284_v1 = vpop.f32.mrf.mxu1  ;;  %v3204_v19 = vadd.f32 %v3034_v9, %v2452_v62  ;;  %1041 = vst [vmem:[#allocation2 + $0x104] sm:$0xf] %v1033_v36  ;;  %v2070_v9 = vsel %vm1842_vm3, %v2065_v45, %v2069_v16 }
 0x258   : > { %v3716_v28 = vpop.f32.mrf.mxu3  ;;  %v2453_v39 = vadd.f32 %v2284_v1, %v11248_v48  ;;  %v4451_v48 = vshrl.u32 %v11496_v26, 16  ;;  %v4455_v1 = vshll.u32 %v10422_v51, 16 }
 0x259   : > { %v3886_v21 = vadd.f32 %v3716_v28, %v3204_v19  ;;  %v10302_v19 = vld [vmem:[#allocation2 + $0xe8] sm:$0xff] }
 0x25b   : > { %v11521_v62 = vadd.f32 %v4662_v54, %v3886_v21  ;;  %v4667_v55 = vpop.f32.mrf.mxu0  ;;  %v10380_v54 = vld [vmem:[#allocation2 + $0xe8] sm:$0xff]  ;;  %v2075_v21 = vshll.u32 %v10302_v19, 16 }
 0x25c   : > { %v10342_v55 = vld [vmem:[#allocation2 + $0xe8] sm:$0xff] }
 0x25d   : > { %v2077_v26 = vrot.slane %v2075_v21, 1  ;;  %v2847_v15 = vrot.slane %v10342_v55, 1 }
 0x25e   : > { %v3036_v32 = vpop.f32.mrf.mxu2  ;;  %4706 = vmatmul.bf16.gmra.mxu0 %v4450_v17  ;;  %v4453_v17 = vor.u32 %v4451_v48, %v4449_v37  ;;  %v10423_v37 = vld [vmem:[#allocation2 + $0x100] sm:$0xff]  ;;  %v4459_v48 = vshrl.u32 %v10422_v51, 16 }
 0x25f   : > { %v2287_v11 = vpop.f32.mrf.mxu1  ;;  %v3205_v40 = vadd.f32 %v3036_v32, %v2453_v39  ;;  %v1034_v39 = vpack.c.b16 %v1030_v23, %v1030_v23  ;;  %v1035_v32 = vpack.c.b16 %v1031_v42, %v1031_v42 }
 0x260   : > { %v3718_v30 = vpop.f32.mrf.mxu3  ;;  %v2073_v11 = vor.u32 %v2071_v0, %v2069_v16  ;;  %v2079_v0 = vshrl.u32 %v10302_v19, 16 }
 0x261   : > { %v3887_v29 = vadd.f32 %v3718_v30, %v3205_v40  ;;  %1042 = vst [vmem:[#allocation2 + $0x108] sm:$0xf] %v1034_v39 }
 0x262   : > { %2326 = vmatmul.bf16.gmra.mxu1 %v2070_v9  ;;  %1043 = vst [vmem:[#allocation2 + $0x10c] sm:$0xf] %v1035_v32  ;;  %v2078_v34 = vsel %vm1842_vm3, %v2073_v11, %v2077_v26  ;;  %v2081_v39 = vor.u32 %v2079_v0, %v2077_v26 }
 0x263   : > { %3078 = vmatmul.bf16.gmra.mxu2 %v2846_v43  ;;  %v11528_v28 = vadd.f32 %v4664_v10, %v3887_v29  ;;  %v4669_v14 = vpop.f32.mrf.mxu0  ;;  %v4457_v10 = vrot.slane %v4455_v1, 1  ;;  %v2848_v29 = vsel %vm2789_vm4, %v2845_v31, %v2847_v15  ;;  %v4463_v1 = vshll.u32 %v10423_v37, 16 }
 0x264   : > { %v10303_v14 = vld [vmem:[#allocation2 + $0xf0] sm:$0xff] }
 0x265   : > { %3760 = vmatmul.bf16.gmra.mxu3 %v10380_v54  ;;  %v4458_v20 = vsel %vm1842_vm3, %v4453_v17, %v4457_v10  ;;  %v10381_v54 = vld [vmem:[#allocation2 + $0xf0] sm:$0xff]  ;;  %v2083_v21 = vshll.u32 %v10303_v14, 16  ;;  %v4461_v55 = vor.u32 %v4459_v48, %v4457_v10  ;;  %v4465_v31 = vrot.slane %v4463_v1, 1  ;;  %v10304_v48 = vld [vmem:[#allocation2 + $0xf8] sm:$0xff] }
 0x266   : > { %v3039_v38 = vpop.f32.mrf.mxu2 }
 0x267   : > { %v2289_v36 = vpop.f32.mrf.mxu1  ;;  %v2085_v32 = vrot.slane %v2083_v21, 1  ;;  %v2087_v21 = vshrl.u32 %v10303_v14, 16 }
 0x268   : > { %v3721_v45 = vpop.f32.mrf.mxu3 }
 0x269   : > { %v10343_v45 = vld [vmem:[#allocation2 + $0xf0] sm:$0xff]  ;;  %v2086_v19 = vsel %vm1842_vm3, %v2081_v39, %v2085_v32  ;;  %v2089_v39 = vor.u32 %v2087_v21, %v2085_v32  ;;  %v2608_v32 = vld [vmem:[#allocation2 + $0x100] sm:$0x1] }
 0x26a   : > { %v2849_v51 = vrot.slane %v10343_v45, 1  ;;  %v10344_v45 = vld [vmem:[#allocation2 + $0xf8] sm:$0xff] }
 0x26b   : > { %v4672_v9 = vpop.f32.mrf.mxu0 }
 0x26c   : > { %v2850_v10 = vsel %vm2789_vm4, %v2847_v15, %v2849_v51 }
 0x26e   : > { %v3041_v40 = vpop.f32.mrf.mxu2  ;;  %4711 = vmatmul.bf16.gmra.mxu0 %v4458_v20 }
 0x26f   : > { %v2292_v30 = vpop.f32.mrf.mxu1  ;;  %v4466_v40 = vsel %vm1842_vm3, %v4461_v55, %v4465_v31 }
 0x270   : > { %v3723_v43 = vpop.f32.mrf.mxu3  ;;  %v2456_v35 = vadd.f32 %v2292_v30, %v11263_v27 }
 0x272   : > { %2331 = vmatmul.bf16.gmra.mxu1 %v2078_v34 }
 0x273   : > { %3083 = vmatmul.bf16.gmra.mxu2 %v2848_v29  ;;  %v4674_v16 = vpop.f32.mrf.mxu0 }
 0x275   : > { %3765 = vmatmul.bf16.gmra.mxu3 %v10381_v54  ;;  %v10424_v54 = vld [vmem:[#allocation2 + $0x108] sm:$0xff] }
 0x276   : > { %v3044_v38 = vpop.f32.mrf.mxu2 }
 0x277   : > { %v2294_v36 = vpop.f32.mrf.mxu1  ;;  %v3208_v23 = vadd.f32 %v3044_v38, %v2456_v35  ;;  %v4467_v38 = vshrl.u32 %v10423_v37, 16 }
 0x278   : > { %v3726_v42 = vpop.f32.mrf.mxu3  ;;  %v2457_v27 = vadd.f32 %v2294_v36, %v11270_v47  ;;  %v4471_v47 = vshll.u32 %v10424_v54, 16 }
 0x279   : > { %v3890_v17 = vadd.f32 %v3726_v42, %v3208_v23  ;;  %v2091_v23 = vshll.u32 %v10304_v48, 16  ;;  %v4469_v55 = vor.u32 %v4467_v38, %v4465_v31  ;;  %v2755_v38 = vunpack.c.l.b16 %v2608_v32 }
 0x27a   : > { %v4473_v15 = vrot.slane %v4471_v47, 1  ;;  %v4475_v47 = vshrl.u32 %v10424_v54, 16 }
 0x27b   : > { %v11538_v11 = vadd.f32 %v4672_v9, %v3890_v17  ;;  %v4677_v20 = vpop.f32.mrf.mxu0  ;;  %v10382_v9 = vld [vmem:[#allocation2 + $0xf8] sm:$0xff]  ;;  %v4042_v17 = vld [vmem:[#allocation2 + $0x110] sm:$0x1] }
 0x27c   : > { %v2093_v20 = vrot.slane %v2091_v23, 1 }
 0x27e   : > { %v3046_v30 = vpop.f32.mrf.mxu2  ;;  %4716 = vmatmul.bf16.gmra.mxu0 %v4466_v40  ;;  %v1661_v40 = vld [vmem:[#allocation2 + $0x100] sm:$0x1] }
 0x27f   : > { %v2297_v34 = vpop.f32.mrf.mxu1  ;;  %v3209_v43 = vadd.f32 %v3046_v30, %v2457_v27  ;;  %v2851_v30 = vrot.slane %v10344_v45, 1 }
 0x280   : > { %v3728_v29 = vpop.f32.mrf.mxu3  ;;  %v4189_v34 = vunpack.c.l.b16 %v4042_v17 }
 0x281   : > { %v3891_v26 = vadd.f32 %v3728_v29, %v3209_v43  ;;  %v2094_v43 = vsel %vm1842_vm3, %v2089_v39, %v2093_v20  ;;  %v1808_v29 = vunpack.c.l.b16 %v1661_v40  ;;  %v4477_v39 = vor.u32 %v4475_v47, %v4473_v15  ;;  %v9513_v47 = vld [vmem:[#allocation2 + $0x10] sm:$0xe] }
 0x282   : > { %2336 = vmatmul.bf16.gmra.mxu1 %v2086_v19  ;;  %v4222_v31 = vpack.c.b16 %v4189_v34, %v4189_v34 }
 0x283   : > { %3088 = vmatmul.bf16.gmra.mxu2 %v2850_v10  ;;  %v11544_v1 = vadd.f32 %v4674_v16, %v3891_v26  ;;  %v4679_v35 = vpop.f32.mrf.mxu0  ;;  %v4474_v16 = vsel %vm1842_vm3, %v4469_v55, %v4473_v15  ;;  %v2852_v10 = vsel %vm2789_vm4, %v2849_v51, %v2851_v30  ;;  %v10383_v26 = vld [vmem:[#allocation2 + $0x100] sm:$0xff]  ;;  %v2788_v51 = vpack.c.b16 %v2755_v38, %v2755_v38 }
 0x284   : > { %v10513_v38 = vld [vmem:[#allocation2 + $0x20] sm:$0xff] }
 0x285   : > { %3770 = vmatmul.bf16.gmra.mxu3 %v10382_v9  ;;  %v1841_v9 = vpack.c.b16 %v1808_v29, %v1808_v29  ;;  %v2853_v54 = vrot.slane %v2788_v51, 1  ;;  %v6605_v51 = vshll.u32 %v10513_v38, 16 }
 0x286   : > { %v3049_v36 = vpop.f32.mrf.mxu2 }
 0x287   : > { %v2299_v0 = vpop.f32.mrf.mxu1  ;;  %v4479_v36 = vshll.u32 %v4222_v31, 16  ;;  %v2099_v45 = vshll.u32 %v1841_v9, 16  ;;  %v2854_v15 = vsel %vm2789_vm4, %v2851_v30, %v2853_v54  ;;  %v10553_v9 = vld [vmem:[#allocation2 + $0x20] sm:$0xf0]  ;;  %v10514_v30 = vld [vmem:[#allocation2 + $0x28] sm:$0xff]  ;;  %v6607_v54 = vrot.slane %v6605_v51, 1 }
 0x288   : > { %v3731_v42 = vpop.f32.mrf.mxu3  ;;  %v6614_v51 = vshrl.u32 %v10514_v30, 16 }
 0x289   : > { %v2095_v42 = vshrl.u32 %v10304_v48, 16  ;;  %v4481_v40 = vrot.slane %v4479_v36, 1  ;;  %v10433_v36 = vld [vmem:[#allocation2 + $0x10] sm:$0xf0] }
 0x28b   : > { %v4682_v27 = vpop.f32.mrf.mxu0  ;;  %v2097_v34 = vor.u32 %v2095_v42, %v2093_v20  ;;  %v10384_v20 = vld [vmem:[#allocation2 + $0x108] sm:$0xff] }
 0x28e   : > { %v3051_v37 = vpop.f32.mrf.mxu2  ;;  %4721 = vmatmul.bf16.gmra.mxu0 %v4474_v16 }
 0x28f   : > { %v2302_v19 = vpop.f32.mrf.mxu1  ;;  %v2101_v37 = vrot.slane %v2099_v45, 1 }
 0x290   : > { %v3733_v14 = vpop.f32.mrf.mxu3  ;;  %v2460_v0 = vadd.f32 %v2302_v19, %v11291_v41 }
 0x291   : > { %v4482_v14 = vsel %vm1842_vm3, %v4477_v39, %v4481_v40  ;;  %v2102_v48 = vsel %vm1842_vm3, %v2097_v34, %v2101_v37  ;;  %v6603_v34 = vshrl.u32 %v10513_v38, 16 }
 0x292   : > { %2341 = vmatmul.bf16.gmra.mxu1 %v2094_v43 }
 0x293   : > { %3093 = vmatmul.bf16.gmra.mxu2 %v2852_v10  ;;  %v4684_v35 = vpop.f32.mrf.mxu0 }
 0x295   : > { %3775 = vmatmul.bf16.gmra.mxu3 %v10383_v26 }
 0x296   : > { %v3054_v21 = vpop.f32.mrf.mxu2 }
 0x297   : > { %v2304_v23 = vpop.f32.mrf.mxu1  ;;  %v3212_v55 = vadd.f32 %v3054_v21, %v2460_v0  ;;  %v10554_v21 = vld [vmem:[#allocation2 + $0x28] sm:$0xff] }
 0x298   : > { %v3736_v17 = vpop.f32.mrf.mxu3  ;;  %v2461_v41 = vadd.f32 %v2304_v23, %v11304_v5 }
 0x299   : > { %v3894_v16 = vadd.f32 %v3736_v17, %v3212_v55  ;;  %v10434_v55 = vld [vmem:[#allocation2 + $0x18] sm:$0xff]  ;;  %v9514_v17 = vor.u32 %v10433_v36, %v9513_v47 }
 0x29b   : > { %v11550_v43 = vadd.f32 %v4682_v27, %v3894_v16  ;;  %v4687_v29 = vpop.f32.mrf.mxu0  ;;  %v10041_v27 = vld [vmem:[#allocation2 + $0x20] sm:$0xe]  ;;  %v7549_v16 = vrot.slane %v10554_v21, 1  ;;  %v5169_v37 = vrot.slane %v9514_v17, 1  ;;  %v10515_v21 = vld [vmem:[#allocation2 + $0x30] sm:$0xff] }
 0x29c   : > { %v10042_v23 = vor.u32 %v10553_v9, %v10041_v27  ;;  %v5170_v29 = vrot.slane %v10434_v55, 1  ;;  %v10555_v9 = vld [vmem:[#allocation2 + $0x30] sm:$0xff] }
 0x29e   : > { %v3056_v19 = vpop.f32.mrf.mxu2  ;;  %4726 = vmatmul.bf16.gmra.mxu0 %v4482_v14  ;;  %v7548_v40 = vrot.slane %v10042_v23, 1  ;;  %v6610_v14 = vshll.u32 %v10514_v30, 16 }
 0x29f   : > { %v2307_v10 = vpop.f32.mrf.mxu1  ;;  %v3213_v31 = vadd.f32 %v3056_v19, %v2461_v41 }
 0x2a0   : > { %v3738_v26 = vpop.f32.mrf.mxu3  ;;  %v7550_v41 = vsel %vm2789_vm4, %v7548_v40, %v7549_v16 }
 0x2a1   : > { %v3895_v32 = vadd.f32 %v3738_v26, %v3213_v31  ;;  %v6608_v31 = vor.u32 %v6607_v54, %v6603_v34  ;;  %v6612_v26 = vrot.slane %v6610_v14, 1 }
 0x2a2   : > { %2346 = vmatmul.bf16.gmra.mxu1 %v2102_v48  ;;  %v5171_v48 = vsel %vm2789_vm4, %v5169_v37, %v5170_v29 }
 0x2a3   : > { %3098 = vmatmul.bf16.gmra.mxu2 %v2854_v15  ;;  %v11556_v0 = vadd.f32 %v4684_v35, %v3895_v32  ;;  %v4689_v5 = vpop.f32.mrf.mxu0  ;;  %v10473_v15 = vld [vmem:[#allocation2 + $0x20] sm:$0xff] }
 0x2a4   : > { %v10435_v5 = vld [vmem:[#allocation2 + $0x20] sm:$0xff] }
 0x2a5   : > { %3780 = vmatmul.bf16.gmra.mxu3 %v10384_v20  ;;  %v6613_v20 = vsel %vm1842_vm3, %v6608_v31, %v6612_v26  ;;  %v5172_v17 = vrot.slane %v10435_v5, 1  ;;  %v10474_v31 = vld [vmem:[#allocation2 + $0x28] sm:$0xff]  ;;  %v6622_v5 = vshrl.u32 %v10515_v21, 16 }
 0x2a6   : > { %v3059_v42 = vpop.f32.mrf.mxu2 }
 0x2a7   : > { %v2309_v45 = vpop.f32.mrf.mxu1 }
 0x2a8   : > { %v3741_v39 = vpop.f32.mrf.mxu3  ;;  %v7551_v45 = vrot.slane %v10555_v9, 1 }
 0x2a9   : > { %v6618_v39 = vshll.u32 %v10515_v21, 16 }
 0x2aa   : > { %v7552_v37 = vsel %vm2789_vm4, %v7549_v16, %v7551_v45 }
 0x2ab   : > { %v4692_v35 = vpop.f32.mrf.mxu0 }
 0x2ae   : > { %v3061_v19 = vpop.f32.mrf.mxu2  ;;  %7701 = vmatmul.bf16.vlgmr.msra.gmra.mxu0 %v7550_v41  ;;  %v5173_v41 = vsel %vm2789_vm4, %v5170_v29, %v5172_v17  ;;  %v10516_v29 = vld [vmem:[#allocation2 + $0x38] sm:$0xff] }
 0x2af   : > { %v2312_v10 = vpop.f32.mrf.mxu1  ;;  %v6616_v19 = vor.u32 %v6614_v51, %v6612_v26 }
 0x2b0   : > { %v3743_v32 = vpop.f32.mrf.mxu3  ;;  %v2464_v38 = vadd.f32 %v2312_v10, %v11211_v44  ;;  %v6620_v10 = vrot.slane %v6618_v39, 1 }
 0x2b2   : > { %5322 = vmatmul.bf16.vlgmr.msra.gmra.mxu1 %v5171_v48  ;;  %v6621_v30 = vsel %vm1842_vm3, %v6616_v19, %v6620_v10  ;;  %v10557_v19 = vld [vmem:[#allocation2 + $0x40] sm:$0xff] }
 0x2b3   : > { %6004 = vmatmul.bf16.vlgmr.msra.gmra.mxu2 %v10473_v15  ;;  %v4694_v27 = vpop.f32.mrf.mxu0 }
 0x2b5   : > { %6950 = vmatmul.bf16.vlgmr.msra.gmra.mxu3 %v6613_v20  ;;  %v10556_v20 = vld [vmem:[#allocation2 + $0x38] sm:$0xff] }
 0x2b6   : > { %v3064_v47 = vpop.f32.mrf.mxu2 }
 0x2b7   : > { %v2314_v36 = vpop.f32.mrf.mxu1  ;;  %v3216_v23 = vadd.f32 %v3064_v47, %v2464_v38  ;;  %v10436_v38 = vld [vmem:[#allocation2 + $0x28] sm:$0xff]  ;;  %v7553_v47 = vrot.slane %v10556_v20, 1  ;;  %v6630_v20 = vshrl.u32 %v10516_v29, 16 }
 0x2b8   : > { %v3746_v42 = vpop.f32.mrf.mxu3  ;;  %v2465_v54 = vadd.f32 %v2314_v36, %v11217_v59  ;;  %v5174_v36 = vrot.slane %v10436_v38, 1 }
 0x2b9   : > { %v3898_v55 = vadd.f32 %v3746_v42, %v3216_v23  ;;  %v6626_v23 = vshll.u32 %v10516_v29, 16 }
 0x2bb   : > { %v11562_v40 = vadd.f32 %v4692_v35, %v3898_v55  ;;  %v4697_v34 = vpop.f32.mrf.mxu0  ;;  %v7554_v55 = vsel %vm2789_vm4, %v7551_v45, %v7553_v47 }
 0x2bc   : > { %v6624_v34 = vor.u32 %v6622_v5, %v6620_v10  ;;  %v7555_v10 = vrot.slane %v10557_v19, 1 }
 0x2be   : > { %v3066_v44 = vpop.f32.mrf.mxu2  ;;  %7706 = vmatmul.bf16.gmra.mxu0 %v7552_v37  ;;  %v6628_v37 = vrot.slane %v6626_v23, 1 }
 0x2bf   : > { %v2317_v14 = vpop.f32.mrf.mxu1  ;;  %v3217_v48 = vadd.f32 %v3066_v44, %v2465_v54  ;;  %v10475_v54 = vld [vmem:[#allocation2 + $0x30] sm:$0xff] }
 0x2c0   : > { %v3748_v15 = vpop.f32.mrf.mxu3  ;;  %v6629_v14 = vsel %vm1842_vm3, %v6624_v34, %v6628_v37  ;;  %v10476_v34 = vld [vmem:[#allocation2 + $0x38] sm:$0xff] }
 0x2c1   : > { %v3899_v32 = vadd.f32 %v3748_v15, %v3217_v48  ;;  %v10517_v15 = vld [vmem:[#allocation2 + $0x40] sm:$0xff] }
 0x2c2   : > { %5327 = vmatmul.bf16.gmra.mxu1 %v5173_v41 }
 0x2c3   : > { %6009 = vmatmul.bf16.gmra.mxu2 %v10474_v31  ;;  %v11568_v35 = vadd.f32 %v4694_v27, %v3899_v32  ;;  %v4699_v16 = vpop.f32.mrf.mxu0  ;;  %v5175_v27 = vsel %vm2789_vm4, %v5172_v17, %v5174_v36  ;;  %v10437_v31 = vld [vmem:[#allocation2 + $0x30] sm:$0xff] }
 0x2c4   : > { %v5176_v16 = vrot.slane %v10437_v31, 1  ;;  %v6638_v31 = vshrl.u32 %v10517_v15, 16 }
 0x2c5   : > { %6955 = vmatmul.bf16.gmra.mxu3 %v6621_v30 }
 0x2c6   : > { %v3069_v59 = vpop.f32.mrf.mxu2 }
 0x2c7   : > { %v2319_v9 = vpop.f32.mrf.mxu1  ;;  %v6634_v59 = vshll.u32 %v10517_v15, 16 }
 0x2c8   : > { %v3751_v26 = vpop.f32.mrf.mxu3 }
 0x2c9   : > { %v7556_v26 = vsel %vm2789_vm4, %v7553_v47, %v7555_v10 }
 0x2cb   : > { %v4702_v42 = vpop.f32.mrf.mxu0 }
 0x2ce   : > { %v3071_v51 = vpop.f32.mrf.mxu2  ;;  %7711 = vmatmul.bf16.gmra.mxu0 %v7554_v55  ;;  %v5177_v55 = vsel %vm2789_vm4, %v5174_v36, %v5176_v16  ;;  %v10518_v36 = vld [vmem:[#allocation2 + $0x48] sm:$0xff] }
 0x2cf   : > { %v2322_v39 = vpop.f32.mrf.mxu1  ;;  %v6632_v51 = vor.u32 %v6630_v20, %v6628_v37 }
 0x2d0   : > { %v3753_v44 = vpop.f32.mrf.mxu3  ;;  %v2468_v21 = vadd.f32 %v2322_v39, %v11239_v3  ;;  %v6636_v39 = vrot.slane %v6634_v59, 1 }
 0x2d2   : > { %5332 = vmatmul.bf16.gmra.mxu1 %v5175_v27  ;;  %v6637_v29 = vsel %vm1842_vm3, %v6632_v51, %v6636_v39  ;;  %v10559_v51 = vld [vmem:[#allocation2 + $0x50] sm:$0xff] }
 0x2d3   : > { %6014 = vmatmul.bf16.gmra.mxu2 %v10475_v54  ;;  %v4704_v41 = vpop.f32.mrf.mxu0 }
 0x2d5   : > { %6960 = vmatmul.bf16.gmra.mxu3 %v6629_v14  ;;  %v10558_v14 = vld [vmem:[#allocation2 + $0x48] sm:$0xff] }
 0x2d6   : > { %v3074_v48 = vpop.f32.mrf.mxu2 }
 0x2d7   : > { %v2324_v45 = vpop.f32.mrf.mxu1  ;;  %v3220_v32 = vadd.f32 %v3074_v48, %v2468_v21  ;;  %v10438_v21 = vld [vmem:[#allocation2 + $0x38] sm:$0xff]  ;;  %v7557_v48 = vrot.slane %v10558_v14, 1  ;;  %v6646_v14 = vshrl.u32 %v10518_v36, 16 }
 0x2d8   : > { %v3756_v17 = vpop.f32.mrf.mxu3  ;;  %v2469_v5 = vadd.f32 %v2324_v45, %v11251_v52  ;;  %v5178_v45 = vrot.slane %v10438_v21, 1 }
 0x2d9   : > { %v3902_v30 = vadd.f32 %v3756_v17, %v3220_v32  ;;  %v6642_v32 = vshll.u32 %v10518_v36, 16 }
 0x2db   : > { %v11574_v9 = vadd.f32 %v4702_v42, %v3902_v30  ;;  %v4707_v38 = vpop.f32.mrf.mxu0  ;;  %v7558_v30 = vsel %vm2789_vm4, %v7555_v10, %v7557_v48 }
 0x2dc   : > { %v6640_v38 = vor.u32 %v6638_v31, %v6636_v39  ;;  %v7559_v39 = vrot.slane %v10559_v51, 1 }
 0x2de   : > { %v3076_v3 = vpop.f32.mrf.mxu2  ;;  %7716 = vmatmul.bf16.gmra.mxu0 %v7556_v26  ;;  %v6644_v26 = vrot.slane %v6642_v32, 1 }
 0x2df   : > { %v2327_v23 = vpop.f32.mrf.mxu1  ;;  %v3221_v27 = vadd.f32 %v3076_v3, %v2469_v5  ;;  %v10477_v5 = vld [vmem:[#allocation2 + $0x40] sm:$0xff] }
 0x2e0   : > { %v3758_v54 = vpop.f32.mrf.mxu3  ;;  %v6645_v23 = vsel %vm1842_vm3, %v6640_v38, %v6644_v26  ;;  %v10478_v38 = vld [vmem:[#allocation2 + $0x48] sm:$0xff] }
 0x2e1   : > { %v3903_v44 = vadd.f32 %v3758_v54, %v3221_v27  ;;  %v10519_v54 = vld [vmem:[#allocation2 + $0x50] sm:$0xff] }
 0x2e2   : > { %5337 = vmatmul.bf16.gmra.mxu1 %v5177_v55 }
 0x2e3   : > { %6019 = vmatmul.bf16.gmra.mxu2 %v10476_v34  ;;  %v11580_v42 = vadd.f32 %v4704_v41, %v3903_v44  ;;  %v4709_v47 = vpop.f32.mrf.mxu0  ;;  %v5179_v41 = vsel %vm2789_vm4, %v5176_v16, %v5178_v45  ;;  %v10439_v34 = vld [vmem:[#allocation2 + $0x40] sm:$0xff] }
 0x2e4   : > { %v5180_v47 = vrot.slane %v10439_v34, 1  ;;  %v6654_v34 = vshrl.u32 %v10519_v54, 16 }
 0x2e5   : > { %6965 = vmatmul.bf16.gmra.mxu3 %v6637_v29 }
 0x2e6   : > { %v3079_v52 = vpop.f32.mrf.mxu2 }
 0x2e7   : > { %v2329_v19 = vpop.f32.mrf.mxu1  ;;  %v6650_v52 = vshll.u32 %v10519_v54, 16 }
 0x2e8   : > { %v3761_v37 = vpop.f32.mrf.mxu3 }
 0x2e9   : > { %v7560_v37 = vsel %vm2789_vm4, %v7557_v48, %v7559_v39 }
 0x2eb   : > { %v4712_v17 = vpop.f32.mrf.mxu0 }
 0x2ee   : > { %v3081_v20 = vpop.f32.mrf.mxu2  ;;  %7721 = vmatmul.bf16.gmra.mxu0 %v7558_v30  ;;  %v5181_v30 = vsel %vm2789_vm4, %v5178_v45, %v5180_v47  ;;  %v10520_v45 = vld [vmem:[#allocation2 + $0x58] sm:$0xff] }
 0x2ef   : > { %v2332_v59 = vpop.f32.mrf.mxu1  ;;  %v6648_v20 = vor.u32 %v6646_v14, %v6644_v26 }
 0x2f0   : > { %v3763_v3 = vpop.f32.mrf.mxu3  ;;  %v2472_v15 = vadd.f32 %v2332_v59, %v11267_v7  ;;  %v6652_v59 = vrot.slane %v6650_v52, 1 }
 0x2f2   : > { %5342 = vmatmul.bf16.gmra.mxu1 %v5179_v41  ;;  %v6653_v36 = vsel %vm1842_vm3, %v6648_v20, %v6652_v59  ;;  %v10561_v20 = vld [vmem:[#allocation2 + $0x60] sm:$0xff] }
 0x2f3   : > { %6024 = vmatmul.bf16.gmra.mxu2 %v10477_v5  ;;  %v4714_v55 = vpop.f32.mrf.mxu0 }
 0x2f5   : > { %6970 = vmatmul.bf16.gmra.mxu3 %v6645_v23  ;;  %v10560_v23 = vld [vmem:[#allocation2 + $0x58] sm:$0xff] }
 0x2f6   : > { %v3084_v27 = vpop.f32.mrf.mxu2 }
 0x2f7   : > { %v2334_v10 = vpop.f32.mrf.mxu1  ;;  %v3224_v44 = vadd.f32 %v3084_v27, %v2472_v15  ;;  %v10440_v15 = vld [vmem:[#allocation2 + $0x48] sm:$0xff]  ;;  %v7561_v27 = vrot.slane %v10560_v23, 1  ;;  %v6662_v23 = vshrl.u32 %v10520_v45, 16 }
 0x2f8   : > { %v3766_v16 = vpop.f32.mrf.mxu3  ;;  %v2473_v31 = vadd.f32 %v2334_v10, %v11273_v53  ;;  %v5182_v10 = vrot.slane %v10440_v15, 1 }
 0x2f9   : > { %v3906_v29 = vadd.f32 %v3766_v16, %v3224_v44  ;;  %v6658_v44 = vshll.u32 %v10520_v45, 16 }
 0x2fb   : > { %v11586_v19 = vadd.f32 %v4712_v17, %v3906_v29  ;;  %v4717_v21 = vpop.f32.mrf.mxu0  ;;  %v7562_v29 = vsel %vm2789_vm4, %v7559_v39, %v7561_v27 }
 0x2fc   : > { %v6656_v21 = vor.u32 %v6654_v34, %v6652_v59  ;;  %v7563_v59 = vrot.slane %v10561_v20, 1 }
 0x2fe   : > { %v3086_v7 = vpop.f32.mrf.mxu2  ;;  %7726 = vmatmul.bf16.gmra.mxu0 %v7560_v37  ;;  %v6660_v37 = vrot.slane %v6658_v44, 1 }
 0x2ff   : > { %v2337_v32 = vpop.f32.mrf.mxu1  ;;  %v3225_v41 = vadd.f32 %v3086_v7, %v2473_v31  ;;  %v10479_v31 = vld [vmem:[#allocation2 + $0x50] sm:$0xff] }
 0x300   : > { %v3768_v5 = vpop.f32.mrf.mxu3  ;;  %v6661_v32 = vsel %vm1842_vm3, %v6656_v21, %v6660_v37  ;;  %v10480_v21 = vld [vmem:[#allocation2 + $0x58] sm:$0xff] }
 0x301   : > { %v3907_v3 = vadd.f32 %v3768_v5, %v3225_v41  ;;  %v10521_v5 = vld [vmem:[#allocation2 + $0x60] sm:$0xff] }
 0x302   : > { %5347 = vmatmul.bf16.gmra.mxu1 %v5181_v30 }
 0x303   : > { %6029 = vmatmul.bf16.gmra.mxu2 %v10478_v38  ;;  %v11592_v17 = vadd.f32 %v4714_v55, %v3907_v3  ;;  %v4719_v48 = vpop.f32.mrf.mxu0  ;;  %v5183_v55 = vsel %vm2789_vm4, %v5180_v47, %v5182_v10  ;;  %v10441_v38 = vld [vmem:[#allocation2 + $0x50] sm:$0xff] }
 0x304   : > { %v5184_v48 = vrot.slane %v10441_v38, 1  ;;  %v6670_v38 = vshrl.u32 %v10521_v5, 16 }
 0x305   : > { %6975 = vmatmul.bf16.gmra.mxu3 %v6653_v36 }
 0x306   : > { %v3089_v53 = vpop.f32.mrf.mxu2 }
 0x307   : > { %v2339_v51 = vpop.f32.mrf.mxu1  ;;  %v6666_v53 = vshll.u32 %v10521_v5, 16 }
 0x308   : > { %v3771_v26 = vpop.f32.mrf.mxu3 }
 0x309   : > { %v7564_v26 = vsel %vm2789_vm4, %v7561_v27, %v7563_v59 }
 0x30b   : > { %v4722_v16 = vpop.f32.mrf.mxu0 }
 0x30e   : > { %v3091_v14 = vpop.f32.mrf.mxu2  ;;  %7731 = vmatmul.bf16.gmra.mxu0 %v7562_v29  ;;  %v5185_v29 = vsel %vm2789_vm4, %v5182_v10, %v5184_v48  ;;  %v10522_v10 = vld [vmem:[#allocation2 + $0x68] sm:$0xff] }
 0x30f   : > { %v2342_v52 = vpop.f32.mrf.mxu1  ;;  %v6664_v14 = vor.u32 %v6662_v23, %v6660_v37 }
 0x310   : > { %v3773_v7 = vpop.f32.mrf.mxu3  ;;  %v2476_v54 = vadd.f32 %v2342_v52, %v11295_v49  ;;  %v6668_v52 = vrot.slane %v6666_v53, 1 }
 0x312   : > { %5352 = vmatmul.bf16.gmra.mxu1 %v5183_v55  ;;  %v6669_v45 = vsel %vm1842_vm3, %v6664_v14, %v6668_v52  ;;  %v10563_v14 = vld [vmem:[#allocation2 + $0x70] sm:$0xff] }
 0x313   : > { %6034 = vmatmul.bf16.gmra.mxu2 %v10479_v31  ;;  %v4724_v30 = vpop.f32.mrf.mxu0 }
 0x315   : > { %6980 = vmatmul.bf16.gmra.mxu3 %v6661_v32  ;;  %v10562_v32 = vld [vmem:[#allocation2 + $0x68] sm:$0xff] }
 0x316   : > { %v3094_v41 = vpop.f32.mrf.mxu2 }
 0x317   : > { %v2344_v39 = vpop.f32.mrf.mxu1  ;;  %v3228_v3 = vadd.f32 %v3094_v41, %v2476_v54  ;;  %v10442_v54 = vld [vmem:[#allocation2 + $0x58] sm:$0xff]  ;;  %v7565_v41 = vrot.slane %v10562_v32, 1  ;;  %v6678_v32 = vshrl.u32 %v10522_v10, 16 }
 0x318   : > { %v3776_v47 = vpop.f32.mrf.mxu3  ;;  %v2477_v34 = vadd.f32 %v2344_v39, %v11307_v8  ;;  %v5186_v39 = vrot.slane %v10442_v54, 1 }
 0x319   : > { %v3910_v36 = vadd.f32 %v3776_v47, %v3228_v3  ;;  %v6674_v3 = vshll.u32 %v10522_v10, 16 }
 0x31b   : > { %v11598_v51 = vadd.f32 %v4722_v16, %v3910_v36  ;;  %v4727_v15 = vpop.f32.mrf.mxu0  ;;  %v7566_v36 = vsel %vm2789_vm4, %v7563_v59, %v7565_v41 }
 0x31c   : > { %v6672_v15 = vor.u32 %v6670_v38, %v6668_v52  ;;  %v7567_v52 = vrot.slane %v10563_v14, 1 }
 0x31e   : > { %v3096_v49 = vpop.f32.mrf.mxu2  ;;  %7736 = vmatmul.bf16.gmra.mxu0 %v7564_v26  ;;  %v6676_v26 = vrot.slane %v6674_v3, 1  ;;  %v7568_v54 = vsel %vm2789_vm4, %v7565_v41, %v7567_v52 }
 0x31f   : > { %v2347_v44 = vpop.f32.mrf.mxu1  ;;  %v3229_v55 = vadd.f32 %v3096_v49, %v2477_v34  ;;  %v10481_v34 = vld [vmem:[#allocation2 + $0x60] sm:$0xff] }
 0x320   : > { %v3778_v31 = vpop.f32.mrf.mxu3  ;;  %v6677_v44 = vsel %vm1842_vm3, %v6672_v15, %v6676_v26  ;;  %v10482_v15 = vld [vmem:[#allocation2 + $0x68] sm:$0xff] }
 0x321   : > { %v3911_v7 = vadd.f32 %v3778_v31, %v3229_v55  ;;  %v10523_v31 = vld [vmem:[#allocation2 + $0x70] sm:$0xff] }
 0x322   : > { %5357 = vmatmul.bf16.gmra.mxu1 %v5185_v29 }
 0x323   : > { %6039 = vmatmul.bf16.gmra.mxu2 %v10480_v21  ;;  %v11604_v16 = vadd.f32 %v4724_v30, %v3911_v7  ;;  %v4729_v27 = vpop.f32.mrf.mxu0  ;;  %v5187_v30 = vsel %vm2789_vm4, %v5184_v48, %v5186_v39  ;;  %v10443_v21 = vld [vmem:[#allocation2 + $0x60] sm:$0xff] }
 0x324   : > { %v5188_v27 = vrot.slane %v10443_v21, 1  ;;  %v10524_v21 = vld [vmem:[#allocation2 + $0x78] sm:$0xff] }
 0x325   : > { %6985 = vmatmul.bf16.gmra.mxu3 %v6669_v45 }
 0x326   : > { %v3099_v8 = vpop.f32.mrf.mxu2 }
 0x327   : > { %v2349_v20 = vpop.f32.mrf.mxu1  ;;  %v6682_v8 = vshll.u32 %v10523_v31, 16 }
 0x328   : > { %v3781_v37 = vpop.f32.mrf.mxu3 }
 0x32b   : > { %v7702_v47 = vpop.f32.mrf.mxu0 }
 0x32e   : > { %v3101_v23 = vpop.f32.mrf.mxu2  ;;  %7741 = vmatmul.bf16.gmra.mxu0 %v7566_v36  ;;  %v5189_v36 = vsel %vm2789_vm4, %v5186_v39, %v5188_v27  ;;  %v10564_v39 = vld [vmem:[#allocation2 + $0x78] sm:$0xff] }
 0x32f   : > { %v5323_v53 = vpop.f32.mrf.mxu1  ;;  %v6680_v23 = vor.u32 %v6678_v32, %v6676_v26 }
 0x330   : > { %v3783_v49 = vpop.f32.mrf.mxu3  ;;  %v5547_v5 = vadd.f32 %v5323_v53, %v11314_v58  ;;  %v6684_v53 = vrot.slane %v6682_v8, 1 }
 0x332   : > { %5362 = vmatmul.bf16.gmra.mxu1 %v5187_v30 }
 0x333   : > { %6044 = vmatmul.bf16.gmra.mxu2 %v10481_v34  ;;  %v7704_v29 = vpop.f32.mrf.mxu0 }
 0x335   : > { %6990 = vmatmul.bf16.gmra.mxu3 %v6677_v44  ;;  %v6685_v44 = vsel %vm1842_vm3, %v6680_v23, %v6684_v53 }
 0x336   : > { %v6005_v55 = vpop.f32.mrf.mxu2 }
 0x337   : > { %v5325_v59 = vpop.f32.mrf.mxu1  ;;  %v6229_v7 = vadd.f32 %v6005_v55, %v5547_v5 }
 0x338   : > { %v6951_v48 = vpop.f32.mrf.mxu3  ;;  %v5548_v38 = vadd.f32 %v5325_v59, %v11320_v12  ;;  %v10444_v59 = vld [vmem:[#allocation2 + $0x68] sm:$0xff] }
 0x339   : > { %v7175_v45 = vadd.f32 %v6951_v48, %v6229_v7  ;;  %v7569_v48 = vrot.slane %v10564_v39, 1 }
 0x33b   : > { %v7707_v20 = vpop.f32.mrf.mxu0  ;;  %v7926_v37 = vadd.f32 %v7702_v47, %v7175_v45 }
 0x33c   : > { %v5190_v20 = vrot.slane %v10444_v59, 1  ;;  %v6694_v59 = vshrl.u32 %v10524_v21, 16 }
 0x33d   : > { %v8056_v49 = vpack.c.bf16 %v7926_v37, %v7926_v37 }
 0x33e   : > { %v6007_v58 = vpop.f32.mrf.mxu2  ;;  %7746 = vmatmul.bf16.gmra.mxu0 %v7568_v54  ;;  %v6686_v54 = vshrl.u32 %v10523_v31, 16  ;;  %v11625_v31 = vld [vmem:[#allocation2 + $0x80] sm:$0xff] }
 0x33f   : > { %v5328_v3 = vpop.f32.mrf.mxu1  ;;  %v6230_v30 = vadd.f32 %v6007_v58, %v5548_v38  ;;  %v8060_v47 = vunpack.c.l.bf16 %v8056_v49  ;;  %v6690_v38 = vshll.u32 %v10524_v21, 16  ;;  %v10483_v49 = vld [vmem:[#allocation2 + $0x70] sm:$0xff] }
 0x340   : > { %v6953_v34 = vpop.f32.mrf.mxu3 }
 0x341   : > { %v7176_v10 = vadd.f32 %v6953_v34, %v6230_v30  ;;  %v8070_v45 = vmul.f32 %v8060_v47, %v8060_v47  ;;  %v5191_v30 = vsel %vm2789_vm4, %v5188_v27, %v5190_v20  ;;  %v6692_v34 = vrot.slane %v6690_v38, 1  ;;  %v11630_v27 = vld [vmem:[#allocation2 + $0x80] sm:$0xff] }
 0x342   : > { %5367 = vmatmul.bf16.gmra.mxu1 %v5189_v36  ;;  %v7570_v36 = vsel %vm2789_vm4, %v7567_v52, %v7569_v48 }
 0x343   : > { %v7927_v41 = vadd.f32 %v7704_v29, %v7176_v10  ;;  %6049 = vmatmul.bf16.gmra.mxu2 %v10482_v15  ;;  %v7709_v12 = vpop.f32.mrf.mxu0  ;;  %v6688_v15 = vor.u32 %v6686_v54, %v6684_v53 }
 0x345   : > { %v8057_v26 = vpack.c.bf16 %v7927_v41, %v7927_v41  ;;  %v10660_v14 = vpack.c.bf16 %v7927_v41, %v7926_v37  ;;  %6995 = vmatmul.bf16.gmra.mxu3 %v6685_v44  ;;  %v6693_v44 = vsel %vm1842_vm3, %v6688_v15, %v6692_v34  ;;  %v10484_v15 = vld [vmem:[#allocation2 + $0x78] sm:$0xff] }
 0x346   : > { %v6010_v5 = vpop.f32.mrf.mxu2 }
 0x347   : > { %v5330_v55 = vpop.f32.mrf.mxu1  ;;  %10661 = vst [vmem:[%s11619_s18] sm:$0xff] %v10660_v14   ;;  %v8061_v29 = vunpack.c.l.bf16 %v8057_v26  ;;  %v7571_v14 = vrot.slane %v11625_v31, 1 }
 0x348   : > { %v6956_v7 = vpop.f32.mrf.mxu3 }
 0x349   : > { %v8062_v32 = vadd.f32 %v8061_v29, %v8060_v47  ;;  %v8071_v8 = vmul.f32 %v8061_v29, %v8061_v29  ;;  %v11628_v47 = vld [vmem:[#allocation2 + $0x70] sm:$0xff]  ;;  %v6698_v29 = vshll.u32 %v11630_v27, 16 }
 0x34a   : > { %v5192_v55 = vrot.slane %v11628_v47, 1 }
 0x34b   : > { %v8072_v58 = vadd.f32 %v8071_v8, %v8070_v45  ;;  %v7712_v3 = vpop.f32.mrf.mxu0 }
 0x34e   : > { %v6012_v37 = vpop.f32.mrf.mxu2  ;;  %7751 = vmatmul.bf16.gmra.mxu0 %v7570_v36  ;;  %v5193_v36 = vsel %vm2789_vm4, %v5190_v20, %v5192_v55 }
 0x34f   : > { %v5333_v23 = vpop.f32.mrf.mxu1  ;;  %v6696_v37 = vor.u32 %v6694_v59, %v6692_v34 }
 0x350   : > { %v6958_v10 = vpop.f32.mrf.mxu3  ;;  %v5551_v12 = vadd.f32 %v5333_v23, %v11338_v46  ;;  %v7572_v46 = vsel %vm2789_vm4, %v7569_v48, %v7571_v14  ;;  %v6700_v23 = vrot.slane %v6698_v29, 1  ;;  %v8073_v48 = vrot.slane %v8072_v58, 4 }
 0x351   : > { %v8063_v10 = vrot.slane %v8062_v32, 4 }
 0x352   : > { %5372 = vmatmul.bf16.gmra.mxu1 %v5191_v30  ;;  %v6701_v31 = vsel %vm1842_vm3, %v6696_v37, %v6700_v23  ;;  %v8074_v59 = vadd.f32 %v8073_v48, %v8072_v58 }
 0x353   : > { %6054 = vmatmul.bf16.gmra.mxu2 %v10483_v49  ;;  %v7714_v41 = vpop.f32.mrf.mxu0  ;;  %v8064_v20 = vadd.f32 %v8063_v10, %v8062_v32 }
 0x354   : > { %v8075_v37 = vrot.slane %v8074_v59, 2 }
 0x355   : > { %7000 = vmatmul.bf16.gmra.mxu3 %v6693_v44 }
 0x356   : > { %v6015_v52 = vpop.f32.mrf.mxu2 }
 0x357   : > { %v5335_v39 = vpop.f32.mrf.mxu1  ;;  %v6233_v53 = vadd.f32 %v6015_v52, %v5551_v12  ;;  %v11639_v12 = vld [vmem:[#allocation2 + $0x88] sm:$0xff] }
 0x358   : > { %v6961_v26 = vpop.f32.mrf.mxu3  ;;  %v5552_v8 = vadd.f32 %v5335_v39, %v11344_v18 }
 0x359   : > { %v7179_v5 = vadd.f32 %v6961_v26, %v6233_v53  ;;  %v11641_v26 = vld [vmem:[#allocation2 + $0x78] sm:$0xff] }
 0x35b   : > { %v7717_v7 = vpop.f32.mrf.mxu0  ;;  %v7930_v45 = vadd.f32 %v7712_v3, %v7179_v5  ;;  %v11643_v5 = vld [vmem:[#allocation2 + $0x88] sm:$0xff] }
 0x35d   : > { %v8082_v21 = vpack.c.bf16 %v7930_v45, %v7930_v45 }
 0x35e   : > { %v6017_v54 = vpop.f32.mrf.mxu2  ;;  %7756 = vmatmul.bf16.gmra.mxu0 %v7572_v46  ;;  %v8065_v46 = vrot.slane %v8064_v20, 2 }
 0x35f   : > { %v5338_v38 = vpop.f32.mrf.mxu1  ;;  %v6234_v30 = vadd.f32 %v6017_v54, %v5552_v8  ;;  %v8087_v34 = vunpack.c.l.bf16 %v8082_v21 }
 0x360   : > { %v6963_v49 = vpop.f32.mrf.mxu3  ;;  %v5194_v38 = vrot.slane %v11641_v26, 1  ;;  %v8066_v10 = vadd.f32 %v8065_v46, %v8064_v20 }
 0x361   : > { %v7180_v44 = vadd.f32 %v6963_v49, %v6234_v30  ;;  %v8097_v8 = vmul.f32 %v8087_v34, %v8087_v34 }
 0x362   : > { %5377 = vmatmul.bf16.gmra.mxu1 %v5193_v36  ;;  %v6706_v36 = vshll.u32 %v11643_v5, 16 }
 0x363   : > { %v7931_v3 = vadd.f32 %v7714_v41, %v7180_v44  ;;  %6059 = vmatmul.bf16.gmra.mxu2 %v10484_v15  ;;  %v7719_v18 = vpop.f32.mrf.mxu0  ;;  %v7573_v41 = vrot.slane %v11639_v12, 1 }
 0x364   : > { %v6708_v12 = vrot.slane %v6706_v36, 1 }
 0x365   : > { %v8083_v52 = vpack.c.bf16 %v7931_v3, %v7931_v3  ;;  %v10665_v39 = vpack.c.bf16 %v7931_v3, %v7930_v45  ;;  %7005 = vmatmul.bf16.gmra.mxu3 %v6701_v31  ;;  %v6702_v45 = vshrl.u32 %v11630_v27, 16  ;;  %v7574_v58 = vsel %vm2789_vm4, %v7571_v14, %v7573_v41 }
 0x366   : > { %v6020_v47 = vpop.f32.mrf.mxu2  ;;  %v5195_v3 = vsel %vm2789_vm4, %v5192_v55, %v5194_v38  ;;  %v11653_v55 = vld [vmem:[#allocation2 + $0x90] sm:$0xff] }
 0x367   : > { %v5340_v53 = vpop.f32.mrf.mxu1  ;;  %10752 = vst [vmem:[%s11619_s18 + $0x8] sm:$0xff] %v10665_v39   ;;  %v8088_v29 = vunpack.c.l.bf16 %v8083_v52  ;;  %v6704_v18 = vor.u32 %v6702_v45, %v6700_v23  ;;  %v10485_v39 = vld [vmem:[#allocation2 + $0x80] sm:$0xff] }
 0x368   : > { %v6966_v7 = vpop.f32.mrf.mxu3  ;;  %v8067_v53 = vrot.slane %v8066_v10, 1 }
 0x369   : > { %v8089_v54 = vadd.f32 %v8088_v29, %v8087_v34  ;;  %v8098_v32 = vmul.f32 %v8088_v29, %v8088_v29  ;;  %v8076_v34 = vadd.f32 %v8075_v37, %v8074_v59  ;;  %v6709_v14 = vsel %vm1842_vm3, %v6704_v18, %v6708_v12  ;;  %v10447_v37 = vld [vmem:[#allocation2 + $0x80] sm:$0xff] }
 0x36a   : > { %v8068_v23 = vadd.f32 %v8067_v53, %v8066_v10 }
 0x36b   : > { %v8090_v30 = vrot.slane %v8089_v54, 4  ;;  %v8099_v15 = vadd.f32 %v8098_v32, %v8097_v8  ;;  %v7722_v49 = vpop.f32.mrf.mxu0  ;;  %v8077_v20 = vrot.slane %v8076_v34, 1 }
 0x36d   : > { %v8091_v21 = vadd.f32 %v8090_v30, %v8089_v54  ;;  %v8100_v44 = vrot.slane %v8099_v15, 4  ;;  %v10527_v30 = vld [vmem:[#allocation2 + $0x90] sm:$0xff] }
 0x36e   : > { %v6022_v31 = vpop.f32.mrf.mxu2  ;;  %7761 = vmatmul.bf16.gmra.mxu0 %v7574_v58 }
 0x36f   : > { %v5343_v48 = vpop.f32.mrf.mxu1  ;;  %v8092_v52 = vrot.slane %v8091_v21, 2  ;;  %v8101_v27 = vadd.f32 %v8100_v44, %v8099_v15  ;;  %v8078_v15 = vadd.f32 %v8077_v20, %v8076_v34 }
 0x370   : > { %v6968_v47 = vpop.f32.mrf.mxu3  ;;  %v5555_v32 = vadd.f32 %v5343_v48, %v11350_v2  ;;  %v6714_v2 = vshll.u32 %v10527_v30, 16 }
 0x371   : > { %v8093_v26 = vadd.f32 %v8092_v52, %v8091_v21  ;;  %v8102_v29 = vrot.slane %v8101_v27, 2  ;;  %v5196_v52 = vrot.slane %v10447_v37, 1  ;;  %v10528_v37 = vld [vmem:[#allocation2 + $0x98] sm:$0xff] }
 0x372   : > { %5382 = vmatmul.bf16.gmra.mxu1 %v5195_v3  ;;  %v7575_v3 = vrot.slane %v11653_v55, 1  ;;  %v6716_v20 = vrot.slane %v6714_v2, 1  ;;  %v6718_v2 = vshrl.u32 %v10527_v30, 16 }
 0x373   : > { %v8094_v7 = vrot.slane %v8093_v26, 1  ;;  %v8103_v46 = vadd.f32 %v8102_v29, %v8101_v27  ;;  %6064 = vmatmul.bf16.gmra.mxu2 %v10485_v39  ;;  %v7724_v8 = vpop.f32.mrf.mxu0  ;;  %v6710_v27 = vshrl.u32 %v11643_v5, 16  ;;  %v5197_v29 = vsel %vm2789_vm4, %v5194_v38, %v5196_v52 }
 0x374   : > { %v7576_v39 = vsel %vm2789_vm4, %v7573_v41, %v7575_v3 }
 0x375   : > { %v8095_v59 = vadd.f32 %v8094_v7, %v8093_v26  ;;  %v8104_v54 = vrot.slane %v8103_v46, 1  ;;  %7010 = vmatmul.bf16.gmra.mxu3 %v6709_v14  ;;  %v6712_v14 = vor.u32 %v6710_v27, %v6708_v12 }
 0x376   : > { %v6025_v45 = vpop.f32.mrf.mxu2 }
 0x377   : > { %v5345_v36 = vpop.f32.mrf.mxu1  ;;  %v11656_v58 = vadd.f32 %v8095_v59, %v8068_v23  ;;  %v8105_v21 = vadd.f32 %v8104_v54, %v8103_v46  ;;  %v6237_v44 = vadd.f32 %v6025_v45, %v5555_v32  ;;  %v10486_v46 = vld [vmem:[#allocation2 + $0x88] sm:$0xff]  ;;  %v6717_v59 = vsel %vm1842_vm3, %v6712_v14, %v6716_v20 }
 0x378   : > { %v6971_v31 = vpop.f32.mrf.mxu3  ;;  %v5556_v34 = vadd.f32 %v5345_v36, %v11356_v25  ;;  %v11666_v25 = vld [vmem:[#allocation2 + $0x98] sm:$0xff]  ;;  %v11668_v36 = vld [vmem:[#allocation2 + $0x88] sm:$0xff] }
 0x379   : > { %v11659_v18 = vadd.f32 %v8105_v21, %v8078_v15  ;;  %v7183_v10 = vadd.f32 %v6971_v31, %v6237_v44  ;;  %v7577_v44 = vrot.slane %v11666_v25, 1  ;;  %v5198_v27 = vrot.slane %v11668_v36, 1 }
 0x37b   : > { %v7727_v48 = vpop.f32.mrf.mxu0  ;;  %v7934_v47 = vadd.f32 %v7722_v49, %v7183_v10 }
 0x37c   : > { %v6722_v48 = vshll.u32 %v10528_v37, 16 }
 0x37d   : > { %v8109_v23 = vpack.c.bf16 %v7934_v47, %v7934_v47 }
 0x37e   : > { %v6027_v53 = vpop.f32.mrf.mxu2  ;;  %7766 = vmatmul.bf16.gmra.mxu0 %v7576_v39 }
 0x37f   : > { %v5348_v26 = vpop.f32.mrf.mxu1  ;;  %v6238_v7 = vadd.f32 %v6027_v53, %v5556_v34  ;;  %v8114_v54 = vunpack.c.l.bf16 %v8109_v23  ;;  %v7578_v53 = vsel %vm2789_vm4, %v7575_v3, %v7577_v44  ;;  %v6724_v23 = vrot.slane %v6722_v48, 1 }
 0x380   : > { %v6973_v55 = vpop.f32.mrf.mxu3 }
 0x381   : > { %v7184_v5 = vadd.f32 %v6973_v55, %v6238_v7  ;;  %v8124_v31 = vmul.f32 %v8114_v54, %v8114_v54  ;;  %v6720_v55 = vor.u32 %v6718_v2, %v6716_v20 }
 0x382   : > { %5387 = vmatmul.bf16.gmra.mxu1 %v5197_v29 }
 0x383   : > { %v7935_v41 = vadd.f32 %v7724_v8, %v7184_v5  ;;  %6069 = vmatmul.bf16.gmra.mxu2 %v10486_v46  ;;  %v7729_v49 = vpop.f32.mrf.mxu0  ;;  %v5199_v46 = vsel %vm2789_vm4, %v5196_v52, %v5198_v27 }
 0x385   : > { %v8110_v32 = vpack.c.bf16 %v7935_v41, %v7935_v41  ;;  %v10670_v38 = vpack.c.bf16 %v7935_v41, %v7934_v47  ;;  %7015 = vmatmul.bf16.gmra.mxu3 %v6717_v59  ;;  %v10487_v41 = vld [vmem:[#allocation2 + $0x90] sm:$0xff] }
 0x386   : > { %v6030_v12 = vpop.f32.mrf.mxu2 }
 0x387   : > { %v5350_v45 = vpop.f32.mrf.mxu1  ;;  %10753 = vst [vmem:[%s11619_s18 + $0x10] sm:$0xff] %v10670_v38   ;;  %v8115_v15 = vunpack.c.l.bf16 %v8110_v32  ;;  %v11676_v12 = vld [vmem:[#allocation2 + $0xa0] sm:$0xff] }
 0x388   : > { %v6976_v21 = vpop.f32.mrf.mxu3 }
 0x389   : > { %v8116_v8 = vadd.f32 %v8115_v15, %v8114_v54  ;;  %v8125_v10 = vmul.f32 %v8115_v15, %v8115_v15  ;;  %v6725_v54 = vsel %vm1842_vm3, %v6720_v55, %v6724_v23  ;;  %v10449_v21 = vld [vmem:[#allocation2 + $0x90] sm:$0xff] }
 0x38b   : > { %v8117_v39 = vrot.slane %v8116_v8, 4  ;;  %v8126_v47 = vadd.f32 %v8125_v10, %v8124_v31  ;;  %v7732_v34 = vpop.f32.mrf.mxu0  ;;  %v10529_v31 = vld [vmem:[#allocation2 + $0xa0] sm:$0xff] }
 0x38d   : > { %v8118_v26 = vadd.f32 %v8117_v39, %v8116_v8  ;;  %v8127_v29 = vrot.slane %v8126_v47, 4  ;;  %v7579_v39 = vrot.slane %v11676_v12, 1 }
 0x38e   : > { %v6032_v14 = vpop.f32.mrf.mxu2  ;;  %7771 = vmatmul.bf16.gmra.mxu0 %v7578_v53 }
 0x38f   : > { %v5353_v7 = vpop.f32.mrf.mxu1  ;;  %v8119_v5 = vrot.slane %v8118_v26, 2  ;;  %v8128_v59 = vadd.f32 %v8127_v29, %v8126_v47  ;;  %v6726_v29 = vshrl.u32 %v10528_v37, 16 }
 0x390   : > { %v6978_v49 = vpop.f32.mrf.mxu3  ;;  %v5559_v20 = vadd.f32 %v5353_v7, %v11374_v4  ;;  %v6730_v4 = vshll.u32 %v10529_v31, 16  ;;  %v7580_v7 = vsel %vm2789_vm4, %v7577_v44, %v7579_v39 }
 0x391   : > { %v8120_v30 = vadd.f32 %v8119_v5, %v8118_v26  ;;  %v8129_v25 = vrot.slane %v8128_v59, 2  ;;  %v5200_v26 = vrot.slane %v10449_v21, 1 }
 0x392   : > { %5392 = vmatmul.bf16.gmra.mxu1 %v5199_v46  ;;  %v6732_v49 = vrot.slane %v6730_v4, 1 }
 0x393   : > { %v8121_v32 = vrot.slane %v8120_v30, 1  ;;  %v8130_v3 = vadd.f32 %v8129_v25, %v8128_v59  ;;  %6074 = vmatmul.bf16.gmra.mxu2 %v10487_v41  ;;  %v7734_v38 = vpop.f32.mrf.mxu0  ;;  %v5201_v59 = vsel %vm2789_vm4, %v5198_v27, %v5200_v26  ;;  %v6728_v41 = vor.u32 %v6726_v29, %v6724_v23  ;;  %v10488_v25 = vld [vmem:[#allocation2 + $0x98] sm:$0xff] }
 0x395   : > { %v8122_v45 = vadd.f32 %v8121_v32, %v8120_v30  ;;  %v8131_v52 = vrot.slane %v8130_v3, 1  ;;  %7020 = vmatmul.bf16.gmra.mxu3 %v6725_v54  ;;  %v6733_v32 = vsel %vm1842_vm3, %v6728_v41, %v6732_v49 }
 0x396   : > { %v6035_v36 = vpop.f32.mrf.mxu2 }
 0x397   : > { %v5355_v15 = vpop.f32.mrf.mxu1  ;;  %v11680_v8 = vadd.f32 %v8122_v45, %v11656_v58  ;;  %v8132_v10 = vadd.f32 %v8131_v52, %v8130_v3  ;;  %v6241_v2 = vadd.f32 %v6035_v36, %v5559_v20  ;;  %v11692_v52 = vld [vmem:[#allocation2 + $0x98] sm:$0xff]  ;;  %v10530_v20 = vld [vmem:[#allocation2 + $0xa8] sm:$0xff] }
 0x398   : > { %v6981_v48 = vpop.f32.mrf.mxu3  ;;  %v5560_v55 = vadd.f32 %v5355_v15, %v11380_v22  ;;  %v11690_v22 = vld [vmem:[#allocation2 + $0xa8] sm:$0xff]  ;;  %v6738_v29 = vshll.u32 %v10530_v20, 16 }
 0x399   : > { %v11684_v47 = vadd.f32 %v8132_v10, %v11659_v18  ;;  %v7187_v53 = vadd.f32 %v6981_v48, %v6241_v2  ;;  %v7581_v21 = vrot.slane %v11690_v22, 1  ;;  %v5202_v48 = vrot.slane %v11692_v52, 1  ;;  %v10451_v52 = vld [vmem:[#allocation2 + $0xa0] sm:$0xff] }
 0x39b   : > { %v7737_v14 = vpop.f32.mrf.mxu0  ;;  %v7938_v46 = vadd.f32 %v7732_v34, %v7187_v53  ;;  %v6734_v53 = vshrl.u32 %v10529_v31, 16  ;;  %v5203_v41 = vsel %vm2789_vm4, %v5200_v26, %v5202_v48 }
 0x39d   : > { %v8136_v54 = vpack.c.bf16 %v7938_v46, %v7938_v46 }
 0x39e   : > { %v6037_v58 = vpop.f32.mrf.mxu2  ;;  %7776 = vmatmul.bf16.gmra.mxu0 %v7580_v7 }
 0x39f   : > { %v5358_v5 = vpop.f32.mrf.mxu1  ;;  %v6242_v30 = vadd.f32 %v6037_v58, %v5560_v55  ;;  %v8141_v3 = vunpack.c.l.bf16 %v8136_v54 }
 0x3a0   : > { %v6983_v18 = vpop.f32.mrf.mxu3 }
 0x3a1   : > { %v7188_v37 = vadd.f32 %v6983_v18, %v6242_v30  ;;  %v8151_v10 = vmul.f32 %v8141_v3, %v8141_v3  ;;  %v6736_v30 = vor.u32 %v6734_v53, %v6732_v49 }
 0x3a2   : > { %5397 = vmatmul.bf16.gmra.mxu1 %v5201_v59 }
 0x3a3   : > { %v7939_v44 = vadd.f32 %v7734_v38, %v7188_v37  ;;  %6079 = vmatmul.bf16.gmra.mxu2 %v10488_v25  ;;  %v7739_v34 = vpop.f32.mrf.mxu0  ;;  %v6740_v25 = vrot.slane %v6738_v29, 1  ;;  %v10489_v37 = vld [vmem:[#allocation2 + $0xa0] sm:$0xff] }
 0x3a5   : > { %v8137_v12 = vpack.c.bf16 %v7939_v44, %v7939_v44  ;;  %v10675_v27 = vpack.c.bf16 %v7939_v44, %v7938_v46  ;;  %7025 = vmatmul.bf16.gmra.mxu3 %v6733_v32  ;;  %v7582_v46 = vsel %vm2789_vm4, %v7579_v39, %v7581_v21  ;;  %v6741_v34 = vsel %vm1842_vm3, %v6736_v30, %v6740_v25 }
 0x3a6   : > { %v6040_v23 = vpop.f32.mrf.mxu2 }
 0x3a7   : > { %v5360_v45 = vpop.f32.mrf.mxu1  ;;  %10754 = vst [vmem:[%s11619_s18 + $0x18] sm:$0xff] %v10675_v27   ;;  %v8142_v36 = vunpack.c.l.bf16 %v8137_v12  ;;  %v11700_v12 = vld [vmem:[#allocation2 + $0xb0] sm:$0xff] }
 0x3a8   : > { %v6986_v15 = vpop.f32.mrf.mxu3  ;;  %v7583_v53 = vrot.slane %v11700_v12, 1  ;;  %v11716_v12 = vld [vmem:[#allocation2 + $0xa8] sm:$0xff] }
 0x3a9   : > { %v8143_v38 = vadd.f32 %v8142_v36, %v8141_v3  ;;  %v8152_v2 = vmul.f32 %v8142_v36, %v8142_v36  ;;  %v10531_v36 = vld [vmem:[#allocation2 + $0xb0] sm:$0xff] }
 0x3ab   : > { %v8144_v4 = vrot.slane %v8143_v38, 4  ;;  %v8153_v14 = vadd.f32 %v8152_v2, %v8151_v10  ;;  %v7742_v7 = vpop.f32.mrf.mxu0 }
 0x3ad   : > { %v8145_v55 = vadd.f32 %v8144_v4, %v8143_v38  ;;  %v8154_v58 = vrot.slane %v8153_v14, 4 }
 0x3ae   : > { %v6042_v5 = vpop.f32.mrf.mxu2  ;;  %7781 = vmatmul.bf16.gmra.mxu0 %v7582_v46  ;;  %v6742_v46 = vshrl.u32 %v10530_v20, 16 }
 0x3af   : > { %v5363_v59 = vpop.f32.mrf.mxu1  ;;  %v8146_v18 = vrot.slane %v8145_v55, 2  ;;  %v8155_v54 = vadd.f32 %v8154_v58, %v8153_v14  ;;  %v5204_v14 = vrot.slane %v10451_v52, 1  ;;  %v7584_v58 = vsel %vm2789_vm4, %v7581_v21, %v7583_v53 }
 0x3b0   : > { %v6988_v32 = vpop.f32.mrf.mxu3  ;;  %v5563_v49 = vadd.f32 %v5363_v59, %v11386_v50  ;;  %v6746_v50 = vshll.u32 %v10531_v36, 16 }
 0x3b1   : > { %v8147_v31 = vadd.f32 %v8146_v18, %v8145_v55  ;;  %v8156_v44 = vrot.slane %v8155_v54, 2  ;;  %v5205_v30 = vsel %vm2789_vm4, %v5202_v48, %v5204_v14  ;;  %v6744_v18 = vor.u32 %v6742_v46, %v6740_v25  ;;  %v10490_v32 = vld [vmem:[#allocation2 + $0xa8] sm:$0xff] }
 0x3b2   : > { %5402 = vmatmul.bf16.gmra.mxu1 %v5203_v41 }
 0x3b3   : > { %v8148_v22 = vrot.slane %v8147_v31, 1  ;;  %v8157_v39 = vadd.f32 %v8156_v44, %v8155_v54  ;;  %6084 = vmatmul.bf16.gmra.mxu2 %v10489_v37  ;;  %v7744_v3 = vpop.f32.mrf.mxu0  ;;  %v6748_v54 = vrot.slane %v6746_v50, 1 }
 0x3b5   : > { %v8149_v27 = vadd.f32 %v8148_v22, %v8147_v31  ;;  %v8158_v26 = vrot.slane %v8157_v39, 1  ;;  %7030 = vmatmul.bf16.gmra.mxu3 %v6741_v34  ;;  %v6749_v44 = vsel %vm1842_vm3, %v6744_v18, %v6748_v54 }
 0x3b6   : > { %v6045_v23 = vpop.f32.mrf.mxu2 }
 0x3b7   : > { %v5365_v45 = vpop.f32.mrf.mxu1  ;;  %v11704_v15 = vadd.f32 %v8149_v27, %v11680_v8  ;;  %v8159_v10 = vadd.f32 %v8158_v26, %v8157_v39  ;;  %v6245_v38 = vadd.f32 %v6045_v23, %v5563_v49  ;;  %v10532_v27 = vld [vmem:[#allocation2 + $0xb8] sm:$0xff] }
 0x3b8   : > { %v6991_v2 = vpop.f32.mrf.mxu3  ;;  %v5564_v59 = vadd.f32 %v5365_v45, %v11392_v6  ;;  %v11714_v6 = vld [vmem:[#allocation2 + $0xb8] sm:$0xff] }
 0x3b9   : > { %v11708_v29 = vadd.f32 %v8159_v10, %v11684_v47  ;;  %v7191_v4 = vadd.f32 %v6991_v2, %v6245_v38  ;;  %v7585_v23 = vrot.slane %v11714_v6, 1  ;;  %v5206_v10 = vrot.slane %v11716_v12, 1  ;;  %v11724_v6 = vld [vmem:[#allocation2 + $0xc0] sm:$0xff] }
 0x3ba   : > { %v6750_v38 = vshrl.u32 %v10531_v36, 16  ;;  %v6754_v2 = vshll.u32 %v10532_v27, 16 }
 0x3bb   : > { %v7747_v55 = vpop.f32.mrf.mxu0  ;;  %v7942_v5 = vadd.f32 %v7742_v7, %v7191_v4 }
 0x3bc   : > { %v7586_v55 = vsel %vm2789_vm4, %v7583_v53, %v7585_v23  ;;  %v6756_v18 = vrot.slane %v6754_v2, 1 }
 0x3bd   : > { %v8163_v31 = vpack.c.bf16 %v7942_v5, %v7942_v5 }
 0x3be   : > { %v6047_v8 = vpop.f32.mrf.mxu2  ;;  %7786 = vmatmul.bf16.gmra.mxu0 %v7584_v58 }
 0x3bf   : > { %v5368_v41 = vpop.f32.mrf.mxu1  ;;  %v6246_v37 = vadd.f32 %v6047_v8, %v5564_v59  ;;  %v8168_v34 = vunpack.c.l.bf16 %v8163_v31 }
 0x3c0   : > { %v6993_v47 = vpop.f32.mrf.mxu3  ;;  %v5207_v41 = vsel %vm2789_vm4, %v5204_v14, %v5206_v10 }
 0x3c1   : > { %v7192_v20 = vadd.f32 %v6993_v47, %v6246_v37  ;;  %v8178_v45 = vmul.f32 %v8168_v34, %v8168_v34  ;;  %v10491_v47 = vld [vmem:[#allocation2 + $0xb0] sm:$0xff] }
 0x3c2   : > { %5407 = vmatmul.bf16.gmra.mxu1 %v5205_v30  ;;  %v6752_v30 = vor.u32 %v6750_v38, %v6748_v54 }
 0x3c3   : > { %v7943_v21 = vadd.f32 %v7744_v3, %v7192_v20  ;;  %6089 = vmatmul.bf16.gmra.mxu2 %v10490_v32  ;;  %v7749_v7 = vpop.f32.mrf.mxu0 }
 0x3c5   : > { %v8164_v22 = vpack.c.bf16 %v7943_v21, %v7943_v21  ;;  %v10680_v48 = vpack.c.bf16 %v7943_v21, %v7942_v5  ;;  %7035 = vmatmul.bf16.gmra.mxu3 %v6749_v44  ;;  %v6757_v44 = vsel %vm1842_vm3, %v6752_v30, %v6756_v18 }
 0x3c6   : > { %v6050_v25 = vpop.f32.mrf.mxu2 }
 0x3c7   : > { %v5370_v39 = vpop.f32.mrf.mxu1  ;;  %10755 = vst [vmem:[%s11619_s18 + $0x20] sm:$0xff] %v10680_v48   ;;  %v8169_v26 = vunpack.c.l.bf16 %v8164_v22  ;;  %v10453_v25 = vld [vmem:[#allocation2 + $0xb0] sm:$0xff] }
 0x3c8   : > { %v6996_v49 = vpop.f32.mrf.mxu3  ;;  %v10533_v39 = vld [vmem:[#allocation2 + $0xc0] sm:$0xff]  ;;  %v5208_v2 = vrot.slane %v10453_v25, 1 }
 0x3c9   : > { %v8170_v3 = vadd.f32 %v8169_v26, %v8168_v34  ;;  %v8179_v52 = vmul.f32 %v8169_v26, %v8169_v26  ;;  %v6766_v25 = vshrl.u32 %v10533_v39, 16 }
 0x3cb   : > { %v8171_v4 = vrot.slane %v8170_v3, 4  ;;  %v8180_v46 = vadd.f32 %v8179_v52, %v8178_v45  ;;  %v7752_v50 = vpop.f32.mrf.mxu0 }
 0x3cd   : > { %v8172_v58 = vadd.f32 %v8171_v4, %v8170_v3  ;;  %v8181_v5 = vrot.slane %v8180_v46, 4  ;;  %v7587_v3 = vrot.slane %v11724_v6, 1  ;;  %v6758_v4 = vshrl.u32 %v10532_v27, 16 }
 0x3ce   : > { %v6052_v59 = vpop.f32.mrf.mxu2  ;;  %7791 = vmatmul.bf16.gmra.mxu0 %v7586_v55 }
 0x3cf   : > { %v5373_v8 = vpop.f32.mrf.mxu1  ;;  %v8173_v37 = vrot.slane %v8172_v58, 2  ;;  %v8182_v32 = vadd.f32 %v8181_v5, %v8180_v46  ;;  %v7588_v55 = vsel %vm2789_vm4, %v7585_v23, %v7587_v3 }
 0x3d0   : > { %v6998_v31 = vpop.f32.mrf.mxu3  ;;  %v5567_v54 = vadd.f32 %v5373_v8, %v11410_v24  ;;  %v6762_v24 = vshll.u32 %v10533_v39, 16  ;;  %v5209_v8 = vsel %vm2789_vm4, %v5206_v10, %v5208_v2 }
 0x3d1   : > { %v8174_v36 = vadd.f32 %v8173_v37, %v8172_v58  ;;  %v8183_v20 = vrot.slane %v8182_v32, 2 }
 0x3d2   : > { %5412 = vmatmul.bf16.gmra.mxu1 %v5207_v41  ;;  %v6760_v41 = vor.u32 %v6758_v4, %v6756_v18  ;;  %v6764_v30 = vrot.slane %v6762_v24, 1 }
 0x3d3   : > { %v8175_v21 = vrot.slane %v8174_v36, 1  ;;  %v8184_v53 = vadd.f32 %v8183_v20, %v8182_v32  ;;  %6094 = vmatmul.bf16.gmra.mxu2 %v10491_v47  ;;  %v7754_v7 = vpop.f32.mrf.mxu0  ;;  %v10492_v32 = vld [vmem:[#allocation2 + $0xb8] sm:$0xff] }
 0x3d4   : > { %v6765_v31 = vsel %vm1842_vm3, %v6760_v41, %v6764_v30 }
 0x3d5   : > { %v8176_v34 = vadd.f32 %v8175_v21, %v8174_v36  ;;  %v8185_v14 = vrot.slane %v8184_v53, 1  ;;  %7040 = vmatmul.bf16.gmra.mxu3 %v6757_v44  ;;  %v11740_v21 = vld [vmem:[#allocation2 + $0xb8] sm:$0xff] }
 0x3d6   : > { %v6055_v22 = vpop.f32.mrf.mxu2 }
 0x3d7   : > { %v5375_v48 = vpop.f32.mrf.mxu1  ;;  %v11728_v12 = vadd.f32 %v8176_v34, %v11704_v15  ;;  %v8186_v26 = vadd.f32 %v8185_v14, %v8184_v53  ;;  %v6249_v49 = vadd.f32 %v6055_v22, %v5567_v54  ;;  %v10534_v53 = vld [vmem:[#allocation2 + $0xc8] sm:$0xff] }
 0x3d8   : > { %v7001_v45 = vpop.f32.mrf.mxu3  ;;  %v5568_v5 = vadd.f32 %v5375_v48, %v11416_v63  ;;  %v11738_v63 = vld [vmem:[#allocation2 + $0xc8] sm:$0xff]  ;;  %v5210_v48 = vrot.slane %v11740_v21, 1 }
 0x3d9   : > { %v11732_v52 = vadd.f32 %v8186_v26, %v11708_v29  ;;  %v7195_v38 = vadd.f32 %v7001_v45, %v6249_v49  ;;  %v7589_v14 = vrot.slane %v11738_v63, 1  ;;  %v6770_v26 = vshll.u32 %v10534_v53, 16 }
 0x3db   : > { %v7757_v46 = vpop.f32.mrf.mxu0  ;;  %v7946_v58 = vadd.f32 %v7752_v50, %v7195_v38  ;;  %v7590_v4 = vsel %vm2789_vm4, %v7587_v3, %v7589_v14 }
 0x3dd   : > { %v8190_v47 = vpack.c.bf16 %v7946_v58, %v7946_v58 }
 0x3de   : > { %v6057_v15 = vpop.f32.mrf.mxu2  ;;  %7796 = vmatmul.bf16.gmra.mxu0 %v7588_v55 }
 0x3df   : > { %v5378_v59 = vpop.f32.mrf.mxu1  ;;  %v6250_v37 = vadd.f32 %v6057_v15, %v5568_v5  ;;  %v8195_v36 = vunpack.c.l.bf16 %v8190_v47  ;;  %v5211_v5 = vsel %vm2789_vm4, %v5208_v2, %v5210_v48  ;;  %v6768_v15 = vor.u32 %v6766_v25, %v6764_v30 }
 0x3e0   : > { %v7003_v29 = vpop.f32.mrf.mxu3  ;;  %v6772_v59 = vrot.slane %v6770_v26, 1  ;;  %v6774_v25 = vshrl.u32 %v10534_v53, 16 }
 0x3e1   : > { %v7196_v27 = vadd.f32 %v7003_v29, %v6250_v37  ;;  %v8205_v54 = vmul.f32 %v8195_v36, %v8195_v36  ;;  %v10493_v37 = vld [vmem:[#allocation2 + $0xc0] sm:$0xff] }
 0x3e2   : > { %5417 = vmatmul.bf16.gmra.mxu1 %v5209_v8  ;;  %v6773_v47 = vsel %vm1842_vm3, %v6768_v15, %v6772_v59  ;;  %v10494_v15 = vld [vmem:[#allocation2 + $0xc8] sm:$0xff] }
 0x3e3   : > { %v7947_v23 = vadd.f32 %v7754_v7, %v7196_v27  ;;  %6099 = vmatmul.bf16.gmra.mxu2 %v10492_v32  ;;  %v7759_v50 = vpop.f32.mrf.mxu0 }
 0x3e5   : > { %v8191_v20 = vpack.c.bf16 %v7947_v23, %v7947_v23  ;;  %v10685_v10 = vpack.c.bf16 %v7947_v23, %v7946_v58  ;;  %7045 = vmatmul.bf16.gmra.mxu3 %v6765_v31  ;;  %v11748_v23 = vld [vmem:[#allocation2 + $0xd0] sm:$0xff] }
 0x3e6   : > { %v6060_v18 = vpop.f32.mrf.mxu2 }
 0x3e7   : > { %v5380_v44 = vpop.f32.mrf.mxu1  ;;  %10756 = vst [vmem:[%s11619_s18 + $0x28] sm:$0xff] %v10685_v10   ;;  %v8196_v6 = vunpack.c.l.bf16 %v8191_v20  ;;  %v10455_v20 = vld [vmem:[#allocation2 + $0xc0] sm:$0xff]  ;;  %v10535_v10 = vld [vmem:[#allocation2 + $0xd0] sm:$0xff] }
 0x3e8   : > { %v7006_v34 = vpop.f32.mrf.mxu3 }
 0x3e9   : > { %v8197_v7 = vadd.f32 %v8196_v6, %v8195_v36  ;;  %v8206_v22 = vmul.f32 %v8196_v6, %v8196_v6  ;;  %v7591_v34 = vrot.slane %v11748_v23, 1 }
 0x3eb   : > { %v8198_v49 = vrot.slane %v8197_v7, 4  ;;  %v8207_v45 = vadd.f32 %v8206_v22, %v8205_v54  ;;  %v7762_v38 = vpop.f32.mrf.mxu0  ;;  %v5212_v22 = vrot.slane %v10455_v20, 1 }
 0x3ed   : > { %v8199_v24 = vadd.f32 %v8198_v49, %v8197_v7  ;;  %v8208_v46 = vrot.slane %v8207_v45, 4  ;;  %v7592_v49 = vsel %vm2789_vm4, %v7589_v14, %v7591_v34 }
 0x3ee   : > { %v6062_v55 = vpop.f32.mrf.mxu2  ;;  %7801 = vmatmul.bf16.gmra.mxu0 %v7590_v4 }
 0x3ef   : > { %v5383_v58 = vpop.f32.mrf.mxu1  ;;  %v8200_v8 = vrot.slane %v8199_v24, 2  ;;  %v8209_v41 = vadd.f32 %v8208_v46, %v8207_v45  ;;  %v5213_v46 = vsel %vm2789_vm4, %v5210_v48, %v5212_v22  ;;  %v6776_v55 = vor.u32 %v6774_v25, %v6772_v59 }
 0x3f0   : > { %v7008_v32 = vpop.f32.mrf.mxu3  ;;  %v5571_v30 = vadd.f32 %v5383_v58, %v11422_v60  ;;  %v6778_v60 = vshll.u32 %v10535_v10, 16 }
 0x3f1   : > { %v8201_v39 = vadd.f32 %v8200_v8, %v8199_v24  ;;  %v8210_v29 = vrot.slane %v8209_v41, 2 }
 0x3f2   : > { %5422 = vmatmul.bf16.gmra.mxu1 %v5211_v5  ;;  %v6780_v58 = vrot.slane %v6778_v60, 1 }
 0x3f3   : > { %v8202_v27 = vrot.slane %v8201_v39, 1  ;;  %v8211_v3 = vadd.f32 %v8210_v29, %v8209_v41  ;;  %6104 = vmatmul.bf16.gmra.mxu2 %v10493_v37  ;;  %v7764_v31 = vpop.f32.mrf.mxu0  ;;  %v11764_v29 = vld [vmem:[#allocation2 + $0xc8] sm:$0xff] }
 0x3f4   : > { %v6781_v41 = vsel %vm1842_vm3, %v6776_v55, %v6780_v58 }
 0x3f5   : > { %v8203_v50 = vadd.f32 %v8202_v27, %v8201_v39  ;;  %v8212_v2 = vrot.slane %v8211_v3, 1  ;;  %7050 = vmatmul.bf16.gmra.mxu3 %v6773_v47  ;;  %v10536_v47 = vld [vmem:[#allocation2 + $0xd8] sm:$0xff] }
 0x3f6   : > { %v6065_v63 = vpop.f32.mrf.mxu2 }
 0x3f7   : > { %v5385_v36 = vpop.f32.mrf.mxu1  ;;  %v11752_v18 = vadd.f32 %v8203_v50, %v11728_v12  ;;  %v8213_v44 = vadd.f32 %v8212_v2, %v8211_v3  ;;  %v6253_v21 = vadd.f32 %v6065_v63, %v5571_v30  ;;  %v5214_v30 = vrot.slane %v11764_v29, 1 }
 0x3f8   : > { %v7011_v6 = vpop.f32.mrf.mxu3  ;;  %v5572_v4 = vadd.f32 %v5385_v36, %v11428_v61  ;;  %v11762_v61 = vld [vmem:[#allocation2 + $0xd8] sm:$0xff]  ;;  %v6782_v63 = vshrl.u32 %v10535_v10, 16  ;;  %v6786_v36 = vshll.u32 %v10536_v47, 16 }
 0x3f9   : > { %v11756_v54 = vadd.f32 %v8213_v44, %v11732_v52  ;;  %v7199_v7 = vadd.f32 %v7011_v6, %v6253_v21  ;;  %v7593_v23 = vrot.slane %v11762_v61, 1  ;;  %v10457_v61 = vld [vmem:[#allocation2 + $0xd0] sm:$0xff] }
 0x3fb   : > { %v7767_v26 = vpop.f32.mrf.mxu0  ;;  %v7950_v45 = vadd.f32 %v7762_v38, %v7199_v7  ;;  %v7594_v6 = vsel %vm2789_vm4, %v7591_v34, %v7593_v23 }
 0x3fd   : > { %v8217_v8 = vpack.c.bf16 %v7950_v45, %v7950_v45 }
 0x3fe   : > { %v6067_v12 = vpop.f32.mrf.mxu2  ;;  %7806 = vmatmul.bf16.gmra.mxu0 %v7592_v49  ;;  %v5215_v49 = vsel %vm2789_vm4, %v5212_v22, %v5214_v30 }
 0x3ff   : > { %v5388_v24 = vpop.f32.mrf.mxu1  ;;  %v6254_v5 = vadd.f32 %v6067_v12, %v5572_v4  ;;  %v8222_v37 = vunpack.c.l.bf16 %v8217_v8  ;;  %v6788_v4 = vrot.slane %v6786_v36, 1 }
 0x400   : > { %v7013_v52 = vpop.f32.mrf.mxu3 }
 0x401   : > { %v7200_v53 = vadd.f32 %v7013_v52, %v6254_v5  ;;  %v8232_v50 = vmul.f32 %v8222_v37, %v8222_v37 }
 0x402   : > { %5427 = vmatmul.bf16.gmra.mxu1 %v5213_v46  ;;  %v10495_v46 = vld [vmem:[#allocation2 + $0xd0] sm:$0xff] }
 0x403   : > { %v7951_v14 = vadd.f32 %v7764_v31, %v7200_v53  ;;  %6109 = vmatmul.bf16.gmra.mxu2 %v10494_v15  ;;  %v7769_v38 = vpop.f32.mrf.mxu0  ;;  %v11772_v53 = vld [vmem:[#allocation2 + $0xe0] sm:$0xff] }
 0x404   : > { %v7595_v29 = vrot.slane %v11772_v53, 1 }
 0x405   : > { %v8218_v32 = vpack.c.bf16 %v7951_v14, %v7951_v14  ;;  %v10690_v48 = vpack.c.bf16 %v7951_v14, %v7950_v45  ;;  %7055 = vmatmul.bf16.gmra.mxu3 %v6781_v41  ;;  %v6784_v45 = vor.u32 %v6782_v63, %v6780_v58 }
 0x406   : > { %v6070_v59 = vpop.f32.mrf.mxu2  ;;  %v7596_v63 = vsel %vm2789_vm4, %v7593_v23, %v7595_v29 }
 0x407   : > { %v5390_v39 = vpop.f32.mrf.mxu1  ;;  %10757 = vst [vmem:[%s11619_s18 + $0x30] sm:$0xff] %v10690_v48   ;;  %v8223_v27 = vunpack.c.l.bf16 %v8218_v32  ;;  %v6789_v15 = vsel %vm1842_vm3, %v6784_v45, %v6788_v4 }
 0x408   : > { %v7016_v3 = vpop.f32.mrf.mxu3 }
 0x409   : > { %v8224_v31 = vadd.f32 %v8223_v27, %v8222_v37  ;;  %v8233_v2 = vmul.f32 %v8223_v27, %v8223_v27  ;;  %v10537_v37 = vld [vmem:[#allocation2 + $0xe0] sm:$0xff] }
 0x40b   : > { %v8225_v20 = vrot.slane %v8224_v31, 4  ;;  %v8234_v44 = vadd.f32 %v8233_v2, %v8232_v50  ;;  %v7772_v21 = vpop.f32.mrf.mxu0  ;;  %v5216_v50 = vrot.slane %v10457_v61, 1 }
 0x40d   : > { %v8226_v7 = vadd.f32 %v8225_v20, %v8224_v31  ;;  %v8235_v25 = vrot.slane %v8234_v44, 4  ;;  %v6790_v31 = vshrl.u32 %v10536_v47, 16 }
 0x40e   : > { %v6072_v60 = vpop.f32.mrf.mxu2  ;;  %7811 = vmatmul.bf16.gmra.mxu0 %v7594_v6  ;;  %v5217_v6 = vsel %vm2789_vm4, %v5214_v30, %v5216_v50 }
 0x40f   : > { %v5393_v26 = vpop.f32.mrf.mxu1  ;;  %v8227_v12 = vrot.slane %v8226_v7, 2  ;;  %v8236_v24 = vadd.f32 %v8235_v25, %v8234_v44 }
 0x410   : > { %v7018_v55 = vpop.f32.mrf.mxu3  ;;  %v5575_v58 = vadd.f32 %v5393_v26, %v11446_v33  ;;  %v6794_v33 = vshll.u32 %v10537_v37, 16  ;;  %v10496_v26 = vld [vmem:[#allocation2 + $0xd8] sm:$0xff] }
 0x411   : > { %v8228_v10 = vadd.f32 %v8227_v12, %v8226_v7  ;;  %v8237_v5 = vrot.slane %v8236_v24, 2  ;;  %v6792_v7 = vor.u32 %v6790_v31, %v6788_v4  ;;  %v11788_v55 = vld [vmem:[#allocation2 + $0xd8] sm:$0xff] }
 0x412   : > { %5432 = vmatmul.bf16.gmra.mxu1 %v5215_v49  ;;  %v6796_v25 = vrot.slane %v6794_v33, 1 }
 0x413   : > { %v8229_v52 = vrot.slane %v8228_v10, 1  ;;  %v8238_v34 = vadd.f32 %v8237_v5, %v8236_v24  ;;  %6114 = vmatmul.bf16.gmra.mxu2 %v10495_v46  ;;  %v7774_v8 = vpop.f32.mrf.mxu0 }
 0x414   : > { %v6797_v45 = vsel %vm1842_vm3, %v6792_v7, %v6796_v25 }
 0x415   : > { %v8230_v41 = vadd.f32 %v8229_v52, %v8228_v10  ;;  %v8239_v22 = vrot.slane %v8238_v34, 1  ;;  %7060 = vmatmul.bf16.gmra.mxu3 %v6789_v15  ;;  %v10538_v10 = vld [vmem:[#allocation2 + $0xe8] sm:$0xff] }
 0x416   : > { %v6075_v14 = vpop.f32.mrf.mxu2 }
 0x417   : > { %v5395_v38 = vpop.f32.mrf.mxu1  ;;  %v11776_v32 = vadd.f32 %v8230_v41, %v11752_v18  ;;  %v8240_v48 = vadd.f32 %v8239_v22, %v8238_v34  ;;  %v6257_v59 = vadd.f32 %v6075_v14, %v5575_v58  ;;  %v5218_v41 = vrot.slane %v11788_v55, 1 }
 0x418   : > { %v7021_v39 = vpop.f32.mrf.mxu3  ;;  %v5576_v20 = vadd.f32 %v5395_v38, %v11452_v57  ;;  %v11786_v57 = vld [vmem:[#allocation2 + $0xe8] sm:$0xff]  ;;  %v6798_v22 = vshrl.u32 %v10537_v37, 16  ;;  %v6802_v58 = vshll.u32 %v10538_v10, 16 }
 0x419   : > { %v11780_v27 = vadd.f32 %v8240_v48, %v11756_v54  ;;  %v7203_v3 = vadd.f32 %v7021_v39, %v6257_v59  ;;  %v7597_v52 = vrot.slane %v11786_v57, 1  ;;  %v5219_v33 = vsel %vm2789_vm4, %v5216_v50, %v5218_v41 }
 0x41b   : > { %v7777_v2 = vpop.f32.mrf.mxu0  ;;  %v7954_v36 = vadd.f32 %v7772_v21, %v7203_v3  ;;  %v7598_v48 = vsel %vm2789_vm4, %v7595_v29, %v7597_v52 }
 0x41c   : > { %v6800_v2 = vor.u32 %v6798_v22, %v6796_v25 }
 0x41d   : > { %v8244_v49 = vpack.c.bf16 %v7954_v36, %v7954_v36 }
 0x41e   : > { %v6077_v18 = vpop.f32.mrf.mxu2  ;;  %7816 = vmatmul.bf16.gmra.mxu0 %v7596_v63  ;;  %v6804_v63 = vrot.slane %v6802_v58, 1 }
 0x41f   : > { %v5398_v44 = vpop.f32.mrf.mxu1  ;;  %v6258_v60 = vadd.f32 %v6077_v18, %v5576_v20  ;;  %v8249_v12 = vunpack.c.l.bf16 %v8244_v49  ;;  %v10497_v18 = vld [vmem:[#allocation2 + $0xe0] sm:$0xff] }
 0x420   : > { %v7023_v54 = vpop.f32.mrf.mxu3  ;;  %v6805_v7 = vsel %vm1842_vm3, %v6800_v2, %v6804_v63 }
 0x421   : > { %v7204_v47 = vadd.f32 %v7023_v54, %v6258_v60  ;;  %v8259_v34 = vmul.f32 %v8249_v12, %v8249_v12  ;;  %v11796_v54 = vld [vmem:[#allocation2 + $0xf0] sm:$0xff] }
 0x422   : > { %5437 = vmatmul.bf16.gmra.mxu1 %v5217_v6 }
 0x423   : > { %v7955_v23 = vadd.f32 %v7774_v8, %v7204_v47  ;;  %6119 = vmatmul.bf16.gmra.mxu2 %v10496_v26  ;;  %v7779_v21 = vpop.f32.mrf.mxu0 }
 0x424   : > { %v10539_v21 = vld [vmem:[#allocation2 + $0xf0] sm:$0xff] }
 0x425   : > { %v8245_v24 = vpack.c.bf16 %v7955_v23, %v7955_v23  ;;  %v10695_v30 = vpack.c.bf16 %v7955_v23, %v7954_v36  ;;  %7065 = vmatmul.bf16.gmra.mxu3 %v6797_v45  ;;  %v10459_v23 = vld [vmem:[#allocation2 + $0xe0] sm:$0xff] }
 0x426   : > { %v6080_v4 = vpop.f32.mrf.mxu2 }
 0x427   : > { %v5400_v46 = vpop.f32.mrf.mxu1  ;;  %10758 = vst [vmem:[%s11619_s18 + $0x38] sm:$0xff] %v10695_v30   ;;  %v8250_v5 = vunpack.c.l.bf16 %v8245_v24  ;;  %v7599_v4 = vrot.slane %v11796_v54, 1  ;;  %v6814_v54 = vshrl.u32 %v10539_v21, 16 }
 0x428   : > { %v7026_v15 = vpop.f32.mrf.mxu3 }
 0x429   : > { %v8251_v8 = vadd.f32 %v8250_v5, %v8249_v12  ;;  %v8260_v53 = vmul.f32 %v8250_v5, %v8250_v5  ;;  %v5220_v5 = vrot.slane %v10459_v23, 1  ;;  %v6806_v15 = vshrl.u32 %v10538_v10, 16 }
 0x42b   : > { %v8252_v14 = vrot.slane %v8251_v8, 4  ;;  %v8261_v38 = vadd.f32 %v8260_v53, %v8259_v34  ;;  %v7782_v61 = vpop.f32.mrf.mxu0 }
 0x42d   : > { %v8253_v59 = vadd.f32 %v8252_v14, %v8251_v8  ;;  %v8262_v39 = vrot.slane %v8261_v38, 4  ;;  %v7600_v8 = vsel %vm2789_vm4, %v7597_v52, %v7599_v4  ;;  %v5221_v14 = vsel %vm2789_vm4, %v5218_v41, %v5220_v5 }
 0x42e   : > { %v6082_v3 = vpop.f32.mrf.mxu2  ;;  %7821 = vmatmul.bf16.gmra.mxu0 %v7598_v48 }
 0x42f   : > { %v5403_v31 = vpop.f32.mrf.mxu1  ;;  %v8254_v36 = vrot.slane %v8253_v59, 2  ;;  %v8263_v20 = vadd.f32 %v8262_v39, %v8261_v38  ;;  %v6808_v38 = vor.u32 %v6806_v15, %v6804_v63  ;;  %v10498_v39 = vld [vmem:[#allocation2 + $0xe8] sm:$0xff] }
 0x430   : > { %v7028_v44 = vpop.f32.mrf.mxu3  ;;  %v5579_v25 = vadd.f32 %v5403_v31, %v11466_v56  ;;  %v6810_v56 = vshll.u32 %v10539_v21, 16 }
 0x431   : > { %v8255_v37 = vadd.f32 %v8254_v36, %v8253_v59  ;;  %v8264_v6 = vrot.slane %v8263_v20, 2 }
 0x432   : > { %5442 = vmatmul.bf16.gmra.mxu1 %v5219_v33  ;;  %v6812_v48 = vrot.slane %v6810_v56, 1 }
 0x433   : > { %v8256_v60 = vrot.slane %v8255_v37, 1  ;;  %v8265_v29 = vadd.f32 %v8264_v6, %v8263_v20  ;;  %6124 = vmatmul.bf16.gmra.mxu2 %v10497_v18  ;;  %v7784_v26 = vpop.f32.mrf.mxu0  ;;  %v11812_v20 = vld [vmem:[#allocation2 + $0xe8] sm:$0xff]  ;;  %v10540_v18 = vld [vmem:[#allocation2 + $0xf8] sm:$0xff] }
 0x434   : > { %v6813_v31 = vsel %vm1842_vm3, %v6808_v38, %v6812_v48  ;;  %v6816_v15 = vor.u32 %v6814_v54, %v6812_v48 }
 0x435   : > { %v8257_v49 = vadd.f32 %v8256_v60, %v8255_v37  ;;  %v8266_v50 = vrot.slane %v8265_v29, 1  ;;  %7070 = vmatmul.bf16.gmra.mxu3 %v6805_v7 }
 0x436   : > { %v6085_v47 = vpop.f32.mrf.mxu2 }
 0x437   : > { %v5405_v45 = vpop.f32.mrf.mxu1  ;;  %v11800_v57 = vadd.f32 %v8257_v49, %v11776_v32  ;;  %v8267_v12 = vadd.f32 %v8266_v50, %v8265_v29  ;;  %v6261_v24 = vadd.f32 %v6085_v47, %v5579_v25  ;;  %v6818_v49 = vshll.u32 %v10540_v18, 16 }
 0x438   : > { %v7031_v30 = vpop.f32.mrf.mxu3  ;;  %v5580_v22 = vadd.f32 %v5405_v45, %v11481_v13  ;;  %v11810_v13 = vld [vmem:[#allocation2 + $0xf8] sm:$0xff] }
 0x439   : > { %v11804_v46 = vadd.f32 %v8267_v12, %v11780_v27  ;;  %v7207_v55 = vadd.f32 %v7031_v30, %v6261_v24  ;;  %v7601_v6 = vrot.slane %v11810_v13, 1  ;;  %v6820_v56 = vrot.slane %v6818_v49, 1 }
 0x43b   : > { %v7787_v34 = vpop.f32.mrf.mxu0  ;;  %v7958_v53 = vadd.f32 %v7782_v61, %v7207_v55  ;;  %v7602_v45 = vsel %vm2789_vm4, %v7599_v4, %v7601_v6 }
 0x43d   : > { %v8271_v3 = vpack.c.bf16 %v7958_v53, %v7958_v53 }
 0x43e   : > { %v6087_v32 = vpop.f32.mrf.mxu2  ;;  %7826 = vmatmul.bf16.gmra.mxu0 %v7600_v8 }
 0x43f   : > { %v5408_v58 = vpop.f32.mrf.mxu1  ;;  %v6262_v59 = vadd.f32 %v6087_v32, %v5580_v22  ;;  %v8276_v33 = vunpack.c.l.bf16 %v8271_v3 }
 0x440   : > { %v7033_v27 = vpop.f32.mrf.mxu3  ;;  %v6821_v58 = vsel %vm1842_vm3, %v6816_v15, %v6820_v56 }
 0x441   : > { %v7208_v10 = vadd.f32 %v7033_v27, %v6262_v59  ;;  %v8286_v7 = vmul.f32 %v8276_v33, %v8276_v33  ;;  %v11820_v59 = vld [vmem:[#allocation2 + $0x100] sm:$0xff] }
 0x442   : > { %5447 = vmatmul.bf16.gmra.mxu1 %v5221_v14 }
 0x443   : > { %v7959_v52 = vadd.f32 %v7784_v26, %v7208_v10  ;;  %6129 = vmatmul.bf16.gmra.mxu2 %v10498_v39  ;;  %v7789_v61 = vpop.f32.mrf.mxu0  ;;  %v5222_v26 = vrot.slane %v11812_v20, 1  ;;  %v10461_v10 = vld [vmem:[#allocation2 + $0xf0] sm:$0xff]  ;;  %v6822_v20 = vshrl.u32 %v10540_v18, 16 }
 0x445   : > { %v8272_v2 = vpack.c.bf16 %v7959_v52, %v7959_v52  ;;  %v10700_v41 = vpack.c.bf16 %v7959_v52, %v7958_v53  ;;  %7075 = vmatmul.bf16.gmra.mxu3 %v6813_v31  ;;  %v5223_v55 = vsel %vm2789_vm4, %v5220_v5, %v5222_v26  ;;  %v10499_v53 = vld [vmem:[#allocation2 + $0xf0] sm:$0xff]  ;;  %v10541_v31 = vld [vmem:[#allocation2 + $0x100] sm:$0xff]  ;;  %v6824_v49 = vor.u32 %v6822_v20, %v6820_v56  ;;  %v11836_v56 = vld [vmem:[#allocation2 + $0xf8] sm:$0xff] }
 0x446   : > { %v6090_v63 = vpop.f32.mrf.mxu2 }
 0x447   : > { %v5410_v36 = vpop.f32.mrf.mxu1  ;;  %10759 = vst [vmem:[%s11619_s18 + $0x40] sm:$0xff] %v10700_v41   ;;  %v8277_v44 = vunpack.c.l.bf16 %v8272_v2  ;;  %v7603_v2 = vrot.slane %v11820_v59, 1 }
 0x448   : > { %v7036_v37 = vpop.f32.mrf.mxu3  ;;  %v5224_v36 = vrot.slane %v10461_v10, 1 }
 0x449   : > { %v8278_v60 = vadd.f32 %v8277_v44, %v8276_v33  ;;  %v8287_v29 = vmul.f32 %v8277_v44, %v8277_v44  ;;  %v7604_v37 = vsel %vm2789_vm4, %v7601_v6, %v7603_v2 }
 0x44a   : > { %v5225_v54 = vsel %vm2789_vm4, %v5222_v26, %v5224_v36 }
 0x44b   : > { %v8279_v50 = vrot.slane %v8278_v60, 4  ;;  %v8288_v25 = vadd.f32 %v8287_v29, %v8286_v7  ;;  %v7792_v47 = vpop.f32.mrf.mxu0 }
 0x44d   : > { %v8280_v23 = vadd.f32 %v8279_v50, %v8278_v60  ;;  %v8289_v12 = vrot.slane %v8288_v25, 4 }
 0x44e   : > { %v6092_v24 = vpop.f32.mrf.mxu2  ;;  %7831 = vmatmul.bf16.gmra.mxu0 %v7602_v45  ;;  %v10500_v45 = vld [vmem:[#allocation2 + $0xf8] sm:$0xff] }
 0x44f   : > { %v5413_v30 = vpop.f32.mrf.mxu1  ;;  %v8281_v34 = vrot.slane %v8280_v23, 2  ;;  %v8290_v8 = vadd.f32 %v8289_v12, %v8288_v25 }
 0x450   : > { %v7038_v22 = vpop.f32.mrf.mxu3  ;;  %v5583_v48 = vadd.f32 %v5413_v30, %v11521_v62  ;;  %v6826_v62 = vshll.u32 %v10541_v31, 16 }
 0x451   : > { %v8282_v21 = vadd.f32 %v8281_v34, %v8280_v23  ;;  %v8291_v32 = vrot.slane %v8290_v8, 2  ;;  %v10542_v34 = vld [vmem:[#allocation2 + $0x108] sm:$0xff] }
 0x452   : > { %5452 = vmatmul.bf16.gmra.mxu1 %v5223_v55  ;;  %v6828_v50 = vrot.slane %v6826_v62, 1 }
 0x453   : > { %v8283_v14 = vrot.slane %v8282_v21, 1  ;;  %v8292_v4 = vadd.f32 %v8291_v32, %v8290_v8  ;;  %6134 = vmatmul.bf16.gmra.mxu2 %v10499_v53  ;;  %v7794_v38 = vpop.f32.mrf.mxu0 }
 0x454   : > { %v6829_v12 = vsel %vm1842_vm3, %v6824_v49, %v6828_v50 }
 0x455   : > { %v8284_v39 = vadd.f32 %v8283_v14, %v8282_v21  ;;  %v8293_v5 = vrot.slane %v8292_v4, 1  ;;  %7080 = vmatmul.bf16.gmra.mxu3 %v6821_v58  ;;  %v5226_v14 = vrot.slane %v11836_v56, 1 }
 0x456   : > { %v6095_v27 = vpop.f32.mrf.mxu2 }
 0x457   : > { %v5415_v3 = vpop.f32.mrf.mxu1  ;;  %v11824_v52 = vadd.f32 %v8284_v39, %v11800_v57  ;;  %v8294_v61 = vadd.f32 %v8293_v5, %v8292_v4  ;;  %v6265_v13 = vadd.f32 %v6095_v27, %v5583_v48  ;;  %v6830_v4 = vshrl.u32 %v10541_v31, 16 }
 0x458   : > { %v7041_v33 = vpop.f32.mrf.mxu3  ;;  %v5584_v60 = vadd.f32 %v5415_v3, %v11528_v28  ;;  %v11834_v28 = vld [vmem:[#allocation2 + $0x108] sm:$0xff] }
 0x459   : > { %v11828_v41 = vadd.f32 %v8294_v61, %v11804_v46  ;;  %v7211_v63 = vadd.f32 %v7041_v33, %v6265_v13  ;;  %v7605_v22 = vrot.slane %v11834_v28, 1  ;;  %v5227_v13 = vsel %vm2789_vm4, %v5224_v36, %v5226_v14 }
 0x45a   : > { %v6832_v33 = vor.u32 %v6830_v4, %v6828_v50 }
 0x45b   : > { %v7797_v44 = vpop.f32.mrf.mxu0  ;;  %v7962_v7 = vadd.f32 %v7792_v47, %v7211_v63  ;;  %v7606_v48 = vsel %vm2789_vm4, %v7603_v2, %v7605_v22 }
 0x45c   : > { %v10501_v44 = vld [vmem:[#allocation2 + $0x100] sm:$0xff] }
 0x45d   : > { %v8298_v23 = vpack.c.bf16 %v7962_v7, %v7962_v7 }
 0x45e   : > { %v6097_v57 = vpop.f32.mrf.mxu2  ;;  %7836 = vmatmul.bf16.gmra.mxu0 %v7604_v37 }
 0x45f   : > { %v5418_v29 = vpop.f32.mrf.mxu1  ;;  %v6266_v25 = vadd.f32 %v6097_v57, %v5584_v60  ;;  %v8303_v24 = vunpack.c.l.bf16 %v8298_v23  ;;  %v10543_v23 = vld [vmem:[#allocation2 + $0x110] sm:$0xff] }
 0x460   : > { %v7043_v46 = vpop.f32.mrf.mxu3 }
 0x461   : > { %v7212_v18 = vadd.f32 %v7043_v46, %v6266_v25  ;;  %v8313_v21 = vmul.f32 %v8303_v24, %v8303_v24  ;;  %v10463_v46 = vld [vmem:[#allocation2 + $0x100] sm:$0xff] }
 0x462   : > { %5457 = vmatmul.bf16.gmra.mxu1 %v5225_v54  ;;  %v11844_v54 = vld [vmem:[#allocation2 + $0x110] sm:$0xff] }
 0x463   : > { %v7963_v6 = vadd.f32 %v7794_v38, %v7212_v18  ;;  %6139 = vmatmul.bf16.gmra.mxu2 %v10500_v45  ;;  %v7799_v47 = vpop.f32.mrf.mxu0  ;;  %v6834_v38 = vshll.u32 %v10542_v34, 16  ;;  %v7607_v28 = vrot.slane %v11844_v54, 1 }
 0x465   : > { %v8299_v30 = vpack.c.bf16 %v7963_v6, %v7963_v6  ;;  %v10705_v26 = vpack.c.bf16 %v7963_v6, %v7962_v7  ;;  %7085 = vmatmul.bf16.gmra.mxu3 %v6829_v12  ;;  %v6836_v63 = vrot.slane %v6834_v38, 1  ;;  %v7608_v56 = vsel %vm2789_vm4, %v7605_v22, %v7607_v28 }
 0x466   : > { %v6100_v55 = vpop.f32.mrf.mxu2 }
 0x467   : > { %v5420_v15 = vpop.f32.mrf.mxu1  ;;  %10760 = vst [vmem:[%s11619_s18 + $0x48] sm:$0xff] %v10705_v26   ;;  %v8304_v8 = vunpack.c.l.bf16 %v8299_v30  ;;  %v6837_v60 = vsel %vm1842_vm3, %v6832_v33, %v6836_v63  ;;  %v5228_v26 = vrot.slane %v10463_v46, 1  ;;  %v6838_v55 = vshrl.u32 %v10542_v34, 16  ;;  %v11862_v33 = vld [vmem:[#allocation2 + $0x118] sm:$0xff] }
 0x468   : > { %v7046_v53 = vpop.f32.mrf.mxu3 }
 0x469   : > { %v8305_v32 = vadd.f32 %v8304_v8, %v8303_v24  ;;  %v8314_v58 = vmul.f32 %v8304_v8, %v8304_v8 }
 0x46b   : > { %v8306_v59 = vrot.slane %v8305_v32, 4  ;;  %v8315_v39 = vadd.f32 %v8314_v58, %v8313_v21  ;;  %v7802_v5 = vpop.f32.mrf.mxu0  ;;  %v6840_v58 = vor.u32 %v6838_v55, %v6836_v63 }
 0x46d   : > { %v8307_v27 = vadd.f32 %v8306_v59, %v8305_v32  ;;  %v8316_v3 = vrot.slane %v8315_v39, 4  ;;  %v5229_v32 = vsel %vm2789_vm4, %v5226_v14, %v5228_v26  ;;  %v10502_v59 = vld [vmem:[#allocation2 + $0x108] sm:$0xff] }
 0x46e   : > { %v6102_v10 = vpop.f32.mrf.mxu2  ;;  %7841 = vmatmul.bf16.gmra.mxu0 %v7606_v48 }
 0x46f   : > { %v5423_v61 = vpop.f32.mrf.mxu1  ;;  %v8308_v20 = vrot.slane %v8307_v27, 2  ;;  %v8317_v62 = vadd.f32 %v8316_v3, %v8315_v39 }
 0x470   : > { %v7048_v37 = vpop.f32.mrf.mxu3  ;;  %v5587_v50 = vadd.f32 %v5423_v61, %v11538_v11  ;;  %v6842_v11 = vshll.u32 %v10543_v23, 16 }
 0x471   : > { %v8309_v31 = vadd.f32 %v8308_v20, %v8307_v27  ;;  %v8318_v7 = vrot.slane %v8317_v62, 2 }
 0x472   : > { %5462 = vmatmul.bf16.gmra.mxu1 %v5227_v13  ;;  %v6844_v4 = vrot.slane %v6842_v11, 1  ;;  %v11860_v13 = vld [vmem:[#allocation2 + $0x108] sm:$0xff]  ;;  %v10503_v11 = vld [vmem:[#allocation2 + $0x110] sm:$0xff] }
 0x473   : > { %v8310_v57 = vrot.slane %v8309_v31, 1  ;;  %v8319_v2 = vadd.f32 %v8318_v7, %v8317_v62  ;;  %6144 = vmatmul.bf16.gmra.mxu2 %v10501_v44  ;;  %v7804_v29 = vpop.f32.mrf.mxu0  ;;  %v5230_v7 = vrot.slane %v11860_v13, 1 }
 0x474   : > { %v6845_v48 = vsel %vm1842_vm3, %v6840_v58, %v6844_v4 }
 0x475   : > { %v8311_v49 = vadd.f32 %v8310_v57, %v8309_v31  ;;  %v8320_v36 = vrot.slane %v8319_v2, 1  ;;  %7090 = vmatmul.bf16.gmra.mxu3 %v6837_v60  ;;  %v6846_v60 = vshrl.u32 %v10543_v23, 16  ;;  %v6850_v57 = vshll.u32 %v11862_v33, 16  ;;  %v6421_v23 = vld [vmem:[#allocation2 + $0x120] sm:$0x1] }
 0x476   : > { %v6105_v25 = vpop.f32.mrf.mxu2 }
 0x477   : > { %v5425_v45 = vpop.f32.mrf.mxu1  ;;  %v11848_v18 = vadd.f32 %v8311_v49, %v11824_v52  ;;  %v8321_v12 = vadd.f32 %v8320_v36, %v8319_v2  ;;  %v6269_v6 = vadd.f32 %v6105_v25, %v5587_v50  ;;  %v7367_v25 = vld [vmem:[#allocation2 + $0x120] sm:$0x1] }
 0x478   : > { %v7051_v47 = vpop.f32.mrf.mxu3  ;;  %v5588_v53 = vadd.f32 %v5425_v45, %v11544_v1  ;;  %v11858_v1 = vld [vmem:[#allocation2 + $0x118] sm:$0xff] }
 0x479   : > { %v11852_v24 = vadd.f32 %v8321_v12, %v11828_v41  ;;  %v7215_v30 = vadd.f32 %v7051_v47, %v6269_v6  ;;  %v7609_v62 = vrot.slane %v11858_v1, 1  ;;  %v5231_v12 = vsel %vm2789_vm4, %v5228_v26, %v5230_v7 }
 0x47a   : > { %v6848_v6 = vor.u32 %v6846_v60, %v6844_v4  ;;  %v6852_v47 = vrot.slane %v6850_v57, 1 }
 0x47b   : > { %v7807_v15 = vpop.f32.mrf.mxu0  ;;  %v7966_v8 = vadd.f32 %v7802_v5, %v7215_v30  ;;  %v7610_v49 = vsel %vm2789_vm4, %v7607_v28, %v7609_v62 }
 0x47c   : > { %v4988_v15 = vld [vmem:[#allocation2 + $0x110] sm:$0x1]  ;;  %v6853_v28 = vsel %vm1842_vm3, %v6848_v6, %v6852_v47 }
 0x47d   : > { %v8325_v39 = vpack.c.bf16 %v7966_v8, %v7966_v8 }
 0x47e   : > { %v6107_v52 = vpop.f32.mrf.mxu2  ;;  %7846 = vmatmul.bf16.gmra.mxu0 %v7608_v56 }
 0x47f   : > { %v5428_v21 = vpop.f32.mrf.mxu1  ;;  %v6270_v38 = vadd.f32 %v6107_v52, %v5588_v53  ;;  %v8330_v27 = vunpack.c.l.bf16 %v8325_v39 }
 0x480   : > { %v7053_v41 = vpop.f32.mrf.mxu3  ;;  %v6568_v21 = vunpack.c.l.b16 %v6421_v23 }
 0x481   : > { %v7216_v34 = vadd.f32 %v7053_v41, %v6270_v38  ;;  %v8340_v44 = vmul.f32 %v8330_v27, %v8330_v27 }
 0x482   : > { %5467 = vmatmul.bf16.gmra.mxu1 %v5229_v32  ;;  %v5135_v32 = vunpack.c.l.b16 %v4988_v15 }
 0x483   : > { %v7967_v22 = vadd.f32 %v7804_v29, %v7216_v34  ;;  %6149 = vmatmul.bf16.gmra.mxu2 %v10502_v59  ;;  %v7809_v5 = vpop.f32.mrf.mxu0 }
 0x484   : > { %v5168_v5 = vpack.c.b16 %v5135_v32, %v5135_v32 }
 0x485   : > { %v8326_v3 = vpack.c.bf16 %v7967_v22, %v7967_v22  ;;  %v10710_v14 = vpack.c.bf16 %v7967_v22, %v7966_v8  ;;  %7095 = vmatmul.bf16.gmra.mxu3 %v6845_v48  ;;  %v7514_v8 = vunpack.c.l.b16 %v7367_v25  ;;  %v6601_v22 = vpack.c.b16 %v6568_v21, %v6568_v21 }
 0x486   : > { %v6110_v10 = vpop.f32.mrf.mxu2 }
 0x487   : > { %v5430_v61 = vpop.f32.mrf.mxu1  ;;  %10761 = vst [vmem:[%s11619_s18 + $0x50] sm:$0xff] %v10710_v14   ;;  %v8331_v63 = vunpack.c.l.bf16 %v8326_v3  ;;  %v7547_v4 = vpack.c.b16 %v7514_v8, %v7514_v8 }
 0x488   : > { %v7056_v20 = vpop.f32.mrf.mxu3 }
 0x489   : > { %v8332_v37 = vadd.f32 %v8331_v63, %v8330_v27  ;;  %v8341_v31 = vmul.f32 %v8331_v63, %v8331_v63  ;;  %v7611_v10 = vrot.slane %v7547_v4, 1  ;;  %v6854_v63 = vshrl.u32 %v11862_v33, 16 }
 0x48a   : > { %v6858_v20 = vshll.u32 %v6601_v22, 16 }
 0x48b   : > { %v8333_v2 = vrot.slane %v8332_v37, 4  ;;  %v8342_v29 = vadd.f32 %v8341_v31, %v8340_v44  ;;  %v7812_v54 = vpop.f32.mrf.mxu0  ;;  %v5232_v44 = vrot.slane %v5168_v5, 1 }
 0x48d   : > { %v8334_v36 = vadd.f32 %v8333_v2, %v8332_v37  ;;  %v8343_v50 = vrot.slane %v8342_v29, 4 }
 0x48e   : > { %v6112_v45 = vpop.f32.mrf.mxu2  ;;  %7851 = vmatmul.bf16.gmra.mxu0 %v7610_v49  ;;  %v5233_v49 = vsel %vm2789_vm4, %v5230_v7, %v5232_v44 }
 0x48f   : > { %v5433_v46 = vpop.f32.mrf.mxu1  ;;  %v8335_v30 = vrot.slane %v8334_v36, 2  ;;  %v8344_v55 = vadd.f32 %v8343_v50, %v8342_v29  ;;  %v6860_v29 = vrot.slane %v6858_v20, 1  ;;  %v10504_v50 = vld [vmem:[#allocation2 + $0x118] sm:$0xff] }
 0x490   : > { %v7058_v56 = vpop.f32.mrf.mxu3  ;;  %v5591_v39 = vadd.f32 %v5433_v46, %v11550_v43  ;;  %v7612_v43 = vsel %vm2789_vm4, %v7609_v62, %v7611_v10 }
 0x491   : > { %v8336_v53 = vadd.f32 %v8335_v30, %v8334_v36  ;;  %v8345_v52 = vrot.slane %v8344_v55, 2 }
 0x492   : > { %5472 = vmatmul.bf16.gmra.mxu1 %v5231_v12 }
 0x493   : > { %v8337_v58 = vrot.slane %v8336_v53, 1  ;;  %v8346_v38 = vadd.f32 %v8345_v52, %v8344_v55  ;;  %6154 = vmatmul.bf16.gmra.mxu2 %v10503_v11  ;;  %v7814_v26 = vpop.f32.mrf.mxu0 }
 0x495   : > { %v8338_v59 = vadd.f32 %v8337_v58, %v8336_v53  ;;  %v8347_v41 = vrot.slane %v8346_v38, 1  ;;  %7100 = vmatmul.bf16.gmra.mxu3 %v6853_v28 }
 0x496   : > { %v6115_v34 = vpop.f32.mrf.mxu2 }
 0x497   : > { %v5435_v48 = vpop.f32.mrf.mxu1  ;;  %v8339_v1 = vadd.f32 %v8338_v59, %v11848_v18  ;;  %v8348_v27 = vadd.f32 %v8347_v41, %v8346_v38  ;;  %v6273_v3 = vadd.f32 %v6115_v34, %v5591_v39  ;;  %v6856_v18 = vor.u32 %v6854_v63, %v6852_v47 }
 0x498   : > { %v7061_v14 = vpop.f32.mrf.mxu3  ;;  %v5592_v60 = vadd.f32 %v5435_v48, %v11556_v0 }
 0x499   : > { %v8349_v61 = vadd.f32 %v8348_v27, %v11852_v24  ;;  %v7219_v13 = vadd.f32 %v7061_v14, %v6273_v3  ;;  %v6861_v45 = vsel %vm1842_vm3, %v6856_v18, %v6860_v29 }
 0x49b   : > { %v7817_v37 = vpop.f32.mrf.mxu0  ;;  %v7970_v31 = vadd.f32 %v7812_v54, %v7219_v13 }
 0x49d   : > { %v8352_v33 = vpack.c.bf16 %v7970_v31, %v7970_v31 }
 0x49e   : > { %v6117_v57 = vpop.f32.mrf.mxu2  ;;  %7856 = vmatmul.bf16.gmra.mxu0 %v7612_v43 }
 0x49f   : > { %v5438_v2 = vpop.f32.mrf.mxu1  ;;  %v6274_v36 = vadd.f32 %v6117_v57, %v5592_v60  ;;  %v8357_v0 = vunpack.c.l.bf16 %v8352_v33 }
 0x4a0   : > { %v7063_v24 = vpop.f32.mrf.mxu3 }
 0x4a1   : > { %v7220_v25 = vadd.f32 %v7063_v24, %v6274_v36  ;;  %v8367_v55 = vmul.f32 %v8357_v0, %v8357_v0 }
 0x4a2   : > { %5477 = vmatmul.bf16.gmra.mxu1 %v5233_v49 }
 0x4a3   : > { %v7971_v62 = vadd.f32 %v7814_v26, %v7220_v25  ;;  %6159 = vmatmul.bf16.gmra.mxu2 %v10504_v50  ;;  %v7819_v54 = vpop.f32.mrf.mxu0 }
 0x4a5   : > { %v8353_v46 = vpack.c.bf16 %v7971_v62, %v7971_v62  ;;  %v10715_v12 = vpack.c.bf16 %v7971_v62, %v7970_v31  ;;  %7105 = vmatmul.bf16.gmra.mxu3 %v6861_v45 }
 0x4a6   : > { %v6120_v6 = vpop.f32.mrf.mxu2 }
 0x4a7   : > { %v5440_v47 = vpop.f32.mrf.mxu1  ;;  %10762 = vst [vmem:[%s11619_s18 + $0x58] sm:$0xff] %v10715_v12   ;;  %v8358_v7 = vunpack.c.l.bf16 %v8353_v46 }
 0x4a8   : > { %v7066_v30 = vpop.f32.mrf.mxu3 }
 0x4a9   : > { %v8359_v11 = vadd.f32 %v8358_v7, %v8357_v0  ;;  %v8368_v23 = vmul.f32 %v8358_v7, %v8358_v7 }
 0x4ab   : > { %v8360_v15 = vrot.slane %v8359_v11, 4  ;;  %v8369_v56 = vadd.f32 %v8368_v23, %v8367_v55  ;;  %v7822_v8 = vpop.f32.mrf.mxu0 }
 0x4ad   : > { %v8361_v53 = vadd.f32 %v8360_v15, %v8359_v11  ;;  %v8370_v52 = vrot.slane %v8369_v56, 4 }
 0x4ae   : > { %v6122_v28 = vpop.f32.mrf.mxu2 }
 0x4af   : > { %v5443_v21 = vpop.f32.mrf.mxu1  ;;  %v8362_v32 = vrot.slane %v8361_v53, 2  ;;  %v8371_v58 = vadd.f32 %v8370_v52, %v8369_v56 }
 0x4b0   : > { %v7068_v38 = vpop.f32.mrf.mxu3  ;;  %v5595_v22 = vadd.f32 %v5443_v21, %v11562_v40 }
 0x4b1   : > { %v8363_v26 = vadd.f32 %v8362_v32, %v8361_v53  ;;  %v8372_v4 = vrot.slane %v8371_v58, 2 }
 0x4b3   : > { %v8364_v59 = vrot.slane %v8363_v26, 1  ;;  %v8373_v41 = vadd.f32 %v8372_v4, %v8371_v58  ;;  %v7824_v39 = vpop.f32.mrf.mxu0 }
 0x4b5   : > { %v8365_v34 = vadd.f32 %v8364_v59, %v8363_v26  ;;  %v8374_v48 = vrot.slane %v8373_v41, 1 }
 0x4b6   : > { %v6125_v5 = vpop.f32.mrf.mxu2 }
 0x4b7   : > { %v5445_v27 = vpop.f32.mrf.mxu1  ;;  %v8366_v3 = vadd.f32 %v8365_v34, %v8339_v1  ;;  %v8375_v14 = vadd.f32 %v8374_v48, %v8373_v41  ;;  %v6277_v10 = vadd.f32 %v6125_v5, %v5595_v22 }
 0x4b8   : > { %v7071_v13 = vpop.f32.mrf.mxu3  ;;  %v5596_v43 = vadd.f32 %v5445_v27, %v11568_v35 }
 0x4b9   : > { %v8376_v63 = vadd.f32 %v8375_v14, %v8349_v61  ;;  %v7223_v20 = vadd.f32 %v7071_v13, %v6277_v10 }
 0x4bb   : > { %v7827_v44 = vpop.f32.mrf.mxu0  ;;  %v7974_v37 = vadd.f32 %v7822_v8, %v7223_v20 }
 0x4bd   : > { %v8379_v18 = vpack.c.bf16 %v7974_v37, %v7974_v37 }
 0x4be   : > { %v6127_v31 = vpop.f32.mrf.mxu2 }
 0x4bf   : > { %v5448_v60 = vpop.f32.mrf.mxu1  ;;  %v6278_v57 = vadd.f32 %v6127_v31, %v5596_v43  ;;  %v8384_v36 = vunpack.c.l.bf16 %v8379_v18 }
 0x4c0   : > { %v7073_v2 = vpop.f32.mrf.mxu3 }
 0x4c1   : > { %v7224_v29 = vadd.f32 %v7073_v2, %v6278_v57  ;;  %v8394_v45 = vmul.f32 %v8384_v36, %v8384_v36 }
 0x4c3   : > { %v7975_v40 = vadd.f32 %v7824_v39, %v7224_v29  ;;  %v7829_v49 = vpop.f32.mrf.mxu0 }
 0x4c5   : > { %v8380_v1 = vpack.c.bf16 %v7975_v40, %v7975_v40  ;;  %v10720_v50 = vpack.c.bf16 %v7975_v40, %v7974_v37 }
 0x4c6   : > { %v6130_v24 = vpop.f32.mrf.mxu2 }
 0x4c7   : > { %v5450_v33 = vpop.f32.mrf.mxu1  ;;  %10763 = vst [vmem:[%s11619_s18 + $0x60] sm:$0xff] %v10720_v50   ;;  %v8385_v61 = vunpack.c.l.bf16 %v8380_v1 }
 0x4c8   : > { %v7076_v25 = vpop.f32.mrf.mxu3 }
 0x4c9   : > { %v8386_v62 = vadd.f32 %v8385_v61, %v8384_v36  ;;  %v8395_v54 = vmul.f32 %v8385_v61, %v8385_v61 }
 0x4cb   : > { %v8387_v35 = vrot.slane %v8386_v62, 4  ;;  %v8396_v0 = vadd.f32 %v8395_v54, %v8394_v45  ;;  %v7832_v46 = vpop.f32.mrf.mxu0 }
 0x4cd   : > { %v8388_v12 = vadd.f32 %v8387_v35, %v8386_v62  ;;  %v8397_v6 = vrot.slane %v8396_v0, 4 }
 0x4ce   : > { %v6132_v47 = vpop.f32.mrf.mxu2 }
 0x4cf   : > { %v5453_v7 = vpop.f32.mrf.mxu1  ;;  %v8389_v30 = vrot.slane %v8388_v12, 2  ;;  %v8398_v55 = vadd.f32 %v8397_v6, %v8396_v0 }
 0x4d0   : > { %v7078_v11 = vpop.f32.mrf.mxu3  ;;  %v5599_v21 = vadd.f32 %v5453_v7, %v11574_v9 }
 0x4d1   : > { %v8390_v23 = vadd.f32 %v8389_v30, %v8388_v12  ;;  %v8399_v15 = vrot.slane %v8398_v55, 2 }
 0x4d3   : > { %v8391_v56 = vrot.slane %v8390_v23, 1  ;;  %v8400_v8 = vadd.f32 %v8399_v15, %v8398_v55  ;;  %v7834_v53 = vpop.f32.mrf.mxu0 }
 0x4d5   : > { %v8392_v52 = vadd.f32 %v8391_v56, %v8390_v23  ;;  %v8401_v28 = vrot.slane %v8400_v8, 1 }
 0x4d6   : > { %v6135_v32 = vpop.f32.mrf.mxu2 }
 0x4d7   : > { %v5455_v58 = vpop.f32.mrf.mxu1  ;;  %v8393_v38 = vadd.f32 %v8392_v52, %v8366_v3  ;;  %v8402_v26 = vadd.f32 %v8401_v28, %v8400_v8  ;;  %v6281_v4 = vadd.f32 %v6135_v32, %v5599_v21 }
 0x4d8   : > { %v7081_v59 = vpop.f32.mrf.mxu3  ;;  %v5600_v22 = vadd.f32 %v5455_v58, %v11580_v42 }
 0x4d9   : > { %v8403_v41 = vadd.f32 %v8402_v26, %v8376_v63  ;;  %v7227_v39 = vadd.f32 %v7081_v59, %v6281_v4 }
 0x4db   : > { %v7837_v34 = vpop.f32.mrf.mxu0  ;;  %v7978_v48 = vadd.f32 %v7832_v46, %v7227_v39 }
 0x4dd   : > { %v8406_v13 = vpack.c.bf16 %v7978_v48, %v7978_v48 }
 0x4de   : > { %v6137_v5 = vpop.f32.mrf.mxu2 }
 0x4df   : > { %v5458_v27 = vpop.f32.mrf.mxu1  ;;  %v6282_v14 = vadd.f32 %v6137_v5, %v5600_v22  ;;  %v8411_v37 = vunpack.c.l.bf16 %v8406_v13 }
 0x4e0   : > { %v7083_v10 = vpop.f32.mrf.mxu3 }
 0x4e1   : > { %v7228_v20 = vadd.f32 %v7083_v10, %v6282_v14  ;;  %v8421_v2 = vmul.f32 %v8411_v37, %v8411_v37 }
 0x4e3   : > { %v7979_v9 = vadd.f32 %v7834_v53, %v7228_v20  ;;  %v7839_v44 = vpop.f32.mrf.mxu0 }
 0x4e5   : > { %v8407_v3 = vpack.c.bf16 %v7979_v9, %v7979_v9  ;;  %v10725_v43 = vpack.c.bf16 %v7979_v9, %v7978_v48 }
 0x4e6   : > { %v6140_v31 = vpop.f32.mrf.mxu2 }
 0x4e7   : > { %v5460_v60 = vpop.f32.mrf.mxu1  ;;  %10764 = vst [vmem:[%s11619_s18 + $0x68] sm:$0xff] %v10725_v43   ;;  %v8412_v63 = vunpack.c.l.bf16 %v8407_v3 }
 0x4e8   : > { %v7086_v57 = vpop.f32.mrf.mxu3 }
 0x4e9   : > { %v8413_v18 = vadd.f32 %v8412_v63, %v8411_v37  ;;  %v8422_v29 = vmul.f32 %v8412_v63, %v8412_v63 }
 0x4eb   : > { %v8414_v42 = vrot.slane %v8413_v18, 4  ;;  %v8423_v40 = vadd.f32 %v8422_v29, %v8421_v2  ;;  %v7842_v49 = vpop.f32.mrf.mxu0 }
 0x4ed   : > { %v8415_v36 = vadd.f32 %v8414_v42, %v8413_v18  ;;  %v8424_v1 = vrot.slane %v8423_v40, 4 }
 0x4ee   : > { %v6142_v50 = vpop.f32.mrf.mxu2 }
 0x4ef   : > { %v5463_v24 = vpop.f32.mrf.mxu1  ;;  %v8416_v33 = vrot.slane %v8415_v36, 2  ;;  %v8425_v61 = vadd.f32 %v8424_v1, %v8423_v40 }
 0x4f0   : > { %v7088_v25 = vpop.f32.mrf.mxu3  ;;  %v5603_v6 = vadd.f32 %v5463_v24, %v11586_v19 }
 0x4f1   : > { %v8417_v45 = vadd.f32 %v8416_v33, %v8415_v36  ;;  %v8426_v62 = vrot.slane %v8425_v61, 2 }
 0x4f3   : > { %v8418_v54 = vrot.slane %v8417_v45, 1  ;;  %v8427_v35 = vadd.f32 %v8426_v62, %v8425_v61  ;;  %v7844_v0 = vpop.f32.mrf.mxu0 }
 0x4f5   : > { %v8419_v46 = vadd.f32 %v8418_v54, %v8417_v45  ;;  %v8428_v12 = vrot.slane %v8427_v35, 1 }
 0x4f6   : > { %v6145_v47 = vpop.f32.mrf.mxu2 }
 0x4f7   : > { %v5465_v7 = vpop.f32.mrf.mxu1  ;;  %v8420_v30 = vadd.f32 %v8419_v46, %v8393_v38  ;;  %v8429_v55 = vadd.f32 %v8428_v12, %v8427_v35  ;;  %v6285_v11 = vadd.f32 %v6145_v47, %v5603_v6 }
 0x4f8   : > { %v7091_v23 = vpop.f32.mrf.mxu3  ;;  %v5604_v52 = vadd.f32 %v5465_v7, %v11592_v17 }
 0x4f9   : > { %v8430_v15 = vadd.f32 %v8429_v55, %v8403_v41  ;;  %v7231_v56 = vadd.f32 %v7091_v23, %v6285_v11 }
 0x4fb   : > { %v7847_v8 = vpop.f32.mrf.mxu0  ;;  %v7982_v53 = vadd.f32 %v7842_v49, %v7231_v56 }
 0x4fd   : > { %v8433_v26 = vpack.c.bf16 %v7982_v53, %v7982_v53 }
 0x4fe   : > { %v6147_v28 = vpop.f32.mrf.mxu2 }
 0x4ff   : > { %v5468_v21 = vpop.f32.mrf.mxu1  ;;  %v6286_v32 = vadd.f32 %v6147_v28, %v5604_v52  ;;  %v8438_v39 = vunpack.c.l.bf16 %v8433_v26 }
 0x500   : > { %v7093_v58 = vpop.f32.mrf.mxu3 }
 0x501   : > { %v7232_v4 = vadd.f32 %v7093_v58, %v6286_v32  ;;  %v8448_v27 = vmul.f32 %v8438_v39, %v8438_v39 }
 0x503   : > { %v7983_v19 = vadd.f32 %v7844_v0, %v7232_v4  ;;  %v7849_v59 = vpop.f32.mrf.mxu0 }
 0x505   : > { %v8434_v38 = vpack.c.bf16 %v7983_v19, %v7983_v19  ;;  %v10730_v34 = vpack.c.bf16 %v7983_v19, %v7982_v53 }
 0x506   : > { %v6150_v48 = vpop.f32.mrf.mxu2 }
 0x507   : > { %v5470_v22 = vpop.f32.mrf.mxu1  ;;  %10765 = vst [vmem:[%s11619_s18 + $0x70] sm:$0xff] %v10730_v34   ;;  %v8439_v41 = vunpack.c.l.bf16 %v8434_v38 }
 0x508   : > { %v7096_v5 = vpop.f32.mrf.mxu3 }
 0x509   : > { %v8440_v14 = vadd.f32 %v8439_v41, %v8438_v39  ;;  %v8449_v10 = vmul.f32 %v8439_v41, %v8439_v41 }
 0x50b   : > { %v8441_v17 = vrot.slane %v8440_v14, 4  ;;  %v8450_v13 = vadd.f32 %v8449_v10, %v8448_v27  ;;  %v7852_v20 = vpop.f32.mrf.mxu0 }
 0x50d   : > { %v8442_v9 = vadd.f32 %v8441_v17, %v8440_v14  ;;  %v8451_v44 = vrot.slane %v8450_v13, 4 }
 0x50e   : > { %v6152_v37 = vpop.f32.mrf.mxu2 }
 0x50f   : > { %v5473_v3 = vpop.f32.mrf.mxu1  ;;  %v8443_v43 = vrot.slane %v8442_v9, 2  ;;  %v8452_v31 = vadd.f32 %v8451_v44, %v8450_v13 }
 0x510   : > { %v7098_v60 = vpop.f32.mrf.mxu3  ;;  %v5607_v49 = vadd.f32 %v5473_v3, %v11598_v51 }
 0x511   : > { %v8444_v63 = vadd.f32 %v8443_v43, %v8442_v9  ;;  %v8453_v57 = vrot.slane %v8452_v31, 2 }
 0x513   : > { %v8445_v2 = vrot.slane %v8444_v63, 1  ;;  %v8454_v18 = vadd.f32 %v8453_v57, %v8452_v31  ;;  %v7854_v29 = vpop.f32.mrf.mxu0 }
 0x515   : > { %v8446_v42 = vadd.f32 %v8445_v2, %v8444_v63  ;;  %v8455_v40 = vrot.slane %v8454_v18, 1 }
 0x516   : > { %v6155_v36 = vpop.f32.mrf.mxu2 }
 0x517   : > { %v5475_v1 = vpop.f32.mrf.mxu1  ;;  %v8447_v50 = vadd.f32 %v8446_v42, %v8420_v30  ;;  %v8456_v24 = vadd.f32 %v8455_v40, %v8454_v18  ;;  %v6289_v33 = vadd.f32 %v6155_v36, %v5607_v49 }
 0x518   : > { %v7101_v61 = vpop.f32.mrf.mxu3  ;;  %v5608_v35 = vadd.f32 %v5475_v1, %v11604_v16 }
 0x519   : > { %v8457_v25 = vadd.f32 %v8456_v24, %v8430_v15  ;;  %v7235_v45 = vadd.f32 %v7101_v61, %v6289_v33 }
 0x51b   : > { %v7857_v62 = vpop.f32.mrf.mxu0  ;;  %v7986_v54 = vadd.f32 %v7852_v20, %v7235_v45 }
 0x51d   : > { %v8460_v47 = vpack.c.bf16 %v7986_v54, %v7986_v54 }
 0x51e   : > { %v6157_v0 = vpop.f32.mrf.mxu2 }
 0x51f   : > { %v5478_v46 = vpop.f32.mrf.mxu1  ;;  %v6290_v12 = vadd.f32 %v6157_v0, %v5608_v35  ;;  %v8465_v11 = vunpack.c.l.bf16 %v8460_v47 }
 0x520   : > { %v7103_v6 = vpop.f32.mrf.mxu3 }
 0x521   : > { %v7236_v7 = vadd.f32 %v7103_v6, %v6290_v12  ;;  %v8475_v52 = vmul.f32 %v8465_v11, %v8465_v11 }
 0x523   : > { %v7987_v51 = vadd.f32 %v7854_v29, %v7236_v7  ;;  %v7859_v55 = vpop.f32.mrf.mxu0 }
 0x525   : > { %v8461_v30 = vpack.c.bf16 %v7987_v51, %v7987_v51  ;;  %v10735_v23 = vpack.c.bf16 %v7987_v51, %v7986_v54 }
 0x526   : > { %v6160_v56 = vpop.f32.mrf.mxu2 }
 0x527   : > { %v5480_v8 = vpop.f32.mrf.mxu1  ;;  %10766 = vst [vmem:[%s11619_s18 + $0x78] sm:$0xff] %v10735_v23   ;;  %v8466_v15 = vunpack.c.l.bf16 %v8461_v30 }
 0x528   : > { %v7106_v53 = vpop.f32.mrf.mxu3 }
 0x529   : > { %v8467_v28 = vadd.f32 %v8466_v15, %v8465_v11  ;;  %v8476_v16 = vmul.f32 %v8466_v15, %v8466_v15 }
 0x52b   : > { %v8468_v21 = vrot.slane %v8467_v28, 4  ;;  %v8477_v32 = vadd.f32 %v8476_v16, %v8475_v52 }
 0x52d   : > { %v8469_v58 = vadd.f32 %v8468_v21, %v8467_v28  ;;  %v8478_v26 = vrot.slane %v8477_v32, 4 }
 0x52e   : > { %v6162_v4 = vpop.f32.mrf.mxu2 }
 0x52f   : > { %v8470_v19 = vrot.slane %v8469_v58, 2  ;;  %v8479_v59 = vadd.f32 %v8478_v26, %v8477_v32 }
 0x530   : > { %v7108_v39 = vpop.f32.mrf.mxu3 }
 0x531   : > { %v8471_v38 = vadd.f32 %v8470_v19, %v8469_v58  ;;  %v8480_v34 = vrot.slane %v8479_v59, 2 }
 0x533   : > { %v8472_v48 = vrot.slane %v8471_v38, 1  ;;  %v8481_v22 = vadd.f32 %v8480_v34, %v8479_v59 }
 0x535   : > { %v8473_v41 = vadd.f32 %v8472_v48, %v8471_v38  ;;  %v8482_v5 = vrot.slane %v8481_v22, 1 }
 0x537   : > { %v8474_v27 = vadd.f32 %v8473_v41, %v8447_v50  ;;  %v8483_v14 = vadd.f32 %v8482_v5, %v8481_v22 }
 0x539   : > { %v8484_v10 = vadd.f32 %v8483_v14, %v8457_v25  ;;  %8485 = vst [vmem:[%s265_s20] sm:$0x1] %v8474_v27 }
 0x53b   : > { %8486 = vst [vmem:[%s268_s25] sm:$0x1] %v8484_v10 }
 0x53c PF: > { %s17_s21 = sadd.s32 1, %s10811_s21  }
 0x53d   : > { %p14_p4 = scmp.ge.s32.totalorder %s17_s21, 4  }
 0x53f   :  { %16 = sbr.rel (!%p14_p4) target bundleno = 1 (0x1), region = 128 }

</bundles_post_ra>
